<compile_context>
chip_gen: v7x
topology: tpu7x:2x2x1
jax: 0.10.0
libtpu: 0.0.40
codegen_flags: <defaults>
</compile_context>

<pallas_src>
import math

import jax
import jax.numpy as jnp
from jax.experimental import pallas as pl
from jax.experimental.pallas import tpu as pltpu

_LN_EPS = 1e-5
_INV_SQRT2 = 1.0 / math.sqrt(2.0)


def _round_up(x, m):
    return ((x + m - 1) // m) * m


def _vmem_bytes(rt, D, H, h_tile):
    """Rough double-buffered working-set estimate for one grid step."""
    return (
        2 * rt * D * 4            # x tile (f32, double-buffered)
        + 2 * rt * D * 4          # out tile (f32, double-buffered)
        + 2 * D * h_tile * 2      # w1 tile (bf16, double-buffered)
        + 2 * h_tile * D * 2      # w2 tile (bf16, double-buffered)
        + 2 * h_tile * 4 * 2      # b1 tile (f32, double-buffered)
        + 3 * 2 * D * 4           # gamma, beta, b2 (f32, double-buffered)
        + rt * D * 4              # f32 accumulator scratch
        + rt * D * 2              # bf16 cached LayerNorm scratch
        + 2 * rt * h_tile * 4     # in-flight f32 intermediates (h, gelu)
    )


def _pick_h_tile(D, H, rt, budget_bytes):
    """Largest divisor-of-H tile (from standard sizes, or H itself) under budget."""
    candidates = []
    for c in (H, 4096, 2048, 1024, 512, 256, 128):
        if 0 < c <= H and H % c == 0 and c not in candidates:
            candidates.append(c)
    for ht in candidates:
        if _vmem_bytes(rt, D, H, ht) <= budget_bytes:
            return ht
    return candidates[-1]


def _ff_kernel(x_ref, gamma_ref, beta_ref, w1_ref, b1_ref, w2_ref, b2_ref,
               o_ref, xn_ref, acc_ref):
    """One (row_tile, D) tile of rows x one (h_tile) slice of the hidden dim."""
    h_idx = pl.program_id(1)

    @pl.when(h_idx == 0)
    def _init():
        # LayerNorm in f32, computed once per row tile, cached as bf16 for the MXU.
        x = x_ref[...].astype(jnp.float32)
        mean = jnp.mean(x, axis=-1, keepdims=True)
        centered = x - mean
        var = jnp.mean(centered * centered, axis=-1, keepdims=True)
        xn = centered * jax.lax.rsqrt(var + _LN_EPS)
        xn = xn * gamma_ref[...] + beta_ref[...]
        xn_ref[...] = xn.astype(xn_ref.dtype)
        acc_ref[...] = jnp.zeros_like(acc_ref)

    # Linear(dim -> hidden_tile): bf16 x bf16 -> f32 accumulation on the MXU.
    h = jnp.dot(xn_ref[...], w1_ref[...], preferred_element_type=jnp.float32)
    h = h + b1_ref[...]

    # Exact (erf) GELU in f32 — matches PyTorch nn.GELU() default.
    g = 0.5 * h * (1.0 + jax.lax.erf(h * _INV_SQRT2))

    # Partial Linear(hidden_tile -> dim), accumulated in f32 across H tiles.
    acc_ref[...] += jnp.dot(g.astype(w2_ref.dtype), w2_ref[...],
                            preferred_element_type=jnp.float32)

    @pl.when(h_idx == pl.num_programs(1) - 1)
    def _finalize():
        o_ref[...] = (acc_ref[...] + b2_ref[...]).astype(o_ref.dtype)


def feed_forward(x, gamma, beta, w1, b1, w2, b2, *, row_tile=256, h_tile=None):
    """x: (B, S, D) float32. Returns (B, S, D). Eval-mode (dropout = identity)."""
    B, S, D = x.shape
    H = w1.shape[1]
    rows = B * S

    # Row tile (multiple of 8); pad row count to a tile multiple so the grid has
    # several "parallel" steps (pipelining + megacore sharding of the row axis).
    rt = min(row_tile, _round_up(rows, 8))
    rows_p = _round_up(rows, rt)
    n_r = rows_p // rt

    # Hidden-dim tile: largest divisor of H fitting a conservative VMEM budget.
    # h_tile == H keeps both weight matrices VMEM-resident for the whole kernel.
    if h_tile is None:
        h_tile = _pick_h_tile(D, H, rt, budget_bytes=28 * 1024 * 1024)
    assert H % h_tile == 0
    n_h = H // h_tile

    x2 = x.reshape(rows, D).astype(jnp.float32)
    if rows_p != rows:
        x2 = jnp.pad(x2, ((0, rows_p - rows), (0, 0)))  # padded rows sliced off below

    # bf16 weights: halve weight DMA/VMEM and hit MXU bf16 peak. Biases stay f32.
    w1_bf = w1.astype(jnp.bfloat16)
    w2_bf = w2.astype(jnp.bfloat16)
    gamma2 = gamma.reshape(1, D).astype(jnp.float32)
    beta2 = beta.reshape(1, D).astype(jnp.float32)
    b1_2 = b1.reshape(1, H).astype(jnp.float32)
    b2_2 = b2.reshape(1, D).astype(jnp.float32)

    # Explicit VMEM budget with headroom, clamped well under v7x's 64 MiB physical.
    est = _vmem_bytes(rt, D, H, h_tile)
    vmem_limit = int(min(max(32 * 1024 * 1024, 2 * est), 60 * 1024 * 1024))

    out = pl.pallas_call(
        _ff_kernel,
        out_shape=jax.ShapeDtypeStruct((rows_p, D), x.dtype),
        grid_spec=pltpu.PrefetchScalarGridSpec(
            num_scalar_prefetch=0,
            grid=(n_r, n_h),                                       # reduction axis last
            in_specs=[
                pl.BlockSpec((rt, D), lambda i, h: (i, 0)),        # x rows
                pl.BlockSpec((1, D), lambda i, h: (0, 0)),         # gamma
                pl.BlockSpec((1, D), lambda i, h: (0, 0)),         # beta
                pl.BlockSpec((D, h_tile), lambda i, h: (0, h)),    # w1 tile
                pl.BlockSpec((1, h_tile), lambda i, h: (0, h)),    # b1 tile
                pl.BlockSpec((h_tile, D), lambda i, h: (h, 0)),    # w2 tile
                pl.BlockSpec((1, D), lambda i, h: (0, 0)),         # b2
            ],
            out_specs=pl.BlockSpec((rt, D), lambda i, h: (i, 0)),
            scratch_shapes=[
                pltpu.VMEM((rt, D), jnp.bfloat16),   # cached LayerNorm output
                pltpu.VMEM((rt, D), jnp.float32),    # f32 output accumulator
            ],
        ),
        compiler_params=pltpu.CompilerParams(
            dimension_semantics=("parallel", "arbitrary"),
            vmem_limit_bytes=vmem_limit,
        ),
    )(x2, gamma2, beta2, w1_bf, b1_2, w2_bf, b2_2)

    return out[:rows].reshape(B, S, D)


def _reference(x, gamma, beta, w1, b1, w2, b2):
    mean = jnp.mean(x, axis=-1, keepdims=True)
    var = jnp.mean((x - mean) ** 2, axis=-1, keepdims=True)
    xn = (x - mean) * jax.lax.rsqrt(var + _LN_EPS) * gamma + beta
    h = xn @ w1 + b1
    h = 0.5 * h * (1.0 + jax.lax.erf(h * _INV_SQRT2))
    return h @ w2 + b2


if __name__ == "__main__":
    # Small FeedForward shapes; D is a multiple of 128 (lane-dense output),
    # rows = B*S = 400 exercises padding + two row tiles, H = 1024 gives a
    # hidden dim large enough to exercise the accumulator / tiling path.
    B, S, D, H = 2, 200, 128, 1024

    key = jax.random.PRNGKey(0)
    kx, kg, kb, kw1, kb1, kw2, kb2 = jax.random.split(key, 7)

    x = jax.random.normal(kx, (B, S, D), dtype=jnp.float32)
    gamma = 1.0 + 0.1 * jax.random.normal(kg, (D,), dtype=jnp.float32)
    beta = 0.1 * jax.random.normal(kb, (D,), dtype=jnp.float32)
    lim1 = 1.0 / math.sqrt(D)
    w1 = jax.random.uniform(kw1, (D, H), jnp.float32, -lim1, lim1)
    b1 = jax.random.uniform(kb1, (H,), jnp.float32, -lim1, lim1)
    lim2 = 1.0 / math.sqrt(H)
    w2 = jax.random.uniform(kw2, (H, D), jnp.float32, -lim2, lim2)
    b2 = jax.random.uniform(kb2, (D,), jnp.float32, -lim2, lim2)

    out = feed_forward(x, gamma, beta, w1, b1, w2, b2)
    out = jax.block_until_ready(out)

    ref = _reference(x, gamma, beta, w1, b1, w2, b2)
    assert out.shape == (B, S, D)
    # bf16 matmuls (f32 accumulation) vs the pure-f32 reference: loosened tolerance.
    assert jnp.allclose(out, ref, atol=2e-2, rtol=2e-2), (
        "mismatch vs reference, max abs diff = "
        f"{float(jnp.max(jnp.abs(out - ref)))}")

    print("KERNEL_OK")
</pallas_src>

<mosaic_0001>
module attributes {stable_mosaic.version = 11 : i64} {
  func.func @_ff_kernel(%arg0: i32, %arg1: i32, %arg2: memref<256x128xf32, #tpu.memory_space<vmem>>, %arg3: memref<1x128xf32, #tpu.memory_space<vmem>>, %arg4: memref<1x128xf32, #tpu.memory_space<vmem>>, %arg5: memref<128x1024xbf16, #tpu.memory_space<vmem>>, %arg6: memref<1x1024xf32, #tpu.memory_space<vmem>>, %arg7: memref<1024x128xbf16, #tpu.memory_space<vmem>>, %arg8: memref<1x128xf32, #tpu.memory_space<vmem>>, %arg9: memref<256x128xf32, #tpu.memory_space<vmem>>, %arg10: memref<256x128xbf16, #tpu.memory_space<vmem>>, %arg11: memref<256x128xf32, #tpu.memory_space<vmem>>) attributes {dimension_semantics = [#tpu.dimension_semantics<parallel>, #tpu.dimension_semantics<arbitrary>], iteration_bounds = array<i64: 2, 1>, scalar_prefetch = 0 : i64, scratch_operands = 2 : i64, tpu.core_type = #tpu.core_type<tc>, window_params = [{transform_indices = @transform_0, window_bounds = array<i64: 256, 128>}, {pipeline_mode = #tpu.pipeline_mode<synchronous>, transform_indices = @transform_1, window_bounds = array<i64: 1, 128>}, {pipeline_mode = #tpu.pipeline_mode<synchronous>, transform_indices = @transform_2, window_bounds = array<i64: 1, 128>}, {transform_indices = @transform_3, window_bounds = array<i64: 128, 1024>}, {transform_indices = @transform_4, window_bounds = array<i64: 1, 1024>}, {transform_indices = @transform_5, window_bounds = array<i64: 1024, 128>}, {pipeline_mode = #tpu.pipeline_mode<synchronous>, transform_indices = @transform_6, window_bounds = array<i64: 1, 128>}, {transform_indices = @transform_7, window_bounds = array<i64: 256, 128>}]} {
    %c0_i32 = arith.constant 0 : i32
    %0 = arith.cmpi eq, %arg1, %c0_i32 : i32
    %1 = arith.extui %0 : i1 to i32
    %c0_i32_0 = arith.constant 0 : i32
    %2 = arith.cmpi ne, %1, %c0_i32_0 : i32
    scf.if %2 {
      %c0_18 = arith.constant 0 : index
      %c0_19 = arith.constant 0 : index
      %26 = vector.load %arg2[%c0_18, %c0_19] : memref<256x128xf32, #tpu.memory_space<vmem>>, vector<256x128xf32>
      %cst_20 = arith.constant dense<0.000000e+00> : vector<256xf32>
      %27 = vector.multi_reduction <add>, %26, %cst_20 [1] : vector<256x128xf32> to vector<256xf32>
      %28 = vector.shape_cast %27 : vector<256xf32> to vector<256x1xf32>
      %cst_21 = arith.constant 1.280000e+02 : f32
      %29 = vector.broadcast %cst_21 : f32 to vector<256x1xf32>
      %30 = arith.divf %28, %29 : vector<256x1xf32>
      %31 = vector.broadcast %30 : vector<256x1xf32> to vector<256x128xf32>
      %32 = arith.subf %26, %31 : vector<256x128xf32>
      %33 = arith.mulf %32, %32 : vector<256x128xf32>
      %cst_22 = arith.constant dense<0.000000e+00> : vector<256xf32>
      %34 = vector.multi_reduction <add>, %33, %cst_22 [1] : vector<256x128xf32> to vector<256xf32>
      %35 = vector.shape_cast %34 : vector<256xf32> to vector<256x1xf32>
      %cst_23 = arith.constant 1.280000e+02 : f32
      %36 = vector.broadcast %cst_23 : f32 to vector<256x1xf32>
      %37 = arith.divf %35, %36 : vector<256x1xf32>
      %cst_24 = arith.constant 9.99999974E-6 : f32
      %38 = vector.broadcast %cst_24 : f32 to vector<256x1xf32>
      %39 = arith.addf %37, %38 : vector<256x1xf32>
      %40 = math.rsqrt %39 : vector<256x1xf32>
      %41 = vector.broadcast %40 : vector<256x1xf32> to vector<256x128xf32>
      %42 = arith.mulf %32, %41 : vector<256x128xf32>
      %c0_25 = arith.constant 0 : index
      %c0_26 = arith.constant 0 : index
      %43 = vector.load %arg3[%c0_25, %c0_26] : memref<1x128xf32, #tpu.memory_space<vmem>>, vector<1x128xf32>
      %44 = vector.broadcast %43 : vector<1x128xf32> to vector<256x128xf32>
      %45 = arith.mulf %42, %44 : vector<256x128xf32>
      %c0_27 = arith.constant 0 : index
      %c0_28 = arith.constant 0 : index
      %46 = vector.load %arg4[%c0_27, %c0_28] : memref<1x128xf32, #tpu.memory_space<vmem>>, vector<1x128xf32>
      %47 = vector.broadcast %46 : vector<1x128xf32> to vector<256x128xf32>
      %48 = arith.addf %45, %47 : vector<256x128xf32>
      %49 = arith.truncf %48 : vector<256x128xf32> to vector<256x128xbf16>
      %c0_29 = arith.constant 0 : index
      %c0_30 = arith.constant 0 : index
      %50 = vector.load %arg10[%c0_29, %c0_30] : memref<256x128xbf16, #tpu.memory_space<vmem>>, vector<256x128xbf16>
      tpu.vector_store %arg10[%c0_29, %c0_30], %49 {strides = array<i32>} : memref<256x128xbf16, #tpu.memory_space<vmem>>, vector<256x128xbf16>,
      %cst_31 = arith.constant 0.000000e+00 : f32
      %51 = vector.broadcast %cst_31 : f32 to vector<256x128xf32>
      %c0_32 = arith.constant 0 : index
      %c0_33 = arith.constant 0 : index
      %52 = vector.load %arg11[%c0_32, %c0_33] : memref<256x128xf32, #tpu.memory_space<vmem>>, vector<256x128xf32>
      tpu.vector_store %arg11[%c0_32, %c0_33], %51 {strides = array<i32>} : memref<256x128xf32, #tpu.memory_space<vmem>>, vector<256x128xf32>,
    } else {
    }
    %c0 = arith.constant 0 : index
    %c0_1 = arith.constant 0 : index
    %3 = vector.load %arg10[%c0, %c0_1] : memref<256x128xbf16, #tpu.memory_space<vmem>>, vector<256x128xbf16>
    %c0_2 = arith.constant 0 : index
    %c0_3 = arith.constant 0 : index
    %4 = vector.load %arg5[%c0_2, %c0_3] : memref<128x1024xbf16, #tpu.memory_space<vmem>>, vector<128x1024xbf16>
    %cst = arith.constant dense<0.000000e+00> : vector<256x1024xf32>
    %5 = tpu.matmul %3, %4, %cst {dimension_numbers = #tpu.dot_dimension_numbers<[1], [0], [0], [1], [0, 0, 1, 1], [], []>} : vector<256x128xbf16>, vector<128x1024xbf16>, vector<256x1024xf32> -> vector<256x1024xf32>
    %c0_4 = arith.constant 0 : index
    %c0_5 = arith.constant 0 : index
    %6 = vector.load %arg6[%c0_4, %c0_5] : memref<1x1024xf32, #tpu.memory_space<vmem>>, vector<1x1024xf32>
    %7 = vector.broadcast %6 : vector<1x1024xf32> to vector<256x1024xf32>
    %8 = arith.addf %5, %7 : vector<256x1024xf32>
    %cst_6 = arith.constant 5.000000e-01 : f32
    %9 = vector.broadcast %cst_6 : f32 to vector<256x1024xf32>
    %10 = arith.mulf %9, %8 : vector<256x1024xf32>
    %cst_7 = arith.constant 0.707106769 : f32
    %11 = vector.broadcast %cst_7 : f32 to vector<256x1024xf32>
    %12 = arith.mulf %8, %11 : vector<256x1024xf32>
    %13 = math.erf %12 : vector<256x1024xf32>
    %cst_8 = arith.constant 1.000000e+00 : f32
    %14 = vector.broadcast %cst_8 : f32 to vector<256x1024xf32>
    %15 = arith.addf %14, %13 : vector<256x1024xf32>
    %16 = arith.mulf %10, %15 : vector<256x1024xf32>
    %c0_9 = arith.constant 0 : index
    %c0_10 = arith.constant 0 : index
    %17 = vector.load %arg11[%c0_9, %c0_10] : memref<256x128xf32, #tpu.memory_space<vmem>>, vector<256x128xf32>
    %18 = arith.truncf %16 : vector<256x1024xf32> to vector<256x1024xbf16>
    %c0_11 = arith.constant 0 : index
    %c0_12 = arith.constant 0 : index
    %19 = vector.load %arg7[%c0_11, %c0_12] : memref<1024x128xbf16, #tpu.memory_space<vmem>>, vector<1024x128xbf16>
    %cst_13 = arith.constant dense<0.000000e+00> : vector<256x128xf32>
    %20 = tpu.matmul %18, %19, %cst_13 {dimension_numbers = #tpu.dot_dimension_numbers<[1], [0], [0], [1], [0, 0, 1, 1], [], []>} : vector<256x1024xbf16>, vector<1024x128xbf16>, vector<256x128xf32> -> vector<256x128xf32>
    %21 = arith.addf %17, %20 : vector<256x128xf32>
    %c0_14 = arith.constant 0 : index
    %c0_15 = arith.constant 0 : index
    %22 = vector.load %arg11[%c0_14, %c0_15] : memref<256x128xf32, #tpu.memory_space<vmem>>, vector<256x128xf32>
    tpu.vector_store %arg11[%c0_14, %c0_15], %21 {strides = array<i32>} : memref<256x128xf32, #tpu.memory_space<vmem>>, vector<256x128xf32>,
    %c0_i32_16 = arith.constant 0 : i32
    %23 = arith.cmpi eq, %arg1, %c0_i32_16 : i32
    %24 = arith.extui %23 : i1 to i32
    %c0_i32_17 = arith.constant 0 : i32
    %25 = arith.cmpi ne, %24, %c0_i32_17 : i32
    scf.if %25 {
      %c0_18 = arith.constant 0 : index
      %c0_19 = arith.constant 0 : index
      %26 = vector.load %arg11[%c0_18, %c0_19] : memref<256x128xf32, #tpu.memory_space<vmem>>, vector<256x128xf32>
      %c0_20 = arith.constant 0 : index
      %c0_21 = arith.constant 0 : index
      %27 = vector.load %arg8[%c0_20, %c0_21] : memref<1x128xf32, #tpu.memory_space<vmem>>, vector<1x128xf32>
      %28 = vector.broadcast %27 : vector<1x128xf32> to vector<256x128xf32>
      %29 = arith.addf %26, %28 : vector<256x128xf32>
      %c0_22 = arith.constant 0 : index
      %c0_23 = arith.constant 0 : index
      %30 = vector.load %arg9[%c0_22, %c0_23] : memref<256x128xf32, #tpu.memory_space<vmem>>, vector<256x128xf32>
      tpu.vector_store %arg9[%c0_22, %c0_23], %29 {strides = array<i32>} : memref<256x128xf32, #tpu.memory_space<vmem>>, vector<256x128xf32>,
    } else {
    }
    return
  }
  func.func @transform_0(%arg0: i32, %arg1: i32) -> (i32, i32) {
    %c0_i32 = arith.constant 0 : i32
    %c0_i32_0 = arith.constant 0 : i32
    return %arg0, %c0_i32 : i32, i32
  }
  func.func @transform_1(%arg0: i32, %arg1: i32) -> (i32, i32) {
    %c0_i32 = arith.constant 0 : i32
    %c0_i32_0 = arith.constant 0 : i32
    %c0_i32_1 = arith.constant 0 : i32
    return %c0_i32, %c0_i32_0 : i32, i32
  }
  func.func @transform_2(%arg0: i32, %arg1: i32) -> (i32, i32) {
    %c0_i32 = arith.constant 0 : i32
    %c0_i32_0 = arith.constant 0 : i32
    %c0_i32_1 = arith.constant 0 : i32
    return %c0_i32, %c0_i32_0 : i32, i32
  }
  func.func @transform_3(%arg0: i32, %arg1: i32) -> (i32, i32) {
    %c0_i32 = arith.constant 0 : i32
    %c0_i32_0 = arith.constant 0 : i32
    return %c0_i32, %arg1 : i32, i32
  }
  func.func @transform_4(%arg0: i32, %arg1: i32) -> (i32, i32) {
    %c0_i32 = arith.constant 0 : i32
    %c0_i32_0 = arith.constant 0 : i32
    return %c0_i32, %arg1 : i32, i32
  }
  func.func @transform_5(%arg0: i32, %arg1: i32) -> (i32, i32) {
    %c0_i32 = arith.constant 0 : i32
    %c0_i32_0 = arith.constant 0 : i32
    return %arg1, %c0_i32 : i32, i32
  }
  func.func @transform_6(%arg0: i32, %arg1: i32) -> (i32, i32) {
    %c0_i32 = arith.constant 0 : i32
    %c0_i32_0 = arith.constant 0 : i32
    %c0_i32_1 = arith.constant 0 : i32
    return %c0_i32, %c0_i32_0 : i32, i32
  }
  func.func @transform_7(%arg0: i32, %arg1: i32) -> (i32, i32) {
    %c0_i32 = arith.constant 0 : i32
    %c0_i32_0 = arith.constant 0 : i32
    return %arg0, %c0_i32 : i32, i32
  }
}

</mosaic_0001>

<bundles_post_ra>
// kernel: tpu_custom_call.1
= control target key start
LH: loop header
LB: loop body
LE: loop exit
PB: predicated region body
PF: predicated region fallthrough
CT: control target
= control target key end

     0   :  { %12 = vsyncpa [#allocation5], 0  ;;  %s10447_s0 = inlined_call_operand.hbm [shape: f32[512,128], index: 0, kind: input, shape index: {}]   ;;  %s10448_s1 = inlined_call_operand.vmem [shape: f32[1,128], index: 1, kind: input, shape index: {}]   ;;  %s10449_s2 = inlined_call_operand.vmem [shape: f32[1,128], index: 2, kind: input, shape index: {}]   ;;  %s10450_s3 = inlined_call_operand.hbm [shape: bf16[128,1024], index: 3, kind: input, shape index: {}]   ;;  %s10451_s4 = inlined_call_operand.vmem [shape: f32[1,1024], index: 4, kind: input, shape index: {}]   ;;  %s10452_s5 = inlined_call_operand.hbm [shape: bf16[1024,128], index: 5, kind: input, shape index: {}]   ;;  %s10453_s6 = inlined_call_operand.vmem [shape: f32[1,128], index: 6, kind: input, shape index: {}]   ;;  %s10454_s7 = inlined_call_operand.hbm [shape: f32[512,128], index: 7, kind: output, shape index: {}]  }
   0x1   :  { %14 = vsyncpa [#allocation5 + $0x1], 0 }
   0x2   :  { %15 = vsyncpa [#allocation8], 0 }
   0x3   :  { %16 = vsyncpa [#allocation6], 0 }
   0x4   :  { %18 = vsyncpa [#allocation6 + $0x1], 0  ;;  %s6580_s24 = smov 0   ;;  %s6582_s25 = smov 0  }
   0x5   :  { %s6584_s26 = smov 0   ;;  %s6586_s27 = smov 0  }
   0x6   :  { %s6588_s28 = smov 0   ;;  %s6590_s29 = smov 0  }
   0x7 LB: > { %10510 = sst [smem:[#allocation14_spill]] %s6505_s24  ;;  %s5019_s30 = sadd.s32 4294967295, %s6525_s29   ;;  %s6525_s29 = sphi %s6590_s29, %s24_s29   ;;  %s6521_s28 = sphi %s6588_s28, %s11150_s28   ;;  %s6517_s27 = sphi %s6586_s27, %s11149_s27   ;;  %s6513_s26 = sphi %s6584_s26, %s11148_s26   ;;  %s6509_s25 = sphi %s6582_s25, %s11147_s25   ;;  %s6505_s24 = sphi %s6580_s24, %s11146_s24  }
   0x8   : > { %s5020_s8 = sadd.s32 4294967294, %s6525_s29   ;;  %p56_p0 = scmp.ne.s32.totalorder %s6509_s25, %s6505_s24 }
   0x9   : > { %p6614_p1 = scmp.eq.s32.totalorder %s5019_s30, 0  ;;  %p6618_p2 = scmp.eq.s32.totalorder %s5019_s30, 1 }
   0xa   : > { %p227_p3 = scmp.eq.s32.totalorder %s5020_s8, 1  ;;  %p5021_p5 = scmp.ge.s32.totalorder %s6525_s29, 1 }
   0xb   : > { %s10511_s9 = scalar_select %p6614_p1, 1, 0 }
   0xc   : > { %p6624_p4 = por %p6614_p1, %p56_p0  ;;  %p6629_p6 = por %p227_p3, %p56_p0 }
   0xd   : > { %p234_p7 = scmp.lt.s32.totalorder %s6525_s29, 3  ;;  %s6527_s14 = smov [#allocation7]  }
   0xe   : > { %s10513_s11 = scalar_select %p6624_p4, 1, 0 }
   0xf   : > { %s10514_s12 = scalar_select %p6629_p6, 1, 0 }
  0x10   : > { %p6634_p8 = pnand %p5021_p5, %p234_p7  ;;  %s255_s15 = sshll.u32 %s6527_s14, 4  ;;  %s6638_s15 = int_to_ptr.vmem [resolvable:$true] %s255_s15 }
  0x11   : > { %10515 = sst [smem:[#allocation15_spill]] %s10514_s12  ;;  %s6528_s17 = smov [#allocation9]  }
  0x12   : > { %p5632_p9 = pneg %p6634_p8  ;;  %s279_s18 = sshll.u32 %s6528_s17, 4  ;;  %s6649_s18 = int_to_ptr.vmem [resolvable:$true] %s279_s18 }
  0x13   : > { %s6353_s21 = scalar_lea.hbm %s10450_s3, 8192 }
  0x14   : > { %p6645_p11 = pnand %p5632_p9, %p6614_p1  ;;  %p6354_p12 = scmp.ne.s32.totalorder %s10450_s3, %s6353_s21 }
  0x15   : > { %p6360_p5 = scmp.lt.u32.totalorder %s6353_s21, %s10450_s3 }
  0x16   : > { %p6355_p13 = pneg %p6645_p11 }
  0x18   : > { %p6356_p0 = pnand %p6355_p13, %p6354_p12 }
  0x1a   : > { %p6357_p3 = pneg %p6356_p0 }
  0x1c   : > { %p6362_p7 = pnand %p6360_p5, %p6357_p3 }
  0x1e   : > { %6365 = shalt.err (!%p6362_p7)
}
  0x1f   : > { %s6366_s14 = scalar_lea.vmem %s6638_s15, 8192  ;;  %p6374_p1 = scmp.lt.s32.totalorder %s6638_s15, %s6638_s15 }
  0x20   : > { %p6367_p9 = scmp.ne.s32.totalorder %s6638_s15, %s6366_s14  ;;  %p6375_p12 = scmp.lt.s32.totalorder %s6366_s14, %s6366_s14 }
  0x22   : > { %p6369_p10 = pnand %p6367_p9, %p6355_p13  ;;  %p6376_p0 = por %p6375_p12, %p6374_p1 }
  0x24   : > { %p6370_p6 = pneg %p6369_p10 }
  0x26   : > { %p6377_p4 = pnand %p6376_p0, %p6370_p6 }
  0x28   : > { %6380 = shalt.err (!%p6377_p4)
}
  0x29   : > { %s6529_s17 = smov 512   ;;  %s6530_s19 = smov 32  }
  0x2a   : > { %5635 = dma.hbm_to_vmem [thread:$0]  (!%p6645_p11), %s10450_s3, 8192, %s6638_s15, [#allocation8], %s6529_s17, %s6529_s17, %s6530_s19  }
  0x2b   : > { %s6381_s30 = scalar_lea.hbm %s10452_s5, 8192 }
  0x2c   : > { %p6382_p1 = scmp.ne.s32.totalorder %s10452_s5, %s6381_s30  ;;  %p6388_p10 = scmp.lt.u32.totalorder %s6381_s30, %s10452_s5 }
  0x2e   : > { %p6384_p4 = pnand %p6382_p1, %p6355_p13 }
  0x30   : > { %p6385_p6 = pneg %p6384_p4 }
  0x32   : > { %p6390_p3 = pnand %p6388_p10, %p6385_p6 }
  0x34   : > { %6393 = shalt.err (!%p6390_p3)
}
  0x35   : > { %s6394_s15 = scalar_lea.vmem %s6649_s18, 8192  ;;  %p6402_p12 = scmp.lt.s32.totalorder %s6649_s18, %s6649_s18 }
  0x36   : > { %p6395_p5 = scmp.ne.s32.totalorder %s6649_s18, %s6394_s15  ;;  %p6403_p0 = scmp.lt.s32.totalorder %s6394_s15, %s6394_s15 }
  0x38   : > { %p6397_p7 = pnand %p6395_p5, %p6355_p13  ;;  %p6404_p1 = por %p6403_p0, %p6402_p12 }
  0x3a   : > { %p6398_p9 = pneg %p6397_p7 }
  0x3c   : > { %p6405_p4 = pnand %p6404_p1, %p6398_p9 }
  0x3e   : > { %6408 = shalt.err (!%p6405_p4)
}
  0x3f   : > { %s6531_s24 = smov 64   ;;  %s6532_s12 = smov 4  }
  0x40   : > { %5638 = dma.hbm_to_vmem [thread:$0]  (!%p6645_p11), %s10452_s5, 8192, %s6649_s18, [#allocation8], %s6531_s24, %s6531_s24, %s6532_s12  }
  0x41   : > { %s36_s20 = sadd.s32 1, %s6521_s28  ;;  %s43_s21 = sadd.s32 1, %s6513_s26 }
  0x42   : > { %p38_p13 = scmp.ge.s32.totalorder %s36_s20, 2  ;;  %p50_p6 = scmp.ne.s32.totalorder %s6513_s26, %s6509_s25 }
  0x43   : > { %p51_p10 = scmp.eq.s32.totalorder %s6525_s29, 0  ;;  %p5649_p3 = scmp.lt.s32.totalorder %s6525_s29, 2 }
  0x44   : > { %s11152_s20 = smov (%p38_p13, %s36_s20), 0  ;;  %p6713_p7 = por %p6618_p2, %p50_p6 }
  0x45   : > { %p52_p5 = por %p51_p10, %p50_p6  ;;  %s40_s16 = ssub.s32 %s6521_s28, %s11152_s20 }
  0x46   : > { %s10518_s22 = scalar_select %p6713_p7, 1, 0 }
  0x47   : > { %s296_s23 = sand.u32 1, %s6513_s26   ;;  %p41_p9 = scmp.eq.s32.totalorder %s40_s16, 0 }
  0x48   : > { %s5026_s18 = sshll.u32 %s296_s23, 8  ;;  %s5170_s30 = sshll.u32 %s6521_s28, 12 }
  0x49   : > { %s6722_s8 = scalar_select %p41_p9, %s6513_s26, %s43_s21  }
  0x4a   : > { %s6727_s24 = scalar_lea.hbm %s10447_s0, %s5170_s30  ;;  %s300_s10 = scalar_lea.vmem [#allocation4], %s5026_s18 }
  0x4b   : > { %s307_s12 = sshll.u32 %s300_s10, 4  ;;  %p6731_p2 = pnand %p5649_p3, %p52_p5  ;;  %s6735_s12 = int_to_ptr.vmem [resolvable:$true] %s307_s12 }
  0x4c   : > { %s6737_s19 = scalar_lea.sflag [#allocation5], %s296_s23  ;;  %s6409_s21 = scalar_lea.hbm %s6727_s24, 4096 }
  0x4d   : > { %p6410_p11 = scmp.ne.s32.totalorder %s6727_s24, %s6409_s21  ;;  %p6411_p12 = pneg %p6731_p2 }
  0x4e   : > { %s6414_s30 = scalar_lea.hbm %s10447_s0, 8192  ;;  %p6415_p4 = scmp.lt.u32.totalorder %s6727_s24, %s10447_s0 }
  0x4f   : > { %p6412_p0 = pnand %p6411_p12, %p6410_p11  ;;  %p6416_p13 = scmp.lt.u32.totalorder %s6414_s30, %s6409_s21 }
  0x50   : > { %p6418_p10 = scmp.lt.u32.totalorder %s6409_s21, %s6727_s24 }
  0x51   : > { %p6413_p1 = pneg %p6412_p0  ;;  %p6417_p6 = por %p6416_p13, %p6415_p4 }
  0x53   : > { %p6419_p3 = por %p6418_p10, %p6417_p6 }
  0x55   : > { %p6420_p5 = pnand %p6419_p3, %p6413_p1 }
  0x57   : > { %6423 = shalt.err (!%p6420_p5)
}
  0x58   : > { %s6424_s23 = scalar_lea.vmem %s6735_s12, 4096  ;;  %s6533_s10 = smov [#allocation4]  }
  0x59   : > { %p6425_p9 = scmp.ne.s32.totalorder %s6735_s12, %s6424_s23  ;;  %s6429_s16 = sshll.u32 %s6533_s10, 4  ;;  %s6430_s16 = int_to_ptr.vmem [resolvable:$false] %s6429_s16 }
  0x5a   : > { %s6431_s18 = scalar_lea.vmem %s6430_s16, 8192  ;;  %p6432_p7 = scmp.lt.s32.totalorder %s6735_s12, %s6430_s16 }
  0x5b   : > { %p6427_p11 = pnand %p6425_p9, %p6411_p12  ;;  %p6433_p4 = scmp.lt.s32.totalorder %s6431_s18, %s6424_s23 }
  0x5d   : > { %p6428_p0 = pneg %p6427_p11  ;;  %p6434_p13 = por %p6433_p4, %p6432_p7 }
  0x5f   : > { %p6435_p6 = pnand %p6434_p13, %p6428_p0 }
  0x61   : > { %6438 = shalt.err (!%p6435_p6)
}
  0x62   : > { %s6534_s21 = smov 128   ;;  %s6535_s30 = smov 8  }
  0x63   : > { %5642 = dma.hbm_to_vmem [thread:$0]  (!%p6731_p2), %s6727_s24, 4096, %s6735_s12, %s6737_s19, %s6534_s21, %s6534_s21, %s6535_s30  }
  0x64   : > { %319 = sbr.rel (%p6634_p8) target bundleno = 1360 (0x550), region = 48 }
  0x6b   : > { %s6768_s14 = sand.u32 1, %s6509_s25   ;;  %p10520_p7 = scmp.ne.s32.totalorder %s10513_s11, 0 }
  0x6c   : > { %s5030_s15 = sshll.u32 %s6768_s14, 8  ;;  %s322_s23 = scalar_lea.sflag [#allocation5], %s6768_s14 }
  0x6d   : > { %s6774_s10 = scalar_lea.vmem [#allocation4], %s5030_s15 }
  0x6e   : > { %6492 = dma.done.wait (%p10520_p7), %s322_s23, 4096  }
  0x6f   : > { %6494 = vsyncadd (%p10520_p7), %s322_s23, 4294963200  ;;  %p10521_p2 = scmp.ne.s32.totalorder %s10511_s9, 0 }
  0x71   : > { %6496 = dma.done.wait (%p10521_p2), [#allocation8], 16384  }
  0x72   : > { %6498 = vsyncadd (%p10521_p2), [#allocation8], 4294950912  ;;  %v6785_v0 = vld [vmem:[%s6774_s10] sm:$0xff]  ;;  %v6788_v1 = vld [vmem:[%s6774_s10 + $0x10] sm:$0xff]  ;;  %s10296_s30 = scalar_lea.vmem [#allocation10], %s5030_s15  ;;  %s5171_s15 = sshll.u32 %s6517_s27, 12 }
  0x73   : > { %414 = vadd.xlane.f32.xlu0 %v6785_v0  ;;  %418 = vadd.xlane.f32.xlu1 %v6788_v1  ;;  %v6793_v2 = vld [vmem:[%s6774_s10 + $0x8] sm:$0xff]  ;;  %v6796_v3 = vld [vmem:[%s6774_s10 + $0x18] sm:$0xff]  ;;  %v6801_v4 = vld [vmem:[%s6774_s10 + $0x20] sm:$0xff]  ;;  %s4903_s23 = sshll.u32 %s10296_s30, 4  ;;  %s10393_s11 = scalar_lea.hbm %s10454_s7, %s5171_s15  ;;  %s10395_s23 = int_to_ptr.vmem [resolvable:$true] %s4903_s23 }
  0x74   : > { %v6804_v5 = vld [vmem:[%s6774_s10 + $0x28] sm:$0xff]  ;;  %v6807_v6 = vld [vmem:[%s6774_s10 + $0x30] sm:$0xff]  ;;  %v6810_v7 = vld [vmem:[%s6774_s10 + $0x38] sm:$0xff]  ;;  %s4890_s13 = scalar_lea.sflag [#allocation6], %s6768_s14  ;;  %s6439_s27 = scalar_lea.vmem %s10395_s23, 4096 }
  0x75   : > { %v6815_v8 = vld [vmem:[%s6774_s10 + $0x40] sm:$0xff]  ;;  %v6818_v9 = vld [vmem:[%s6774_s10 + $0x48] sm:$0xff]  ;;  %v6823_v10 = vld [vmem:[%s6774_s10 + $0x50] sm:$0xff]  ;;  %p6440_p8 = scmp.ne.s32.totalorder %s10395_s23, %s6439_s27  ;;  %p11141_p12 = scmp.ne.s32.totalorder %s10518_s22, 0 }
  0x76   : > { %v6826_v11 = vld [vmem:[%s6774_s10 + $0x58] sm:$0xff]  ;;  %v6831_v12 = vld [vmem:[%s6774_s10 + $0x60] sm:$0xff]  ;;  %v6836_v13 = vld [vmem:[%s6774_s10 + $0x68] sm:$0xff]  ;;  %s6537_s24 = smov [#allocation10]  }
  0x77   : > { %416 = vadd.xlane.f32.xlu0 %v6793_v2  ;;  %420 = vadd.xlane.f32.xlu1 %v6796_v3  ;;  %v6839_v14 = vld [vmem:[%s6774_s10 + $0x70] sm:$0xff]  ;;  %v6842_v15 = vld [vmem:[%s6774_s10 + $0x78] sm:$0xff]  ;;  %v6847_v16 = vld [vmem:[%s6774_s10 + $0x80] sm:$0xff]  ;;  %p6441_p1 = pnand %p6440_p8, %p11141_p12  ;;  %s6443_s12 = sshll.u32 %s6537_s24, 4  ;;  %s6444_s12 = int_to_ptr.vmem [resolvable:$false] %s6443_s12 }
  0x78   : > { %v6852_v17 = vld [vmem:[%s6774_s10 + $0x88] sm:$0xff]  ;;  %v6855_v18 = vld [vmem:[%s6774_s10 + $0x90] sm:$0xff]  ;;  %v6860_v19 = vld [vmem:[%s6774_s10 + $0x98] sm:$0xff]  ;;  %s6445_s17 = scalar_lea.vmem %s6444_s12, 8192  ;;  %p6446_p3 = scmp.lt.s32.totalorder %s10395_s23, %s6444_s12 }
  0x79   : > { %v925_v20 = vld [vmem:[#allocation7] sm:$0xff]  ;;  %v926_v22 = vld [vmem:[#allocation7 + $0x8] sm:$0xff]  ;;  %v6896_v57 = vld [vmem:[%s6774_s10 + $0xb0] sm:$0xff]  ;;  %p6442_p10 = pneg %p6441_p1  ;;  %p6447_p5 = scmp.lt.s32.totalorder %s6445_s17, %s6439_s27 }
  0x7a   : > { %v929_v21 = vld [vmem:[#allocation7 + $0x20] sm:$0xff]  ;;  %v930_v24 = vld [vmem:[#allocation7 + $0x28] sm:$0xff]  ;;  %v6905_v63 = vld [vmem:[%s6774_s10 + $0xb8] sm:$0xff] }
  0x7b   : > { %422 = vadd.xlane.f32.xlu0 %v6801_v4  ;;  %424 = vadd.xlane.f32.xlu1 %v6804_v5  ;;  %v5037_v23 = vcombine.high %v925_v20, %v929_v21  ;;  %v5036_v25 = vcombine.low %v925_v20, %v929_v21  ;;  %v933_v26 = vld [vmem:[#allocation7 + $0x40] sm:$0xff]  ;;  %v5039_v28 = vcombine.high %v926_v22, %v930_v24  ;;  %v934_v31 = vld [vmem:[#allocation7 + $0x48] sm:$0xff]  ;;  %p6448_p9 = por %p6447_p5, %p6446_p3 }
  0x7c   : > { %v937_v27 = vld [vmem:[#allocation7 + $0x60] sm:$0xff]  ;;  %v5038_v29 = vcombine.low %v926_v22, %v930_v24  ;;  %v938_v32 = vld [vmem:[#allocation7 + $0x68] sm:$0xff] }
  0x7d   : > { %v5045_v30 = vcombine.high %v933_v26, %v937_v27  ;;  %1351 = vmatprep.subr.bf16.mxu0 %v5037_v23  ;;  %v5047_v33 = vcombine.high %v934_v31, %v938_v32  ;;  %1544 = vmatprep.subr.bf16.mxu1 %v5039_v28  ;;  %v6876_v46 = vld [vmem:[%s6774_s10 + $0xa0] sm:$0xff]  ;;  %v6887_v52 = vld [vmem:[%s6774_s10 + $0xa8] sm:$0xff]  ;;  %v5044_v62 = vcombine.low %v933_v26, %v937_v27  ;;  %p6449_p11 = pnand %p6448_p9, %p6442_p10 }
  0x7e   : > { %1352 = vmatpush1.bf16.msra.mxu0 %v5036_v25  ;;  %1545 = vmatpush1.bf16.msra.mxu1 %v5038_v29  ;;  %v946_v21 = vld [vmem:[#allocation7 + $0xa8] sm:$0xff]  ;;  %v6914_v25 = vld [vmem:[%s6774_s10 + $0xc0] sm:$0xff] }
  0x7f   : > { %426 = vadd.xlane.f32.xlu0 %v6807_v6  ;;  %428 = vadd.xlane.f32.xlu1 %v6810_v7  ;;  %v949_v29 = vld [vmem:[#allocation7 + $0xc0] sm:$0xff] }
  0x80   : > { %1353 = vmatprep.subr.bf16.mxu0 %v5045_v30  ;;  %1546 = vmatprep.subr.bf16.mxu1 %v5047_v33  ;;  %v953_v30 = vld [vmem:[#allocation7 + $0xe0] sm:$0xff] }
  0x82   : > { %1354 = vmatpush1.bf16.msra.mxu0 %v5044_v62  ;;  %v965_v62 = vld [vmem:[#allocation7 + $0x140] sm:$0xff] }
  0x83   : > { %430 = vadd.xlane.f32.xlu0 %v6815_v8  ;;  %432 = vadd.xlane.f32.xlu1 %v6818_v9 }
  0x87   : > { %434 = vadd.xlane.f32.xlu0 %v6823_v10  ;;  %436 = vadd.xlane.f32.xlu1 %v6826_v11 }
  0x8b   : > { %438 = vadd.xlane.f32.xlu0 %v6831_v12  ;;  %440 = vadd.xlane.f32.xlu1 %v6836_v13 }
  0x8f   : > { %442 = vadd.xlane.f32.xlu0 %v6839_v14  ;;  %444 = vadd.xlane.f32.xlu1 %v6842_v15 }
  0x93   : > { %446 = vadd.xlane.f32.xlu0 %v6847_v16  ;;  %448 = vadd.xlane.f32.xlu1 %v6852_v17 }
  0x97   : > { %450 = vadd.xlane.f32.xlu0 %v6855_v18  ;;  %452 = vadd.xlane.f32.xlu1 %v6860_v19 }
 0x100   : > { %v415_v34 = vpop.xlane.xlu0 %414  ;;  %v419_v35 = vpop.xlane.xlu1 %418 }
 0x101   : > { %v479_v36 = vmul.f32 0.0078125, %v415_v34  ;;  %v481_v38 = vmul.f32 0.0078125, %v419_v35 }
 0x103   : > { %v6865_v37 = vsub.f32 %v6785_v0, %v479_v36  ;;  %v6873_v44 = vsub.f32 %v6788_v1, %v481_v38  ;;  %v5046_v1 = vcombine.low %v934_v31, %v938_v32  ;;  %v950_v31 = vld [vmem:[#allocation7 + $0xc8] sm:$0xff] }
 0x104   : > { %v417_v39 = vpop.xlane.xlu0 %416  ;;  %v421_v40 = vpop.xlane.xlu1 %420  ;;  %v954_v32 = vld [vmem:[#allocation7 + $0xe8] sm:$0xff] }
 0x105   : > { %v480_v41 = vmul.f32 0.0078125, %v417_v39  ;;  %v543_v42 = vmul.f32 %v6865_v37, %v6865_v37  ;;  %v482_v45 = vmul.f32 0.0078125, %v421_v40  ;;  %v545_v50 = vmul.f32 %v6873_v44, %v6873_v44  ;;  %1547 = vmatpush1.bf16.msra.mxu1 %v5046_v1  ;;  %v6923_v38 = vld [vmem:[%s6774_s10 + $0xc8] sm:$0xff] }
 0x106   : > { %v5063_v36 = vcombine.high %v950_v31, %v954_v32  ;;  %v5060_v40 = vcombine.low %v949_v29, %v953_v30  ;;  %v966_v1 = vld [vmem:[#allocation7 + $0x148] sm:$0xff] }
 0x107   : > { %v6870_v43 = vsub.f32 %v6793_v2, %v480_v41  ;;  %575 = vadd.xlane.f32.xlu0 %v543_v42  ;;  %v6882_v49 = vsub.f32 %v6796_v3, %v482_v45  ;;  %v941_v2 = vld [vmem:[#allocation7 + $0x80] sm:$0xff]  ;;  %v5062_v41 = vcombine.low %v950_v31, %v954_v32 }
 0x108   : > { %v423_v47 = vpop.xlane.xlu0 %422  ;;  %v425_v53 = vpop.xlane.xlu1 %424  ;;  %v945_v3 = vld [vmem:[#allocation7 + $0xa0] sm:$0xff] }
 0x109   : > { %v544_v48 = vmul.f32 %v6870_v43, %v6870_v43  ;;  %v483_v51 = vmul.f32 0.0078125, %v423_v47  ;;  %v546_v55 = vmul.f32 %v6882_v49, %v6882_v49  ;;  %v484_v56 = vmul.f32 0.0078125, %v425_v53  ;;  %v957_v42 = vld [vmem:[#allocation7 + $0x100] sm:$0xff]  ;;  %v958_v47 = vld [vmem:[#allocation7 + $0x108] sm:$0xff] }
 0x10a   : > { %v5053_v20 = vcombine.high %v941_v2, %v945_v3  ;;  %v5052_v27 = vcombine.low %v941_v2, %v945_v3  ;;  %v961_v45 = vld [vmem:[#allocation7 + $0x120] sm:$0xff] }
 0x10b   : > { %454 = vadd.xlane.f32.xlu0 %v6876_v46  ;;  %577 = vadd.xlane.f32.xlu1 %v544_v48  ;;  %v6891_v54 = vsub.f32 %v6801_v4, %v483_v51  ;;  %v6900_v59 = vsub.f32 %v6804_v5, %v484_v56  ;;  %v942_v4 = vld [vmem:[#allocation7 + $0x88] sm:$0xff] }
 0x10c   : > { %v427_v58 = vpop.xlane.xlu0 %426  ;;  %v429_v0 = vpop.xlane.xlu1 %428  ;;  %v5055_v24 = vcombine.high %v942_v4, %v946_v21  ;;  %1355 = vmatprep.subr.bf16.mxu0 %v5053_v20  ;;  %v5054_v28 = vcombine.low %v942_v4, %v946_v21  ;;  %v970_v20 = vld [vmem:[#allocation7 + $0x168] sm:$0xff] }
 0x10d   : > { %v547_v60 = vmul.f32 %v6891_v54, %v6891_v54  ;;  %v485_v61 = vmul.f32 0.0078125, %v427_v58  ;;  %v548_v22 = vmul.f32 %v6900_v59, %v6900_v59  ;;  %v486_v23 = vmul.f32 0.0078125, %v429_v0  ;;  %1356 = vmatpush1.bf16.msra.mxu0 %v5052_v27  ;;  %v6932_v58 = vld [vmem:[%s6774_s10 + $0xd0] sm:$0xff]  ;;  %v969_v0 = vld [vmem:[#allocation7 + $0x160] sm:$0xff] }
 0x10e   : > { %1548 = vmatprep.subr.bf16.mxu1 %v5055_v24  ;;  %v6941_v24 = vld [vmem:[%s6774_s10 + $0xd8] sm:$0xff]  ;;  %v5078_v27 = vcombine.low %v966_v1, %v970_v20 }
 0x10f   : > { %579 = vadd.xlane.f32.xlu0 %v545_v50  ;;  %456 = vadd.xlane.f32.xlu1 %v6887_v52  ;;  %v6909_v5 = vsub.f32 %v6807_v6, %v485_v61  ;;  %v5061_v6 = vcombine.high %v949_v29, %v953_v30  ;;  %v6918_v33 = vsub.f32 %v6810_v7, %v486_v23  ;;  %v962_v50 = vld [vmem:[#allocation7 + $0x128] sm:$0xff]  ;;  %v977_v29 = vld [vmem:[#allocation7 + $0x1a0] sm:$0xff] }
 0x110   : > { %v431_v26 = vpop.xlane.xlu0 %430  ;;  %1549 = vmatpush1.bf16.msra.mxu1 %v5054_v28  ;;  %v433_v39 = vpop.xlane.xlu1 %432  ;;  %v5069_v7 = vcombine.high %v957_v42, %v961_v45  ;;  %v5071_v56 = vcombine.high %v958_v47, %v962_v50  ;;  %v5070_v61 = vcombine.low %v958_v47, %v962_v50  ;;  %v5079_v23 = vcombine.high %v966_v1, %v970_v20  ;;  %v973_v28 = vld [vmem:[#allocation7 + $0x180] sm:$0xff]  ;;  %v974_v30 = vld [vmem:[#allocation7 + $0x188] sm:$0xff] }
 0x111   : > { %v549_v34 = vmul.f32 %v6909_v5, %v6909_v5  ;;  %v487_v35 = vmul.f32 0.0078125, %v431_v26  ;;  %1357 = vmatprep.subr.bf16.mxu0 %v5061_v6  ;;  %1550 = vmatprep.subr.bf16.mxu1 %v5063_v36  ;;  %v550_v53 = vmul.f32 %v6918_v33, %v6918_v33  ;;  %v5076_v26 = vcombine.low %v965_v62, %v969_v0  ;;  %v982_v47 = vld [vmem:[#allocation7 + $0x1c8] sm:$0xff] }
 0x112   : > { %1358 = vmatpush1.bf16.msra.mxu0 %v5060_v40  ;;  %v5085_v32 = vcombine.high %v973_v28, %v977_v29  ;;  %v10461_v20 = vmov 0  }
 0x113   : > { %458 = vadd.xlane.f32.xlu0 %v6896_v57  ;;  %581 = vadd.xlane.f32.xlu1 %v546_v55  ;;  %v6927_v51 = vsub.f32 %v6815_v8, %v487_v35  ;;  %v488_v55 = vmul.f32 0.0078125, %v433_v39  ;;  %v5077_v8 = vcombine.high %v965_v62, %v969_v0  ;;  %v6950_v39 = vld [vmem:[%s6774_s10 + $0xe0] sm:$0xff]  ;;  %v6959_v62 = vld [vmem:[%s6774_s10 + $0xe8] sm:$0xff] }
 0x114   : > { %v435_v48 = vpop.xlane.xlu0 %434  ;;  %1551 = vmatpush1.bf16.msra.mxu1 %v5062_v41  ;;  %1359 = vmatprep.subr.bf16.mxu0 %v5069_v7  ;;  %v437_v3 = vpop.xlane.xlu1 %436  ;;  %v5084_v41 = vcombine.low %v973_v28, %v977_v29  ;;  %v6982_v29 = vld [vmem:[%s6774_s10 + $0xf8] sm:$0xff] }
 0x115   : > { %1552 = vmatprep.subr.bf16.mxu1 %v5071_v56  ;;  %v489_v2 = vmul.f32 0.0078125, %v435_v48  ;;  %v6936_v21 = vsub.f32 %v6818_v9, %v488_v55  ;;  %v490_v6 = vmul.f32 0.0078125, %v437_v3  ;;  %1383 = vmatprep.mubr.bf16.mxu0 %v10461_v20 }
 0x116   : > { %1576 = vmatprep.mubr.bf16.mxu1 %v10461_v20 }
 0x117   : > { %460 = vadd.xlane.f32.xlu1 %v6905_v63  ;;  %583 = vadd.xlane.f32.xlu0 %v547_v60  ;;  %v5068_v60 = vcombine.low %v957_v42, %v961_v45  ;;  %v6944_v31 = vsub.f32 %v6823_v10, %v489_v2  ;;  %v552_v35 = vmul.f32 %v6936_v21, %v6936_v21  ;;  %v981_v42 = vld [vmem:[#allocation7 + $0x1c0] sm:$0xff] }
 0x118   : > { %v439_v4 = vpop.xlane.xlu0 %438  ;;  %1553 = vmatpush1.bf16.msra.mxu1 %v5070_v61  ;;  %v441_v9 = vpop.xlane.xlu1 %440  ;;  %v985_v45 = vld [vmem:[#allocation7 + $0x1e0] sm:$0xff]  ;;  %v6953_v48 = vsub.f32 %v6826_v11, %v490_v6 }
 0x119   : > { %1360 = vmatpush1.bf16.msra.mxu0 %v5068_v60  ;;  %1554 = vmatprep.subr.bf16.mxu1 %v5079_v23  ;;  %v553_v7 = vmul.f32 %v6944_v31, %v6944_v31  ;;  %v5093_v50 = vcombine.high %v981_v42, %v985_v45  ;;  %v491_v55 = vmul.f32 0.0078125, %v439_v4  ;;  %v5092_v60 = vcombine.low %v981_v42, %v985_v45 }
 0x11a   : > { %1361 = vmatprep.subr.bf16.mxu0 %v5077_v8  ;;  %v492_v11 = vmul.f32 0.0078125, %v441_v9  ;;  %v554_v3 = vmul.f32 %v6953_v48, %v6953_v48  ;;  %v6968_v8 = vld [vmem:[%s6774_s10 + $0xf0] sm:$0xff] }
 0x11b   : > { %585 = vadd.xlane.f32.xlu1 %v548_v22  ;;  %462 = vadd.xlane.f32.xlu0 %v6914_v25  ;;  %v551_v22 = vmul.f32 %v6927_v51, %v6927_v51  ;;  %v6963_v2 = vsub.f32 %v6831_v12, %v491_v55 }
 0x11c   : > { %1555 = vmatpush1.bf16.msra.mxu1 %v5078_v27  ;;  %v443_v40 = vpop.xlane.xlu0 %442  ;;  %v445_v0 = vpop.xlane.xlu1 %444 }
 0x11d   : > { %1362 = vmatpush1.bf16.msra.mxu0 %v5076_v26  ;;  %v493_v4 = vmul.f32 0.0078125, %v443_v40  ;;  %v494_v23 = vmul.f32 0.0078125, %v445_v0  ;;  %v555_v27 = vmul.f32 %v6963_v2, %v6963_v2 }
 0x11e   : > { %1363 = vmatprep.subr.bf16.mxu0 %v5085_v32 }
 0x11f   : > { %464 = vadd.xlane.f32.xlu1 %v6923_v38  ;;  %587 = vadd.xlane.f32.xlu0 %v549_v34  ;;  %v978_v34 = vld [vmem:[#allocation7 + $0x1a8] sm:$0xff]  ;;  %v6977_v12 = vsub.f32 %v6839_v14, %v493_v4  ;;  %v6985_v6 = vsub.f32 %v6842_v15, %v494_v23 }
 0x120   : > { %v5087_v36 = vcombine.high %v974_v30, %v978_v34  ;;  %v5086_v10 = vcombine.low %v974_v30, %v978_v34  ;;  %v447_v1 = vpop.xlane.xlu0 %446  ;;  %v449_v26 = vpop.xlane.xlu1 %448 }
 0x121   : > { %1364 = vmatpush1.bf16.msra.mxu0 %v5084_v41  ;;  %v495_v28 = vmul.f32 0.0078125, %v447_v1  ;;  %v557_v14 = vmul.f32 %v6977_v12, %v6977_v12  ;;  %v496_v32 = vmul.f32 0.0078125, %v449_v26 }
 0x122   : > { %1556 = vmatprep.subr.bf16.mxu1 %v5087_v36  ;;  %1365 = vmatprep.subr.bf16.mxu0 %v5093_v50  ;;  %v558_v36 = vmul.f32 %v6985_v6, %v6985_v6  ;;  %v7022_v50 = vld [vmem:[#allocation7 + $0x38] sm:$0xff] }
 0x123   : > { %589 = vadd.xlane.f32.xlu1 %v550_v53  ;;  %466 = vadd.xlane.f32.xlu0 %v6932_v58  ;;  %v986_v53 = vld [vmem:[#allocation7 + $0x1e8] sm:$0xff]  ;;  %v6991_v9 = vsub.f32 %v6847_v16, %v495_v28  ;;  %v6998_v15 = vsub.f32 %v6852_v17, %v496_v32 }
 0x124   : > { %1557 = vmatpush1.bf16.msra.mxu1 %v5086_v10  ;;  %v5095_v56 = vcombine.high %v982_v47, %v986_v53  ;;  %v5094_v61 = vcombine.low %v982_v47, %v986_v53  ;;  %v451_v30 = vpop.xlane.xlu0 %450  ;;  %v7016_v47 = vld [vmem:[#allocation7 + $0x30] sm:$0xff] }
 0x125   : > { %1366 = vmatpush1.bf16.msra.mxu0 %v5092_v60  ;;  %v497_v34 = vmul.f32 0.0078125, %v451_v30  ;;  %v559_v16 = vmul.f32 %v6991_v9, %v6991_v9  ;;  %v560_v42 = vmul.f32 %v6998_v15, %v6998_v15 }
 0x126   : > { %1558 = vmatprep.subr.bf16.mxu1 %v5095_v56 }
 0x127   : > { %468 = vadd.xlane.f32.xlu1 %v6941_v24  ;;  %591 = vadd.xlane.f32.xlu0 %v551_v22  ;;  %v6973_v22 = vsub.f32 %v6836_v13, %v492_v11  ;;  %v7001_v40 = vsub.f32 %v6855_v18, %v497_v34  ;;  %v7014_v18 = vld [vmem:[#allocation7 + $0x10] sm:$0xff] }
 0x128   : > { %1559 = vmatpush1.bf16.msra.mxu1 %v5094_v61 }
 0x129   : > { %v556_v13 = vmul.f32 %v6973_v22, %v6973_v22  ;;  %v561_v45 = vmul.f32 %v7001_v40, %v7001_v40 }
 0x12b   : > { %593 = vadd.xlane.f32.xlu1 %v552_v35  ;;  %470 = vadd.xlane.f32.xlu0 %v6950_v39  ;;  %v453_v35 = vpop.xlane.xlu1 %452 }
 0x12c   : > { %v498_v41 = vmul.f32 0.0078125, %v453_v35 }
 0x12e   : > { %v7006_v10 = vsub.f32 %v6860_v19, %v498_v41  ;;  %v5041_v19 = vcombine.high %v7014_v18, %v7016_v47 }
 0x12f   : > { %472 = vadd.xlane.f32.xlu1 %v6959_v62  ;;  %595 = vadd.xlane.f32.xlu0 %v553_v7  ;;  %v7020_v7 = vld [vmem:[#allocation7 + $0x18] sm:$0xff] }
 0x130   : > { %v562_v17 = vmul.f32 %v7006_v10, %v7006_v10  ;;  %1737 = vmatprep.subr.bf16.mxu0 %v5041_v19  ;;  %v5043_v53 = vcombine.high %v7020_v7, %v7022_v50 }
 0x132   : > { %1930 = vmatprep.subr.bf16.mxu1 %v5043_v53 }
 0x133   : > { %597 = vadd.xlane.f32.xlu1 %v554_v3  ;;  %474 = vadd.xlane.f32.xlu0 %v6968_v8 }
 0x137   : > { %476 = vadd.xlane.f32.xlu1 %v6982_v29  ;;  %599 = vadd.xlane.f32.xlu0 %v555_v27 }
 0x13b   : > { %601 = vadd.xlane.f32.xlu1 %v556_v13  ;;  %603 = vadd.xlane.f32.xlu0 %v557_v14 }
 0x13f   : > { %605 = vadd.xlane.f32.xlu1 %v558_v36  ;;  %607 = vadd.xlane.f32.xlu0 %v559_v16 }
 0x143   : > { %609 = vadd.xlane.f32.xlu1 %v560_v42  ;;  %611 = vadd.xlane.f32.xlu0 %v561_v45 }
 0x147   : > { %613 = vadd.xlane.f32.xlu1 %v562_v17 }
 0x194   : > { %v576_v55 = vpop.xlane.xlu0 %575 }
 0x195   : > { %v639_v56 = vmul.f32 0.0078125, %v576_v55 }
 0x197   : > { %v671_v60 = vadd.f32 1e-05, %v639_v56  ;;  %v7045_v56 = vld [vmem:[%s10448_s1] ss:$0 sm:$0xff] }
 0x198   : > { %v578_v61 = vpop.xlane.xlu1 %577  ;;  %v455_v0 = vpop.xlane.xlu0 %454 }
 0x199   : > { %5776 = vrsqrt.f32 %v671_v60  ;;  %v640_v11 = vmul.f32 0.0078125, %v578_v61  ;;  %v499_v1 = vmul.f32 0.0078125, %v455_v0 }
 0x19b   : > { %v672_v3 = vadd.f32 1e-05, %v640_v11  ;;  %v7027_v4 = vsub.f32 %v6876_v46, %v499_v1 }
 0x19c   : > { %v457_v23 = vpop.xlane.xlu1 %456  ;;  %v580_v26 = vpop.xlane.xlu0 %579 }
 0x19d   : > { %5778 = vrsqrt.f32 %v672_v3  ;;  %v500_v27 = vmul.f32 0.0078125, %v457_v23  ;;  %v641_v28 = vmul.f32 0.0078125, %v580_v26  ;;  %v563_v30 = vmul.f32 %v7027_v4, %v7027_v4 }
 0x19f   : > { %v7032_v13 = vsub.f32 %v6887_v52, %v500_v27  ;;  %v673_v14 = vadd.f32 1e-05, %v641_v28  ;;  %615 = vadd.xlane.f32.xlu0 %v563_v30  ;;  %v7057_v27 = vld [vmem:[%s10449_s2] ss:$0 sm:$0xff] }
 0x1a0   : > { %v582_v32 = vpop.xlane.xlu1 %581  ;;  %v459_v34 = vpop.xlane.xlu0 %458 }
 0x1a1   : > { %5780 = vrsqrt.f32 %v673_v14  ;;  %v642_v35 = vmul.f32 0.0078125, %v582_v32  ;;  %v501_v36 = vmul.f32 0.0078125, %v459_v34  ;;  %v564_v46 = vmul.f32 %v7032_v13, %v7032_v13 }
 0x1a3   : > { %v5777_v16 = vpop.eup %5776  ;;  %v674_v41 = vadd.f32 1e-05, %v642_v35  ;;  %v7037_v42 = vsub.f32 %v6896_v57, %v501_v36  ;;  %617 = vadd.xlane.f32.xlu1 %v564_v46  ;;  %v935_v46 = vld [vmem:[#allocation7 + $0x50] sm:$0xff] }
 0x1a4   : > { %v735_v45 = vmul.f32 %v5777_v16, %v6865_v37  ;;  %v461_v52 = vpop.xlane.xlu1 %460  ;;  %v584_v17 = vpop.xlane.xlu0 %583  ;;  %v939_v16 = vld [vmem:[#allocation7 + $0x70] sm:$0xff] }
 0x1a5   : > { %5782 = vrsqrt.f32 %v674_v41  ;;  %v502_v19 = vmul.f32 0.0078125, %v461_v52  ;;  %v643_v53 = vmul.f32 0.0078125, %v584_v17  ;;  %v565_v55 = vmul.f32 %v7037_v42, %v7037_v42  ;;  %v936_v17 = vld [vmem:[#allocation7 + $0x58] sm:$0xff] }
 0x1a6   : > { %v774_v1 = vmul.f32 %v7045_v56, %v735_v45 }
 0x1a7   : > { %v5779_v60 = vpop.eup %5778  ;;  %v7048_v57 = vsub.f32 %v6905_v63, %v502_v19  ;;  %v675_v61 = vadd.f32 1e-05, %v643_v53  ;;  %619 = vadd.xlane.f32.xlu0 %v565_v55  ;;  %v5042_v53 = vcombine.low %v7020_v7, %v7022_v50  ;;  %v947_v7 = vld [vmem:[#allocation7 + $0xb0] sm:$0xff] }
 0x1a8   : > { %v736_v37 = vmul.f32 %v5779_v60, %v6870_v43  ;;  %v586_v0 = vpop.xlane.xlu1 %585  ;;  %v463_v11 = vpop.xlane.xlu0 %462  ;;  %v813_v35 = vadd.f32 %v7057_v27, %v774_v1 }
 0x1a9   : > { %5784 = vrsqrt.f32 %v675_v61  ;;  %v644_v3 = vmul.f32 0.0078125, %v586_v0  ;;  %v503_v23 = vmul.f32 0.0078125, %v463_v11  ;;  %v566_v26 = vmul.f32 %v7048_v57, %v7048_v57 }
 0x1aa   : > { %v775_v63 = vmul.f32 %v7045_v56, %v736_v37  ;;  %v5049_v37 = vcombine.high %v935_v46, %v939_v16 }
 0x1ab   : > { %v5781_v28 = vpop.eup %5780  ;;  %v676_v30 = vadd.f32 1e-05, %v644_v3  ;;  %v7061_v43 = vsub.f32 %v6914_v25, %v503_v23  ;;  %621 = vadd.xlane.f32.xlu1 %v566_v26  ;;  %v940_v25 = vld [vmem:[#allocation7 + $0x78] sm:$0xff]  ;;  %v943_v3 = vld [vmem:[#allocation7 + $0x90] sm:$0xff]  ;;  %v5048_v26 = vcombine.low %v935_v46, %v939_v16 }
 0x1ac   : > { %v737_v14 = vmul.f32 %v5781_v28, %v6873_v44  ;;  %v465_v32 = vpop.xlane.xlu1 %464  ;;  %v588_v34 = vpop.xlane.xlu0 %587  ;;  %v814_v36 = vadd.f32 %v7057_v27, %v775_v63  ;;  %v5040_v44 = vcombine.low %v7014_v18, %v7016_v47  ;;  %v5051_v47 = vcombine.high %v936_v17, %v940_v25  ;;  %v951_v46 = vld [vmem:[#allocation7 + $0xd0] sm:$0xff] }
 0x1ad   : > { %5786 = vrsqrt.f32 %v676_v30  ;;  %v504_v41 = vmul.f32 0.0078125, %v465_v32  ;;  %v645_v45 = vmul.f32 0.0078125, %v588_v34  ;;  %v567_v52 = vmul.f32 %v7061_v43, %v7061_v43  ;;  %v944_v34 = vld [vmem:[#allocation7 + $0x98] sm:$0xff]  ;;  %v955_v16 = vld [vmem:[#allocation7 + $0xf0] sm:$0xff] }
 0x1ae   : > { %v7068_v19 = vpack.c.bf16 %v814_v36, %v813_v35  ;;  %v776_v18 = vmul.f32 %v7045_v56, %v737_v14  ;;  %v5050_v63 = vcombine.low %v936_v17, %v940_v25  ;;  %v5057_v32 = vcombine.high %v943_v3, %v947_v7  ;;  %v948_v35 = vld [vmem:[#allocation7 + $0xb8] sm:$0xff] }
 0x1af   : > { %v5783_v55 = vpop.eup %5782  ;;  %v7075_v60 = vsub.f32 %v6923_v38, %v504_v41  ;;  %v677_v61 = vadd.f32 1e-05, %v645_v45  ;;  %623 = vadd.xlane.f32.xlu0 %v567_v52 }
 0x1b0   : > { %v738_v0 = vmul.f32 %v5783_v55, %v6882_v49  ;;  %v590_v11 = vpop.xlane.xlu1 %589  ;;  %1384 = vmatmul.mubr.bf16.vlgmr.msra.gmra.mrb[0].mxu0 %v7068_v19  ;;  %1577 = vmatmul.mubr.bf16.vlgmr.msra.gmra.mrb[0].mxu1 %v7068_v19  ;;  %v467_v1 = vpop.xlane.xlu0 %466  ;;  %v815_v52 = vadd.f32 %v7057_v27, %v776_v18  ;;  %v956_v55 = vld [vmem:[#allocation7 + $0xf8] sm:$0xff]  ;;  %v5058_v18 = vcombine.low %v944_v34, %v948_v35 }
 0x1b1   : > { %5788 = vrsqrt.f32 %v677_v61  ;;  %v646_v50 = vmul.f32 0.0078125, %v590_v11  ;;  %v505_v38 = vmul.f32 0.0078125, %v467_v1  ;;  %v568_v23 = vmul.f32 %v7075_v60, %v7075_v60  ;;  %1393 = vmatprep.mubr.bf16.mxu0 %v10461_v20  ;;  %1586 = vmatprep.mubr.bf16.mxu1 %v10461_v20 }
 0x1b2   : > { %v777_v49 = vmul.f32 %v7045_v56, %v738_v0  ;;  %1738 = vmatpush1.bf16.msra.mxu0 %v5040_v44  ;;  %1931 = vmatpush1.bf16.msra.mxu1 %v5042_v53  ;;  %v952_v53 = vld [vmem:[#allocation7 + $0xd8] sm:$0xff] }
 0x1b3   : > { %v5785_v28 = vpop.eup %5784  ;;  %v678_v30 = vadd.f32 1e-05, %v646_v50  ;;  %v7087_v14 = vsub.f32 %v6932_v58, %v505_v38  ;;  %625 = vadd.xlane.f32.xlu1 %v568_v23  ;;  %1739 = vmatprep.subr.bf16.mxu0 %v5049_v37  ;;  %v5059_v37 = vcombine.high %v944_v34, %v948_v35  ;;  %v5066_v34 = vcombine.low %v952_v53, %v956_v55 }
 0x1b4   : > { %v739_v36 = vmul.f32 %v5785_v28, %v6891_v54  ;;  %v469_v41 = vpop.xlane.xlu1 %468  ;;  %v592_v45 = vpop.xlane.xlu0 %591  ;;  %v816_v44 = vadd.f32 %v7057_v27, %v777_v49  ;;  %1932 = vmatprep.subr.bf16.mxu1 %v5051_v47  ;;  %v5056_v54 = vcombine.low %v943_v3, %v947_v7  ;;  %v5065_v47 = vcombine.high %v951_v46, %v955_v16 }
 0x1b5   : > { %5790 = vrsqrt.f32 %v678_v30  ;;  %v506_v17 = vmul.f32 0.0078125, %v469_v41  ;;  %v647_v58 = vmul.f32 0.0078125, %v592_v45  ;;  %v569_v25 = vmul.f32 %v7087_v14, %v7087_v14 }
 0x1b6   : > { %v7094_v61 = vpack.c.bf16 %v816_v44, %v815_v52  ;;  %1740 = vmatpush1.bf16.msra.mxu0 %v5048_v26  ;;  %1933 = vmatpush1.bf16.msra.mxu1 %v5050_v63  ;;  %v778_v3 = vmul.f32 %v7045_v56, %v739_v36  ;;  %v5067_v7 = vcombine.high %v952_v53, %v956_v55 }
 0x1b7   : > { %v5787_v0 = vpop.eup %5786  ;;  %v7097_v11 = vsub.f32 %v6941_v24, %v506_v17  ;;  %v679_v1 = vadd.f32 1e-05, %v647_v58  ;;  %627 = vadd.xlane.f32.xlu0 %v569_v25  ;;  %1741 = vmatprep.subr.bf16.mxu0 %v5057_v32  ;;  %v5064_v63 = vcombine.low %v951_v46, %v955_v16 }
 0x1b8   : > { %v740_v50 = vmul.f32 %v5787_v0, %v6900_v59  ;;  %v594_v38 = vpop.xlane.xlu1 %593  ;;  %1394 = vmatmul.mubr.bf16.gmra.mrb[4].mxu0 %v7094_v61  ;;  %1587 = vmatmul.mubr.bf16.gmra.mrb[4].mxu1 %v7094_v61  ;;  %v471_v23 = vpop.xlane.xlu0 %470  ;;  %v817_v45 = vadd.f32 %v7057_v27, %v778_v3 }
 0x1b9   : > { %5792 = vrsqrt.f32 %v679_v1  ;;  %v648_v49 = vmul.f32 0.0078125, %v594_v38  ;;  %v507_v24 = vmul.f32 0.0078125, %v471_v23  ;;  %v570_v26 = vmul.f32 %v7097_v11, %v7097_v11  ;;  %1403 = vmatprep.mubr.bf16.mxu0 %v10461_v20  ;;  %1596 = vmatprep.mubr.bf16.mxu1 %v10461_v20 }
 0x1ba   : > { %v779_v59 = vmul.f32 %v7045_v56, %v740_v50  ;;  %1742 = vmatpush1.bf16.msra.mxu0 %v5056_v54  ;;  %1934 = vmatprep.subr.bf16.mxu1 %v5059_v37 }
 0x1bb   : > { %v5789_v28 = vpop.eup %5788  ;;  %v680_v30 = vadd.f32 1e-05, %v648_v49  ;;  %v7109_v32 = vsub.f32 %v6950_v39, %v507_v24  ;;  %629 = vadd.xlane.f32.xlu1 %v570_v26  ;;  %1935 = vmatpush1.bf16.msra.mxu1 %v5058_v18  ;;  %v959_v49 = vld [vmem:[#allocation7 + $0x110] sm:$0xff] }
 0x1bc   : > { %v741_v35 = vmul.f32 %v5789_v28, %v6909_v5  ;;  %v473_v36 = vpop.xlane.xlu1 %472  ;;  %v596_v41 = vpop.xlane.xlu0 %595  ;;  %v818_v52 = vadd.f32 %v7057_v27, %v779_v59  ;;  %1743 = vmatprep.subr.bf16.mxu0 %v5065_v47  ;;  %1936 = vmatprep.subr.bf16.mxu1 %v5067_v7  ;;  %v963_v24 = vld [vmem:[#allocation7 + $0x130] sm:$0xff] }
 0x1bd   : > { %5794 = vrsqrt.f32 %v680_v30  ;;  %v508_v44 = vmul.f32 0.0078125, %v473_v36  ;;  %v649_v46 = vmul.f32 0.0078125, %v596_v41  ;;  %v571_v39 = vmul.f32 %v7109_v32, %v7109_v32 }
 0x1be   : > { %v7116_v16 = vpack.c.bf16 %v818_v52, %v817_v45  ;;  %1744 = vmatpush1.bf16.msra.mxu0 %v5064_v63  ;;  %v780_v54 = vmul.f32 %v7045_v56, %v741_v35  ;;  %v5072_v35 = vcombine.low %v959_v49, %v963_v24 }
 0x1bf   : > { %v5791_v17 = vpop.eup %5790  ;;  %v7119_v5 = vsub.f32 %v6959_v62, %v508_v44  ;;  %v681_v58 = vadd.f32 1e-05, %v649_v46  ;;  %631 = vadd.xlane.f32.xlu0 %v571_v39  ;;  %1937 = vmatpush1.bf16.msra.mxu1 %v5066_v34  ;;  %v960_v44 = vld [vmem:[#allocation7 + $0x118] sm:$0xff] }
 0x1c0   : > { %v742_v25 = vmul.f32 %v5791_v17, %v6918_v33  ;;  %v598_v53 = vpop.xlane.xlu1 %597  ;;  %1404 = vmatmul.mubr.bf16.gmra.mrb[8].mxu0 %v7116_v16  ;;  %1597 = vmatmul.mubr.bf16.gmra.mrb[8].mxu1 %v7116_v16  ;;  %v475_v55 = vpop.xlane.xlu0 %474  ;;  %v819_v3 = vadd.f32 %v7057_v27, %v780_v54  ;;  %v964_v46 = vld [vmem:[#allocation7 + $0x138] sm:$0xff] }
 0x1c1   : > { %5796 = vrsqrt.f32 %v681_v58  ;;  %v650_v37 = vmul.f32 0.0078125, %v598_v53  ;;  %v509_v0 = vmul.f32 0.0078125, %v475_v55  ;;  %v572_v62 = vmul.f32 %v7119_v5, %v7119_v5  ;;  %1413 = vmatprep.mubr.bf16.mxu0 %v10461_v20  ;;  %1606 = vmatprep.mubr.bf16.mxu1 %v10461_v20 }
 0x1c2   : > { %v781_v33 = vmul.f32 %v7045_v56, %v742_v25  ;;  %v5074_v58 = vcombine.low %v960_v44, %v964_v46  ;;  %v5075_v25 = vcombine.high %v960_v44, %v964_v46 }
 0x1c3   : > { %v5793_v1 = vpop.eup %5792  ;;  %v682_v18 = vadd.f32 1e-05, %v650_v37  ;;  %v7131_v47 = vsub.f32 %v6968_v8, %v509_v0  ;;  %633 = vadd.xlane.f32.xlu1 %v572_v62  ;;  %v5073_v8 = vcombine.high %v959_v49, %v963_v24 }
 0x1c4   : > { %v743_v50 = vmul.f32 %v5793_v1, %v6927_v51  ;;  %v477_v38 = vpop.xlane.xlu1 %476  ;;  %v600_v23 = vpop.xlane.xlu0 %599  ;;  %v820_v7 = vadd.f32 %v7057_v27, %v781_v33  ;;  %1938 = vmatprep.subr.bf16.mxu1 %v5075_v25  ;;  %v972_v25 = vld [vmem:[#allocation7 + $0x178] sm:$0xff] }
 0x1c5   : > { %5798 = vrsqrt.f32 %v682_v18  ;;  %v510_v26 = vmul.f32 0.0078125, %v477_v38  ;;  %v651_v59 = vmul.f32 0.0078125, %v600_v23  ;;  %v573_v63 = vmul.f32 %v7131_v47, %v7131_v47  ;;  %1745 = vmatprep.subr.bf16.mxu0 %v5073_v8  ;;  %1939 = vmatpush1.bf16.msra.mxu1 %v5074_v58  ;;  %v968_v58 = vld [vmem:[#allocation7 + $0x158] sm:$0xff] }
 0x1c6   : > { %v7138_v28 = vpack.c.bf16 %v820_v7, %v819_v3  ;;  %v782_v52 = vmul.f32 %v7045_v56, %v743_v50  ;;  %1746 = vmatpush1.bf16.msra.mxu0 %v5072_v35 }
 0x1c7   : > { %v5795_v30 = vpop.eup %5794  ;;  %v7141_v51 = vsub.f32 %v6982_v29, %v510_v26  ;;  %v683_v34 = vadd.f32 1e-05, %v651_v59  ;;  %635 = vadd.xlane.f32.xlu0 %v573_v63 }
 0x1c8   : > { %v744_v36 = vmul.f32 %v5795_v30, %v6936_v21  ;;  %v602_v41 = vpop.xlane.xlu1 %601  ;;  %1414 = vmatmul.mubr.bf16.gmra.mrb[12].mxu0 %v7138_v28  ;;  %1607 = vmatmul.mubr.bf16.gmra.mrb[12].mxu1 %v7138_v28  ;;  %v604_v45 = vpop.xlane.xlu0 %603  ;;  %v821_v33 = vadd.f32 %v7057_v27, %v782_v52 }
 0x1c9   : > { %5800 = vrsqrt.f32 %v683_v34  ;;  %v652_v39 = vmul.f32 0.0078125, %v602_v41  ;;  %v653_v17 = vmul.f32 0.0078125, %v604_v45  ;;  %v574_v29 = vmul.f32 %v7141_v51, %v7141_v51  ;;  %1423 = vmatprep.mubr.bf16.mxu0 %v10461_v20  ;;  %1616 = vmatprep.mubr.bf16.mxu1 %v10461_v20  ;;  %v967_v41 = vld [vmem:[#allocation7 + $0x150] sm:$0xff] }
 0x1ca   : > { %v783_v21 = vmul.f32 %v7045_v56, %v744_v36  ;;  %v971_v45 = vld [vmem:[#allocation7 + $0x170] sm:$0xff] }
 0x1cb   : > { %v5797_v53 = vpop.eup %5796  ;;  %v684_v55 = vadd.f32 1e-05, %v652_v39  ;;  %v685_v54 = vadd.f32 1e-05, %v653_v17  ;;  %637 = vadd.xlane.f32.xlu1 %v574_v29  ;;  %v5081_v44 = vcombine.high %v967_v41, %v971_v45  ;;  %v5080_v39 = vcombine.low %v967_v41, %v971_v45  ;;  %v983_v41 = vld [vmem:[#allocation7 + $0x1d0] sm:$0xff] }
 0x1cc   : > { %v745_v37 = vmul.f32 %v5797_v53, %v6944_v31  ;;  %v606_v0 = vpop.xlane.xlu1 %605  ;;  %v608_v62 = vpop.xlane.xlu0 %607  ;;  %v822_v1 = vadd.f32 %v7057_v27, %v783_v21 }
 0x1cd   : > { %5802 = vrsqrt.f32 %v684_v55  ;;  %v654_v18 = vmul.f32 0.0078125, %v606_v0  ;;  %v655_v3 = vmul.f32 0.0078125, %v608_v62  ;;  %1747 = vmatprep.subr.bf16.mxu0 %v5081_v44 }
 0x1ce   : > { %v7155_v50 = vpack.c.bf16 %v822_v1, %v821_v33  ;;  %5804 = vrsqrt.f32 %v685_v54  ;;  %v784_v31 = vmul.f32 %v7045_v56, %v745_v37  ;;  %v5082_v54 = vcombine.low %v968_v58, %v972_v25  ;;  %1748 = vmatpush1.bf16.msra.mxu0 %v5080_v39  ;;  %v987_v39 = vld [vmem:[#allocation7 + $0x1f0] sm:$0xff] }
 0x1cf   : > { %v5799_v38 = vpop.eup %5798  ;;  %v686_v23 = vadd.f32 1e-05, %v654_v18  ;;  %v687_v63 = vadd.f32 1e-05, %v655_v3  ;;  %v5083_v37 = vcombine.high %v968_v58, %v972_v25  ;;  %v5096_v58 = vcombine.low %v983_v41, %v987_v39 }
 0x1d0   : > { %v746_v7 = vmul.f32 %v5799_v38, %v6953_v48  ;;  %v610_v49 = vpop.xlane.xlu1 %609  ;;  %1424 = vmatmul.mubr.bf16.gmra.mrb[16].mxu0 %v7155_v50  ;;  %1617 = vmatmul.mubr.bf16.gmra.mrb[16].mxu1 %v7155_v50  ;;  %v612_v30 = vpop.xlane.xlu0 %611  ;;  %v823_v35 = vadd.f32 %v7057_v27, %v784_v31  ;;  %v5097_v25 = vcombine.high %v983_v41, %v987_v39 }
 0x1d1   : > { %5806 = vrsqrt.f32 %v686_v23  ;;  %v656_v24 = vmul.f32 0.0078125, %v610_v49  ;;  %1433 = vmatprep.mubr.bf16.mxu0 %v10461_v20  ;;  %1626 = vmatprep.mubr.bf16.mxu1 %v10461_v20  ;;  %v657_v29 = vmul.f32 0.0078125, %v612_v30 }
 0x1d2   : > { %v785_v26 = vmul.f32 %v7045_v56, %v746_v7  ;;  %1940 = vmatprep.subr.bf16.mxu1 %v5083_v37 }
 0x1d3   : > { %v5801_v59 = vpop.eup %5800  ;;  %v688_v8 = vadd.f32 1e-05, %v656_v24  ;;  %v689_v62 = vadd.f32 1e-05, %v657_v29  ;;  %1941 = vmatpush1.bf16.msra.mxu1 %v5082_v54  ;;  %v988_v29 = vld [vmem:[#allocation7 + $0x1f8] sm:$0xff] }
 0x1d4   : > { %v747_v48 = vmul.f32 %v5801_v59, %v6963_v2  ;;  %v614_v34 = vpop.xlane.xlu1 %613  ;;  %v824_v36 = vadd.f32 %v7057_v27, %v785_v26  ;;  %v975_v59 = vld [vmem:[#allocation7 + $0x190] sm:$0xff] }
 0x1d5   : > { %5808 = vrsqrt.f32 %v688_v8  ;;  %v658_v52 = vmul.f32 0.0078125, %v614_v34 }
 0x1d6   : > { %v7167_v46 = vpack.c.bf16 %v824_v36, %v823_v35  ;;  %5810 = vrsqrt.f32 %v687_v63  ;;  %v786_v21 = vmul.f32 %v7045_v56, %v747_v48  ;;  %v979_v63 = vld [vmem:[#allocation7 + $0x1b0] sm:$0xff]  ;;  %v976_v36 = vld [vmem:[#allocation7 + $0x198] sm:$0xff] }
 0x1d7   : > { %v5803_v17 = vpop.eup %5802  ;;  %v690_v55 = vadd.f32 1e-05, %v658_v52  ;;  %v5089_v8 = vcombine.high %v975_v59, %v979_v63  ;;  %v5088_v34 = vcombine.low %v975_v59, %v979_v63 }
 0x1d8   : > { %v748_v2 = vmul.f32 %v5803_v17, %v6973_v22  ;;  %1434 = vmatmul.mubr.bf16.gmra.mrb[20].mxu0 %v7167_v46  ;;  %1627 = vmatmul.mubr.bf16.gmra.mrb[20].mxu1 %v7167_v46  ;;  %v5805_v53 = vpop.eup %5804  ;;  %v825_v18 = vadd.f32 %v7057_v27, %v786_v21  ;;  %v984_v17 = vld [vmem:[#allocation7 + $0x1d8] sm:$0xff] }
 0x1d9   : > { %1443 = vmatprep.mubr.bf16.mxu0 %v10461_v20  ;;  %1636 = vmatprep.mubr.bf16.mxu1 %v10461_v20  ;;  %v749_v33 = vmul.f32 %v5805_v53, %v6977_v12  ;;  %5812 = vrsqrt.f32 %v690_v55  ;;  %v5099_v53 = vcombine.high %v984_v17, %v988_v29 }
 0x1da   : > { %v787_v0 = vmul.f32 %v7045_v56, %v748_v2  ;;  %5814 = vrsqrt.f32 %v689_v62  ;;  %1749 = vmatprep.subr.bf16.mxu0 %v5089_v8 }
 0x1db   : > { %v5807_v22 = vpop.eup %5806  ;;  %v788_v12 = vmul.f32 %v7045_v56, %v749_v33  ;;  %1750 = vmatpush1.bf16.msra.mxu0 %v5088_v34 }
 0x1dc   : > { %v750_v1 = vmul.f32 %v5807_v22, %v6985_v6  ;;  %v826_v38 = vadd.f32 %v7057_v27, %v787_v0  ;;  %1751 = vmatprep.subr.bf16.mxu0 %v5097_v25 }
 0x1dd   : > { %v827_v26 = vadd.f32 %v7057_v27, %v788_v12 }
 0x1de   : > { %v7180_v23 = vpack.c.bf16 %v826_v38, %v825_v18  ;;  %v789_v3 = vmul.f32 %v7045_v56, %v750_v1  ;;  %v5714_v18 = vld [vmem:[#allocation9 + $0xc0] sm:$0xff]  }
 0x1df   : > { %v5809_v7 = vpop.eup %5808  ;;  %1752 = vmatpush1.bf16.msra.mxu0 %v5096_v58 }
 0x1e0   : > { %1444 = vmatmul.mubr.bf16.gmra.mrb[24].mxu0 %v7180_v23  ;;  %1637 = vmatmul.mubr.bf16.gmra.mrb[24].mxu1 %v7180_v23  ;;  %v5811_v49 = vpop.eup %5810  ;;  %v752_v6 = vmul.f32 %v5809_v7, %v6998_v15  ;;  %v828_v31 = vadd.f32 %v7057_v27, %v789_v3 }
 0x1e1   : > { %1453 = vmatprep.mubr.bf16.mxu0 %v10461_v20  ;;  %1646 = vmatprep.mubr.bf16.mxu1 %v10461_v20  ;;  %v751_v24 = vmul.f32 %v5811_v49, %v6991_v9  ;;  %v980_v9 = vld [vmem:[#allocation7 + $0x1b8] sm:$0xff] }
 0x1e2   : > { %v7192_v48 = vpack.c.bf16 %v828_v31, %v827_v26  ;;  %v791_v30 = vmul.f32 %v7045_v56, %v752_v6  ;;  %v5090_v52 = vcombine.low %v976_v36, %v980_v9  ;;  %v5091_v44 = vcombine.high %v976_v36, %v980_v9 }
 0x1e3   : > { %v5813_v35 = vpop.eup %5812  ;;  %v790_v15 = vmul.f32 %v7045_v56, %v751_v24 }
 0x1e4   : > { %v5815_v45 = vpop.eup %5814  ;;  %v754_v2 = vmul.f32 %v5813_v35, %v7006_v10  ;;  %v830_v21 = vadd.f32 %v7057_v27, %v791_v30  ;;  %1942 = vmatprep.subr.bf16.mxu1 %v5091_v44  ;;  %v5098_v10 = vcombine.low %v984_v17, %v988_v29 }
 0x1e5   : > { %v753_v55 = vmul.f32 %v5815_v45, %v7001_v40  ;;  %v829_v54 = vadd.f32 %v7057_v27, %v790_v15  ;;  %1943 = vmatpush1.bf16.msra.mxu1 %v5090_v52  ;;  %v5712_v40 = vld [vmem:[#allocation9 + $0x40] sm:$0xff]  }
 0x1e6   : > { %1944 = vmatprep.subr.bf16.mxu1 %v5099_v53  ;;  %v793_v0 = vmul.f32 %v7045_v56, %v754_v2  ;;  %5172 = vmatprep.subr.bf16.mxu0 %v5712_v40 }
 0x1e7   : > { %v7204_v37 = vpack.c.bf16 %v830_v21, %v829_v54  ;;  %v792_v22 = vmul.f32 %v7045_v56, %v753_v55 }
 0x1e8   : > { %1454 = vmatmul.mubr.bf16.gmra.mrb[28].mxu0 %v7192_v48  ;;  %1647 = vmatmul.mubr.bf16.gmra.mrb[28].mxu1 %v7192_v48  ;;  %v832_v62 = vadd.f32 %v7057_v27, %v793_v0 }
 0x1e9   : > { %1463 = vmatprep.mubr.bf16.mxu0 %v10461_v20  ;;  %1656 = vmatprep.mubr.bf16.mxu1 %v10461_v20  ;;  %v831_v33 = vadd.f32 %v7057_v27, %v792_v22 }
 0x1ea   : > { %1945 = vmatpush1.bf16.msra.mxu1 %v5098_v10 }
 0x1eb   : > { %v7214_v1 = vpack.c.bf16 %v832_v62, %v831_v33  ;;  %5284 = vmatprep.subr.bf16.mxu1 %v5714_v18 }
 0x1f0   : > { %1464 = vmatmul.mubr.bf16.gmra.mrb[32].mxu0 %v7204_v37  ;;  %1657 = vmatmul.mubr.bf16.gmra.mrb[32].mxu1 %v7204_v37 }
 0x1f1   : > { %1473 = vmatprep.mubr.bf16.mxu0 %v10461_v20  ;;  %1666 = vmatprep.mubr.bf16.mxu1 %v10461_v20 }
 0x1f8   : > { %1474 = vmatmul.mubr.bf16.gmra.mrb[36].mxu0 %v7214_v1  ;;  %1667 = vmatmul.mubr.bf16.gmra.mrb[36].mxu1 %v7214_v1 }
 0x1f9   : > { %1483 = vmatprep.mubr.bf16.mxu0 %v10461_v20  ;;  %1676 = vmatprep.mubr.bf16.mxu1 %v10461_v20 }
 0x22c   : > { %v616_v38 = vpop.xlane.xlu0 %615 }
 0x22d   : > { %v659_v3 = vmul.f32 0.0078125, %v616_v38 }
 0x22f   : > { %v691_v7 = vadd.f32 1e-05, %v659_v3 }
 0x230   : > { %v618_v12 = vpop.xlane.xlu1 %617 }
 0x231   : > { %5816 = vrsqrt.f32 %v691_v7  ;;  %v660_v49 = vmul.f32 0.0078125, %v618_v12 }
 0x233   : > { %v692_v6 = vadd.f32 1e-05, %v660_v49 }
 0x234   : > { %v620_v31 = vpop.xlane.xlu0 %619 }
 0x235   : > { %5818 = vrsqrt.f32 %v692_v6  ;;  %v661_v24 = vmul.f32 0.0078125, %v620_v31 }
 0x237   : > { %v693_v26 = vadd.f32 1e-05, %v661_v24 }
 0x238   : > { %v622_v59 = vpop.xlane.xlu1 %621 }
 0x239   : > { %5820 = vrsqrt.f32 %v693_v26  ;;  %v662_v63 = vmul.f32 0.0078125, %v622_v59 }
 0x23b   : > { %v5817_v8 = vpop.eup %5816  ;;  %v694_v30 = vadd.f32 1e-05, %v662_v63 }
 0x23c   : > { %v755_v34 = vmul.f32 %v5817_v8, %v7027_v4  ;;  %v624_v35 = vpop.xlane.xlu0 %623 }
 0x23d   : > { %5822 = vrsqrt.f32 %v694_v30  ;;  %v663_v15 = vmul.f32 0.0078125, %v624_v35 }
 0x23e   : > { %v794_v52 = vmul.f32 %v7045_v56, %v755_v34 }
 0x23f   : > { %v5819_v36 = vpop.eup %5818  ;;  %v695_v9 = vadd.f32 1e-05, %v663_v15 }
 0x240   : > { %v756_v41 = vmul.f32 %v5819_v36, %v7032_v13  ;;  %v626_v45 = vpop.xlane.xlu1 %625  ;;  %v833_v4 = vadd.f32 %v7057_v27, %v794_v52 }
 0x241   : > { %5824 = vrsqrt.f32 %v695_v9  ;;  %v664_v44 = vmul.f32 0.0078125, %v626_v45 }
 0x242   : > { %v795_v39 = vmul.f32 %v7045_v56, %v756_v41 }
 0x243   : > { %v5821_v17 = vpop.eup %5820  ;;  %v696_v29 = vadd.f32 1e-05, %v664_v44 }
 0x244   : > { %v757_v2 = vmul.f32 %v5821_v17, %v7037_v42  ;;  %v628_v21 = vpop.xlane.xlu0 %627  ;;  %v834_v58 = vadd.f32 %v7057_v27, %v795_v39 }
 0x245   : > { %5826 = vrsqrt.f32 %v696_v29  ;;  %v665_v25 = vmul.f32 0.0078125, %v628_v21 }
 0x246   : > { %v7227_v53 = vpack.c.bf16 %v834_v58, %v833_v4  ;;  %v796_v42 = vmul.f32 %v7045_v56, %v757_v2 }
 0x247   : > { %v5823_v13 = vpop.eup %5822  ;;  %v697_v55 = vadd.f32 1e-05, %v665_v25 }
 0x248   : > { %v758_v54 = vmul.f32 %v5823_v13, %v7048_v57  ;;  %v630_v0 = vpop.xlane.xlu1 %629  ;;  %1484 = vmatmul.mubr.bf16.gmra.mrb[40].mxu0 %v7227_v53  ;;  %1677 = vmatmul.mubr.bf16.gmra.mrb[40].mxu1 %v7227_v53  ;;  %v835_v18 = vadd.f32 %v7057_v27, %v796_v42 }
 0x249   : > { %5828 = vrsqrt.f32 %v697_v55  ;;  %v666_v10 = vmul.f32 0.0078125, %v630_v0  ;;  %1493 = vmatprep.mubr.bf16.mxu0 %v10461_v20  ;;  %1686 = vmatprep.mubr.bf16.mxu1 %v10461_v20 }
 0x24a   : > { %v797_v22 = vmul.f32 %v7045_v56, %v758_v54 }
 0x24b   : > { %v5825_v40 = vpop.eup %5824  ;;  %v698_v62 = vadd.f32 1e-05, %v666_v10 }
 0x24c   : > { %v759_v33 = vmul.f32 %v5825_v40, %v7061_v43  ;;  %v632_v57 = vpop.xlane.xlu0 %631  ;;  %v836_v38 = vadd.f32 %v7057_v27, %v797_v22 }
 0x24d   : > { %5830 = vrsqrt.f32 %v698_v62  ;;  %v667_v3 = vmul.f32 0.0078125, %v632_v57  ;;  %v5713_v57 = vld [vmem:[#allocation9] sm:$0xff]  }
 0x24e   : > { %v7239_v7 = vpack.c.bf16 %v836_v38, %v835_v18  ;;  %v798_v43 = vmul.f32 %v7045_v56, %v759_v33  ;;  %v5715_v18 = vld [vmem:[#allocation9 + $0x80] sm:$0xff]   ;;  %v5716_v38 = vld [vmem:[#allocation9 + $0x48] sm:$0xff]  }
 0x24f   : > { %v5827_v12 = vpop.eup %5826  ;;  %v699_v49 = vadd.f32 1e-05, %v667_v3  ;;  %v5718_v3 = vld [vmem:[#allocation9 + $0xc8] sm:$0xff]  }
 0x250   : > { %v760_v6 = vmul.f32 %v5827_v12, %v7075_v60  ;;  %v634_v31 = vpop.xlane.xlu1 %633  ;;  %1494 = vmatmul.mubr.bf16.gmra.mrb[44].mxu0 %v7239_v7  ;;  %1687 = vmatmul.mubr.bf16.gmra.mrb[44].mxu1 %v7239_v7  ;;  %v837_v30 = vadd.f32 %v7057_v27, %v798_v43  ;;  %v5719_v12 = vld [vmem:[#allocation9 + $0x88] sm:$0xff]  }
 0x251   : > { %5832 = vrsqrt.f32 %v699_v49  ;;  %v668_v24 = vmul.f32 0.0078125, %v634_v31  ;;  %1503 = vmatprep.mubr.bf16.mxu0 %v10461_v20  ;;  %1696 = vmatprep.mubr.bf16.mxu1 %v10461_v20  ;;  %v5720_v49 = vld [vmem:[#allocation9 + $0x50] sm:$0xff]  }
 0x252   : > { %v799_v26 = vmul.f32 %v7045_v56, %v760_v6  ;;  %v5722_v6 = vld [vmem:[#allocation9 + $0xd0] sm:$0xff]  }
 0x253   : > { %v5829_v59 = vpop.eup %5828  ;;  %v700_v63 = vadd.f32 1e-05, %v668_v24 }
 0x254   : > { %v761_v8 = vmul.f32 %v5829_v59, %v7087_v14  ;;  %v636_v60 = vpop.xlane.xlu0 %635  ;;  %v838_v34 = vadd.f32 %v7057_v27, %v799_v26  ;;  %v5721_v59 = vld [vmem:[#allocation9 + $0x10] sm:$0xff]  }
 0x255   : > { %5834 = vrsqrt.f32 %v700_v63  ;;  %v669_v35 = vmul.f32 0.0078125, %v636_v60  ;;  %v5723_v63 = vld [vmem:[#allocation9 + $0x90] sm:$0xff]   ;;  %v5726_v60 = vld [vmem:[#allocation9 + $0xd8] sm:$0xff]  }
 0x256   : > { %v7251_v15 = vpack.c.bf16 %v838_v34, %v837_v30  ;;  %v800_v14 = vmul.f32 %v7045_v56, %v761_v8  ;;  %v5724_v8 = vld [vmem:[#allocation9 + $0x58] sm:$0xff]  }
 0x257   : > { %v5831_v36 = vpop.eup %5830  ;;  %v701_v9 = vadd.f32 1e-05, %v669_v35 }
 0x258   : > { %v762_v41 = vmul.f32 %v5831_v36, %v7097_v11  ;;  %v638_v45 = vpop.xlane.xlu1 %637  ;;  %1504 = vmatmul.mubr.bf16.gmra.mrb[48].mxu0 %v7251_v15  ;;  %1697 = vmatmul.mubr.bf16.gmra.mrb[48].mxu1 %v7251_v15  ;;  %v839_v11 = vadd.f32 %v7057_v27, %v800_v14 }
 0x259   : > { %5836 = vrsqrt.f32 %v701_v9  ;;  %v670_v52 = vmul.f32 0.0078125, %v638_v45  ;;  %1513 = vmatprep.mubr.bf16.mxu0 %v10461_v20  ;;  %1706 = vmatprep.mubr.bf16.mxu1 %v10461_v20  ;;  %v5725_v9 = vld [vmem:[#allocation9 + $0x18] sm:$0xff]  }
 0x25a   : > { %v801_v44 = vmul.f32 %v7045_v56, %v762_v41  ;;  %v5727_v41 = vld [vmem:[#allocation9 + $0x98] sm:$0xff]  }
 0x25b   : > { %v5833_v39 = vpop.eup %5832  ;;  %v702_v17 = vadd.f32 1e-05, %v670_v52  ;;  %v5730_v52 = vld [vmem:[#allocation9 + $0xe0] sm:$0xff]  }
 0x25c   : > { %v763_v29 = vmul.f32 %v5833_v39, %v7109_v32  ;;  %v840_v2 = vadd.f32 %v7057_v27, %v801_v44 }
 0x25d   : > { %5838 = vrsqrt.f32 %v702_v17 }
 0x25e   : > { %v7263_v21 = vpack.c.bf16 %v840_v2, %v839_v11  ;;  %v802_v25 = vmul.f32 %v7045_v56, %v763_v29 }
 0x25f   : > { %v5835_v4 = vpop.eup %5834 }
 0x260   : > { %v764_v58 = vmul.f32 %v5835_v4, %v7119_v5  ;;  %1514 = vmatmul.mubr.bf16.gmra.mrb[52].mxu0 %v7263_v21  ;;  %1707 = vmatmul.mubr.bf16.gmra.mrb[52].mxu1 %v7263_v21  ;;  %v841_v54 = vadd.f32 %v7057_v27, %v802_v25 }
 0x261   : > { %1523 = vmatprep.mubr.bf16.mxu0 %v10461_v20  ;;  %1716 = vmatprep.mubr.bf16.mxu1 %v10461_v20 }
 0x262   : > { %v803_v32 = vmul.f32 %v7045_v56, %v764_v58 }
 0x263   : > { %v5837_v13 = vpop.eup %5836 }
 0x264   : > { %v765_v55 = vmul.f32 %v5837_v13, %v7131_v47  ;;  %v842_v0 = vadd.f32 %v7057_v27, %v803_v32  ;;  %v5729_v13 = vld [vmem:[#allocation9 + $0x20] sm:$0xff]  }
 0x266   : > { %v7275_v5 = vpack.c.bf16 %v842_v0, %v841_v54  ;;  %v804_v22 = vmul.f32 %v7045_v56, %v765_v55  ;;  %v5731_v55 = vld [vmem:[#allocation9 + $0xa0] sm:$0xff]  }
 0x267   : > { %v5839_v42 = vpop.eup %5838 }
 0x268   : > { %v766_v10 = vmul.f32 %v5839_v42, %v7141_v51  ;;  %1524 = vmatmul.mubr.bf16.gmra.mrb[56].mxu0 %v7275_v5  ;;  %1717 = vmatmul.mubr.bf16.gmra.mrb[56].mxu1 %v7275_v5  ;;  %v843_v40 = vadd.f32 %v7057_v27, %v804_v22  ;;  %v991_v51 = vlaneseq  ;;  %v5732_v42 = vld [vmem:[#allocation9 + $0x68] sm:$0xff]  }
 0x269   : > { %1533 = vmatprep.mubr.bf16.mxu0 %v10461_v20  ;;  %1726 = vmatprep.mubr.bf16.mxu1 %v10461_v20 }
 0x26a   : > { %v805_v47 = vmul.f32 %v7045_v56, %v766_v10  ;;  %v7294_v56 = vshrl.u32 %v991_v51, 7  ;;  %v5734_v10 = vld [vmem:[#allocation9 + $0xe8] sm:$0xff]  }
 0x26c   : > { %v844_v62 = vadd.f32 %v7057_v27, %v805_v47  ;;  %10523 = vst [vmem:[#allocation17_spill] sm:$0xff] %v7294_v56  ;;  %v5717_v27 = vld [vmem:[#allocation9 + $0x8] sm:$0xff]   ;;  %v993_v31 = vsub.s32 0, %v7294_v56  ;;  %v1001_v43 = vsub.s32 2, %v7294_v56  ;;  %v997_v24 = vsub.s32 1, %v7294_v56 }
 0x26d   : > { %v1005_v26 = vsub.s32 3, %v7294_v56  ;;  %v10538_v56 = vmov 0  }
 0x26e   : > { %v7286_v33 = vpack.c.bf16 %v844_v62, %v843_v40 }
 0x270   : > { %10522 = vst [vmem:[#allocation16_spill] sm:$0xff] %v7286_v33  ;;  %1534 = vmatmul.mubr.bf16.gmra.mrb[60].mxu0 %v7286_v33  ;;  %1727 = vmatmul.mubr.bf16.gmra.mrb[60].mxu1 %v7286_v33 }
 0x271   : > { %1769 = vmatprep.mubr.bf16.mxu0 %v10461_v20  ;;  %1962 = vmatprep.mubr.bf16.mxu1 %v10461_v20 }
 0x278   : > { %1770 = vmatmul.mubr.bf16.vlgmr.msra.gmra.mrb[64].mxu0 %v7068_v19  ;;  %1963 = vmatmul.mubr.bf16.vlgmr.msra.gmra.mrb[64].mxu1 %v7068_v19  ;;  %v989_v19 = vld [vmem:[%s10451_s4] sm:$0xff] }
 0x279   : > { %5173 = vmatpush3.bf16.msra.mxu0 %v5713_v57  ;;  %5285 = vmatpush3.bf16.msra.mxu1 %v5715_v18  ;;  %v7307_v30 = vrot.slane %v989_v19, %v993_v31  ;;  %v7309_v34 = vrot.slane %v989_v19, %v1001_v43  ;;  %v7311_v35 = vrot.slane %v989_v19, %v997_v24  ;;  %v5738_v31 = vld [vmem:[#allocation9 + $0xf0] sm:$0xff]  }
 0x27a   : > { %1779 = vmatprep.mubr.bf16.mxu0 %v10461_v20  ;;  %1972 = vmatprep.mubr.bf16.mxu1 %v10461_v20  ;;  %v7313_v36 = vrot.slane %v989_v19, %v1005_v26 }
 0x27b   : > { %5174 = vmatprep.subr.bf16.mxu0 %v5716_v38  ;;  %5286 = vmatprep.subr.bf16.mxu1 %v5718_v3  ;;  %10524 = vst [vmem:[#allocation18_spill] sm:$0xff] %v7307_v30  ;;  %10525 = vst [vmem:[#allocation19_spill] sm:$0xff] %v7309_v34  ;;  %v5733_v3 = vld [vmem:[#allocation9 + $0x28] sm:$0xff]  }
 0x27c   : > { %10526 = vst [vmem:[#allocation20_spill] sm:$0xff] %v7311_v35  ;;  %10527 = vst [vmem:[#allocation21_spill] sm:$0xff] %v7313_v36 }
 0x27d   : > { %5175 = vmatpush3.bf16.msra.mxu0 %v5717_v27  ;;  %5287 = vmatpush3.bf16.msra.mxu1 %v5719_v12  ;;  %v5735_v27 = vld [vmem:[#allocation9 + $0xa8] sm:$0xff]   ;;  %v5736_v12 = vld [vmem:[#allocation9 + $0x70] sm:$0xff]  }
 0x27e   : > { %5176 = vmatprep.subr.bf16.mxu0 %v5720_v49  ;;  %5288 = vmatprep.subr.bf16.mxu1 %v5722_v6 }
 0x280   : > { %1780 = vmatmul.mubr.bf16.gmra.mrb[68].mxu0 %v7094_v61  ;;  %1973 = vmatmul.mubr.bf16.gmra.mrb[68].mxu1 %v7094_v61  ;;  %v5728_v61 = vld [vmem:[#allocation9 + $0x60] sm:$0xff]  }
 0x281   : > { %1789 = vmatprep.mubr.bf16.mxu0 %v10461_v20  ;;  %1982 = vmatprep.mubr.bf16.mxu1 %v10461_v20 }
 0x282   : > { %5177 = vmatpush3.bf16.msra.mxu0 %v5721_v59  ;;  %5289 = vmatpush3.bf16.msra.mxu1 %v5723_v63 }
 0x283   : > { %v1385_v45 = vpop.f32.mrb[0].mxu0  ;;  %v1578_v14 = vpop.f32.mrb[0].mxu1  ;;  %5178 = vmatprep.subr.bf16.mxu0 %v5724_v8  ;;  %5290 = vmatprep.subr.bf16.mxu1 %v5726_v60 }
 0x284   : > { %v1386_v44 = vadd.f32 %v1385_v45, %v7307_v30  ;;  %v1579_v39 = vadd.f32 %v1578_v14, %v7309_v34  ;;  %v1387_v17 = vpop.f32.mrb[1].mxu0  ;;  %v1580_v29 = vpop.f32.mrb[1].mxu1 }
 0x285   : > { %v1388_v11 = vadd.f32 %v1387_v17, %v7311_v35  ;;  %v1581_v2 = vadd.f32 %v1580_v29, %v7313_v36  ;;  %v1389_v4 = vpop.f32.mrb[2].mxu0  ;;  %v1582_v58 = vpop.f32.mrb[2].mxu1 }
 0x286   : > { %v2379_v25 = vmul.f32 0.70710677, %v1386_v44  ;;  %v2381_v32 = vmul.f32 0.70710677, %v1579_v39  ;;  %5179 = vmatpush3.bf16.msra.mxu0 %v5725_v9  ;;  %5291 = vmatpush3.bf16.msra.mxu1 %v5727_v41  ;;  %v1390_v22 = vadd.f32 %v1389_v4, %v7307_v30  ;;  %v7323_v47 = vadd.f32 %v1582_v58, %v7309_v34  ;;  %v1391_v40 = vpop.f32.mrb[3].mxu0  ;;  %v1584_v62 = vpop.f32.mrb[3].mxu1 }
 0x287   : > { %v2380_v54 = vmul.f32 0.70710677, %v1388_v11  ;;  %v2382_v0 = vmul.f32 0.70710677, %v1581_v2  ;;  %5180 = vmatprep.subr.bf16.mxu0 %v5728_v61  ;;  %5292 = vmatprep.subr.bf16.mxu1 %v5730_v52  ;;  %v1392_v51 = vadd.f32 %v1391_v40, %v7311_v35  ;;  %v1585_v57 = vadd.f32 %v1584_v62, %v7313_v36  ;;  %v5740_v4 = vld [vmem:[#allocation9 + $0x78] sm:$0xff]   ;;  %v5744_v62 = vld [vmem:[#allocation9 + $0x140] sm:$0xff]  }
 0x288   : > { %5840 = verf.f32 %v2379_v25  ;;  %1790 = vmatmul.mubr.bf16.gmra.mrb[72].mxu0 %v7116_v16  ;;  %1983 = vmatmul.mubr.bf16.gmra.mrb[72].mxu1 %v7116_v16  ;;  %v7331_v18 = vmul.f32 0.5, %v1386_v44  ;;  %v2387_v38 = vmul.f32 0.70710677, %v1390_v22  ;;  %v2389_v16 = vmul.f32 0.70710677, %v7323_v47  ;;  %v5737_v44 = vld [vmem:[#allocation9 + $0x30] sm:$0xff]  }
 0x289   : > { %5842 = verf.f32 %v2381_v32  ;;  %1799 = vmatprep.mubr.bf16.mxu0 %v10461_v20  ;;  %1992 = vmatprep.mubr.bf16.mxu1 %v10461_v20  ;;  %v2388_v49 = vmul.f32 0.70710677, %v1392_v51  ;;  %v7334_v43 = vmul.f32 0.5, %v1579_v39  ;;  %v2390_v19 = vmul.f32 0.70710677, %v1585_v57  ;;  %v5739_v39 = vld [vmem:[#allocation9 + $0xb0] sm:$0xff]  }
 0x28a   : > { %5844 = verf.f32 %v2380_v54  ;;  %5181 = vmatpush3.bf16.msra.mxu0 %v5729_v13  ;;  %5293 = vmatpush3.bf16.msra.mxu1 %v5731_v55  ;;  %v7337_v63 = vmul.f32 0.5, %v1388_v11  ;;  %v7342_v17 = vmul.f32 0.5, %v1581_v2  ;;  %v5742_v58 = vld [vmem:[#allocation9 + $0xf8] sm:$0xff]   ;;  %v7344_v25 = vmul.f32 0.5, %v1390_v22 }
 0x28b   : > { %5846 = verf.f32 %v2382_v0  ;;  %v1395_v6 = vpop.f32.mrb[4].mxu0  ;;  %5182 = vmatprep.subr.bf16.mxu0 %v5732_v42  ;;  %5294 = vmatprep.subr.bf16.mxu1 %v5734_v10  ;;  %v1588_v26 = vpop.f32.mrb[4].mxu1  ;;  %v7354_v42 = vmul.f32 0.5, %v7323_v47  ;;  %v7356_v10 = vmul.f32 0.5, %v1392_v51  ;;  %v7358_v22 = vmul.f32 0.5, %v1585_v57  ;;  %v5743_v40 = vld [vmem:[#allocation9 + $0xb8] sm:$0xff]  }
 0x28c   : > { %5848 = verf.f32 %v2387_v38  ;;  %v1396_v24 = vadd.f32 %v1395_v6, %v7307_v30  ;;  %v1397_v59 = vpop.f32.mrb[5].mxu0  ;;  %v1589_v8 = vadd.f32 %v1588_v26, %v7309_v34  ;;  %v1590_v9 = vpop.f32.mrb[5].mxu1  ;;  %v5746_v51 = vld [vmem:[#allocation9 + $0x1c0] sm:$0xff]  }
 0x28d   : > { %5850 = verf.f32 %v2389_v16  ;;  %v1398_v60 = vadd.f32 %v1397_v59, %v7311_v35  ;;  %v1399_v41 = vpop.f32.mrb[6].mxu0  ;;  %v1591_v14 = vadd.f32 %v1590_v9, %v7313_v36  ;;  %v1592_v61 = vpop.f32.mrb[6].mxu1 }
 0x28e   : > { %5852 = verf.f32 %v2388_v49  ;;  %v2395_v45 = vmul.f32 0.70710677, %v1396_v24  ;;  %v1401_v52 = vpop.f32.mrb[7].mxu0  ;;  %5183 = vmatpush3.bf16.msra.mxu0 %v5733_v3  ;;  %5295 = vmatpush3.bf16.msra.mxu1 %v5735_v27  ;;  %v2397_v29 = vmul.f32 0.70710677, %v1589_v8  ;;  %v1594_v11 = vpop.f32.mrb[7].mxu1  ;;  %v1400_v2 = vadd.f32 %v1399_v41, %v7307_v30 }
 0x28f   : > { %5854 = verf.f32 %v2390_v19  ;;  %5184 = vmatprep.subr.bf16.mxu0 %v5736_v12  ;;  %5296 = vmatprep.subr.bf16.mxu1 %v5738_v31  ;;  %v2396_v32 = vmul.f32 0.70710677, %v1398_v60  ;;  %v2398_v13 = vmul.f32 0.70710677, %v1591_v14  ;;  %v1593_v55 = vadd.f32 %v1592_v61, %v7309_v34 }
 0x290   : > { %5856 = verf.f32 %v2395_v45  ;;  %1800 = vmatmul.mubr.bf16.gmra.mrb[76].mxu0 %v7138_v28  ;;  %1993 = vmatmul.mubr.bf16.gmra.mrb[76].mxu1 %v7138_v28  ;;  %v1402_v54 = vadd.f32 %v1401_v52, %v7311_v35  ;;  %v5741_v28 = vld [vmem:[#allocation9 + $0x38] sm:$0xff]   ;;  %v7360_v3 = vmul.f32 0.5, %v1396_v24  ;;  %v2403_v27 = vmul.f32 0.70710677, %v1400_v2 }
 0x291   : > { %5858 = verf.f32 %v2397_v29  ;;  %1809 = vmatprep.mubr.bf16.mxu0 %v10461_v20  ;;  %2002 = vmatprep.mubr.bf16.mxu1 %v10461_v20  ;;  %v1595_v12 = vadd.f32 %v1594_v11, %v7313_v36  ;;  %v7363_v6 = vmul.f32 0.5, %v1589_v8  ;;  %v7365_v31 = vmul.f32 0.5, %v1398_v60 }
 0x292   : > { %v5841_v0 = vpop.eup %5840  ;;  %5860 = verf.f32 %v2396_v32  ;;  %5185 = vmatpush3.bf16.msra.mxu0 %v5737_v44  ;;  %5297 = vmatpush3.bf16.msra.mxu1 %v5739_v39  ;;  %v2405_v19 = vmul.f32 0.70710677, %v1593_v55  ;;  %v7367_v24 = vmul.f32 0.5, %v1591_v14  ;;  %v7369_v9 = vmul.f32 0.5, %v1400_v2 }
 0x293   : > { %v5843_v38 = vpop.eup %5842  ;;  %5862 = verf.f32 %v2398_v13  ;;  %v1405_v16 = vpop.f32.mrb[8].mxu0  ;;  %5186 = vmatprep.subr.bf16.mxu0 %v5740_v4  ;;  %5298 = vmatprep.subr.bf16.mxu1 %v5742_v58  ;;  %v2891_v49 = vadd.f32 1.0, %v5841_v0  ;;  %v2404_v41 = vmul.f32 0.70710677, %v1402_v54  ;;  %v7373_v29 = vmul.f32 0.5, %v1593_v55 }
 0x294   : > { %v1598_v47 = vpop.f32.mrb[8].mxu1  ;;  %v5845_v57 = vpop.eup %5844  ;;  %5864 = verf.f32 %v2403_v27  ;;  %v2893_v44 = vadd.f32 1.0, %v5843_v38  ;;  %v2406_v58 = vmul.f32 0.70710677, %v1595_v12  ;;  %v7382_v0 = vmul.f32 0.5, %v1402_v54 }
 0x295   : > { %v1407_v26 = vpop.f32.mrb[9].mxu0  ;;  %v5847_v59 = vpop.eup %5846  ;;  %v2892_v39 = vadd.f32 1.0, %v5845_v57  ;;  %5866 = verf.f32 %v2405_v19  ;;  %v7380_v2 = vmul.f32 %v2891_v49, %v7331_v18  ;;  %v1406_v38 = vadd.f32 %v1405_v16, %v7307_v30 }
 0x296   : > { %v1600_v45 = vpop.f32.mrb[9].mxu1  ;;  %v7371_v61 = vpop.f32.mrb[10].mxu0  ;;  %5187 = vmatpush3.bf16.msra.mxu0 %v5741_v28  ;;  %5299 = vmatpush3.bf16.msra.mxu1 %v5743_v40  ;;  %v2894_v11 = vadd.f32 1.0, %v5847_v59  ;;  %5868 = verf.f32 %v2404_v41  ;;  %v7394_v54 = vmul.f32 %v2893_v44, %v7334_v43  ;;  %v7408_v19 = vmul.f32 0.5, %v1595_v12 }
 0x297   : > { %v5849_v52 = vpop.eup %5848  ;;  %v1602_v8 = vpop.f32.mrb[10].mxu1  ;;  %5396 = vmatprep.subr.bf16.mxu0 %v5744_v62  ;;  %5508 = vmatprep.subr.bf16.mxu1 %v5746_v51  ;;  %10528 = vst [vmem:[#allocation22_spill] sm:$0xff] %v7380_v2  ;;  %5870 = verf.f32 %v2406_v58  ;;  %v1599_v62 = vadd.f32 %v1598_v47, %v7309_v34  ;;  %v1408_v51 = vadd.f32 %v1407_v26, %v7311_v35 }
 0x298   : > { %v7375_v60 = vpop.f32.mrb[11].mxu0  ;;  %v5851_v14 = vpop.eup %5850  ;;  %v2899_v4 = vadd.f32 1.0, %v5849_v52  ;;  %1810 = vmatmul.mubr.bf16.gmra.mrb[80].mxu0 %v7155_v50  ;;  %2003 = vmatmul.mubr.bf16.gmra.mrb[80].mxu1 %v7155_v50  ;;  %10530 = vst [vmem:[#allocation24_spill] sm:$0xff] %v7394_v54  ;;  %v2411_v50 = vmul.f32 0.70710677, %v1406_v38  ;;  %v7401_v57 = vmul.f32 %v2892_v39, %v7337_v63  ;;  %v7404_v47 = vmul.f32 %v2894_v11, %v7342_v17 }
 0x299   : > { %v7377_v32 = vpop.f32.mrb[11].mxu1  ;;  %v5853_v13 = vpop.eup %5852  ;;  %v2901_v55 = vadd.f32 1.0, %v5851_v14  ;;  %1819 = vmatprep.mubr.bf16.mxu0 %v10461_v20  ;;  %2012 = vmatprep.mubr.bf16.mxu1 %v10461_v20  ;;  %v7421_v14 = vmul.f32 0.5, %v1406_v38  ;;  %v2413_v11 = vmul.f32 0.70710677, %v1599_v62  ;;  %v1410_v38 = vadd.f32 %v7371_v61, %v7307_v30 }
 0x29a   : > { %v5855_v28 = vpop.eup %5854  ;;  %v7388_v40 = vmul.f32 %v2899_v4, %v7344_v25  ;;  %v2900_v27 = vadd.f32 1.0, %v5853_v13  ;;  %10532 = vst [vmem:[#allocation26_spill] sm:$0xff] %v7401_v57  ;;  %10533 = vst [vmem:[#allocation27_spill] sm:$0xff] %v7404_v47  ;;  %5872 = verf.f32 %v2411_v50 }
 0x29b   : > { %v5857_v18 = vpop.eup %5856  ;;  %v7397_v16 = vmul.f32 %v2901_v55, %v7354_v42  ;;  %v1415_v43 = vpop.f32.mrb[12].mxu0  ;;  %v2902_v26 = vadd.f32 1.0, %v5855_v28  ;;  %v2412_v28 = vmul.f32 0.70710677, %v1408_v51  ;;  %5874 = verf.f32 %v2413_v11 }
 0x29c   : > { %10529 = vst [vmem:[#allocation23_spill] sm:$0xff] %v7388_v40  ;;  %v5859_v25 = vpop.eup %5858  ;;  %v7410_v59 = vpop.f32.mrb[12].mxu1  ;;  %v2907_v52 = vadd.f32 1.0, %v5857_v18  ;;  %v7419_v39 = vmul.f32 %v2900_v27, %v7356_v10  ;;  %v1601_v18 = vadd.f32 %v1600_v45, %v7313_v36  ;;  %v7432_v10 = vmul.f32 0.5, %v1599_v62 }
 0x29d   : > { %10531 = vst [vmem:[#allocation25_spill] sm:$0xff] %v7397_v16  ;;  %v5861_v42 = vpop.eup %5860  ;;  %v7414_v63 = vpop.f32.mrb[13].mxu0  ;;  %v2909_v12 = vadd.f32 1.0, %v5859_v25  ;;  %v1603_v27 = vadd.f32 %v1602_v8, %v7309_v34  ;;  %v7443_v45 = vmul.f32 0.5, %v1408_v51  ;;  %5876 = verf.f32 %v2412_v28 }
 0x29e   : > { %v7416_v44 = vpop.f32.mrb[13].mxu1  ;;  %v5863_v17 = vpop.eup %5862  ;;  %10534 = vst [vmem:[#allocation28_spill] sm:$0xff] %v7419_v39  ;;  %v2908_v13 = vadd.f32 1.0, %v5861_v42  ;;  %v7438_v42 = vmul.f32 %v2902_v26, %v7358_v22  ;;  %v2414_v8 = vmul.f32 0.70710677, %v1601_v18 }
 0x29f   : > { %v7423_v4 = vpop.f32.mrb[14].mxu0  ;;  %v7425_v58 = vpop.f32.mrb[14].mxu1  ;;  %v2910_v55 = vadd.f32 1.0, %v5863_v17  ;;  %v7441_v17 = vmul.f32 %v2907_v52, %v7360_v3  ;;  %v7448_v11 = vmul.f32 %v2909_v12, %v7363_v6  ;;  %v2419_v20 = vmul.f32 0.70710677, %v1410_v38 }
 0x2a0   : > { %v7428_v50 = vpop.f32.mrb[15].mxu0  ;;  %v7430_v41 = vpop.f32.mrb[15].mxu1  ;;  %10535 = vst [vmem:[#allocation29_spill] sm:$0xff] %v7438_v42  ;;  %1820 = vmatmul.mubr.bf16.gmra.mrb[84].mxu0 %v7167_v46  ;;  %2013 = vmatmul.mubr.bf16.gmra.mrb[84].mxu1 %v7167_v46  ;;  %v7453_v22 = vmul.f32 %v2908_v13, %v7365_v31  ;;  %v2421_v26 = vmul.f32 0.70710677, %v1603_v27  ;;  %v7458_v52 = vmul.f32 0.5, %v1601_v18  ;;  %5878 = verf.f32 %v2414_v8 }
 0x2a1   : > { %v5865_v49 = vpop.eup %5864  ;;  %10536 = vst [vmem:[#allocation30_spill] sm:$0xff] %v7441_v17  ;;  %10537 = vst [vmem:[#allocation31_spill] sm:$0xff] %v7448_v11  ;;  %1829 = vmatprep.mubr.bf16.mxu0 %v10538_v56  ;;  %2022 = vmatprep.mubr.bf16.mxu1 %v10538_v56  ;;  %v7456_v3 = vmul.f32 %v2910_v55, %v7367_v24  ;;  %v1412_v6 = vadd.f32 %v7375_v60, %v7311_v35  ;;  %v7468_v13 = vmul.f32 0.5, %v1410_v38 }
 0x2a2   : > { %v5867_v25 = vpop.eup %5866  ;;  %v2915_v61 = vadd.f32 1.0, %v5865_v49  ;;  %10539 = vst [vmem:[#allocation32_spill] sm:$0xff] %v7453_v22  ;;  %v1605_v49 = vadd.f32 %v7377_v32, %v7313_v36  ;;  %5880 = verf.f32 %v2419_v20  ;;  %v1416_v24 = vadd.f32 %v1415_v43, %v7307_v30 }
 0x2a3   : > { %v5869_v62 = vpop.eup %5868  ;;  %10540 = vst [vmem:[#allocation33_spill] sm:$0xff] %v7456_v3  ;;  %v2917_v51 = vadd.f32 1.0, %v5867_v25  ;;  %v7464_v12 = vpop.f32.mrb[16].mxu0  ;;  %v7478_v60 = vmul.f32 0.5, %v1603_v27  ;;  %5882 = verf.f32 %v2421_v26  ;;  %v2420_v32 = vmul.f32 0.70710677, %v1412_v6 }
 0x2a4   : > { %v5871_v46 = vpop.eup %5870  ;;  %v7466_v28 = vpop.f32.mrb[16].mxu1  ;;  %v2916_v31 = vadd.f32 1.0, %v5869_v62  ;;  %v7476_v25 = vmul.f32 %v2915_v61, %v7369_v9  ;;  %v2422_v62 = vmul.f32 0.70710677, %v1605_v49  ;;  %v2427_v54 = vmul.f32 0.70710677, %v1416_v24 }
 0x2a5   : > { %v7471_v55 = vpop.f32.mrb[17].mxu0  ;;  %v7473_v18 = vpop.f32.mrb[17].mxu1  ;;  %v7485_v20 = vmul.f32 %v2917_v51, %v7373_v29  ;;  %v2918_v43 = vadd.f32 1.0, %v5871_v46  ;;  %5884 = verf.f32 %v2420_v32  ;;  %v1609_v9 = vadd.f32 %v7410_v59, %v7309_v34 }
 0x2a6   : > { %10541 = vst [vmem:[#allocation34_spill] sm:$0xff] %v7476_v25  ;;  %v7480_v8 = vpop.f32.mrb[18].mxu0  ;;  %v7482_v11 = vpop.f32.mrb[18].mxu1  ;;  %v1418_v27 = vadd.f32 %v7414_v63, %v7311_v35  ;;  %v7496_v26 = vmul.f32 %v2916_v31, %v7382_v0  ;;  %5886 = verf.f32 %v2422_v62  ;;  %v1611_v29 = vadd.f32 %v7416_v44, %v7313_v36 }
 0x2a7   : > { %v5873_v38 = vpop.eup %5872  ;;  %10542 = vst [vmem:[#allocation35_spill] sm:$0xff] %v7485_v20  ;;  %v7487_v16 = vpop.f32.mrb[19].mxu0  ;;  %v1420_v51 = vadd.f32 %v7423_v4, %v7307_v30  ;;  %v7504_v46 = vmul.f32 0.5, %v1412_v6  ;;  %5888 = verf.f32 %v2427_v54  ;;  %v2429_v63 = vmul.f32 0.70710677, %v1609_v9 }
 0x2a8   : > { %v2923_v17 = vadd.f32 1.0, %v5873_v38  ;;  %v7493_v61 = vpop.f32.mrb[19].mxu1  ;;  %10543 = vst [vmem:[#allocation36_spill] sm:$0xff] %v7496_v26  ;;  %1830 = vmatmul.mubr.bf16.gmra.mrb[88].mxu0 %v7180_v23  ;;  %2023 = vmatmul.mubr.bf16.gmra.mrb[88].mxu1 %v7180_v23  ;;  %v5875_v59 = vpop.eup %5874  ;;  %v1613_v0 = vadd.f32 %v7425_v58, %v7309_v34  ;;  %v7511_v31 = vmul.f32 %v2918_v43, %v7408_v19  ;;  %v7513_v4 = vmul.f32 0.5, %v1605_v49 }
 0x2a9   : > { %1839 = vmatprep.mubr.bf16.mxu0 %v10538_v56  ;;  %2032 = vmatprep.mubr.bf16.mxu1 %v10538_v56  ;;  %v5877_v44 = vpop.eup %5876  ;;  %v7515_v32 = vmul.f32 0.5, %v1416_v24  ;;  %v2428_v23 = vmul.f32 0.70710677, %v1418_v27  ;;  %v7520_v54 = vmul.f32 0.5, %v1609_v9  ;;  %5890 = verf.f32 %v2429_v63 }
 0x2aa   : > { %10544 = vst [vmem:[#allocation37_spill] sm:$0xff] %v7511_v31  ;;  %v7518_v6 = vmul.f32 %v2923_v17, %v7421_v14  ;;  %v2430_v58 = vmul.f32 0.70710677, %v1611_v29  ;;  %v2925_v20 = vadd.f32 1.0, %v5875_v59  ;;  %v7526_v25 = vmul.f32 0.5, %v1418_v27  ;;  %v5879_v43 = vpop.eup %5878 }
 0x2ab   : > { %v7522_v38 = vpop.f32.mrb[20].mxu0  ;;  %v7524_v62 = vpop.f32.mrb[20].mxu1  ;;  %5892 = verf.f32 %v2428_v23  ;;  %v2435_v19 = vmul.f32 0.70710677, %v1420_v51  ;;  %v2924_v14 = vadd.f32 1.0, %v5877_v44  ;;  %v1422_v9 = vadd.f32 %v7428_v50, %v7311_v35 }
 0x2ac   : > { %10545 = vst [vmem:[#allocation38_spill] sm:$0xff] %v7518_v6  ;;  %v7528_v49 = vpop.f32.mrb[21].mxu0  ;;  %v7530_v24 = vpop.f32.mrb[21].mxu1  ;;  %5894 = verf.f32 %v2430_v58  ;;  %v2437_v17 = vmul.f32 0.70710677, %v1613_v0  ;;  %v7538_v27 = vmul.f32 0.5, %v1611_v29  ;;  %v1615_v23 = vadd.f32 %v7430_v41, %v7313_v36 }
 0x2ad   : > { %v7534_v63 = vpop.f32.mrb[22].mxu0  ;;  %v7536_v6 = vpop.f32.mrb[22].mxu1  ;;  %5896 = verf.f32 %v2435_v19  ;;  %v1426_v31 = vadd.f32 %v7464_v12, %v7307_v30  ;;  %v2926_v50 = vadd.f32 1.0, %v5879_v43  ;;  %v7548_v26 = vmul.f32 0.5, %v1420_v51 }
 0x2ae   : > { %v5881_v59 = vpop.eup %5880  ;;  %v7544_v44 = vpop.f32.mrb[23].mxu0  ;;  %5898 = verf.f32 %v2437_v17  ;;  %v2436_v22 = vmul.f32 0.70710677, %v1422_v9  ;;  %v7551_v29 = vmul.f32 %v2925_v20, %v7432_v10  ;;  %v7553_v2 = vmul.f32 0.5, %v1613_v0 }
 0x2af   : > { %v7546_v58 = vpop.f32.mrb[23].mxu1  ;;  %v5883_v3 = vpop.eup %5882  ;;  %v2931_v19 = vadd.f32 1.0, %v5881_v59  ;;  %v2438_v41 = vmul.f32 0.70710677, %v1615_v23  ;;  %v7558_v40 = vmul.f32 %v2924_v14, %v7443_v45  ;;  %v2443_v51 = vmul.f32 0.70710677, %v1426_v31 }
 0x2b0   : > { %10546 = vst [vmem:[#allocation39_spill] sm:$0xff] %v7551_v29  ;;  %1840 = vmatmul.mubr.bf16.gmra.mrb[92].mxu0 %v7192_v48  ;;  %2033 = vmatmul.mubr.bf16.gmra.mrb[92].mxu1 %v7192_v48  ;;  %v5885_v12 = vpop.eup %5884  ;;  %v2933_v43 = vadd.f32 1.0, %v5883_v3  ;;  %5900 = verf.f32 %v2436_v22  ;;  %v7562_v0 = vmul.f32 0.5, %v1422_v9  ;;  %v1619_v17 = vadd.f32 %v7466_v28, %v7309_v34 }
 0x2b1   : > { %10547 = vst [vmem:[#allocation40_spill] sm:$0xff] %v7558_v40  ;;  %1849 = vmatprep.mubr.bf16.mxu0 %v10538_v56  ;;  %2042 = vmatprep.mubr.bf16.mxu1 %v10538_v56  ;;  %v5887_v10 = vpop.eup %5886  ;;  %v2932_v20 = vadd.f32 1.0, %v5885_v12  ;;  %5902 = verf.f32 %v2438_v41  ;;  %v7567_v59 = vmul.f32 %v2926_v50, %v7458_v52  ;;  %v1428_v45 = vadd.f32 %v7471_v55, %v7311_v35 }
 0x2b2   : > { %v5889_v48 = vpop.eup %5888  ;;  %5904 = verf.f32 %v2443_v51  ;;  %v1621_v22 = vadd.f32 %v7473_v18, %v7313_v36  ;;  %v7578_v9 = vmul.f32 %v2931_v19, %v7468_v13  ;;  %v2934_v41 = vadd.f32 1.0, %v5887_v10 }
 0x2b3   : > { %10548 = vst [vmem:[#allocation41_spill] sm:$0xff] %v7567_v59  ;;  %v7573_v3 = vpop.f32.mrb[24].mxu0  ;;  %v7575_v14 = vpop.f32.mrb[24].mxu1  ;;  %v7580_v28 = vmul.f32 0.5, %v1615_v23  ;;  %v2445_v12 = vmul.f32 0.70710677, %v1619_v17  ;;  %v7587_v55 = vmul.f32 %v2933_v43, %v7478_v60  ;;  %v7590_v18 = vmul.f32 %v2932_v20, %v7504_v46 }
 0x2b4   : > { %10549 = vst [vmem:[#allocation42_spill] sm:$0xff] %v7578_v9  ;;  %v7582_v52 = vpop.f32.mrb[25].mxu0  ;;  %v7584_v50 = vpop.f32.mrb[25].mxu1  ;;  %v7592_v29 = vmul.f32 0.5, %v1426_v31  ;;  %v2444_v59 = vmul.f32 0.70710677, %v1428_v45  ;;  %v1430_v46 = vadd.f32 %v7480_v8, %v7307_v30  ;;  %v1623_v31 = vadd.f32 %v7482_v11, %v7309_v34 }
 0x2b5   : > { %v5891_v51 = vpop.eup %5890  ;;  %10550 = vst [vmem:[#allocation43_spill] sm:$0xff] %v7587_v55  ;;  %10551 = vst [vmem:[#allocation44_spill] sm:$0xff] %v7590_v18  ;;  %v7594_v13 = vpop.f32.mrb[26].mxu0  ;;  %v2939_v10 = vadd.f32 1.0, %v5889_v48  ;;  %5906 = verf.f32 %v2445_v12  ;;  %v2446_v40 = vmul.f32 0.70710677, %v1621_v22  ;;  %v7607_v55 = vmul.f32 %v2934_v41, %v7513_v4 }
 0x2b6   : > { %v7596_v19 = vpop.f32.mrb[26].mxu1  ;;  %v5893_v23 = vpop.eup %5892  ;;  %v2941_v9 = vadd.f32 1.0, %v5891_v51  ;;  %5908 = verf.f32 %v2444_v59  ;;  %v7609_v48 = vmul.f32 0.5, %v1619_v17  ;;  %v1432_v12 = vadd.f32 %v7487_v16, %v7311_v35 }
 0x2b7   : > { %v7598_v42 = vpop.f32.mrb[27].mxu0  ;;  %v7600_v47 = vpop.f32.mrb[27].mxu1  ;;  %v2940_v43 = vadd.f32 1.0, %v5893_v23  ;;  %10552 = vst [vmem:[#allocation45_spill] sm:$0xff] %v7607_v55  ;;  %5910 = verf.f32 %v2446_v40  ;;  %v7615_v8 = vmul.f32 0.5, %v1428_v45  ;;  %v7617_v23 = vmul.f32 0.5, %v1621_v22 }
 0x2b8   : > { %v5895_v60 = vpop.eup %5894  ;;  %1850 = vmatmul.mubr.bf16.gmra.mrb[96].mxu0 %v7204_v37  ;;  %2043 = vmatmul.mubr.bf16.gmra.mrb[96].mxu1 %v7204_v37  ;;  %v2451_v11 = vmul.f32 0.70710677, %v1430_v46  ;;  %v7622_v40 = vmul.f32 %v2939_v10, %v7515_v32  ;;  %v7625_v16 = vmul.f32 %v2941_v9, %v7520_v54  ;;  %v2453_v17 = vmul.f32 0.70710677, %v1623_v31 }
 0x2b9   : > { %v5897_v20 = vpop.eup %5896  ;;  %v2942_v51 = vadd.f32 1.0, %v5895_v60  ;;  %1859 = vmatprep.mubr.bf16.mxu0 %v10538_v56  ;;  %2052 = vmatprep.mubr.bf16.mxu1 %v10538_v56  ;;  %v7628_v41 = vmul.f32 %v2940_v43, %v7526_v25  ;;  %v2452_v22 = vmul.f32 0.70710677, %v1432_v12  ;;  %v7634_v32 = vmul.f32 0.5, %v1430_v46 }
 0x2ba   : > { %v5899_v59 = vpop.eup %5898  ;;  %10553 = vst [vmem:[#allocation46_spill] sm:$0xff] %v7622_v40  ;;  %10554 = vst [vmem:[#allocation47_spill] sm:$0xff] %v7625_v16  ;;  %v2947_v4 = vadd.f32 1.0, %v5897_v20  ;;  %5912 = verf.f32 %v2451_v11  ;;  %v1625_v54 = vadd.f32 %v7493_v61, %v7313_v36  ;;  %v1436_v20 = vadd.f32 %v7522_v38, %v7307_v30 }
 0x2bb   : > { %v5901_v37 = vpop.eup %5900  ;;  %10555 = vst [vmem:[#allocation48_spill] sm:$0xff] %v7628_v41  ;;  %v2949_v45 = vadd.f32 1.0, %v5899_v59  ;;  %v7630_v60 = vpop.f32.mrb[28].mxu0  ;;  %5914 = verf.f32 %v2453_v17  ;;  %v7643_v43 = vmul.f32 %v2942_v51, %v7538_v27  ;;  %v1629_v46 = vadd.f32 %v7524_v62, %v7309_v34 }
 0x2bc   : > { %v7632_v55 = vpop.f32.mrb[28].mxu1  ;;  %v5903_v18 = vpop.eup %5902  ;;  %v2948_v39 = vadd.f32 1.0, %v5901_v37  ;;  %5916 = verf.f32 %v2452_v22  ;;  %v7654_v61 = vmul.f32 %v2947_v4, %v7548_v26  ;;  %v7656_v17 = vmul.f32 0.5, %v1623_v31 }
 0x2bd   : > { %v7638_v9 = vpop.f32.mrb[29].mxu0  ;;  %v7640_v10 = vpop.f32.mrb[29].mxu1  ;;  %10556 = vst [vmem:[#allocation49_spill] sm:$0xff] %v7643_v43  ;;  %v7658_v37 = vmul.f32 0.5, %v1432_v12  ;;  %v2454_v27 = vmul.f32 0.70710677, %v1625_v54  ;;  %v7665_v38 = vmul.f32 %v2949_v45, %v7553_v2  ;;  %v1438_v12 = vadd.f32 %v7528_v49, %v7311_v35 }
 0x2be   : > { %v5905_v25 = vpop.eup %5904  ;;  %v7649_v59 = vpop.f32.mrb[30].mxu0  ;;  %10557 = vst [vmem:[#allocation50_spill] sm:$0xff] %v7654_v61  ;;  %v7668_v62 = vmul.f32 %v2948_v39, %v7562_v0  ;;  %v2950_v16 = vadd.f32 1.0, %v5903_v18  ;;  %v2459_v40 = vmul.f32 0.70710677, %v1436_v20  ;;  %v7674_v61 = vmul.f32 0.5, %v1625_v54 }
 0x2bf   : > { %v7651_v11 = vpop.f32.mrb[30].mxu1  ;;  %v7660_v51 = vpop.f32.mrb[31].mxu0  ;;  %10558 = vst [vmem:[#allocation51_spill] sm:$0xff] %v7665_v38  ;;  %v2955_v26 = vadd.f32 1.0, %v5905_v25  ;;  %5918 = verf.f32 %v2454_v27  ;;  %v2461_v31 = vmul.f32 0.70710677, %v1629_v46  ;;  %v1631_v2 = vadd.f32 %v7530_v24, %v7313_v36 }
 0x2c0   : > { %v7662_v22 = vpop.f32.mrb[31].mxu1  ;;  %10559 = vst [vmem:[#allocation52_spill] sm:$0xff] %v7668_v62  ;;  %v5907_v43 = vpop.eup %5906  ;;  %1860 = vmatmul.mubr.bf16.gmra.mrb[100].mxu0 %v7214_v1  ;;  %2053 = vmatmul.mubr.bf16.gmra.mrb[100].mxu1 %v7214_v1  ;;  %5920 = verf.f32 %v2459_v40  ;;  %v1440_v39 = vadd.f32 %v7534_v63, %v7307_v30  ;;  %v7682_v18 = vmul.f32 0.5, %v1436_v20  ;;  %v2460_v1 = vmul.f32 0.70710677, %v1438_v12 }
 0x2c1   : > { %v5909_v4 = vpop.eup %5908  ;;  %1869 = vmatprep.mubr.bf16.mxu0 %v10538_v56  ;;  %2062 = vmatprep.mubr.bf16.mxu1 %v10538_v56  ;;  %v2957_v49 = vadd.f32 1.0, %v5907_v43  ;;  %5922 = verf.f32 %v2461_v31  ;;  %v7685_v45 = vmul.f32 %v2950_v16, %v7580_v28  ;;  %v7687_v54 = vmul.f32 0.5, %v1629_v46 }
 0x2c2   : > { %v5911_v0 = vpop.eup %5910  ;;  %v2956_v40 = vadd.f32 1.0, %v5909_v4  ;;  %v2462_v24 = vmul.f32 0.70710677, %v1631_v2  ;;  %v7694_v27 = vmul.f32 %v2955_v26, %v7592_v29  ;;  %5924 = verf.f32 %v2460_v1 }
 0x2c3   : > { %10560 = vst [vmem:[#allocation53_spill] sm:$0xff] %v7685_v45  ;;  %v7689_v25 = vpop.f32.mrb[32].mxu0  ;;  %v7691_v63 = vpop.f32.mrb[32].mxu1  ;;  %v2958_v38 = vadd.f32 1.0, %v5911_v0  ;;  %v2467_v43 = vmul.f32 0.70710677, %v1440_v39  ;;  %v1633_v46 = vadd.f32 %v7536_v6, %v7309_v34  ;;  %v1442_v4 = vadd.f32 %v7544_v44, %v7311_v35 }
 0x2c4   : > { %10561 = vst [vmem:[#allocation54_spill] sm:$0xff] %v7694_v27  ;;  %v7696_v20 = vpop.f32.mrb[33].mxu0  ;;  %v7698_v31 = vpop.f32.mrb[33].mxu1  ;;  %v7700_v16 = vmul.f32 0.5, %v1438_v12  ;;  %5926 = verf.f32 %v2462_v24  ;;  %v7711_v0 = vmul.f32 %v2957_v49, %v7609_v48  ;;  %v1635_v12 = vadd.f32 %v7546_v58, %v7313_v36 }
 0x2c5   : > { %v5913_v28 = vpop.eup %5912  ;;  %v7706_v45 = vpop.f32.mrb[34].mxu0  ;;  %5928 = verf.f32 %v2467_v43  ;;  %v1446_v1 = vadd.f32 %v7573_v3, %v7307_v30  ;;  %v7722_v27 = vmul.f32 %v2956_v40, %v7615_v8  ;;  %v7724_v41 = vmul.f32 0.5, %v1631_v2 }
 0x2c6   : > { %v7708_v29 = vpop.f32.mrb[34].mxu1  ;;  %v5915_v26 = vpop.eup %5914  ;;  %10562 = vst [vmem:[#allocation55_spill] sm:$0xff] %v7711_v0  ;;  %v2963_v62 = vadd.f32 1.0, %v5913_v28  ;;  %v2469_v48 = vmul.f32 0.70710677, %v1633_v46  ;;  %v7727_v49 = vmul.f32 %v2958_v38, %v7617_v23  ;;  %v7729_v58 = vmul.f32 0.5, %v1440_v39 }
 0x2c7   : > { %v7717_v24 = vpop.f32.mrb[35].mxu0  ;;  %v7719_v6 = vpop.f32.mrb[35].mxu1  ;;  %10563 = vst [vmem:[#allocation56_spill] sm:$0xff] %v7722_v27  ;;  %v2965_v43 = vadd.f32 1.0, %v5915_v26  ;;  %v2468_v0 = vmul.f32 0.70710677, %v1442_v4  ;;  %v1639_v39 = vadd.f32 %v7575_v14, %v7309_v34 }
 0x2c8   : > { %v5917_v44 = vpop.eup %5916  ;;  %10564 = vst [vmem:[#allocation57_spill] sm:$0xff] %v7727_v49  ;;  %1870 = vmatmul.mubr.bf16.gmra.mrb[104].mxu0 %v7227_v53  ;;  %2063 = vmatmul.mubr.bf16.gmra.mrb[104].mxu1 %v7227_v53  ;;  %v7733_v3 = vmul.f32 0.5, %v1633_v46  ;;  %5930 = verf.f32 %v2469_v48  ;;  %v7735_v8 = vmul.f32 0.5, %v1442_v4  ;;  %v2470_v40 = vmul.f32 0.70710677, %v1635_v12 }
 0x2c9   : > { %1879 = vmatprep.mubr.bf16.mxu0 %v10538_v56  ;;  %2072 = vmatprep.mubr.bf16.mxu1 %v10538_v56  ;;  %v5919_v23 = vpop.eup %5918  ;;  %v2964_v38 = vadd.f32 1.0, %v5917_v44  ;;  %5932 = verf.f32 %v2468_v0  ;;  %v2475_v2 = vmul.f32 0.70710677, %v1446_v1  ;;  %v7742_v53 = vmul.f32 %v2963_v62, %v7634_v32 }
 0x2ca   : > { %v5921_v28 = vpop.eup %5920  ;;  %5934 = verf.f32 %v2470_v40  ;;  %v1448_v46 = vadd.f32 %v7582_v52, %v7311_v35  ;;  %v1641_v4 = vadd.f32 %v7584_v50, %v7313_v36  ;;  %v2966_v44 = vadd.f32 1.0, %v5919_v23 }
 0x2cb   : > { %10565 = vst [vmem:[#allocation58_spill] sm:$0xff] %v7742_v53  ;;  %v7748_v26 = vpop.f32.mrb[36].mxu0  ;;  %v7750_v48 = vpop.f32.mrb[36].mxu1  ;;  %v7752_v49 = vmul.f32 0.5, %v1635_v12  ;;  %5936 = verf.f32 %v2475_v2  ;;  %v2477_v14 = vmul.f32 0.70710677, %v1639_v39  ;;  %v7759_v62 = vmul.f32 %v2965_v43, %v7656_v17 }
 0x2cc   : > { %v5923_v0 = vpop.eup %5922  ;;  %v7754_v27 = vpop.f32.mrb[37].mxu0  ;;  %v2971_v52 = vadd.f32 1.0, %v5921_v28  ;;  %v7761_v40 = vmul.f32 0.5, %v1446_v1  ;;  %v2476_v50 = vmul.f32 0.70710677, %v1448_v46  ;;  %v7768_v12 = vmul.f32 %v2964_v38, %v7658_v37 }
 0x2cd   : > { %10566 = vst [vmem:[#allocation59_spill] sm:$0xff] %v7754_v27  ;;  %v7756_v32 = vpop.f32.mrb[37].mxu1  ;;  %10568 = vst [vmem:[#allocation61_spill] sm:$0xff] %v7759_v62  ;;  %v7763_v53 = vpop.f32.mrb[38].mxu0  ;;  %v2973_v2 = vadd.f32 1.0, %v5923_v0  ;;  %5938 = verf.f32 %v2477_v14  ;;  %v7774_v1 = vmul.f32 0.5, %v1639_v39  ;;  %v1450_v28 = vadd.f32 %v7594_v13, %v7307_v30 }
 0x2ce   : > { %10567 = vst [vmem:[#allocation60_spill] sm:$0xff] %v7756_v32  ;;  %v7765_v57 = vpop.f32.mrb[38].mxu1  ;;  %v5925_v23 = vpop.eup %5924  ;;  %v2478_v33 = vmul.f32 0.70710677, %v1641_v4  ;;  %5940 = verf.f32 %v2476_v50  ;;  %v1643_v37 = vadd.f32 %v7596_v19, %v7309_v34  ;;  %v1452_v38 = vadd.f32 %v7598_v42, %v7311_v35 }
 0x2cf   : > { %10569 = vst [vmem:[#allocation62_spill] sm:$0xff] %v7765_v57  ;;  %v7770_v27 = vpop.f32.mrb[39].mxu0  ;;  %v7772_v32 = vpop.f32.mrb[39].mxu1  ;;  %v2972_v43 = vadd.f32 1.0, %v5925_v23  ;;  %v7779_v57 = vmul.f32 %v2966_v44, %v7674_v61  ;;  %v7788_v39 = vmul.f32 %v2971_v52, %v7682_v18  ;;  %v7790_v13 = vmul.f32 0.5, %v1448_v46 }
 0x2d0   : > { %v5927_v17 = vpop.eup %5926  ;;  %5942 = verf.f32 %v2478_v33  ;;  %1880 = vmatmul.mubr.bf16.gmra.mrb[108].mxu0 %v7239_v7  ;;  %2073 = vmatmul.mubr.bf16.gmra.mrb[108].mxu1 %v7239_v7  ;;  %v2483_v14 = vmul.f32 0.70710677, %v1450_v28  ;;  %v7795_v33 = vmul.f32 %v2973_v2, %v7687_v54  ;;  %v7800_v19 = vmul.f32 0.5, %v1641_v4 }
 0x2d1   : > { %v5929_v62 = vpop.eup %5928  ;;  %v2974_v0 = vadd.f32 1.0, %v5927_v17  ;;  %1889 = vmatprep.mubr.bf16.mxu0 %v10538_v56  ;;  %2082 = vmatprep.mubr.bf16.mxu1 %v10538_v56  ;;  %v7798_v42 = vmul.f32 %v2972_v43, %v7700_v16  ;;  %v2485_v7 = vmul.f32 0.70710677, %v1643_v37  ;;  %v2484_v44 = vmul.f32 0.70710677, %v1452_v38 }
 0x2d2   : > { %10570 = vst [vmem:[#allocation63_spill] sm:$0xff] %v7795_v33  ;;  %v5931_v61 = vpop.eup %5930  ;;  %v2979_v18 = vadd.f32 1.0, %v5929_v62  ;;  %5944 = verf.f32 %v2483_v14  ;;  %v1645_v46 = vadd.f32 %v7600_v47, %v7313_v36  ;;  %v7804_v50 = vmul.f32 0.5, %v1450_v28 }
 0x2d3   : > { %v5933_v52 = vpop.eup %5932  ;;  %5946 = verf.f32 %v2485_v7  ;;  %v1456_v54 = vadd.f32 %v7630_v60, %v7307_v30  ;;  %v1649_v16 = vadd.f32 %v7632_v55, %v7309_v34  ;;  %v7811_v23 = vmul.f32 %v2974_v0, %v7724_v41 }
 0x2d4   : > { %v5935_v4 = vpop.eup %5934  ;;  %v2981_v62 = vadd.f32 1.0, %v5931_v61  ;;  %5948 = verf.f32 %v2484_v44  ;;  %v2486_v2 = vmul.f32 0.70710677, %v1645_v46  ;;  %v2980_v43 = vadd.f32 1.0, %v5933_v52 }
 0x2d5   : > { %v5937_v17 = vpop.eup %5936  ;;  %v7813_v47 = vmul.f32 0.5, %v1643_v37  ;;  %v7815_v28 = vmul.f32 0.5, %v1452_v38  ;;  %v2491_v14 = vmul.f32 0.70710677, %v1456_v54  ;;  %v7818_v7 = vmul.f32 %v2979_v18, %v7729_v58 }
 0x2d6   : > { %v2982_v60 = vadd.f32 1.0, %v5935_v4  ;;  %v7820_v33 = vmul.f32 0.5, %v1645_v46  ;;  %5950 = verf.f32 %v2486_v2  ;;  %v2987_v41 = vadd.f32 1.0, %v5937_v17 }
 0x2d7   : > { %v5939_v55 = vpop.eup %5938  ;;  %5952 = verf.f32 %v2491_v14  ;;  %v2493_v0 = vmul.f32 0.70710677, %v1649_v16  ;;  %v1458_v61 = vadd.f32 %v7638_v9, %v7311_v35  ;;  %v7827_v38 = vmul.f32 %v2981_v62, %v7733_v3 }
 0x2d8   : > { %1890 = vmatmul.mubr.bf16.gmra.mrb[112].mxu0 %v7251_v15  ;;  %2083 = vmatmul.mubr.bf16.gmra.mrb[112].mxu1 %v7251_v15  ;;  %v5941_v37 = vpop.eup %5940  ;;  %v7829_v58 = vmul.f32 0.5, %v1456_v54  ;;  %v1651_v18 = vadd.f32 %v7640_v10, %v7313_v36  ;;  %v1460_v44 = vadd.f32 %v7649_v59, %v7307_v30  ;;  %v7838_v46 = vmul.f32 %v2980_v43, %v7735_v8 }
 0x2d9   : > { %1899 = vmatprep.mubr.bf16.mxu0 %v10538_v56  ;;  %2092 = vmatprep.mubr.bf16.mxu1 %v10538_v56  ;;  %v2989_v15 = vadd.f32 1.0, %v5939_v55  ;;  %5954 = verf.f32 %v2493_v0  ;;  %v2492_v3 = vmul.f32 0.70710677, %v1458_v61  ;;  %v7841_v52 = vmul.f32 %v2982_v60, %v7752_v49 }
 0x2da   : > { %v5943_v9 = vpop.eup %5942  ;;  %v2988_v54 = vadd.f32 1.0, %v5941_v37  ;;  %v7843_v4 = vmul.f32 0.5, %v1649_v16  ;;  %v2494_v10 = vmul.f32 0.70710677, %v1651_v18  ;;  %v7846_v59 = vmul.f32 %v2987_v41, %v7761_v40 }
 0x2db   : > { %v2990_v62 = vadd.f32 1.0, %v5943_v9  ;;  %5956 = verf.f32 %v2492_v3  ;;  %v2499_v2 = vmul.f32 0.70710677, %v1460_v44  ;;  %v7848_v14 = vmul.f32 0.5, %v1458_v61 }
 0x2dc   : > { %v5945_v17 = vpop.eup %5944  ;;  %5958 = verf.f32 %v2494_v10  ;;  %v1653_v8 = vadd.f32 %v7651_v11, %v7309_v34  ;;  %v1462_v49 = vadd.f32 %v7660_v51, %v7311_v35  ;;  %v7855_v16 = vmul.f32 %v2989_v15, %v7774_v1 }
 0x2dd   : > { %v5947_v43 = vpop.eup %5946  ;;  %5960 = verf.f32 %v2499_v2  ;;  %v1655_v40 = vadd.f32 %v7662_v22, %v7313_v36  ;;  %v1466_v60 = vadd.f32 %v7689_v25, %v7307_v30  ;;  %v7862_v41 = vmul.f32 %v2988_v54, %v7790_v13 }
 0x2de   : > { %v5949_v55 = vpop.eup %5948  ;;  %v7864_v0 = vmul.f32 0.5, %v1651_v18  ;;  %v7866_v11 = vmul.f32 0.5, %v1460_v44  ;;  %v2501_v51 = vmul.f32 0.70710677, %v1653_v8  ;;  %v7869_v61 = vmul.f32 %v2990_v62, %v7800_v19 }
 0x2df   : > { %v2995_v1 = vadd.f32 1.0, %v5945_v17  ;;  %v2997_v37 = vadd.f32 1.0, %v5947_v43  ;;  %v2500_v9 = vmul.f32 0.70710677, %v1462_v49  ;;  %v7873_v25 = vmul.f32 0.5, %v1653_v8 }
 0x2e0   : > { %1900 = vmatmul.mubr.bf16.gmra.mrb[116].mxu0 %v7263_v21  ;;  %2093 = vmatmul.mubr.bf16.gmra.mrb[116].mxu1 %v7263_v21  ;;  %v5951_v22 = vpop.eup %5950  ;;  %5962 = verf.f32 %v2501_v51  ;;  %v7875_v13 = vmul.f32 0.5, %v1462_v49  ;;  %v2502_v18 = vmul.f32 0.70710677, %v1655_v40  ;;  %v2996_v44 = vadd.f32 1.0, %v5949_v55 }
 0x2e1   : > { %1909 = vmatprep.mubr.bf16.mxu0 %v10538_v56  ;;  %2102 = vmatprep.mubr.bf16.mxu1 %v10538_v56  ;;  %v5953_v19 = vpop.eup %5952  ;;  %v2998_v15 = vadd.f32 1.0, %v5951_v22  ;;  %5964 = verf.f32 %v2500_v9  ;;  %v2507_v3 = vmul.f32 0.70710677, %v1466_v60  ;;  %v1659_v21 = vadd.f32 %v7691_v63, %v7309_v34 }
 0x2e2   : > { %v3003_v54 = vadd.f32 1.0, %v5953_v19  ;;  %5966 = verf.f32 %v2502_v18  ;;  %v1468_v10 = vadd.f32 %v7696_v20, %v7311_v35  ;;  %v7884_v2 = vmul.f32 %v2995_v1, %v7804_v50 }
 0x2e3   : > { %v5955_v62 = vpop.eup %5954  ;;  %5968 = verf.f32 %v2507_v3  ;;  %v1661_v17 = vadd.f32 %v7698_v31, %v7313_v36  ;;  %v1470_v8 = vadd.f32 %v7706_v45, %v7307_v30  ;;  %v7891_v49 = vmul.f32 %v2997_v37, %v7813_v47 }
 0x2e4   : > { %v7893_v43 = vmul.f32 0.5, %v1655_v40  ;;  %v7895_v63 = vmul.f32 0.5, %v1466_v60  ;;  %v2509_v55 = vmul.f32 0.70710677, %v1659_v21  ;;  %v7898_v51 = vmul.f32 %v2996_v44, %v7815_v28 }
 0x2e5   : > { %v5957_v20 = vpop.eup %5956  ;;  %v7901_v50 = vmul.f32 %v2998_v15, %v7820_v33  ;;  %v2508_v1 = vmul.f32 0.70710677, %v1468_v10  ;;  %v2510_v31 = vmul.f32 0.70710677, %v1661_v17  ;;  %v7904_v45 = vmul.f32 %v3003_v54, %v7829_v58 }
 0x2e6   : > { %v5959_v9 = vpop.eup %5958  ;;  %v3005_v47 = vadd.f32 1.0, %v5955_v62  ;;  %v7906_v37 = vmul.f32 0.5, %v1659_v21  ;;  %5970 = verf.f32 %v2509_v55  ;;  %v3004_v60 = vadd.f32 1.0, %v5957_v20 }
 0x2e7   : > { %10571 = vst [vmem:[#allocation64_spill] sm:$0xff] %v7904_v45  ;;  %v5961_v40 = vpop.eup %5960  ;;  %5972 = verf.f32 %v2508_v1  ;;  %v2515_v22 = vmul.f32 0.70710677, %v1470_v8  ;;  %v1663_v28 = vadd.f32 %v7708_v29, %v7309_v34  ;;  %v3006_v33 = vadd.f32 1.0, %v5959_v9 }
 0x2e8   : > { %1910 = vmatmul.mubr.bf16.gmra.mrb[120].mxu0 %v7275_v5  ;;  %2103 = vmatmul.mubr.bf16.gmra.mrb[120].mxu1 %v7275_v5  ;;  %v7912_v18 = vmul.f32 0.5, %v1468_v10  ;;  %5974 = verf.f32 %v2510_v31  ;;  %v1472_v58 = vadd.f32 %v7717_v24, %v7311_v35  ;;  %v3011_v19 = vadd.f32 1.0, %v5961_v40  ;;  %v10573_v40 = vld [vmem:[#allocation59_spill] sm:$0xff] }
 0x2e9   : > { %1919 = vmatprep.mubr.bf16.mxu0 %v10538_v56  ;;  %2112 = vmatprep.mubr.bf16.mxu1 %v10538_v56  ;;  %v7918_v44 = vmul.f32 0.5, %v1661_v17  ;;  %5976 = verf.f32 %v2515_v22  ;;  %v2517_v29 = vmul.f32 0.70710677, %v1663_v28  ;;  %v7921_v3 = vmul.f32 %v3005_v47, %v7843_v4  ;;  %v10574_v22 = vld [vmem:[#allocation16_spill] sm:$0xff] }
 0x2ea   : > { %v5963_v15 = vpop.eup %5962  ;;  %v7923_v5 = vmul.f32 0.5, %v1470_v8  ;;  %v2516_v54 = vmul.f32 0.70710677, %v1472_v58  ;;  %v1665_v21 = vadd.f32 %v7719_v6, %v7313_v36  ;;  %v7928_v10 = vmul.f32 %v3004_v60, %v7848_v14 }
 0x2eb   : > { %10572 = vst [vmem:[#allocation65_spill] sm:$0xff] %v7921_v3  ;;  %v5965_v24 = vpop.eup %5964  ;;  %5978 = verf.f32 %v2517_v29  ;;  %v1476_v56 = vadd.f32 %v7748_v26, %v7307_v30  ;;  %v1669_v62 = vadd.f32 %v7750_v48, %v7309_v34  ;;  %v7935_v4 = vmul.f32 %v3006_v33, %v7864_v0 }
 0x2ec   : > { %v5967_v17 = vpop.eup %5966  ;;  %v3013_v8 = vadd.f32 1.0, %v5963_v15  ;;  %5980 = verf.f32 %v2516_v54  ;;  %v2518_v55 = vmul.f32 0.70710677, %v1665_v21  ;;  %v7938_v6 = vmul.f32 %v3011_v19, %v7866_v11 }
 0x2ed   : > { %v5969_v20 = vpop.eup %5968  ;;  %v3012_v14 = vadd.f32 1.0, %v5965_v24  ;;  %v7940_v1 = vmul.f32 0.5, %v1663_v28  ;;  %v2523_v31 = vmul.f32 0.70710677, %v1476_v56  ;;  %v3014_v9 = vadd.f32 1.0, %v5967_v17  ;;  %v10576_v24 = vld [vmem:[#allocation62_spill] sm:$0xff] }
 0x2ee   : > { %v7942_v26 = vmul.f32 0.5, %v1472_v58  ;;  %v7944_v47 = vmul.f32 0.5, %v1665_v21  ;;  %5982 = verf.f32 %v2518_v55  ;;  %v3019_v48 = vadd.f32 1.0, %v5969_v20  ;;  %v10575_v58 = vld [vmem:[#allocation60_spill] sm:$0xff] }
 0x2ef   : > { %5984 = verf.f32 %v2523_v31  ;;  %v2525_v0 = vmul.f32 0.70710677, %v1669_v62  ;;  %v1478_v60 = vadd.f32 %v10573_v40, %v7311_v35  ;;  %v7951_v28 = vmul.f32 %v3013_v8, %v7873_v25 }
 0x2f0   : > { %1920 = vmatmul.mubr.bf16.gmra.mrb[124].mxu0 %v10574_v22  ;;  %2113 = vmatmul.mubr.bf16.gmra.mrb[124].mxu1 %v10574_v22  ;;  %v5971_v11 = vpop.eup %5970  ;;  %v7953_v33 = vmul.f32 0.5, %v1476_v56  ;;  %v1671_v19 = vadd.f32 %v10575_v58, %v7313_v36  ;;  %v1480_v29 = vadd.f32 %v7763_v53, %v7307_v30  ;;  %v7960_v54 = vmul.f32 %v3012_v14, %v7875_v13  ;;  %v5750_v30 = vld [vmem:[#allocation9 + $0x1c8] sm:$0xff]  }
 0x2f1   : > { %v5973_v15 = vpop.eup %5972  ;;  %5986 = verf.f32 %v2525_v0  ;;  %v2524_v21 = vmul.f32 0.70710677, %v1478_v60  ;;  %v1673_v17 = vadd.f32 %v10576_v24, %v7309_v34  ;;  %v7965_v25 = vmul.f32 %v3014_v9, %v7893_v43 }
 0x2f2   : > { %v5975_v55 = vpop.eup %5974  ;;  %v3021_v56 = vadd.f32 1.0, %v5971_v11  ;;  %v7967_v8 = vmul.f32 0.5, %v1669_v62  ;;  %v2526_v20 = vmul.f32 0.70710677, %v1671_v19  ;;  %v7970_v53 = vmul.f32 %v3019_v48, %v7895_v63 }
 0x2f3   : > { %v5977_v31 = vpop.eup %5976  ;;  %v3020_v40 = vadd.f32 1.0, %v5973_v15  ;;  %5988 = verf.f32 %v2524_v21  ;;  %v2531_v13 = vmul.f32 0.70710677, %v1480_v29  ;;  %v3022_v14 = vadd.f32 1.0, %v5975_v55  ;;  %v5745_v15 = vld [vmem:[#allocation9 + $0x100] sm:$0xff]  }
 0x2f4   : > { %10577 = vst [vmem:[#allocation59_spill] sm:$0xff] %v7970_v53  ;;  %v7972_v0 = vmul.f32 0.5, %v1478_v60  ;;  %v7974_v22 = vmul.f32 0.5, %v1671_v19  ;;  %v7976_v58 = vmul.f32 0.5, %v1480_v29  ;;  %v3027_v9 = vadd.f32 1.0, %v5977_v31  ;;  %v10580_v60 = vld [vmem:[#allocation26_spill] sm:$0xff] }
 0x2f5   : > { %v5979_v43 = vpop.eup %5978  ;;  %5990 = verf.f32 %v2531_v13  ;;  %v2533_v62 = vmul.f32 0.70710677, %v1673_v17  ;;  %v1482_v11 = vadd.f32 %v7770_v27, %v7311_v35  ;;  %v7981_v63 = vmul.f32 %v3021_v56, %v7906_v37  ;;  %v10581_v19 = vld [vmem:[#allocation28_spill] sm:$0xff]  ;;  %v10582_v56 = vld [vmem:[#allocation27_spill] sm:$0xff] }
 0x2f6   : > { %10578 = vst [vmem:[#allocation16_spill] sm:$0xff] %v7974_v22  ;;  %v5981_v24 = vpop.eup %5980  ;;  %5992 = verf.f32 %v2526_v20  ;;  %v7985_v48 = vadd.f32 %v7772_v32, %v7313_v36  ;;  %v3436_v29 = vpack.c.bf16 %v10581_v19, %v10580_v60  ;;  %v7990_v21 = vmul.f32 %v3020_v40, %v7912_v18  ;;  %v10583_v32 = vld [vmem:[#allocation29_spill] sm:$0xff]  ;;  %v5747_v36 = vld [vmem:[#allocation9 + $0x180] sm:$0xff]   ;;  %v10586_v40 = vld [vmem:[#allocation23_spill] sm:$0xff] }
 0x2f7   : > { %10579 = vst [vmem:[#allocation60_spill] sm:$0xff] %v7981_v63  ;;  %v3029_v55 = vadd.f32 1.0, %v5979_v43  ;;  %5994 = verf.f32 %v2533_v62  ;;  %v2532_v31 = vmul.f32 0.70710677, %v1482_v11  ;;  %v3028_v13 = vadd.f32 1.0, %v5981_v24  ;;  %v10587_v43 = vld [vmem:[#allocation22_spill] sm:$0xff] }
 0x2f8   : > { %v5983_v27 = vpop.eup %5982  ;;  %v7992_v35 = vmul.f32 0.5, %v1673_v17  ;;  %v2534_v37 = vmul.f32 0.70710677, %v7985_v48  ;;  %4107 = vmatprep.mubr.bf16.mxu0 %v3436_v29  ;;  %v3438_v20 = vpack.c.bf16 %v10583_v32, %v10582_v56  ;;  %v7998_v60 = vmul.f32 %v3022_v14, %v7918_v44  ;;  %v10589_v17 = vld [vmem:[#allocation32_spill] sm:$0xff]  ;;  %v5748_v29 = vld [vmem:[#allocation9 + $0x148] sm:$0xff]   ;;  %v10593_v32 = vld [vmem:[#allocation30_spill] sm:$0xff] }
 0x2f9   : > { %v5985_v34 = vpop.eup %5984  ;;  %v8001_v18 = vmul.f32 %v3027_v9, %v7923_v5  ;;  %5996 = verf.f32 %v2532_v31  ;;  %v10588_v62 = vpack.c.bf16 %v10586_v40, %v10587_v43  ;;  %v10590_v24 = vld [vmem:[#allocation36_spill] sm:$0xff]  ;;  %v3030_v22 = vadd.f32 1.0, %v5983_v27  ;;  %v10591_v56 = vld [vmem:[#allocation33_spill] sm:$0xff]  ;;  %v10594_v5 = vld [vmem:[#allocation34_spill] sm:$0xff] }
 0x2fa   : > { %10584 = vst [vmem:[#allocation62_spill] sm:$0xff] %v7998_v60  ;;  %v3444_v19 = vpack.c.bf16 %v10590_v24, %v10589_v17  ;;  %5998 = verf.f32 %v2534_v37  ;;  %4268 = vmatprep.mubr.bf16.mxu1 %v3438_v20  ;;  %v10592_v44 = vld [vmem:[#allocation37_spill] sm:$0xff]  ;;  %v3443_v9 = vpack.c.bf16 %v10594_v5, %v10593_v32  ;;  %v8013_v40 = vmul.f32 %v3029_v55, %v7940_v1  ;;  %v10597_v17 = vld [vmem:[#allocation24_spill] sm:$0xff]  ;;  %v10599_v27 = vld [vmem:[#allocation31_spill] sm:$0xff] }
 0x2fb   : > { %10585 = vst [vmem:[#allocation26_spill] sm:$0xff] %v8001_v18  ;;  %4108 = vmatmul.mubr.bf16.vlgmr.msra.gmra.mrb[128].mxu0 %v10588_v62  ;;  %v3446_v14 = vpack.c.bf16 %v10592_v44, %v10591_v56  ;;  %v5749_v31 = vld [vmem:[#allocation9 + $0x108] sm:$0xff]   ;;  %v5987_v63 = vpop.eup %5986  ;;  %v3035_v43 = vadd.f32 1.0, %v5985_v34  ;;  %v10600_v37 = vld [vmem:[#allocation35_spill] sm:$0xff]  ;;  %v10601_v20 = vld [vmem:[#allocation40_spill] sm:$0xff]  ;;  %v8023_v32 = vmul.f32 %v3028_v13, %v7942_v26  ;;  %v8029_v53 = vmul.f32 0.5, %v1482_v11 }
 0x2fc   : > { %5397 = vmatpush3.bf16.msra.mxu0 %v5745_v15  ;;  %10595 = vst [vmem:[#allocation28_spill] sm:$0xff] %v8013_v40  ;;  %v10596_v62 = vld [vmem:[#allocation25_spill] sm:$0xff]  ;;  %4115 = vmatprep.mubr.bf16.mxu0 %v3444_v19  ;;  %v3445_v15 = vpack.c.bf16 %v10600_v37, %v10599_v27  ;;  %v10602_v18 = vld [vmem:[#allocation44_spill] sm:$0xff]  ;;  %v5752_v44 = vld [vmem:[#allocation9 + $0x150] sm:$0xff]   ;;  %v3037_v5 = vadd.f32 1.0, %v5987_v63 }
 0x2fd   : > { %v10598_v24 = vpack.c.bf16 %v10596_v62, %v10597_v17  ;;  %v3452_v56 = vpack.c.bf16 %v10602_v18, %v10601_v20  ;;  %v10603_v1 = vld [vmem:[#allocation41_spill] sm:$0xff]  ;;  %10607 = vst [vmem:[#allocation27_spill] sm:$0xff] %v8029_v53  ;;  %5398 = vmatprep.subr.bf16.mxu0 %v5748_v29  ;;  %v10610_v20 = vld [vmem:[#allocation48_spill] sm:$0xff]  ;;  %v5754_v60 = vld [vmem:[#allocation9 + $0x1d0] sm:$0xff]   ;;  %v8045_v13 = vmul.f32 %v3035_v43, %v7953_v33 }
 0x2fe   : > { %v10604_v34 = vld [vmem:[#allocation45_spill] sm:$0xff]  ;;  %v10611_v26 = vld [vmem:[#allocation52_spill] sm:$0xff]  ;;  %v10615_v11 = vld [vmem:[#allocation50_spill] sm:$0xff]  ;;  %v8054_v17 = vmul.f32 %v3037_v5, %v7967_v8 }
 0x2ff   : > { %4269 = vmatmul.mubr.bf16.vlgmr.msra.gmra.mrb[128].mxu1 %v10598_v24  ;;  %v3454_v55 = vpack.c.bf16 %v10604_v34, %v10603_v1  ;;  %v5751_v19 = vld [vmem:[#allocation9 + $0x188] sm:$0xff]   ;;  %v5989_v24 = vpop.eup %5988  ;;  %v8038_v1 = vmul.f32 %v3030_v22, %v7944_v47  ;;  %v5753_v37 = vld [vmem:[#allocation9 + $0x110] sm:$0xff]   ;;  %v5756_v63 = vld [vmem:[#allocation9 + $0x158] sm:$0xff]  }
 0x300   : > { %4276 = vmatprep.mubr.bf16.mxu1 %v3446_v14  ;;  %5509 = vmatpush3.bf16.msra.mxu1 %v5747_v36  ;;  %v10613_v14 = vld [vmem:[#allocation53_spill] sm:$0xff]  ;;  %v3036_v34 = vadd.f32 1.0, %v5989_v24  ;;  %v5991_v27 = vpop.eup %5990  ;;  %v10620_v22 = vld [vmem:[#allocation54_spill] sm:$0xff]  ;;  %10622 = vst [vmem:[#allocation29_spill] sm:$0xff] %v8054_v17  ;;  %v10623_v29 = vld [vmem:[#allocation55_spill] sm:$0xff]  ;;  %v2278_v24 = vmul.f32 0.5, %v7985_v48 }
 0x301   : > { %5510 = vmatprep.subr.bf16.mxu1 %v5750_v30  ;;  %5399 = vmatpush3.bf16.msra.mxu0 %v5749_v31  ;;  %v10619_v36 = vld [vmem:[#allocation57_spill] sm:$0xff]  ;;  %v10621_v31 = vld [vmem:[#allocation58_spill] sm:$0xff]  ;;  %v5993_v40 = vpop.eup %5992  ;;  %v3043_v53 = vadd.f32 1.0, %v5991_v27  ;;  %v10625_v30 = vld [vmem:[#allocation63_spill] sm:$0xff] }
 0x302   : > { %5400 = vmatprep.subr.bf16.mxu0 %v5752_v44  ;;  %v10624_v33 = vld [vmem:[#allocation61_spill] sm:$0xff]  ;;  %v5755_v62 = vld [vmem:[#allocation9 + $0x190] sm:$0xff]   ;;  %v5995_v18 = vpop.eup %5994  ;;  %v8061_v44 = vmul.f32 %v3036_v34, %v7972_v0  ;;  %v3038_v8 = vadd.f32 1.0, %v5993_v40  ;;  %v10628_v40 = vld [vmem:[#allocation59_spill] sm:$0xff] }
 0x303   : > { %4116 = vmatmul.mubr.bf16.gmra.mrb[132].mxu0 %v3443_v9  ;;  %v8069_v27 = vmul.f32 %v3043_v53, %v7976_v58  ;;  %v3045_v43 = vadd.f32 1.0, %v5995_v18  ;;  %v5757_v9 = vld [vmem:[#allocation9 + $0x118] sm:$0xff]   ;;  %v5997_v34 = vpop.eup %5996  ;;  %v10631_v5 = vld [vmem:[#allocation28_spill] sm:$0xff]  ;;  %v10633_v58 = vld [vmem:[#allocation42_spill] sm:$0xff] }
 0x304   : > { %5511 = vmatpush3.bf16.msra.mxu1 %v5751_v19  ;;  %v5758_v19 = vld [vmem:[#allocation9 + $0x1d8] sm:$0xff]   ;;  %4123 = vmatprep.mubr.bf16.mxu0 %v3452_v56  ;;  %v5760_v56 = vld [vmem:[#allocation9 + $0x160] sm:$0xff]   ;;  %v5999_v18 = vpop.eup %5998  ;;  %v3044_v0 = vadd.f32 1.0, %v5997_v34  ;;  %v10627_v34 = vld [vmem:[#allocation62_spill] sm:$0xff] }
 0x305   : > { %5512 = vmatprep.subr.bf16.mxu1 %v5754_v60  ;;  %5401 = vmatpush3.bf16.msra.mxu0 %v5753_v37  ;;  %v8082_v37 = vmul.f32 %v3045_v43, %v7992_v35  ;;  %v3046_v60 = vadd.f32 1.0, %v5999_v18  ;;  %v10629_v18 = vld [vmem:[#allocation26_spill] sm:$0xff]  ;;  %v5761_v47 = vld [vmem:[#allocation9 + $0x120] sm:$0xff]  }
 0x306   : > { %5402 = vmatprep.subr.bf16.mxu0 %v5756_v63  ;;  %v5759_v63 = vld [vmem:[#allocation9 + $0x198] sm:$0xff]   ;;  %v10632_v45 = vld [vmem:[#allocation16_spill] sm:$0xff]  ;;  %v10634_v35 = vld [vmem:[#allocation38_spill] sm:$0xff] }
 0x307   : > { %4277 = vmatmul.mubr.bf16.gmra.mrb[132].mxu1 %v3445_v15  ;;  %v8104_v53 = vmul.f32 %v3038_v8, %v10632_v45  ;;  %v8106_v3 = vmul.f32 %v3046_v60, %v2278_v24  ;;  %v5763_v15 = vld [vmem:[#allocation9 + $0x1a0] sm:$0xff]   ;;  %v10635_v48 = vpack.c.bf16 %v10633_v58, %v10634_v35  ;;  %v5766_v24 = vld [vmem:[#allocation9 + $0x1e8] sm:$0xff]   ;;  %v10636_v8 = vpack.c.bf16 %v10611_v26, %v10610_v20  ;;  %v5769_v45 = vld [vmem:[#allocation9 + $0x130] sm:$0xff]  }
 0x308   : > { %4284 = vmatprep.mubr.bf16.mxu1 %v3454_v55  ;;  %5513 = vmatpush3.bf16.msra.mxu1 %v5755_v62  ;;  %v5762_v55 = vld [vmem:[#allocation9 + $0x1e0] sm:$0xff]   ;;  %v10626_v62 = vld [vmem:[#allocation27_spill] sm:$0xff]  ;;  %v5765_v60 = vld [vmem:[#allocation9 + $0x128] sm:$0xff]  }
 0x309   : > { %5514 = vmatprep.subr.bf16.mxu1 %v5758_v19  ;;  %v8095_v43 = vmul.f32 %v3044_v0, %v10626_v62  ;;  %5403 = vmatpush3.bf16.msra.mxu0 %v5757_v9  ;;  %v5764_v62 = vld [vmem:[#allocation9 + $0x168] sm:$0xff]   ;;  %v5768_v0 = vld [vmem:[#allocation9 + $0x170] sm:$0xff]  }
 0x30a   : > { %5404 = vmatprep.subr.bf16.mxu0 %v5760_v56  ;;  %v10637_v56 = vld [vmem:[#allocation43_spill] sm:$0xff]  ;;  %v10640_v58 = vld [vmem:[#allocation49_spill] sm:$0xff]  ;;  %v5771_v20 = vld [vmem:[#allocation9 + $0x1b0] sm:$0xff]  }
 0x30b   : > { %4124 = vmatmul.mubr.bf16.gmra.mrb[136].mxu0 %v10635_v48  ;;  %v10641_v48 = vpack.c.bf16 %v10613_v14, %v10640_v58  ;;  %v5767_v35 = vld [vmem:[#allocation9 + $0x1a8] sm:$0xff]   ;;  %v10642_v26 = vld [vmem:[#allocation46_spill] sm:$0xff]  ;;  %v10646_v14 = vld [vmem:[#allocation51_spill] sm:$0xff] }
 0x30c   : > { %5515 = vmatpush3.bf16.msra.mxu1 %v5759_v63  ;;  %4131 = vmatprep.mubr.bf16.mxu0 %v10636_v8  ;;  %v10638_v63 = vld [vmem:[#allocation39_spill] sm:$0xff] }
 0x30d   : > { %5516 = vmatprep.subr.bf16.mxu1 %v5762_v55  ;;  %5405 = vmatpush3.bf16.msra.mxu0 %v5761_v47  ;;  %v10639_v9 = vpack.c.bf16 %v10637_v56, %v10638_v63  ;;  %v5770_v55 = vld [vmem:[#allocation9 + $0x1f0] sm:$0xff]   ;;  %v10643_v47 = vpack.c.bf16 %v10615_v11, %v10642_v26  ;;  %v10651_v11 = vpack.c.bf16 %v7838_v46, %v7798_v42  ;;  %v10654_v58 = vld [vmem:[#allocation19_spill] sm:$0xff]  ;;  %v10657_v46 = vld [vmem:[#allocation21_spill] sm:$0xff] }
 0x30e   : > { %5406 = vmatprep.subr.bf16.mxu0 %v5764_v62  ;;  %v10653_v56 = vld [vmem:[#allocation18_spill] sm:$0xff] }
 0x30f   : > { %4285 = vmatmul.mubr.bf16.gmra.mrb[136].mxu1 %v10639_v9  ;;  %v10644_v9 = vld [vmem:[#allocation56_spill] sm:$0xff] }
 0x310   : > { %4292 = vmatprep.mubr.bf16.mxu1 %v10641_v48  ;;  %5517 = vmatpush3.bf16.msra.mxu1 %v5763_v15  ;;  %v10645_v62 = vpack.c.bf16 %v7768_v12, %v10644_v9  ;;  %v10647_v15 = vld [vmem:[#allocation47_spill] sm:$0xff] }
 0x311   : > { %5518 = vmatprep.subr.bf16.mxu1 %v5766_v24  ;;  %5407 = vmatpush3.bf16.msra.mxu0 %v5765_v60  ;;  %v10648_v8 = vpack.c.bf16 %v10646_v14, %v10647_v15  ;;  %v10649_v24 = vpack.c.bf16 %v7779_v57, %v10619_v36 }
 0x312   : > { %5408 = vmatprep.subr.bf16.mxu0 %v5768_v0  ;;  %v10650_v0 = vpack.c.bf16 %v10621_v31, %v10620_v22  ;;  %v10655_v22 = vpack.c.bf16 %v7841_v52, %v7811_v23  ;;  %v10656_v31 = vld [vmem:[#allocation20_spill] sm:$0xff] }
 0x313   : > { %4132 = vmatmul.mubr.bf16.gmra.mrb[140].mxu0 %v10643_v47 }
 0x314   : > { %5519 = vmatpush3.bf16.msra.mxu1 %v5767_v35  ;;  %4139 = vmatprep.mubr.bf16.mxu0 %v10645_v62 }
 0x315   : > { %5520 = vmatprep.subr.bf16.mxu1 %v5770_v55  ;;  %5409 = vmatpush3.bf16.msra.mxu0 %v5769_v45  ;;  %v10652_v45 = vpack.c.bf16 %v10624_v33, %v10623_v29 }
 0x317   : > { %4293 = vmatmul.mubr.bf16.gmra.mrb[140].mxu1 %v10648_v8 }
 0x318   : > { %4300 = vmatprep.mubr.bf16.mxu1 %v10649_v24  ;;  %5521 = vmatpush3.bf16.msra.mxu1 %v5771_v20  ;;  %v10658_v24 = vpack.c.bf16 %v7818_v7, %v7788_v39  ;;  %v10661_v7 = vpack.c.bf16 %v7827_v38, %v10625_v30  ;;  %v5773_v38 = vld [vmem:[#allocation9 + $0x138] sm:$0xff]  }
 0x319   : > { %v5774_v30 = vld [vmem:[#allocation9 + $0x1f8] sm:$0xff]  }
 0x31a   : > { %5522 = vmatprep.subr.bf16.mxu1 %v5774_v30 }
 0x31b   : > { %4140 = vmatmul.mubr.bf16.gmra.mrb[144].mxu0 %v10650_v0  ;;  %v1485_v12 = vpop.f32.mrb[40].mxu0  ;;  %v1678_v60 = vpop.f32.mrb[40].mxu1  ;;  %v10659_v0 = vld [vmem:[#allocation17_spill] sm:$0xff] }
 0x31c   : > { %4147 = vmatprep.mubr.bf16.mxu0 %v10651_v11  ;;  %v1486_v63 = vadd.f32 %v1485_v12, %v10653_v56  ;;  %v8151_v57 = vadd.f32 %v1678_v60, %v10654_v58  ;;  %v1487_v36 = vpop.f32.mrb[41].mxu0  ;;  %v1680_v48 = vpop.f32.mrb[41].mxu1  ;;  %v1009_v11 = vsub.s32 4, %v10659_v0  ;;  %v1017_v12 = vsub.s32 6, %v10659_v0 }
 0x31d   : > { %v8157_v42 = vadd.f32 %v1487_v36, %v10656_v31  ;;  %v8160_v35 = vadd.f32 %v1680_v48, %v10657_v46  ;;  %v1489_v55 = vpop.f32.mrb[42].mxu0  ;;  %v1682_v29 = vpop.f32.mrb[42].mxu1  ;;  %v10660_v36 = vpack.c.bf16 %v7898_v51, %v7862_v41 }
 0x31e   : > { %v2539_v33 = vmul.f32 0.70710677, %v1486_v63  ;;  %v2541_v20 = vmul.f32 0.70710677, %v8151_v57  ;;  %v8166_v9 = vadd.f32 %v1489_v55, %v10653_v56  ;;  %v8169_v23 = vadd.f32 %v1682_v29, %v10654_v58  ;;  %v1491_v52 = vpop.f32.mrb[43].mxu0  ;;  %v1684_v62 = vpop.f32.mrb[43].mxu1 }
 0x31f   : > { %4301 = vmatmul.mubr.bf16.gmra.mrb[144].mxu1 %v10652_v45  ;;  %v2540_v26 = vmul.f32 0.70710677, %v8157_v42  ;;  %v2542_v47 = vmul.f32 0.70710677, %v8160_v35  ;;  %v8172_v14 = vadd.f32 %v1491_v52, %v10656_v31  ;;  %v8175_v15 = vadd.f32 %v1684_v62, %v10657_v46  ;;  %v5772_v62 = vld [vmem:[#allocation9 + $0x178] sm:$0xff]  }
 0x320   : > { %4308 = vmatprep.mubr.bf16.mxu1 %v10655_v22  ;;  %6000 = verf.f32 %v2539_v33  ;;  %v2547_v8 = vmul.f32 0.70710677, %v8166_v9  ;;  %v2549_v60 = vmul.f32 0.70710677, %v8169_v23  ;;  %v1013_v22 = vsub.s32 5, %v10659_v0  ;;  %5410 = vmatprep.subr.bf16.mxu0 %v5772_v62 }
 0x321   : > { %6002 = verf.f32 %v2541_v20  ;;  %v2548_v45 = vmul.f32 0.70710677, %v8172_v14  ;;  %v2550_v39 = vmul.f32 0.70710677, %v8175_v15  ;;  %v10662_v20 = vpack.c.bf16 %v7901_v50, %v7869_v61  ;;  %v6352_v61 = vld [vmem:[%s10451_s4] sm:$0xff]  ;;  %5411 = vmatpush3.bf16.msra.mxu0 %v5773_v38 }
 0x322   : > { %6004 = verf.f32 %v2540_v26  ;;  %v1021_v52 = vsub.s32 7, %v10659_v0  ;;  %v8204_v50 = vrot.slane %v6352_v61, %v1009_v11  ;;  %v8206_v0 = vrot.slane %v6352_v61, %v1017_v12 }
 0x323   : > { %4148 = vmatmul.mubr.bf16.gmra.mrb[148].mxu0 %v10658_v24  ;;  %6006 = verf.f32 %v2542_v47  ;;  %v1495_v48 = vpop.f32.mrb[44].mxu0  ;;  %v1688_v29 = vpop.f32.mrb[44].mxu1  ;;  %v2284_v62 = vmul.f32 0.5, %v8157_v42  ;;  %v10666_v38 = vpack.c.bf16 %v7884_v2, %v7846_v59  ;;  %v8234_v59 = vmul.f32 0.5, %v8172_v14 }
 0x324   : > { %4155 = vmatprep.mubr.bf16.mxu0 %v10660_v36  ;;  %6008 = verf.f32 %v2547_v8  ;;  %v1496_v55 = vadd.f32 %v1495_v48, %v10653_v56  ;;  %v1497_v33 = vpop.f32.mrb[45].mxu0  ;;  %v1689_v41 = vadd.f32 %v1688_v29, %v10654_v58  ;;  %v1690_v26 = vpop.f32.mrb[45].mxu1  ;;  %10663 = vst [vmem:[#allocation23_spill] sm:$0xff] %v8204_v50  ;;  %v5775_v48 = vld [vmem:[#allocation9 + $0x1b8] sm:$0xff]   ;;  %10664 = vst [vmem:[#allocation22_spill] sm:$0xff] %v8206_v0  ;;  %v8237_v2 = vmul.f32 0.5, %v8175_v15 }
 0x325   : > { %6010 = verf.f32 %v2549_v60  ;;  %v1498_v51 = vadd.f32 %v1497_v33, %v10656_v31  ;;  %v1499_v47 = vpop.f32.mrb[46].mxu0  ;;  %v1691_v24 = vadd.f32 %v1690_v26, %v10657_v46  ;;  %v1692_v60 = vpop.f32.mrb[46].mxu1  ;;  %v8208_v33 = vrot.slane %v6352_v61, %v1013_v22  ;;  %5523 = vmatpush3.bf16.msra.mxu1 %v5775_v48 }
 0x326   : > { %6012 = verf.f32 %v2548_v45  ;;  %v2555_v8 = vmul.f32 0.70710677, %v1496_v55  ;;  %v1501_v36 = vpop.f32.mrb[47].mxu0  ;;  %v1694_v29 = vpop.f32.mrb[47].mxu1  ;;  %v8210_v45 = vmul.f32 0.5, %v1486_v63  ;;  %v1500_v11 = vadd.f32 %v1499_v47, %v10653_v56 }
 0x327   : > { %4309 = vmatmul.mubr.bf16.gmra.mrb[148].mxu1 %v10661_v7  ;;  %6014 = verf.f32 %v2550_v39  ;;  %v2557_v7 = vmul.f32 0.70710677, %v1689_v41  ;;  %10665 = vst [vmem:[#allocation32_spill] sm:$0xff] %v8208_v33  ;;  %v2558_v26 = vmul.f32 0.70710677, %v1691_v24  ;;  %v1693_v39 = vadd.f32 %v1692_v60, %v10654_v58 }
 0x328   : > { %4316 = vmatprep.mubr.bf16.mxu1 %v10662_v20  ;;  %6016 = verf.f32 %v2555_v8  ;;  %v2556_v20 = vmul.f32 0.70710677, %v1498_v51  ;;  %v1502_v19 = vadd.f32 %v1501_v36, %v10656_v31  ;;  %v2285_v22 = vmul.f32 0.5, %v8151_v57 }
 0x329   : > { %6018 = verf.f32 %v2557_v7  ;;  %v8218_v63 = vmul.f32 0.5, %v8160_v35  ;;  %v8224_v47 = vmul.f32 0.5, %v8166_v9  ;;  %v2563_v8 = vmul.f32 0.70710677, %v1500_v11 }
 0x32a   : > { %v6001_v12 = vpop.eup %6000  ;;  %6020 = verf.f32 %v2556_v20  ;;  %v1695_v60 = vadd.f32 %v1694_v29, %v10657_v46  ;;  %v10667_v57 = vpack.c.bf16 %v7960_v54, %v7928_v10  ;;  %v8231_v48 = vmul.f32 0.5, %v8169_v23 }
 0x32b   : > { %4156 = vmatmul.mubr.bf16.gmra.mrb[152].mxu0 %v10666_v38  ;;  %v6003_v30 = vpop.eup %6002  ;;  %6022 = verf.f32 %v2558_v26  ;;  %v1505_v42 = vpop.f32.mrb[48].mxu0  ;;  %v2565_v9 = vmul.f32 0.70710677, %v1693_v39  ;;  %v10668_v7 = vpack.c.bf16 %v7891_v49, %v7855_v16  ;;  %v8242_v54 = vmul.f32 0.5, %v1496_v55 }
 0x32c   : > { %4163 = vmatprep.mubr.bf16.mxu0 %v10667_v57  ;;  %v1698_v35 = vpop.f32.mrb[48].mxu1  ;;  %v6005_v36 = vpop.eup %6004  ;;  %v8244_v20 = vmul.f32 0.5, %v1689_v41  ;;  %v2564_v26 = vmul.f32 0.70710677, %v1502_v19  ;;  %v10669_v23 = vpack.c.bf16 %v7965_v25, %v7935_v4  ;;  %v8249_v15 = vrot.slane %v6352_v61, %v1021_v52 }
 0x32d   : > { %v1507_v29 = vpop.f32.mrb[49].mxu0  ;;  %v6007_v10 = vpop.eup %6006  ;;  %v3051_v33 = vadd.f32 1.0, %v6001_v12  ;;  %v8251_v0 = vmul.f32 0.5, %v1498_v51  ;;  %v8253_v16 = vmul.f32 0.5, %v1691_v24  ;;  %6024 = verf.f32 %v2563_v8 }
 0x32e   : > { %v1700_v14 = vpop.f32.mrb[49].mxu1  ;;  %v1509_v38 = vpop.f32.mrb[50].mxu0  ;;  %10670 = vst [vmem:[#allocation36_spill] sm:$0xff] %v8249_v15  ;;  %v3052_v50 = vadd.f32 1.0, %v6005_v36  ;;  %6026 = verf.f32 %v2565_v9  ;;  %v2566_v17 = vmul.f32 0.70710677, %v1695_v60  ;;  %v1506_v52 = vadd.f32 %v1505_v42, %v10653_v56 }
 0x32f   : > { %4317 = vmatmul.mubr.bf16.gmra.mrb[152].mxu1 %v10668_v7  ;;  %v6009_v57 = vpop.eup %6008  ;;  %v1702_v49 = vpop.f32.mrb[50].mxu1  ;;  %v3053_v7 = vadd.f32 1.0, %v6003_v30  ;;  %6028 = verf.f32 %v2564_v26  ;;  %v1699_v51 = vadd.f32 %v1698_v35, %v10654_v58  ;;  %v8259_v12 = vmul.f32 0.5, %v1500_v11  ;;  %v10672_v42 = vld [vmem:[#allocation64_spill] sm:$0xff] }
 0x330   : > { %4324 = vmatprep.mubr.bf16.mxu1 %v10669_v23  ;;  %v1511_v55 = vpop.f32.mrb[51].mxu0  ;;  %v6011_v41 = vpop.eup %6010  ;;  %v3054_v23 = vadd.f32 1.0, %v6007_v10  ;;  %v3059_v24 = vadd.f32 1.0, %v6009_v57  ;;  %6030 = verf.f32 %v2566_v17  ;;  %v1508_v8 = vadd.f32 %v1507_v29, %v10656_v31 }
 0x331   : > { %v8255_v4 = vpop.f32.mrb[51].mxu1  ;;  %v6013_v25 = vpop.eup %6012  ;;  %v8263_v36 = vmul.f32 %v3051_v33, %v8210_v45  ;;  %v8265_v9 = vmul.f32 0.5, %v1693_v39  ;;  %v8267_v15 = vmul.f32 0.5, %v1502_v19  ;;  %v2571_v10 = vmul.f32 0.70710677, %v1506_v52 }
 0x332   : > { %v6015_v61 = vpop.eup %6014  ;;  %v10673_v26 = vpack.c.bf16 %v7938_v6, %v10672_v42  ;;  %v8272_v57 = vmul.f32 %v3053_v7, %v2285_v22  ;;  %v8274_v11 = vmul.f32 %v3052_v50, %v2284_v62  ;;  %v8276_v17 = vmul.f32 0.5, %v1695_v60  ;;  %v10676_v22 = vld [vmem:[#allocation65_spill] sm:$0xff] }
 0x333   : > { %v6017_v30 = vpop.eup %6016  ;;  %10671 = vst [vmem:[#allocation33_spill] sm:$0xff] %v8263_v36  ;;  %v2573_v29 = vmul.f32 0.70710677, %v1699_v51  ;;  %v10675_v33 = vpack.c.bf16 %v8023_v32, %v7990_v21  ;;  %v1515_v45 = vpop.f32.mrb[52].mxu0  ;;  %v8282_v36 = vmul.f32 %v3054_v23, %v8218_v63  ;;  %v3061_v6 = vadd.f32 1.0, %v6011_v41 }
 0x334   : > { %4164 = vmatmul.mubr.bf16.gmra.mrb[156].mxu0 %v10673_v26  ;;  %v6019_v35 = vpop.eup %6018  ;;  %10674 = vst [vmem:[#allocation37_spill] sm:$0xff] %v8272_v57  ;;  %v1708_v19 = vpop.f32.mrb[52].mxu1  ;;  %v3060_v42 = vadd.f32 1.0, %v6013_v25  ;;  %v3062_v26 = vadd.f32 1.0, %v6015_v61  ;;  %v10677_v50 = vpack.c.bf16 %v7951_v28, %v10676_v22  ;;  %v8288_v57 = vmul.f32 %v3059_v24, %v8224_v47 }
 0x335   : > { %4171 = vmatprep.mubr.bf16.mxu0 %v10675_v33  ;;  %v6021_v39 = vpop.eup %6020  ;;  %v1517_v62 = vpop.f32.mrb[53].mxu0  ;;  %v3067_v21 = vadd.f32 1.0, %v6017_v30  ;;  %v3069_v32 = vadd.f32 1.0, %v6019_v35  ;;  %v2572_v33 = vmul.f32 0.70710677, %v1508_v8  ;;  %v10678_v63 = vpack.c.bf16 %v8038_v1, %v10627_v34 }
 0x336   : > { %v1710_v60 = vpop.f32.mrb[53].mxu1  ;;  %v6023_v7 = vpop.eup %6022  ;;  %v3068_v23 = vadd.f32 1.0, %v6021_v39  ;;  %6032 = verf.f32 %v2571_v10  ;;  %v1701_v28 = vadd.f32 %v1700_v14, %v10657_v46  ;;  %v1510_v61 = vadd.f32 %v1509_v38, %v10653_v56 }
 0x337   : > { %4325 = vmatmul.mubr.bf16.gmra.mrb[156].mxu1 %v10677_v50  ;;  %v8293_v41 = vpop.f32.mrb[54].mxu0  ;;  %v8295_v25 = vpop.f32.mrb[54].mxu1  ;;  %v3070_v24 = vadd.f32 1.0, %v6023_v7  ;;  %6034 = verf.f32 %v2573_v29  ;;  %v1703_v30 = vadd.f32 %v1702_v49, %v10654_v58  ;;  %v1512_v1 = vadd.f32 %v1511_v55, %v10656_v31 }
 0x338   : > { %4332 = vmatprep.mubr.bf16.mxu1 %v10678_v63  ;;  %v8299_v22 = vpop.f32.mrb[55].mxu0  ;;  %v8301_v47 = vpop.f32.mrb[55].mxu1  ;;  %v8306_v35 = vmul.f32 %v3061_v6, %v8231_v48  ;;  %v8308_v39 = vmul.f32 0.5, %v1506_v52  ;;  %6036 = verf.f32 %v2572_v33  ;;  %v2574_v14 = vmul.f32 0.70710677, %v1701_v28 }
 0x339   : > { %v6025_v34 = vpop.eup %6024  ;;  %v8311_v38 = vmul.f32 %v3060_v42, %v8234_v59  ;;  %v8314_v50 = vmul.f32 %v3062_v26, %v8237_v2  ;;  %v8316_v29 = vmul.f32 0.5, %v1699_v51  ;;  %v2579_v49 = vmul.f32 0.70710677, %v1510_v61 }
 0x33a   : > { %v6027_v10 = vpop.eup %6026  ;;  %v8319_v55 = vmul.f32 %v3067_v21, %v8242_v54  ;;  %v8322_v48 = vmul.f32 %v3069_v32, %v8244_v20  ;;  %v8324_v52 = vmul.f32 0.5, %v1508_v8  ;;  %v2581_v6 = vmul.f32 0.70710677, %v1703_v30 }
 0x33b   : > { %v6029_v7 = vpop.eup %6028  ;;  %v10681_v59 = vpack.c.bf16 %v10629_v18, %v10628_v40  ;;  %v8330_v2 = vmul.f32 %v3068_v23, %v8251_v0  ;;  %v8333_v51 = vmul.f32 %v3070_v24, %v8253_v16  ;;  %6038 = verf.f32 %v2574_v14  ;;  %v1525_v8 = vpop.f32.mrb[56].mxu0  ;;  %v10683_v18 = vld [vmem:[#allocation60_spill] sm:$0xff] }
 0x33c   : > { %10679 = vst [vmem:[#allocation30_spill] sm:$0xff] %v8319_v55  ;;  %10680 = vst [vmem:[#allocation34_spill] sm:$0xff] %v8322_v48  ;;  %v6031_v42 = vpop.eup %6030  ;;  %v2580_v54 = vmul.f32 0.70710677, %v1512_v1  ;;  %v10682_v20 = vpack.c.bf16 %v8095_v43, %v8061_v44  ;;  %v8338_v26 = vpop.f32.mrb[56].mxu1  ;;  %v3075_v21 = vadd.f32 1.0, %v6025_v34  ;;  %6040 = verf.f32 %v2579_v49 }
 0x33d   : > { %4172 = vmatmul.mubr.bf16.gmra.mrb[160].mxu0 %v10681_v59  ;;  %v3077_v32 = vadd.f32 1.0, %v6027_v10  ;;  %v1705_v40 = vadd.f32 %v8255_v4, %v10657_v46  ;;  %v10684_v0 = vpack.c.bf16 %v10631_v5, %v10683_v18  ;;  %v8345_v16 = vpop.f32.mrb[57].mxu0  ;;  %v8347_v33 = vpop.f32.mrb[57].mxu1  ;;  %6042 = verf.f32 %v2581_v6 }
 0x33e   : > { %4179 = vmatprep.mubr.bf16.mxu0 %v10682_v20  ;;  %v1516_v44 = vadd.f32 %v1515_v45, %v10653_v56  ;;  %v1709_v43 = vadd.f32 %v1708_v19, %v10654_v58  ;;  %v1518_v63 = vadd.f32 %v1517_v62, %v10656_v31  ;;  %v10685_v23 = vpack.c.bf16 %v8106_v3, %v8104_v53  ;;  %v8355_v4 = vpop.f32.mrb[58].mxu0  ;;  %v8357_v24 = vpop.f32.mrb[58].mxu1 }
 0x33f   : > { %4333 = vmatmul.mubr.bf16.gmra.mrb[160].mxu1 %v10684_v0  ;;  %v3076_v5 = vadd.f32 1.0, %v6029_v7  ;;  %v3078_v34 = vadd.f32 1.0, %v6031_v42  ;;  %v2582_v14 = vmul.f32 0.70710677, %v1705_v40  ;;  %v1711_v10 = vadd.f32 %v1710_v60, %v10657_v46  ;;  %v8360_v49 = vpop.f32.mrb[59].mxu0  ;;  %v8362_v45 = vpop.f32.mrb[59].mxu1 }
 0x340   : > { %4340 = vmatprep.mubr.bf16.mxu1 %v10685_v23  ;;  %v8364_v19 = vmul.f32 0.5, %v1701_v28  ;;  %v8366_v62 = vmul.f32 0.5, %v1510_v61  ;;  %6044 = verf.f32 %v2580_v54  ;;  %v2587_v3 = vmul.f32 0.70710677, %v1516_v44  ;;  %v6033_v53 = vpop.eup %6032 }
 0x341   : > { %v8369_v6 = vmul.f32 %v3075_v21, %v8259_v12  ;;  %v8371_v59 = vmul.f32 0.5, %v1703_v30  ;;  %6046 = verf.f32 %v2582_v14  ;;  %v2589_v7 = vmul.f32 0.70710677, %v1709_v43  ;;  %v6035_v42 = vpop.eup %6034 }
 0x342   : > { %v8374_v60 = vmul.f32 %v3077_v32, %v8265_v9  ;;  %v8376_v20 = vmul.f32 0.5, %v1512_v1  ;;  %6048 = verf.f32 %v2587_v3  ;;  %v2588_v28 = vmul.f32 0.70710677, %v1518_v63  ;;  %v6037_v61 = vpop.eup %6036 }
 0x343   : > { %10686 = vst [vmem:[#allocation25_spill] sm:$0xff] %v8369_v6  ;;  %v8379_v54 = vmul.f32 %v3076_v5, %v8267_v15  ;;  %v8382_v18 = vmul.f32 %v3078_v34, %v8276_v17  ;;  %6050 = verf.f32 %v2589_v7  ;;  %v2590_v12 = vmul.f32 0.70710677, %v1711_v10  ;;  %v8393_v32 = vpop.f32.mrb[60].mxu0  ;;  %v8395_v17 = vpop.f32.mrb[60].mxu1 }
 0x344   : > { %10687 = vst [vmem:[#allocation24_spill] sm:$0xff] %v8374_v60  ;;  %v10688_v30 = vpack.c.bf16 %v8069_v27, %v8045_v13  ;;  %v3083_v21 = vadd.f32 1.0, %v6033_v53  ;;  %v1520_v9 = vadd.f32 %v8293_v41, %v10653_v56  ;;  %v1713_v1 = vadd.f32 %v8295_v25, %v10654_v58  ;;  %v10689_v27 = vld [vmem:[#allocation29_spill] sm:$0xff]  ;;  %v8404_v5 = vpop.f32.mrb[61].mxu0  ;;  %v8406_v25 = vpop.f32.mrb[61].mxu1 }
 0x345   : > { %v1522_v15 = vadd.f32 %v8299_v22, %v10656_v31  ;;  %v3085_v0 = vadd.f32 1.0, %v6035_v42  ;;  %v8397_v23 = vmul.f32 0.5, %v1705_v40  ;;  %6052 = verf.f32 %v2588_v28  ;;  %v6039_v22 = vpop.eup %6038  ;;  %v8411_v53 = vpop.f32.mrb[62].mxu0 }
 0x346   : > { %4180 = vmatmul.mubr.bf16.gmra.mrb[164].mxu0 %v10688_v30  ;;  %v1715_v13 = vadd.f32 %v8301_v47, %v10657_v46  ;;  %v10690_v41 = vpack.c.bf16 %v8082_v37, %v10689_v27  ;;  %v3084_v34 = vadd.f32 1.0, %v6037_v61  ;;  %v8408_v14 = vmul.f32 0.5, %v1516_v44  ;;  %v6041_v7 = vpop.eup %6040  ;;  %v8422_v44 = vpop.f32.mrb[62].mxu1 }
 0x347   : > { %v2595_v3 = vmul.f32 0.70710677, %v1520_v9  ;;  %v1526_v40 = vadd.f32 %v1525_v8, %v10653_v56  ;;  %v8413_v42 = vmul.f32 0.5, %v1709_v43  ;;  %6054 = verf.f32 %v2590_v12  ;;  %v6043_v28 = vpop.eup %6042  ;;  %v8424_v8 = vpop.f32.mrb[63].mxu0 }
 0x348   : > { %4341 = vmatmul.mubr.bf16.gmra.mrb[164].mxu1 %v10690_v41  ;;  %v2597_v47 = vmul.f32 0.70710677, %v1713_v1  ;;  %v2596_v37 = vmul.f32 0.70710677, %v1522_v15  ;;  %v8416_v30 = vmul.f32 %v3083_v21, %v8308_v39  ;;  %v8418_v27 = vmul.f32 0.5, %v1518_v63  ;;  %v8429_v60 = vpop.f32.mrb[63].mxu1 }
 0x349   : > { %v8420_v61 = vmul.f32 0.5, %v1711_v10  ;;  %6056 = verf.f32 %v2595_v3  ;;  %v8427_v41 = vmul.f32 %v3085_v0, %v8316_v29  ;;  %v3086_v43 = vadd.f32 1.0, %v6039_v22 }
 0x34a   : > { %10691 = vst [vmem:[#allocation31_spill] sm:$0xff] %v8416_v30  ;;  %6058 = verf.f32 %v2597_v47  ;;  %v2598_v12 = vmul.f32 0.70710677, %v1715_v13  ;;  %v6045_v48 = vpop.eup %6044  ;;  %v8432_v39 = vmul.f32 %v3084_v34, %v8324_v52  ;;  %v3091_v63 = vadd.f32 1.0, %v6041_v7 }
 0x34b   : > { %10692 = vst [vmem:[#allocation35_spill] sm:$0xff] %v8427_v41  ;;  %6060 = verf.f32 %v2596_v37  ;;  %v2603_v10 = vmul.f32 0.70710677, %v1526_v40  ;;  %v6047_v21 = vpop.eup %6046  ;;  %v3093_v3 = vadd.f32 1.0, %v6043_v28  ;;  %v8434_v30 = vmul.f32 0.5, %v1520_v9  ;;  %v8446_v34 = vpop.f32.mrb[64].mxu0 }
 0x34c   : > { %10693 = vst [vmem:[#allocation40_spill] sm:$0xff] %v8432_v39  ;;  %v1719_v29 = vadd.f32 %v8338_v26, %v10654_v58  ;;  %v1528_v0 = vadd.f32 %v8345_v16, %v10656_v31  ;;  %v6049_v22 = vpop.eup %6048  ;;  %v8440_v47 = vmul.f32 0.5, %v1713_v1  ;;  %v8442_v41 = vmul.f32 0.5, %v1522_v15  ;;  %v8448_v7 = vpop.f32.mrb[64].mxu1 }
 0x34d   : > { %6062 = verf.f32 %v2598_v12  ;;  %v1721_v52 = vadd.f32 %v8347_v33, %v10657_v46  ;;  %v6051_v9 = vpop.eup %6050  ;;  %v8451_v37 = vmul.f32 %v3086_v43, %v8364_v19  ;;  %v3092_v26 = vadd.f32 1.0, %v6045_v48  ;;  %v8455_v1 = vpop.f32.mrb[65].mxu0 }
 0x34e   : > { %v2605_v28 = vmul.f32 0.70710677, %v1719_v29  ;;  %v1530_v16 = vadd.f32 %v8355_v4, %v10653_v56  ;;  %v8458_v15 = vmul.f32 %v3091_v63, %v8366_v62  ;;  %v8460_v12 = vmul.f32 0.5, %v1715_v13  ;;  %v8462_v39 = vpop.f32.mrb[65].mxu1  ;;  %v8464_v6 = vpop.f32.mrb[66].mxu0 }
 0x34f   : > { %10694 = vst [vmem:[#allocation44_spill] sm:$0xff] %v8451_v37  ;;  %6064 = verf.f32 %v2603_v10  ;;  %v2604_v33 = vmul.f32 0.70710677, %v1528_v0  ;;  %10696 = vst [vmem:[#allocation45_spill] sm:$0xff] %v8462_v39  ;;  %v6053_v19 = vpop.eup %6052  ;;  %v8467_v48 = vmul.f32 %v3093_v3, %v8371_v59  ;;  %v3094_v43 = vadd.f32 1.0, %v6047_v21  ;;  %v8469_v37 = vpop.f32.mrb[66].mxu1 }
 0x350   : > { %10695 = vst [vmem:[#allocation41_spill] sm:$0xff] %v8458_v15  ;;  %6066 = verf.f32 %v2605_v28  ;;  %v2606_v4 = vmul.f32 0.70710677, %v1721_v52  ;;  %v8471_v55 = vpop.f32.mrb[67].mxu0  ;;  %v3099_v62 = vadd.f32 1.0, %v6049_v22  ;;  %v3101_v13 = vadd.f32 1.0, %v6051_v9 }
 0x351   : > { %10697 = vst [vmem:[#allocation48_spill] sm:$0xff] %v8467_v48  ;;  %v8473_v63 = vmul.f32 0.5, %v1526_v40  ;;  %6068 = verf.f32 %v2604_v33  ;;  %v8475_v10 = vpop.f32.mrb[67].mxu1  ;;  %v6055_v15 = vpop.eup %6054  ;;  %v8478_v39 = vmul.f32 %v3092_v26, %v8376_v20  ;;  %v2611_v59 = vmul.f32 0.70710677, %v1530_v16 }
 0x352   : > { %6070 = verf.f32 %v2606_v4  ;;  %v1723_v21 = vadd.f32 %v8357_v24, %v10654_v58  ;;  %v3100_v28 = vadd.f32 1.0, %v6053_v19  ;;  %v1532_v22 = vadd.f32 %v8360_v49, %v10656_v31 }
 0x353   : > { %10698 = vst [vmem:[#allocation52_spill] sm:$0xff] %v8478_v39  ;;  %v6057_v3 = vpop.eup %6056  ;;  %v1725_v40 = vadd.f32 %v8362_v45, %v10657_v46  ;;  %v3516_v9 = vpack.c.bf16 %v8311_v38, %v8274_v11  ;;  %v8489_v20 = vmul.f32 %v3094_v43, %v8397_v23  ;;  %v8491_v26 = vmul.f32 0.5, %v1719_v29  ;;  %v8503_v11 = vpop.f32.mrb[68].mxu0 }
 0x354   : > { %v6059_v33 = vpop.eup %6058  ;;  %v8493_v4 = vmul.f32 0.5, %v1528_v0  ;;  %v2613_v24 = vmul.f32 0.70710677, %v1723_v21  ;;  %v8496_v19 = vmul.f32 %v3099_v62, %v8408_v14  ;;  %v8499_v49 = vmul.f32 %v3101_v13, %v8413_v42  ;;  %v8507_v0 = vpop.f32.mrb[68].mxu1 }
 0x355   : > { %v6061_v48 = vpop.eup %6060  ;;  %v8501_v45 = vmul.f32 0.5, %v1721_v52  ;;  %v2612_v39 = vmul.f32 0.70710677, %v1532_v22  ;;  %4187 = vmatprep.mubr.bf16.mxu0 %v3516_v9  ;;  %v3102_v38 = vadd.f32 1.0, %v6055_v15  ;;  %v8505_v23 = vmul.f32 0.5, %v1530_v16  ;;  %v8509_v43 = vpop.f32.mrb[69].mxu0 }
 0x356   : > { %10699 = vst [vmem:[#allocation53_spill] sm:$0xff] %v8496_v19  ;;  %10700 = vst [vmem:[#allocation50_spill] sm:$0xff] %v8499_v49  ;;  %6072 = verf.f32 %v2611_v59  ;;  %v2614_v29 = vmul.f32 0.70710677, %v1725_v40  ;;  %v8512_v62 = vmul.f32 %v3100_v28, %v8418_v27  ;;  %v3107_v42 = vadd.f32 1.0, %v6057_v3  ;;  %v8516_v13 = vpop.f32.mrb[69].mxu1 }
 0x357   : > { %v6063_v14 = vpop.eup %6062  ;;  %6074 = verf.f32 %v2613_v24  ;;  %v3518_v52 = vpack.c.bf16 %v8314_v50, %v8282_v36  ;;  %v8518_v15 = vpop.f32.mrb[70].mxu0  ;;  %v3109_v16 = vadd.f32 1.0, %v6059_v33  ;;  %v3108_v59 = vadd.f32 1.0, %v6061_v48 }
 0x358   : > { %10701 = vst [vmem:[#allocation57_spill] sm:$0xff] %v8512_v62  ;;  %6076 = verf.f32 %v2612_v39  ;;  %v1536_v9 = vadd.f32 %v8393_v32, %v10653_v56  ;;  %v8522_v49 = vpop.f32.mrb[70].mxu1  ;;  %v8524_v19 = vpop.f32.mrb[71].mxu0  ;;  %v1729_v36 = vadd.f32 %v8395_v17, %v10654_v58  ;;  %v1538_v50 = vadd.f32 %v8404_v5, %v10656_v31 }
 0x359   : > { %v6065_v27 = vpop.eup %6064  ;;  %6078 = verf.f32 %v2614_v29  ;;  %4348 = vmatprep.mubr.bf16.mxu1 %v3518_v52  ;;  %v1731_v48 = vadd.f32 %v8406_v25, %v10657_v46  ;;  %v8532_v39 = vpop.f32.mrb[71].mxu1  ;;  %v8535_v32 = vmul.f32 %v3102_v38, %v8420_v61  ;;  %v3110_v28 = vadd.f32 1.0, %v6063_v14 }
 0x35a   : > { %10702 = vst [vmem:[#allocation54_spill] sm:$0xff] %v8532_v39  ;;  %v6067_v3 = vpop.eup %6066  ;;  %v2619_v33 = vmul.f32 0.70710677, %v1536_v9  ;;  %v1540_v24 = vadd.f32 %v8411_v53, %v10653_v56  ;;  %v8539_v52 = vmul.f32 0.5, %v1723_v21  ;;  %v8541_v17 = vmul.f32 0.5, %v1532_v22 }
 0x35b   : > { %v6069_v29 = vpop.eup %6068  ;;  %v8543_v5 = vmul.f32 0.5, %v1725_v40  ;;  %v2621_v62 = vmul.f32 0.70710677, %v1729_v36  ;;  %v8546_v39 = vmul.f32 %v3107_v42, %v8434_v30  ;;  %v8549_v61 = vmul.f32 %v3109_v16, %v8440_v47  ;;  %v8554_v21 = vpop.f32.mrb[72].mxu0 }
 0x35c   : > { %v6071_v25 = vpop.eup %6070  ;;  %6080 = verf.f32 %v2619_v33  ;;  %v2620_v38 = vmul.f32 0.70710677, %v1538_v50  ;;  %v8552_v14 = vmul.f32 %v3108_v59, %v8442_v41  ;;  %v3115_v56 = vadd.f32 1.0, %v6065_v27  ;;  %v8556_v22 = vpop.f32.mrb[72].mxu1 }
 0x35d   : > { %10703 = vst [vmem:[#allocation58_spill] sm:$0xff] %v8546_v39  ;;  %10704 = vst [vmem:[#allocation55_spill] sm:$0xff] %v8549_v61  ;;  %6082 = verf.f32 %v2621_v62  ;;  %v2622_v53 = vmul.f32 0.70710677, %v1731_v48  ;;  %v8559_v40 = vmul.f32 %v3110_v28, %v8460_v12  ;;  %v3117_v30 = vadd.f32 1.0, %v6067_v3  ;;  %v8561_v47 = vpop.f32.mrb[73].mxu0 }
 0x35e   : > { %6084 = verf.f32 %v2620_v38  ;;  %v2627_v42 = vmul.f32 0.70710677, %v1540_v24  ;;  %v8563_v16 = vpop.f32.mrb[73].mxu1  ;;  %v3116_v33 = vadd.f32 1.0, %v6069_v29  ;;  %v3118_v41 = vadd.f32 1.0, %v6071_v25  ;;  %v8567_v59 = vpop.f32.mrb[74].mxu0 }
 0x35f   : > { %6086 = verf.f32 %v2622_v53  ;;  %v1733_v62 = vadd.f32 %v8422_v44, %v10654_v58  ;;  %v8569_v27 = vpop.f32.mrb[74].mxu1  ;;  %v1542_v12 = vadd.f32 %v8424_v8, %v10656_v31  ;;  %v1735_v3 = vadd.f32 %v8429_v60, %v10657_v46  ;;  %v10705_v28 = vld [vmem:[#allocation33_spill] sm:$0xff]  ;;  %v8577_v25 = vpop.f32.mrb[75].mxu0 }
 0x360   : > { %v6073_v61 = vpop.eup %6072  ;;  %6088 = verf.f32 %v2627_v42  ;;  %v3515_v29 = vpack.c.bf16 %v8288_v57, %v10705_v28  ;;  %v8579_v38 = vpop.f32.mrb[75].mxu1  ;;  %v8582_v44 = vmul.f32 %v3115_v56, %v8473_v63  ;;  %v8584_v53 = vmul.f32 0.5, %v1536_v9 }
 0x361   : > { %10706 = vst [vmem:[#allocation61_spill] sm:$0xff] %v8579_v38  ;;  %v6075_v58 = vpop.eup %6074  ;;  %v8586_v42 = vmul.f32 0.5, %v1729_v36  ;;  %v2629_v39 = vmul.f32 0.70710677, %v1733_v62  ;;  %v8589_v8 = vmul.f32 %v3117_v30, %v8491_v26  ;;  %v8591_v46 = vmul.f32 0.5, %v1538_v50  ;;  %v10709_v26 = vld [vmem:[#allocation37_spill] sm:$0xff] }
 0x362   : > { %10707 = vst [vmem:[#allocation63_spill] sm:$0xff] %v8582_v44  ;;  %v6077_v31 = vpop.eup %6076  ;;  %v8593_v57 = vmul.f32 0.5, %v1731_v48  ;;  %v2628_v60 = vmul.f32 0.70710677, %v1542_v12  ;;  %4188 = vmatmul.mubr.bf16.gmra.mrb[168].mxu0 %v3515_v29  ;;  %v8596_v38 = vmul.f32 %v3116_v33, %v8493_v4  ;;  %v3123_v63 = vadd.f32 1.0, %v6073_v61  ;;  %v10710_v33 = vld [vmem:[#allocation23_spill] sm:$0xff] }
 0x363   : > { %10708 = vst [vmem:[#allocation27_spill] sm:$0xff] %v8589_v8  ;;  %v6079_v28 = vpop.eup %6078  ;;  %v8598_v9 = vmul.f32 0.5, %v1540_v24  ;;  %v2630_v36 = vmul.f32 0.70710677, %v1735_v3  ;;  %v8601_v56 = vmul.f32 %v3118_v41, %v8501_v45  ;;  %v3125_v44 = vadd.f32 1.0, %v6075_v58  ;;  %v8611_v61 = vpop.f32.mrb[76].mxu0 }
 0x364   : > { %v3517_v50 = vpack.c.bf16 %v8306_v35, %v10709_v26  ;;  %v3524_v48 = vpack.c.bf16 %v8379_v54, %v8330_v2  ;;  %v3124_v30 = vadd.f32 1.0, %v6077_v31  ;;  %6090 = verf.f32 %v2629_v39  ;;  %v8613_v29 = vpop.f32.mrb[76].mxu1  ;;  %v10711_v35 = vld [vmem:[#allocation22_spill] sm:$0xff]  ;;  %v10712_v54 = vld [vmem:[#allocation32_spill] sm:$0xff]  ;;  %v8619_v58 = vpop.f32.mrb[77].mxu0 }
 0x365   : > { %v3526_v4 = vpack.c.bf16 %v8382_v18, %v8333_v51  ;;  %v1772_v24 = vadd.f32 %v8446_v34, %v10710_v33  ;;  %v3126_v41 = vadd.f32 1.0, %v6079_v28  ;;  %6092 = verf.f32 %v2628_v60  ;;  %10713 = vst [vmem:[#allocation62_spill] sm:$0xff] %v8619_v58  ;;  %v8621_v51 = vpop.f32.mrb[77].mxu1  ;;  %v8628_v28 = vpop.f32.mrb[78].mxu0 }
 0x366   : > { %v6081_v45 = vpop.eup %6080  ;;  %4349 = vmatmul.mubr.bf16.gmra.mrb[168].mxu1 %v3517_v50  ;;  %4195 = vmatprep.mubr.bf16.mxu0 %v3524_v48  ;;  %v1965_v2 = vadd.f32 %v8448_v7, %v10711_v35  ;;  %v1774_v39 = vadd.f32 %v8455_v1, %v10712_v54  ;;  %10714 = vst [vmem:[#allocation59_spill] sm:$0xff] %v8621_v51  ;;  %v8626_v31 = vmul.f32 0.5, %v1733_v62  ;;  %6094 = verf.f32 %v2630_v36  ;;  %v8630_v26 = vpop.f32.mrb[78].mxu1 }
 0x367   : > { %v6083_v18 = vpop.eup %6082  ;;  %v8624_v34 = vmul.f32 %v3123_v63, %v8505_v23  ;;  %4356 = vmatprep.mubr.bf16.mxu1 %v3526_v4  ;;  %v2383_v60 = vmul.f32 0.70710677, %v1772_v24  ;;  %10716 = vst [vmem:[#allocation28_spill] sm:$0xff] %v8628_v28  ;;  %10717 = vst [vmem:[#allocation16_spill] sm:$0xff] %v8630_v26  ;;  %v8632_v50 = vmul.f32 0.5, %v1542_v12  ;;  %v8634_v1 = vmul.f32 0.5, %v1735_v3 }
 0x368   : > { %v6085_v7 = vpop.eup %6084  ;;  %v2385_v48 = vmul.f32 0.70710677, %v1965_v2  ;;  %v1776_v8 = vadd.f32 %v8464_v6, %v10710_v33  ;;  %v8638_v23 = vpop.f32.mrb[79].mxu0  ;;  %v8641_v63 = vmul.f32 %v3125_v44, %v8539_v52  ;;  %v2384_v36 = vmul.f32 0.70710677, %v1774_v39  ;;  %v10720_v4 = vld [vmem:[#allocation36_spill] sm:$0xff] }
 0x369   : > { %10715 = vst [vmem:[#allocation26_spill] sm:$0xff] %v8624_v34  ;;  %10718 = vst [vmem:[#allocation42_spill] sm:$0xff] %v8638_v23  ;;  %v6087_v62 = vpop.eup %6086  ;;  %6096 = verf.f32 %v2383_v60  ;;  %v10721_v34 = vld [vmem:[#allocation45_spill] sm:$0xff]  ;;  %v8645_v28 = vpop.f32.mrb[79].mxu1  ;;  %v8648_v3 = vmul.f32 %v3124_v30, %v8541_v17  ;;  %v8651_v51 = vmul.f32 %v3126_v41, %v8543_v5  ;;  %v3131_v6 = vadd.f32 1.0, %v6081_v45 }
 0x36a   : > { %10719 = vst [vmem:[#allocation38_spill] sm:$0xff] %v8641_v63  ;;  %v1967_v26 = vadd.f32 %v10721_v34, %v10720_v4  ;;  %10722 = vst [vmem:[#allocation43_spill] sm:$0xff] %v8645_v28  ;;  %v6089_v12 = vpop.eup %6088  ;;  %6098 = verf.f32 %v2385_v48  ;;  %v3133_v23 = vadd.f32 1.0, %v6083_v18  ;;  %v3132_v58 = vadd.f32 1.0, %v6085_v7 }
 0x36b   : > { %v8653_v52 = vmul.f32 0.5, %v1772_v24  ;;  %v8655_v44 = vmul.f32 0.5, %v1965_v2  ;;  %v3134_v60 = vadd.f32 1.0, %v6087_v62  ;;  %6100 = verf.f32 %v2384_v36  ;;  %v8663_v45 = vpop.f32.mrb[80].mxu0  ;;  %v8665_v24 = vpop.f32.mrb[80].mxu1 }
 0x36c   : > { %v2391_v34 = vmul.f32 0.70710677, %v1776_v8  ;;  %v1969_v63 = vadd.f32 %v8469_v37, %v10711_v35  ;;  %v3139_v28 = vadd.f32 1.0, %v6089_v12  ;;  %v2386_v17 = vmul.f32 0.70710677, %v1967_v26  ;;  %10723 = vst [vmem:[#allocation39_spill] sm:$0xff] %v8663_v45 }
 0x36d   : > { %v1778_v5 = vadd.f32 %v8471_v55, %v10712_v54  ;;  %v1971_v30 = vadd.f32 %v8475_v10, %v10720_v4  ;;  %10724 = vst [vmem:[#allocation49_spill] sm:$0xff] %v8665_v24  ;;  %v8668_v41 = vmul.f32 %v3131_v6, %v8584_v53  ;;  %v8670_v2 = vmul.f32 0.5, %v1774_v39  ;;  %v8672_v37 = vpop.f32.mrb[81].mxu0  ;;  %v8674_v7 = vpop.f32.mrb[81].mxu1  ;;  %v10738_v24 = vld [vmem:[#allocation44_spill] sm:$0xff] }
 0x36e   : > { %6102 = verf.f32 %v2391_v34  ;;  %v2393_v18 = vmul.f32 0.70710677, %v1969_v63  ;;  %10726 = vst [vmem:[#allocation56_spill] sm:$0xff] %v8672_v37  ;;  %10727 = vst [vmem:[#allocation51_spill] sm:$0xff] %v8674_v7  ;;  %v6091_v48 = vpop.eup %6090  ;;  %v8677_v55 = vmul.f32 %v3133_v23, %v8586_v42  ;;  %v8680_v10 = vmul.f32 %v3132_v58, %v8591_v46  ;;  %v8684_v53 = vpop.f32.mrb[82].mxu0  ;;  %v10732_v58 = vld [vmem:[#allocation30_spill] sm:$0xff] }
 0x36f   : > { %10725 = vst [vmem:[#allocation46_spill] sm:$0xff] %v8668_v41  ;;  %v8682_v62 = vmul.f32 0.5, %v1967_v26  ;;  %v2392_v36 = vmul.f32 0.70710677, %v1778_v5  ;;  %10729 = vst [vmem:[#allocation18_spill] sm:$0xff] %v8684_v53  ;;  %v6093_v39 = vpop.eup %6092  ;;  %v8687_v12 = vmul.f32 %v3134_v60, %v8593_v57  ;;  %v8689_v6 = vmul.f32 0.5, %v1776_v8 }
 0x370   : > { %10728 = vst [vmem:[#allocation47_spill] sm:$0xff] %v8677_v55  ;;  %6104 = verf.f32 %v2393_v18  ;;  %v2394_v34 = vmul.f32 0.70710677, %v1971_v30  ;;  %v8691_v41 = vpop.f32.mrb[82].mxu1  ;;  %v8693_v42 = vpop.f32.mrb[83].mxu0  ;;  %v8696_v46 = vmul.f32 %v3139_v28, %v8598_v9  ;;  %v10733_v26 = vld [vmem:[#allocation25_spill] sm:$0xff]  ;;  %v1782_v28 = vadd.f32 %v8503_v11, %v10710_v33 }
 0x371   : > { %10730 = vst [vmem:[#allocation19_spill] sm:$0xff] %v8691_v41  ;;  %10731 = vst [vmem:[#allocation20_spill] sm:$0xff] %v8693_v42  ;;  %v6095_v23 = vpop.eup %6094  ;;  %6106 = verf.f32 %v2386_v17  ;;  %v3523_v55 = vpack.c.bf16 %v10733_v26, %v10732_v58  ;;  %v10734_v53 = vld [vmem:[#allocation34_spill] sm:$0xff]  ;;  %v10735_v7 = vld [vmem:[#allocation24_spill] sm:$0xff]  ;;  %v8702_v60 = vpop.f32.mrb[83].mxu1  ;;  %v3141_v8 = vadd.f32 1.0, %v6091_v48  ;;  %v3534_v42 = vpack.c.bf16 %v8489_v20, %v10738_v24 }
 0x372   : > { %v3525_v57 = vpack.c.bf16 %v10735_v7, %v10734_v53  ;;  %6108 = verf.f32 %v2392_v36  ;;  %v10736_v18 = vld [vmem:[#allocation40_spill] sm:$0xff]  ;;  %v3140_v9 = vadd.f32 1.0, %v6093_v39  ;;  %v1975_v17 = vadd.f32 %v8507_v0, %v10711_v35 }
 0x373   : > { %v10737_v37 = vld [vmem:[#allocation52_spill] sm:$0xff]  ;;  %v6097_v45 = vpop.eup %6096  ;;  %4196 = vmatmul.mubr.bf16.gmra.mrb[172].mxu0 %v3523_v55  ;;  %v1784_v7 = vadd.f32 %v8509_v43, %v10712_v54  ;;  %v3142_v36 = vadd.f32 1.0, %v6095_v23  ;;  %v2137_v53 = vmul.f32 0.5, %v1969_v63  ;;  %6110 = verf.f32 %v2394_v34  ;;  %v8724_v55 = vpop.f32.mrb[84].mxu0 }
 0x374   : > { %v3532_v41 = vpack.c.bf16 %v10737_v37, %v10736_v18  ;;  %4357 = vmatmul.mubr.bf16.gmra.mrb[172].mxu1 %v3525_v57  ;;  %v6099_v48 = vpop.eup %6098  ;;  %v1977_v20 = vadd.f32 %v8516_v13, %v10720_v4  ;;  %v8716_v24 = vmul.f32 0.5, %v1778_v5  ;;  %v8718_v37 = vmul.f32 0.5, %v1971_v30  ;;  %v8733_v5 = vpop.f32.mrb[84].mxu1 }
 0x375   : > { %4364 = vmatprep.mubr.bf16.mxu1 %v3534_v42  ;;  %v2399_v11 = vmul.f32 0.70710677, %v1782_v28  ;;  %v8722_v0 = vadd.f32 %v8518_v15, %v10710_v33  ;;  %v6101_v43 = vpop.eup %6100  ;;  %v8727_v63 = vmul.f32 %v3141_v8, %v8626_v31  ;;  %v2401_v39 = vmul.f32 0.70710677, %v1975_v17  ;;  %v8735_v30 = vpop.f32.mrb[85].mxu0 }
 0x376   : > { %4203 = vmatprep.mubr.bf16.mxu0 %v3532_v41  ;;  %v2895_v41 = vadd.f32 1.0, %v6097_v45  ;;  %v8731_v13 = vadd.f32 %v8522_v49, %v10711_v35  ;;  %v8738_v34 = vmul.f32 %v3140_v9, %v8632_v50  ;;  %v2897_v15 = vadd.f32 1.0, %v6099_v48  ;;  %v8740_v23 = vpop.f32.mrb[85].mxu1  ;;  %v8742_v31 = vpop.f32.mrb[86].mxu0 }
 0x377   : > { %6112 = verf.f32 %v2399_v11  ;;  %v2400_v42 = vmul.f32 0.70710677, %v1784_v7  ;;  %10739 = vst [vmem:[#allocation21_spill] sm:$0xff] %v8740_v23  ;;  %10740 = vst [vmem:[#allocation17_spill] sm:$0xff] %v8742_v31  ;;  %v8745_v58 = vmul.f32 %v3142_v36, %v8634_v1  ;;  %v8747_v49 = vmul.f32 0.5, %v1782_v28  ;;  %v8749_v57 = vpop.f32.mrb[86].mxu1 }
 0x378   : > { %v6103_v45 = vpop.eup %6102  ;;  %6114 = verf.f32 %v2401_v39  ;;  %v2402_v26 = vmul.f32 0.70710677, %v1977_v20  ;;  %10741 = vst [vmem:[#allocation64_spill] sm:$0xff] %v8749_v57  ;;  %v8751_v8 = vpop.f32.mrb[87].mxu0  ;;  %v2896_v50 = vadd.f32 1.0, %v6101_v43  ;;  %v8757_v31 = vmul.f32 %v2895_v41, %v8653_v52  ;;  %v10745_v41 = vld [vmem:[#allocation31_spill] sm:$0xff] }
 0x379   : > { %10742 = vst [vmem:[#allocation65_spill] sm:$0xff] %v8751_v8  ;;  %v2903_v18 = vadd.f32 1.0, %v6103_v45  ;;  %6116 = verf.f32 %v2400_v42  ;;  %v2407_v9 = vmul.f32 0.70710677, %v8722_v0  ;;  %v8754_v48 = vpop.f32.mrb[87].mxu1  ;;  %v8759_v1 = vmul.f32 0.5, %v1975_v17 }
 0x37a   : > { %10743 = vst [vmem:[#allocation60_spill] sm:$0xff] %v8754_v48  ;;  %v6105_v11 = vpop.eup %6104  ;;  %v8761_v28 = vmul.f32 0.5, %v1784_v7  ;;  %v2409_v36 = vmul.f32 0.70710677, %v8731_v13  ;;  %v8765_v8 = vmul.f32 %v2897_v15, %v8655_v44  ;;  %v1788_v45 = vadd.f32 %v8524_v19, %v10712_v54  ;;  %v10744_v17 = vld [vmem:[#allocation54_spill] sm:$0xff]  ;;  %v10746_v57 = vld [vmem:[#allocation41_spill] sm:$0xff] }
 0x37b   : > { %v6107_v39 = vpop.eup %6106  ;;  %v8768_v43 = vmul.f32 %v2903_v18, %v8689_v6  ;;  %v2905_v42 = vadd.f32 1.0, %v6105_v11  ;;  %v8772_v52 = vmul.f32 0.5, %v1977_v20  ;;  %6118 = verf.f32 %v2402_v26  ;;  %v8785_v19 = vpop.f32.mrb[88].mxu0 }
 0x37c   : > { %v6109_v48 = vpop.eup %6108  ;;  %v1981_v7 = vadd.f32 %v10744_v17, %v10720_v4  ;;  %v3531_v23 = vpack.c.bf16 %v10746_v57, %v10745_v41  ;;  %v8779_v44 = vmul.f32 %v2896_v50, %v8670_v2  ;;  %6120 = verf.f32 %v2407_v9  ;;  %10747 = vst [vmem:[#allocation29_spill] sm:$0xff] %v8785_v19  ;;  %v8787_v20 = vpop.f32.mrb[88].mxu1  ;;  %v10750_v41 = vld [vmem:[#allocation35_spill] sm:$0xff]  ;;  %v10752_v9 = vld [vmem:[#allocation57_spill] sm:$0xff] }
 0x37d   : > { %v8783_v15 = vmul.f32 %v2905_v42, %v2137_v53  ;;  %10748 = vst [vmem:[#allocation33_spill] sm:$0xff] %v8787_v20  ;;  %v6111_v26 = vpop.eup %6110  ;;  %v2898_v18 = vadd.f32 1.0, %v6107_v39  ;;  %6122 = verf.f32 %v2409_v36  ;;  %v2408_v11 = vmul.f32 0.70710677, %v1788_v45  ;;  %v8789_v57 = vpop.f32.mrb[89].mxu0  ;;  %v10751_v53 = vld [vmem:[#allocation48_spill] sm:$0xff] }
 0x37e   : > { %v2410_v17 = vmul.f32 0.70710677, %v1981_v7  ;;  %4204 = vmatmul.mubr.bf16.gmra.mrb[176].mxu0 %v3531_v23  ;;  %10749 = vst [vmem:[#allocation37_spill] sm:$0xff] %v8789_v57  ;;  %v2904_v50 = vadd.f32 1.0, %v6109_v48  ;;  %v3533_v42 = vpack.c.bf16 %v10751_v53, %v10750_v41  ;;  %v3540_v6 = vpack.c.bf16 %v8552_v14, %v10752_v9  ;;  %v8797_v19 = vpop.f32.mrb[89].mxu1  ;;  %v8799_v20 = vpop.f32.mrb[90].mxu0 }
 0x37f   : > { %10753 = vst [vmem:[#allocation23_spill] sm:$0xff] %v8797_v19  ;;  %10754 = vst [vmem:[#allocation22_spill] sm:$0xff] %v8799_v20  ;;  %6124 = verf.f32 %v2408_v11  ;;  %v3542_v23 = vpack.c.bf16 %v8559_v40, %v8535_v32  ;;  %v1792_v36 = vadd.f32 %v8554_v21, %v10710_v33  ;;  %v1985_v48 = vadd.f32 %v8556_v22, %v10711_v35  ;;  %v8807_v39 = vpop.f32.mrb[90].mxu1  ;;  %v8809_v41 = vpop.f32.mrb[91].mxu0 }
 0x380   : > { %10755 = vst [vmem:[#allocation32_spill] sm:$0xff] %v8807_v39  ;;  %10756 = vst [vmem:[#allocation36_spill] sm:$0xff] %v8809_v41  ;;  %v2906_v14 = vadd.f32 1.0, %v6111_v26  ;;  %6126 = verf.f32 %v2410_v17  ;;  %4365 = vmatmul.mubr.bf16.gmra.mrb[176].mxu1 %v3533_v42  ;;  %4211 = vmatprep.mubr.bf16.mxu0 %v3540_v6  ;;  %v1794_v11 = vadd.f32 %v8561_v47, %v10712_v54  ;;  %v8815_v40 = vpop.f32.mrb[91].mxu1  ;;  %v8821_v9 = vmul.f32 0.5, %v8722_v0 }
 0x381   : > { %v6113_v53 = vpop.eup %6112  ;;  %v1987_v32 = vadd.f32 %v8563_v16, %v10720_v4  ;;  %10757 = vst [vmem:[#allocation45_spill] sm:$0xff] %v8815_v40  ;;  %v8818_v22 = vmul.f32 %v2898_v18, %v8682_v62  ;;  %v8824_v26 = vmul.f32 0.5, %v8731_v13  ;;  %4372 = vmatprep.mubr.bf16.mxu1 %v3542_v23  ;;  %v2415_v6 = vmul.f32 0.70710677, %v1792_v36 }
 0x382   : > { %v6115_v21 = vpop.eup %6114  ;;  %v2911_v42 = vadd.f32 1.0, %v6113_v53  ;;  %v2417_v47 = vmul.f32 0.70710677, %v1985_v48  ;;  %v2416_v2 = vmul.f32 0.70710677, %v1794_v11  ;;  %v1796_v16 = vadd.f32 %v8567_v59, %v10710_v33 }
 0x383   : > { %v6117_v17 = vpop.eup %6116  ;;  %v8829_v40 = vmul.f32 %v2904_v50, %v8716_v24  ;;  %v2913_v62 = vadd.f32 1.0, %v6115_v21  ;;  %v8831_v18 = vmul.f32 0.5, %v1788_v45  ;;  %6128 = verf.f32 %v2415_v6  ;;  %v8838_v53 = vpop.f32.mrb[92].mxu0 }
 0x384   : > { %v8834_v0 = vmul.f32 %v2906_v14, %v8718_v37  ;;  %v8836_v13 = vmul.f32 0.5, %v1981_v7  ;;  %6130 = verf.f32 %v2417_v47  ;;  %v2418_v23 = vmul.f32 0.70710677, %v1987_v32  ;;  %10758 = vst [vmem:[#allocation30_spill] sm:$0xff] %v8838_v53  ;;  %v8840_v41 = vpop.f32.mrb[92].mxu1  ;;  %v8846_v45 = vpop.f32.mrb[93].mxu0 }
 0x385   : > { %10759 = vst [vmem:[#allocation25_spill] sm:$0xff] %v8840_v41  ;;  %v6119_v39 = vpop.eup %6118  ;;  %v2912_v59 = vadd.f32 1.0, %v6117_v17  ;;  %v8842_v20 = vmul.f32 0.5, %v1792_v36  ;;  %v8844_v24 = vmul.f32 0.5, %v1985_v48  ;;  %6132 = verf.f32 %v2416_v2  ;;  %10760 = vst [vmem:[#allocation34_spill] sm:$0xff] %v8846_v45  ;;  %v8848_v50 = vpop.f32.mrb[93].mxu1 }
 0x386   : > { %10761 = vst [vmem:[#allocation24_spill] sm:$0xff] %v8848_v50  ;;  %v6121_v37 = vpop.eup %6120  ;;  %v8851_v7 = vmul.f32 %v2911_v42, %v8747_v49  ;;  %v8853_v14 = vmul.f32 0.5, %v1794_v11  ;;  %v8855_v21 = vmul.f32 0.5, %v1987_v32  ;;  %v2423_v6 = vmul.f32 0.70710677, %v1796_v16  ;;  %v8857_v47 = vpop.f32.mrb[94].mxu0 }
 0x387   : > { %10763 = vst [vmem:[#allocation52_spill] sm:$0xff] %v8857_v47  ;;  %v8859_v36 = vpop.f32.mrb[94].mxu1  ;;  %v6123_v48 = vpop.eup %6122  ;;  %v8862_v2 = vmul.f32 %v2913_v62, %v8759_v1  ;;  %v1989_v17 = vadd.f32 %v8569_v27, %v10711_v35  ;;  %v1798_v49 = vadd.f32 %v8577_v25, %v10712_v54  ;;  %v10766_v11 = vld [vmem:[#allocation61_spill] sm:$0xff]  ;;  %v2914_v47 = vadd.f32 1.0, %v6119_v39  ;;  %v10770_v45 = vld [vmem:[#allocation58_spill] sm:$0xff]  ;;  %v10772_v62 = vld [vmem:[#allocation55_spill] sm:$0xff] }
 0x388   : > { %10762 = vst [vmem:[#allocation40_spill] sm:$0xff] %v8851_v7  ;;  %10764 = vst [vmem:[#allocation44_spill] sm:$0xff] %v8859_v36  ;;  %v1991_v42 = vadd.f32 %v10766_v11, %v10720_v4  ;;  %v8870_v32 = vpop.f32.mrb[95].mxu0  ;;  %v8872_v50 = vpop.f32.mrb[95].mxu1  ;;  %6134 = verf.f32 %v2418_v23  ;;  %v10769_v36 = vld [vmem:[#allocation53_spill] sm:$0xff]  ;;  %v10771_v1 = vld [vmem:[#allocation50_spill] sm:$0xff]  ;;  %v8879_v27 = vmul.f32 %v2912_v59, %v8761_v28  ;;  %v3548_v39 = vpack.c.bf16 %v8648_v3, %v8596_v38 }
 0x389   : > { %10765 = vst [vmem:[#allocation54_spill] sm:$0xff] %v8862_v2  ;;  %10767 = vst [vmem:[#allocation31_spill] sm:$0xff] %v8870_v32  ;;  %v3539_v41 = vpack.c.bf16 %v10770_v45, %v10769_v36  ;;  %v3541_v53 = vpack.c.bf16 %v10772_v62, %v10771_v1  ;;  %v6125_v2 = vpop.eup %6124  ;;  %6136 = verf.f32 %v2423_v6  ;;  %v2425_v25 = vmul.f32 0.70710677, %v1989_v17 }
 0x38a   : > { %10768 = vst [vmem:[#allocation41_spill] sm:$0xff] %v8872_v50  ;;  %v2424_v7 = vmul.f32 0.70710677, %v1798_v49  ;;  %v6127_v11 = vpop.eup %6126  ;;  %v2919_v19 = vadd.f32 1.0, %v6121_v37  ;;  %v2921_v32 = vadd.f32 1.0, %v6123_v48  ;;  %v2920_v23 = vadd.f32 1.0, %v6125_v2 }
 0x38b   : > { %v2426_v57 = vmul.f32 0.70710677, %v1991_v42  ;;  %4212 = vmatmul.mubr.bf16.gmra.mrb[180].mxu0 %v3539_v41  ;;  %4373 = vmatmul.mubr.bf16.gmra.mrb[180].mxu1 %v3541_v53  ;;  %6138 = verf.f32 %v2425_v25  ;;  %v3550_v45 = vpack.c.bf16 %v8651_v51, %v8601_v56  ;;  %v1802_v28 = vadd.f32 %v8611_v61, %v10710_v33  ;;  %v10773_v41 = vld [vmem:[#allocation62_spill] sm:$0xff]  ;;  %v8891_v6 = vpop.f32.mrb[96].mxu0  ;;  %v8893_v38 = vpop.f32.mrb[96].mxu1  ;;  %v10780_v25 = vld [vmem:[#allocation59_spill] sm:$0xff] }
 0x38c   : > { %v2922_v59 = vadd.f32 1.0, %v6127_v11  ;;  %6140 = verf.f32 %v2424_v7  ;;  %4219 = vmatprep.mubr.bf16.mxu0 %v3548_v39  ;;  %v1995_v37 = vadd.f32 %v8613_v29, %v10711_v35  ;;  %v1804_v53 = vadd.f32 %v10773_v41, %v10712_v54  ;;  %10774 = vst [vmem:[#allocation35_spill] sm:$0xff] %v8891_v6  ;;  %10775 = vst [vmem:[#allocation48_spill] sm:$0xff] %v8893_v38  ;;  %v8900_v51 = vpop.f32.mrb[97].mxu0  ;;  %v8902_v7 = vpop.f32.mrb[97].mxu1 }
 0x38d   : > { %v6129_v3 = vpop.eup %6128  ;;  %v8896_v36 = vmul.f32 %v2914_v47, %v8772_v52  ;;  %v8898_v56 = vmul.f32 0.5, %v1796_v16  ;;  %6142 = verf.f32 %v2426_v57  ;;  %4380 = vmatprep.mubr.bf16.mxu1 %v3550_v45  ;;  %v2431_v61 = vmul.f32 0.70710677, %v1802_v28  ;;  %10776 = vst [vmem:[#allocation57_spill] sm:$0xff] %v8900_v51  ;;  %10777 = vst [vmem:[#allocation61_spill] sm:$0xff] %v8902_v7  ;;  %v8912_v47 = vpop.f32.mrb[98].mxu0 }
 0x38e   : > { %v6131_v29 = vpop.eup %6130  ;;  %v8905_v48 = vmul.f32 %v2919_v19, %v8821_v9  ;;  %v8908_v2 = vmul.f32 %v2921_v32, %v8824_v26  ;;  %v8910_v1 = vmul.f32 0.5, %v1989_v17  ;;  %v2433_v52 = vmul.f32 0.70710677, %v1995_v37  ;;  %10779 = vst [vmem:[#allocation58_spill] sm:$0xff] %v8912_v47  ;;  %v8918_v39 = vpop.f32.mrb[98].mxu1  ;;  %v10790_v7 = vld [vmem:[#allocation27_spill] sm:$0xff] }
 0x38f   : > { %v6133_v16 = vpop.eup %6132  ;;  %v8914_v57 = vmul.f32 0.5, %v1798_v49  ;;  %6144 = verf.f32 %v2431_v61  ;;  %v2432_v62 = vmul.f32 0.70710677, %v1804_v53  ;;  %v1997_v11 = vadd.f32 %v10780_v25, %v10720_v4  ;;  %10781 = vst [vmem:[#allocation50_spill] sm:$0xff] %v8918_v39  ;;  %v8920_v19 = vpop.f32.mrb[99].mxu0  ;;  %v10783_v49 = vld [vmem:[#allocation28_spill] sm:$0xff] }
 0x390   : > { %10778 = vst [vmem:[#allocation53_spill] sm:$0xff] %v8908_v2  ;;  %10782 = vst [vmem:[#allocation55_spill] sm:$0xff] %v8920_v19  ;;  %v8923_v9 = vmul.f32 %v2920_v23, %v8831_v18  ;;  %v8926_v26 = vmul.f32 %v2922_v59, %v8836_v13  ;;  %v8928_v17 = vmul.f32 0.5, %v1991_v42  ;;  %v1806_v32 = vadd.f32 %v10783_v49, %v10710_v33  ;;  %v8932_v45 = vpop.f32.mrb[99].mxu1  ;;  %v10785_v59 = vld [vmem:[#allocation16_spill] sm:$0xff] }
 0x391   : > { %10784 = vst [vmem:[#allocation62_spill] sm:$0xff] %v8932_v45  ;;  %v2927_v41 = vadd.f32 1.0, %v6129_v3  ;;  %v2929_v61 = vadd.f32 1.0, %v6131_v29  ;;  %v8934_v25 = vmul.f32 0.5, %v1802_v28  ;;  %6146 = verf.f32 %v2433_v52  ;;  %v10786_v45 = vld [vmem:[#allocation42_spill] sm:$0xff]  ;;  %v10787_v28 = vld [vmem:[#allocation43_spill] sm:$0xff] }
 0x392   : > { %v6135_v39 = vpop.eup %6134  ;;  %v2928_v19 = vadd.f32 1.0, %v6133_v16  ;;  %v8936_v47 = vmul.f32 0.5, %v1995_v37  ;;  %6148 = verf.f32 %v2432_v62  ;;  %v2434_v18 = vmul.f32 0.70710677, %v1997_v11  ;;  %v10788_v52 = vld [vmem:[#allocation63_spill] sm:$0xff]  ;;  %v10789_v16 = vld [vmem:[#allocation26_spill] sm:$0xff] }
 0x393   : > { %v6137_v13 = vpop.eup %6136  ;;  %v8938_v23 = vmul.f32 0.5, %v1804_v53  ;;  %v2439_v42 = vmul.f32 0.70710677, %v1806_v32  ;;  %v1999_v49 = vadd.f32 %v10785_v59, %v10711_v35  ;;  %v1808_v3 = vadd.f32 %v10786_v45, %v10712_v54  ;;  %v10791_v62 = vld [vmem:[#allocation38_spill] sm:$0xff]  ;;  %v8950_v38 = vpop.f32.mrb[100].mxu0 }
 0x394   : > { %6150 = verf.f32 %v2434_v18  ;;  %v2001_v29 = vadd.f32 %v10787_v28, %v10720_v4  ;;  %v3547_v37 = vpack.c.bf16 %v10789_v16, %v10788_v52  ;;  %v3549_v51 = vpack.c.bf16 %v10791_v62, %v10790_v7  ;;  %v8952_v53 = vpop.f32.mrb[100].mxu1  ;;  %v8960_v28 = vpop.f32.mrb[101].mxu0 }
 0x395   : > { %10792 = vst [vmem:[#allocation59_spill] sm:$0xff] %v8952_v53  ;;  %v6139_v6 = vpop.eup %6138  ;;  %v8955_v59 = vmul.f32 %v2927_v41, %v8842_v20  ;;  %v8958_v45 = vmul.f32 %v2929_v61, %v8844_v24  ;;  %v2930_v18 = vadd.f32 1.0, %v6135_v39  ;;  %v2441_v50 = vmul.f32 0.70710677, %v1999_v49  ;;  %10793 = vst [vmem:[#allocation28_spill] sm:$0xff] %v8960_v28  ;;  %v8962_v2 = vpop.f32.mrb[101].mxu1 }
 0x396   : > { %10794 = vst [vmem:[#allocation16_spill] sm:$0xff] %v8962_v2  ;;  %v6141_v52 = vpop.eup %6140  ;;  %v8965_v7 = vmul.f32 %v2928_v19, %v8853_v14  ;;  %v2935_v16 = vadd.f32 1.0, %v6137_v13  ;;  %v8967_v62 = vmul.f32 0.5, %v1997_v11  ;;  %v2440_v53 = vmul.f32 0.70710677, %v1808_v3  ;;  %4220 = vmatmul.mubr.bf16.gmra.mrb[184].mxu0 %v3547_v37  ;;  %4381 = vmatmul.mubr.bf16.gmra.mrb[184].mxu1 %v3549_v51  ;;  %v8969_v20 = vpop.f32.mrb[102].mxu0 }
 0x397   : > { %10795 = vst [vmem:[#allocation42_spill] sm:$0xff] %v8969_v20  ;;  %v6143_v24 = vpop.eup %6142  ;;  %v8971_v41 = vmul.f32 0.5, %v1806_v32  ;;  %6152 = verf.f32 %v2439_v42  ;;  %v2442_v39 = vmul.f32 0.70710677, %v2001_v29  ;;  %v3556_v61 = vpack.c.bf16 %v8738_v34, %v8680_v10  ;;  %v8975_v2 = vpop.f32.mrb[102].mxu1  ;;  %v10799_v42 = vld [vmem:[#allocation39_spill] sm:$0xff] }
 0x398   : > { %10796 = vst [vmem:[#allocation43_spill] sm:$0xff] %v8975_v2  ;;  %v8977_v14 = vpop.f32.mrb[103].mxu0  ;;  %v2937_v19 = vadd.f32 1.0, %v6139_v6  ;;  %v2936_v11 = vadd.f32 1.0, %v6141_v52  ;;  %6154 = verf.f32 %v2441_v50  ;;  %v3558_v51 = vpack.c.bf16 %v8745_v58, %v8687_v12  ;;  %v8981_v13 = vpop.f32.mrb[103].mxu1  ;;  %v10800_v10 = vld [vmem:[#allocation49_spill] sm:$0xff] }
 0x399   : > { %10797 = vst [vmem:[#allocation63_spill] sm:$0xff] %v8977_v14  ;;  %10798 = vst [vmem:[#allocation26_spill] sm:$0xff] %v8981_v13  ;;  %v6145_v37 = vpop.eup %6144  ;;  %v2938_v32 = vadd.f32 1.0, %v6143_v24  ;;  %6156 = verf.f32 %v2440_v53  ;;  %4227 = vmatprep.mubr.bf16.mxu0 %v3556_v61  ;;  %v1812_v20 = vadd.f32 %v10799_v42, %v10710_v33  ;;  %v2005_v34 = vadd.f32 %v10800_v10, %v10711_v35  ;;  %v10801_v12 = vld [vmem:[#allocation56_spill] sm:$0xff]  ;;  %v10802_v6 = vld [vmem:[#allocation51_spill] sm:$0xff] }
 0x39a   : > { %v8988_v14 = vmul.f32 %v2930_v18, %v8855_v21  ;;  %v8991_v50 = vmul.f32 %v2935_v16, %v8898_v56  ;;  %4388 = vmatprep.mubr.bf16.mxu1 %v3558_v51  ;;  %v1814_v58 = vadd.f32 %v10801_v12, %v10712_v54  ;;  %v2007_v53 = vadd.f32 %v10802_v6, %v10720_v4 }
 0x39b   : > { %v6147_v52 = vpop.eup %6146  ;;  %v8997_v24 = vmul.f32 0.5, %v1999_v49  ;;  %v8999_v61 = vmul.f32 0.5, %v1808_v3  ;;  %6158 = verf.f32 %v2442_v39  ;;  %v2447_v42 = vmul.f32 0.70710677, %v1812_v20  ;;  %v9006_v51 = vpop.f32.mrb[104].mxu0 }
 0x39c   : > { %v6149_v10 = vpop.eup %6148  ;;  %v9002_v21 = vmul.f32 %v2937_v19, %v8910_v1  ;;  %v2943_v56 = vadd.f32 1.0, %v6145_v37  ;;  %v9004_v18 = vmul.f32 0.5, %v2001_v29  ;;  %v2449_v16 = vmul.f32 0.70710677, %v2005_v34  ;;  %10803 = vst [vmem:[#allocation27_spill] sm:$0xff] %v9006_v51  ;;  %v9008_v12 = vpop.f32.mrb[104].mxu1 }
 0x39d   : > { %10804 = vst [vmem:[#allocation38_spill] sm:$0xff] %v9008_v12  ;;  %v9011_v6 = vmul.f32 %v2936_v11, %v8914_v57  ;;  %v9014_v49 = vmul.f32 %v2938_v32, %v8928_v17  ;;  %6160 = verf.f32 %v2447_v42  ;;  %v2448_v3 = vmul.f32 0.70710677, %v1814_v58  ;;  %v9016_v39 = vpop.f32.mrb[105].mxu0  ;;  %v9018_v1 = vpop.f32.mrb[105].mxu1  ;;  %v10807_v51 = vld [vmem:[#allocation18_spill] sm:$0xff] }
 0x39e   : > { %10805 = vst [vmem:[#allocation39_spill] sm:$0xff] %v9016_v39  ;;  %10806 = vst [vmem:[#allocation49_spill] sm:$0xff] %v9018_v1  ;;  %v6151_v19 = vpop.eup %6150  ;;  %v2945_v29 = vadd.f32 1.0, %v6147_v52  ;;  %6162 = verf.f32 %v2449_v16  ;;  %v2450_v37 = vmul.f32 0.70710677, %v2007_v53  ;;  %v1816_v13 = vadd.f32 %v10807_v51, %v10710_v33  ;;  %v9022_v12 = vpop.f32.mrb[106].mxu0 }
 0x39f   : > { %10808 = vst [vmem:[#allocation56_spill] sm:$0xff] %v9022_v12  ;;  %v9024_v57 = vpop.f32.mrb[106].mxu1  ;;  %v2944_v11 = vadd.f32 1.0, %v6149_v10  ;;  %6164 = verf.f32 %v2448_v3  ;;  %v10810_v17 = vld [vmem:[#allocation19_spill] sm:$0xff]  ;;  %v10811_v42 = vld [vmem:[#allocation20_spill] sm:$0xff]  ;;  %v9030_v1 = vpop.f32.mrb[107].mxu0  ;;  %v9035_v16 = vmul.f32 %v2943_v56, %v8934_v25 }
 0x3a0   : > { %10809 = vst [vmem:[#allocation51_spill] sm:$0xff] %v9024_v57  ;;  %v2009_v32 = vadd.f32 %v10810_v17, %v10711_v35  ;;  %v1818_v39 = vadd.f32 %v10811_v42, %v10712_v54  ;;  %10812 = vst [vmem:[#allocation18_spill] sm:$0xff] %v9030_v1  ;;  %v9032_v52 = vpop.f32.mrb[107].mxu1  ;;  %v9037_v51 = vmul.f32 0.5, %v1812_v20  ;;  %v9039_v12 = vmul.f32 0.5, %v2005_v34 }
 0x3a1   : > { %10813 = vst [vmem:[#allocation19_spill] sm:$0xff] %v9032_v52  ;;  %v2455_v57 = vmul.f32 0.70710677, %v1816_v13  ;;  %v6153_v10 = vpop.eup %6152  ;;  %v2946_v3 = vadd.f32 1.0, %v6151_v19  ;;  %v9041_v2 = vmul.f32 0.5, %v1814_v58  ;;  %6166 = verf.f32 %v2450_v37  ;;  %v10814_v58 = vld [vmem:[#allocation46_spill] sm:$0xff] }
 0x3a2   : > { %v2457_v17 = vmul.f32 0.70710677, %v2009_v32  ;;  %v6155_v28 = vpop.eup %6154  ;;  %v9044_v42 = vmul.f32 %v2945_v29, %v8936_v47  ;;  %v9046_v1 = vmul.f32 0.5, %v2007_v53  ;;  %v2456_v25 = vmul.f32 0.70710677, %v1818_v39  ;;  %v10815_v47 = vld [vmem:[#allocation47_spill] sm:$0xff] }
 0x3a3   : > { %6168 = verf.f32 %v2455_v57  ;;  %v6157_v56 = vpop.eup %6156  ;;  %v9049_v20 = vmul.f32 %v2944_v11, %v8938_v23  ;;  %v2011_v34 = vadd.f32 %v8702_v60, %v10720_v4  ;;  %v3555_v19 = vpack.c.bf16 %v8696_v46, %v10814_v58  ;;  %v9059_v29 = vpop.f32.mrb[108].mxu0 }
 0x3a4   : > { %6170 = verf.f32 %v2457_v17  ;;  %v2951_v37 = vadd.f32 1.0, %v6153_v10  ;;  %v9055_v52 = vmul.f32 0.5, %v1816_v13  ;;  %v3557_v53 = vpack.c.bf16 %v8727_v63, %v10815_v47  ;;  %10816 = vst [vmem:[#allocation20_spill] sm:$0xff] %v9059_v29  ;;  %v9061_v57 = vpop.f32.mrb[108].mxu1  ;;  %v9068_v13 = vpop.f32.mrb[109].mxu0 }
 0x3a5   : > { %6172 = verf.f32 %v2456_v25  ;;  %10817 = vst [vmem:[#allocation46_spill] sm:$0xff] %v9061_v57  ;;  %v6159_v23 = vpop.eup %6158  ;;  %v9064_v11 = vmul.f32 %v2946_v3, %v8967_v62  ;;  %v2953_v17 = vadd.f32 1.0, %v6155_v28  ;;  %v2458_v60 = vmul.f32 0.70710677, %v2011_v34  ;;  %4228 = vmatmul.mubr.bf16.gmra.mrb[188].mxu0 %v3555_v19  ;;  %10818 = vst [vmem:[#allocation47_spill] sm:$0xff] %v9068_v13  ;;  %v9070_v10 = vpop.f32.mrb[109].mxu1 }
 0x3a6   : > { %v3440_v46 = vpack.c.bf16 %v8829_v40, %v8779_v44  ;;  %10819 = vst [vmem:[#allocation66_spill] sm:$0xff] %v9070_v10  ;;  %v2952_v25 = vadd.f32 1.0, %v6157_v56  ;;  %4389 = vmatmul.mubr.bf16.gmra.mrb[188].mxu1 %v3557_v53  ;;  %v3442_v63 = vpack.c.bf16 %v8834_v0, %v8818_v22  ;;  %v1822_v58 = vadd.f32 %v8724_v55, %v10710_v33  ;;  %v9078_v62 = vpop.f32.mrb[110].mxu0  ;;  %v9080_v3 = vpop.f32.mrb[110].mxu1  ;;  %v10822_v22 = vld [vmem:[#allocation21_spill] sm:$0xff] }
 0x3a7   : > { %v2015_v28 = vadd.f32 %v8733_v5, %v10711_v35  ;;  %10820 = vst [vmem:[#allocation67_spill] sm:$0xff] %v9078_v62  ;;  %10821 = vst [vmem:[#allocation68_spill] sm:$0xff] %v9080_v3  ;;  %v6161_v44 = vpop.eup %6160  ;;  %v9082_v40 = vmul.f32 0.5, %v2009_v32  ;;  %6174 = verf.f32 %v2458_v60  ;;  %v1824_v56 = vadd.f32 %v8735_v30, %v10712_v54  ;;  %v9088_v19 = vpop.f32.mrb[111].mxu0  ;;  %v10825_v32 = vld [vmem:[#allocation17_spill] sm:$0xff] }
 0x3a8   : > { %4429 = vmatprep.mubr.bf16.mxu0 %v3440_v46  ;;  %v2017_v0 = vadd.f32 %v10822_v22, %v10720_v4  ;;  %10823 = vst [vmem:[#allocation21_spill] sm:$0xff] %v9088_v19  ;;  %v9090_v55 = vpop.f32.mrb[111].mxu1  ;;  %v6163_v5 = vpop.eup %6162  ;;  %v2954_v47 = vadd.f32 1.0, %v6159_v23  ;;  %v9092_v53 = vmul.f32 0.5, %v1818_v39  ;;  %4590 = vmatprep.mubr.bf16.mxu1 %v3442_v63  ;;  %v2463_v3 = vmul.f32 0.70710677, %v1822_v58 }
 0x3a9   : > { %10824 = vst [vmem:[#allocation69_spill] sm:$0xff] %v9090_v55  ;;  %v9096_v60 = vadd.f32 %v10825_v32, %v10710_v33  ;;  %v6165_v46 = vpop.eup %6164  ;;  %v9099_v30 = vmul.f32 %v2951_v37, %v8971_v41  ;;  %v9102_v22 = vmul.f32 %v2953_v17, %v8997_v24  ;;  %v2465_v19 = vmul.f32 0.70710677, %v2015_v28 }
 0x3aa   : > { %v2464_v62 = vmul.f32 0.70710677, %v1824_v56  ;;  %v9105_v55 = vmul.f32 %v2952_v25, %v8999_v61  ;;  %v2959_v39 = vadd.f32 1.0, %v6161_v44  ;;  %v9107_v23 = vmul.f32 0.5, %v2011_v34  ;;  %v10828_v44 = vld [vmem:[#allocation64_spill] sm:$0xff] }
 0x3ab   : > { %6176 = verf.f32 %v2463_v3  ;;  %v6167_v63 = vpop.eup %6166  ;;  %v2961_v10 = vadd.f32 1.0, %v6163_v5  ;;  %v2960_v32 = vadd.f32 1.0, %v6165_v46  ;;  %v2466_v13 = vmul.f32 0.70710677, %v2017_v0  ;;  %v9115_v61 = vpop.f32.mrb[112].mxu0  ;;  %v10833_v46 = vld [vmem:[#allocation60_spill] sm:$0xff] }
 0x3ac   : > { %6178 = verf.f32 %v2465_v19  ;;  %v9110_v41 = vmul.f32 %v2954_v47, %v9004_v18  ;;  %v9112_v24 = vmul.f32 0.5, %v1822_v58  ;;  %v2471_v37 = vmul.f32 0.70710677, %v9096_v60  ;;  %10826 = vst [vmem:[#allocation17_spill] sm:$0xff] %v9115_v61  ;;  %v9117_v17 = vpop.f32.mrb[112].mxu1  ;;  %v9128_v58 = vpop.f32.mrb[113].mxu0 }
 0x3ad   : > { %v6169_v57 = vpop.eup %6168  ;;  %6180 = verf.f32 %v2464_v62  ;;  %10827 = vst [vmem:[#allocation70_spill] sm:$0xff] %v9117_v17  ;;  %v9119_v25 = vmul.f32 0.5, %v2015_v28  ;;  %v9121_v3 = vmul.f32 0.5, %v1824_v56  ;;  %v2019_v19 = vadd.f32 %v10828_v44, %v10711_v35  ;;  %10830 = vst [vmem:[#allocation64_spill] sm:$0xff] %v9128_v58  ;;  %v9130_v62 = vpop.f32.mrb[113].mxu1  ;;  %v10832_v56 = vld [vmem:[#allocation65_spill] sm:$0xff] }
 0x3ae   : > { %v6171_v34 = vpop.eup %6170  ;;  %6182 = verf.f32 %v2466_v13  ;;  %v10829_v18 = vpack.c.bf16 %v8768_v43, %v8757_v31  ;;  %10831 = vst [vmem:[#allocation71_spill] sm:$0xff] %v9130_v62  ;;  %v9133_v47 = vmul.f32 %v2959_v39, %v9037_v51  ;;  %v9135_v28 = vmul.f32 0.5, %v2017_v0  ;;  %v9144_v43 = vpop.f32.mrb[114].mxu0 }
 0x3af   : > { %v6173_v5 = vpop.eup %6172  ;;  %v1828_v13 = vadd.f32 %v10832_v56, %v10712_v54  ;;  %v2021_v44 = vadd.f32 %v10833_v46, %v10720_v4  ;;  %v10834_v31 = vpack.c.bf16 %v8783_v15, %v8765_v8  ;;  %10835 = vst [vmem:[#allocation65_spill] sm:$0xff] %v9144_v43  ;;  %v9149_v62 = vmul.f32 %v2961_v10, %v9039_v12  ;;  %v9154_v56 = vpop.f32.mrb[115].mxu0 }
 0x3b0   : > { %4430 = vmatmul.mubr.bf16.vlgmr.msra.gmra.mrb[192].mxu0 %v10829_v18  ;;  %v9146_v18 = vpop.f32.mrb[114].mxu1  ;;  %v9152_v51 = vmul.f32 %v2960_v32, %v9041_v2  ;;  %v2962_v0 = vadd.f32 1.0, %v6167_v63  ;;  %v2473_v39 = vmul.f32 0.70710677, %v2019_v19  ;;  %10838 = vst [vmem:[#allocation73_spill] sm:$0xff] %v9154_v56  ;;  %v2967_v46 = vadd.f32 1.0, %v6169_v57 }
 0x3b1   : > { %4591 = vmatmul.mubr.bf16.vlgmr.msra.gmra.mrb[192].mxu1 %v10834_v31  ;;  %10836 = vst [vmem:[#allocation60_spill] sm:$0xff] %v9146_v18  ;;  %10837 = vst [vmem:[#allocation72_spill] sm:$0xff] %v9149_v62  ;;  %v9156_v58 = vpop.f32.mrb[115].mxu1  ;;  %v2969_v17 = vadd.f32 1.0, %v6171_v34  ;;  %6184 = verf.f32 %v2471_v37  ;;  %v2472_v8 = vmul.f32 0.70710677, %v1828_v13  ;;  %v6175_v15 = vpop.eup %6174  ;;  %v3448_v12 = vpack.c.bf16 %v8923_v9, %v8879_v27 }
 0x3b2   : > { %10839 = vst [vmem:[#allocation74_spill] sm:$0xff] %v9156_v58  ;;  %v2968_v31 = vadd.f32 1.0, %v6173_v5  ;;  %6186 = verf.f32 %v2473_v39  ;;  %v2474_v18 = vmul.f32 0.70710677, %v2021_v44  ;;  %v2970_v10 = vadd.f32 1.0, %v6175_v15  ;;  %v10840_v63 = vld [vmem:[#allocation29_spill] sm:$0xff] }
 0x3b3   : > { %6188 = verf.f32 %v2472_v8  ;;  %v3450_v2 = vpack.c.bf16 %v8926_v26, %v8896_v36  ;;  %v1832_v32 = vadd.f32 %v10840_v63, %v10710_v33  ;;  %4437 = vmatprep.mubr.bf16.mxu0 %v3448_v12  ;;  %v10841_v57 = vld [vmem:[#allocation33_spill] sm:$0xff]  ;;  %v10843_v39 = vld [vmem:[#allocation23_spill] sm:$0xff]  ;;  %v9171_v9 = vmul.f32 %v2962_v0, %v9046_v1  ;;  %v9179_v8 = vpop.f32.mrb[116].mxu0  ;;  %v9181_v15 = vpop.f32.mrb[116].mxu1  ;;  %v10847_v0 = vld [vmem:[#allocation22_spill] sm:$0xff] }
 0x3b4   : > { %6190 = verf.f32 %v2474_v18  ;;  %v2025_v37 = vadd.f32 %v10841_v57, %v10711_v35  ;;  %v10842_v34 = vld [vmem:[#allocation37_spill] sm:$0xff]  ;;  %v2027_v58 = vadd.f32 %v10843_v39, %v10720_v4  ;;  %v9174_v36 = vmul.f32 %v2967_v46, %v9055_v52  ;;  %10844 = vst [vmem:[#allocation29_spill] sm:$0xff] %v9179_v8  ;;  %10845 = vst [vmem:[#allocation33_spill] sm:$0xff] %v9181_v15  ;;  %v9190_v46 = vpop.f32.mrb[117].mxu0  ;;  %v9199_v8 = vpop.f32.mrb[117].mxu1 }
 0x3b5   : > { %v1834_v5 = vadd.f32 %v10842_v34, %v10712_v54  ;;  %v6177_v27 = vpop.eup %6176  ;;  %v9177_v26 = vmul.f32 0.5, %v9096_v60  ;;  %4598 = vmatprep.mubr.bf16.mxu1 %v3450_v2  ;;  %v2479_v18 = vmul.f32 0.70710677, %v1832_v32  ;;  %v9184_v63 = vmul.f32 %v2969_v17, %v9082_v40  ;;  %10848 = vst [vmem:[#allocation23_spill] sm:$0xff] %v9190_v46  ;;  %10849 = vst [vmem:[#allocation22_spill] sm:$0xff] %v9199_v8  ;;  %v9201_v40 = vpop.f32.mrb[118].mxu0 }
 0x3b6   : > { %v6179_v12 = vpop.eup %6178  ;;  %v9186_v57 = vmul.f32 0.5, %v2019_v19  ;;  %v2481_v1 = vmul.f32 0.70710677, %v2025_v37  ;;  %v1836_v52 = vadd.f32 %v10847_v0, %v10710_v33  ;;  %v9193_v2 = vmul.f32 %v2968_v31, %v9092_v53  ;;  %10850 = vst [vmem:[#allocation75_spill] sm:$0xff] %v9201_v40  ;;  %v9208_v56 = vpop.f32.mrb[118].mxu1 }
 0x3b7   : > { %10846 = vst [vmem:[#allocation37_spill] sm:$0xff] %v9184_v63  ;;  %v6181_v60 = vpop.eup %6180  ;;  %v9195_v34 = vmul.f32 0.5, %v1828_v13  ;;  %v9197_v39 = vmul.f32 0.5, %v2021_v44  ;;  %v2480_v15 = vmul.f32 0.70710677, %v1834_v5  ;;  %v9204_v19 = vmul.f32 %v2970_v10, %v9107_v23  ;;  %10851 = vst [vmem:[#allocation76_spill] sm:$0xff] %v9208_v56 }
 0x3b8   : > { %v6183_v17 = vpop.eup %6182  ;;  %v9206_v0 = vmul.f32 0.5, %v1832_v32  ;;  %6192 = verf.f32 %v2479_v18  ;;  %v2482_v46 = vmul.f32 0.70710677, %v2027_v58  ;;  %v9210_v53 = vpop.f32.mrb[119].mxu0  ;;  %v2975_v13 = vadd.f32 1.0, %v6177_v27  ;;  %v10854_v32 = vld [vmem:[#allocation32_spill] sm:$0xff] }
 0x3b9   : > { %10852 = vst [vmem:[#allocation77_spill] sm:$0xff] %v9210_v53  ;;  %v2977_v44 = vadd.f32 1.0, %v6179_v12  ;;  %v9212_v31 = vmul.f32 0.5, %v2025_v37  ;;  %6194 = verf.f32 %v2481_v1  ;;  %v9214_v8 = vpop.f32.mrb[119].mxu1  ;;  %v2976_v40 = vadd.f32 1.0, %v6181_v60  ;;  %v10855_v56 = vld [vmem:[#allocation36_spill] sm:$0xff] }
 0x3ba   : > { %10853 = vst [vmem:[#allocation78_spill] sm:$0xff] %v9214_v8  ;;  %v2978_v43 = vadd.f32 1.0, %v6183_v17  ;;  %6196 = verf.f32 %v2480_v15  ;;  %v2487_v23 = vmul.f32 0.70710677, %v1836_v52  ;;  %v2029_v18 = vadd.f32 %v10854_v32, %v10711_v35  ;;  %v10856_v27 = vld [vmem:[#allocation45_spill] sm:$0xff]  ;;  %v10857_v1 = vld [vmem:[#allocation40_spill] sm:$0xff] }
 0x3bb   : > { %v6185_v10 = vpop.eup %6184  ;;  %6198 = verf.f32 %v2482_v46  ;;  %v1838_v61 = vadd.f32 %v10855_v56, %v10712_v54  ;;  %v2031_v12 = vadd.f32 %v10856_v27, %v10720_v4  ;;  %v9222_v53 = vmul.f32 0.5, %v1834_v5  ;;  %v10858_v15 = vld [vmem:[#allocation54_spill] sm:$0xff]  ;;  %v10859_v17 = vld [vmem:[#allocation53_spill] sm:$0xff]  ;;  %v9236_v63 = vpop.f32.mrb[120].mxu0 }
 0x3bc   : > { %v6187_v37 = vpop.eup %6186  ;;  %6200 = verf.f32 %v2487_v23  ;;  %v3447_v60 = vpack.c.bf16 %v8905_v48, %v10857_v1  ;;  %v3449_v8 = vpack.c.bf16 %v10859_v17, %v10858_v15  ;;  %v9229_v29 = vmul.f32 %v2975_v13, %v9112_v24  ;;  %10860 = vst [vmem:[#allocation32_spill] sm:$0xff] %v9236_v63  ;;  %v9248_v13 = vpop.f32.mrb[120].mxu1 }
 0x3bd   : > { %v6189_v46 = vpop.eup %6188  ;;  %v9232_v32 = vmul.f32 %v2977_v44, %v9119_v25  ;;  %v9234_v56 = vmul.f32 0.5, %v2027_v58  ;;  %v2489_v27 = vmul.f32 0.70710677, %v2029_v18  ;;  %v2983_v23 = vadd.f32 1.0, %v6185_v10  ;;  %10861 = vst [vmem:[#allocation36_spill] sm:$0xff] %v9248_v13  ;;  %v9250_v44 = vpop.f32.mrb[121].mxu0 }
 0x3be   : > { %v6191_v5 = vpop.eup %6190  ;;  %v9238_v62 = vmul.f32 0.5, %v1836_v52  ;;  %v2488_v48 = vmul.f32 0.70710677, %v1838_v61  ;;  %v2490_v1 = vmul.f32 0.70710677, %v2031_v12  ;;  %4438 = vmatmul.mubr.bf16.gmra.mrb[196].mxu0 %v3447_v60  ;;  %4599 = vmatmul.mubr.bf16.gmra.mrb[196].mxu1 %v3449_v8  ;;  %v9241_v15 = vmul.f32 %v2976_v40, %v9121_v3  ;;  %10862 = vst [vmem:[#allocation45_spill] sm:$0xff] %v9250_v44 }
 0x3bf   : > { %v9244_v24 = vmul.f32 %v2978_v43, %v9135_v28  ;;  %v2985_v25 = vadd.f32 1.0, %v6187_v37  ;;  %v3456_v58 = vpack.c.bf16 %v9011_v6, %v8965_v7  ;;  %v2984_v52 = vadd.f32 1.0, %v6189_v46  ;;  %v10863_v8 = vld [vmem:[#allocation30_spill] sm:$0xff]  ;;  %v9256_v40 = vpop.f32.mrb[121].mxu1  ;;  %v9258_v28 = vpop.f32.mrb[122].mxu0  ;;  %v10866_v7 = vld [vmem:[#allocation25_spill] sm:$0xff] }
 0x3c0   : > { %6202 = verf.f32 %v2489_v27  ;;  %v3458_v10 = vpack.c.bf16 %v9014_v49, %v8988_v14  ;;  %v1842_v3 = vadd.f32 %v10863_v8, %v10710_v33  ;;  %10864 = vst [vmem:[#allocation40_spill] sm:$0xff] %v9256_v40  ;;  %10865 = vst [vmem:[#allocation54_spill] sm:$0xff] %v9258_v28  ;;  %v2986_v43 = vadd.f32 1.0, %v6191_v5  ;;  %v10867_v37 = vld [vmem:[#allocation34_spill] sm:$0xff]  ;;  %v9264_v17 = vpop.f32.mrb[122].mxu1  ;;  %v9266_v46 = vpop.f32.mrb[123].mxu0 }
 0x3c1   : > { %6204 = verf.f32 %v2488_v48  ;;  %4445 = vmatprep.mubr.bf16.mxu0 %v3456_v58  ;;  %v2035_v6 = vadd.f32 %v10866_v7, %v10711_v35  ;;  %v1844_v60 = vadd.f32 %v10867_v37, %v10712_v54  ;;  %10868 = vst [vmem:[#allocation53_spill] sm:$0xff] %v9264_v17  ;;  %10869 = vst [vmem:[#allocation30_spill] sm:$0xff] %v9266_v46  ;;  %v10870_v5 = vld [vmem:[#allocation24_spill] sm:$0xff]  ;;  %v9273_v58 = vpop.f32.mrb[123].mxu1  ;;  %v9275_v7 = vmul.f32 0.5, %v2029_v18 }
 0x3c2   : > { %v6193_v14 = vpop.eup %6192  ;;  %v9269_v49 = vmul.f32 %v2983_v23, %v9177_v26  ;;  %6206 = verf.f32 %v2490_v1  ;;  %4606 = vmatprep.mubr.bf16.mxu1 %v3458_v10  ;;  %v2495_v27 = vmul.f32 0.70710677, %v1842_v3  ;;  %v2037_v48 = vadd.f32 %v10870_v5, %v10720_v4  ;;  %10871 = vst [vmem:[#allocation25_spill] sm:$0xff] %v9273_v58 }
 0x3c3   : > { %v6195_v8 = vpop.eup %6194  ;;  %v9277_v37 = vmul.f32 0.5, %v1838_v61  ;;  %v9279_v17 = vmul.f32 0.5, %v2031_v12  ;;  %v2497_v46 = vmul.f32 0.70710677, %v2035_v6  ;;  %v9282_v26 = vmul.f32 %v2985_v25, %v9186_v57  ;;  %v9292_v61 = vpop.f32.mrb[124].mxu0 }
 0x3c4   : > { %v6197_v28 = vpop.eup %6196  ;;  %v9285_v23 = vmul.f32 %v2984_v52, %v9195_v34  ;;  %6208 = verf.f32 %v2495_v27  ;;  %v2496_v1 = vmul.f32 0.70710677, %v1844_v60  ;;  %v9288_v5 = vmul.f32 %v2986_v43, %v9197_v39  ;;  %10873 = vst [vmem:[#allocation24_spill] sm:$0xff] %v9292_v61  ;;  %v9294_v12 = vpop.f32.mrb[124].mxu1  ;;  %v10875_v34 = vld [vmem:[#allocation52_spill] sm:$0xff] }
 0x3c5   : > { %10872 = vst [vmem:[#allocation34_spill] sm:$0xff] %v9282_v26  ;;  %v6199_v10 = vpop.eup %6198  ;;  %v2991_v18 = vadd.f32 1.0, %v6193_v14  ;;  %v9290_v58 = vmul.f32 0.5, %v1842_v3  ;;  %6210 = verf.f32 %v2497_v46  ;;  %10874 = vst [vmem:[#allocation79_spill] sm:$0xff] %v9294_v12  ;;  %v2993_v57 = vadd.f32 1.0, %v6195_v8  ;;  %v9298_v27 = vpop.f32.mrb[125].mxu0 }
 0x3c6   : > { %v6201_v40 = vpop.eup %6200  ;;  %6212 = verf.f32 %v2496_v1  ;;  %v2498_v25 = vmul.f32 0.70710677, %v2037_v48  ;;  %v1846_v52 = vadd.f32 %v10875_v34, %v10710_v33  ;;  %10876 = vst [vmem:[#allocation52_spill] sm:$0xff] %v9298_v27  ;;  %v9300_v44 = vpop.f32.mrb[125].mxu1  ;;  %v2992_v39 = vadd.f32 1.0, %v6197_v28  ;;  %v10878_v3 = vld [vmem:[#allocation44_spill] sm:$0xff] }
 0x3c7   : > { %10877 = vst [vmem:[#allocation80_spill] sm:$0xff] %v9300_v44  ;;  %v9302_v43 = vmul.f32 0.5, %v2035_v6  ;;  %v2039_v46 = vadd.f32 %v10878_v3, %v10711_v35  ;;  %v10879_v14 = vld [vmem:[#allocation31_spill] sm:$0xff]  ;;  %v9308_v61 = vpop.f32.mrb[126].mxu0  ;;  %v9310_v8 = vpop.f32.mrb[126].mxu1  ;;  %v2994_v1 = vadd.f32 1.0, %v6199_v10  ;;  %v9321_v3 = vmul.f32 %v2991_v18, %v9206_v0 }
 0x3c8   : > { %v1848_v12 = vadd.f32 %v10879_v14, %v10712_v54  ;;  %10880 = vst [vmem:[#allocation44_spill] sm:$0xff] %v9308_v61  ;;  %10881 = vst [vmem:[#allocation31_spill] sm:$0xff] %v9310_v8  ;;  %v9312_v13 = vmul.f32 0.5, %v1844_v60  ;;  %v2503_v34 = vmul.f32 0.70710677, %v1846_v52  ;;  %v10882_v27 = vld [vmem:[#allocation41_spill] sm:$0xff]  ;;  %6214 = verf.f32 %v2498_v25 }
 0x3c9   : > { %v2041_v44 = vadd.f32 %v10882_v27, %v10720_v4  ;;  %v9316_v28 = vpop.f32.mrb[127].mxu0  ;;  %v9318_v6 = vpop.f32.mrb[127].mxu1  ;;  %v2999_v63 = vadd.f32 1.0, %v6201_v40  ;;  %v2505_v14 = vmul.f32 0.70710677, %v2039_v46  ;;  %v9324_v8 = vmul.f32 %v2993_v57, %v9212_v31 }
 0x3ca   : > { %10883 = vst [vmem:[#allocation41_spill] sm:$0xff] %v9316_v28  ;;  %10884 = vst [vmem:[#allocation81_spill] sm:$0xff] %v9318_v6  ;;  %v6203_v61 = vpop.eup %6202  ;;  %v9326_v60 = vmul.f32 0.5, %v2037_v48  ;;  %6216 = verf.f32 %v2503_v34  ;;  %v2504_v10 = vmul.f32 0.70710677, %v1848_v12  ;;  %v9329_v27 = vmul.f32 %v2992_v39, %v9222_v53 }
 0x3cb   : > { %v6205_v26 = vpop.eup %6204  ;;  %6218 = verf.f32 %v2505_v14  ;;  %v2506_v6 = vmul.f32 0.70710677, %v2041_v44  ;;  %v3455_v0 = vpack.c.bf16 %v8991_v50, %v8955_v59  ;;  %v9334_v18 = vmul.f32 %v2994_v1, %v9234_v56  ;;  %v10886_v1 = vld [vmem:[#allocation48_spill] sm:$0xff] }
 0x3cc   : > { %v6207_v40 = vpop.eup %6206  ;;  %v9336_v25 = vmul.f32 0.5, %v1846_v52  ;;  %6220 = verf.f32 %v2504_v10  ;;  %v3457_v31 = vpack.c.bf16 %v9002_v21, %v8958_v45  ;;  %v9341_v48 = vmul.f32 %v2999_v63, %v9238_v62  ;;  %v10885_v52 = vld [vmem:[#allocation35_spill] sm:$0xff]  ;;  %v10887_v21 = vld [vmem:[#allocation57_spill] sm:$0xff] }
 0x3cd   : > { %v3001_v53 = vadd.f32 1.0, %v6203_v61  ;;  %4446 = vmatmul.mubr.bf16.gmra.mrb[200].mxu0 %v3455_v0  ;;  %v3464_v57 = vpack.c.bf16 %v9105_v55, %v9049_v20  ;;  %v3466_v59 = vpack.c.bf16 %v9110_v41, %v9064_v11  ;;  %v3000_v56 = vadd.f32 1.0, %v6205_v26  ;;  %v10888_v20 = vld [vmem:[#allocation61_spill] sm:$0xff]  ;;  %v10890_v0 = vld [vmem:[#allocation58_spill] sm:$0xff] }
 0x3ce   : > { %v6209_v50 = vpop.eup %6208  ;;  %4607 = vmatmul.mubr.bf16.gmra.mrb[200].mxu1 %v3457_v31  ;;  %v1852_v39 = vadd.f32 %v10885_v52, %v10710_v33  ;;  %v2045_v45 = vadd.f32 %v10886_v1, %v10711_v35  ;;  %v1854_v62 = vadd.f32 %v10887_v21, %v10712_v54  ;;  %v3002_v61 = vadd.f32 1.0, %v6207_v40  ;;  %v9357_v55 = vpop.f32.mrb[128].mxu0 }
 0x3cf   : > { %v6211_v63 = vpop.eup %6210  ;;  %v9353_v34 = vmul.f32 0.5, %v2039_v46  ;;  %6222 = verf.f32 %v2506_v6  ;;  %4453 = vmatprep.mubr.bf16.mxu0 %v3464_v57  ;;  %4614 = vmatprep.mubr.bf16.mxu1 %v3466_v59  ;;  %v2047_v11 = vadd.f32 %v10888_v20, %v10720_v4  ;;  %10889 = vst [vmem:[#allocation35_spill] sm:$0xff] %v9357_v55  ;;  %v9359_v26 = vmul.f32 0.5, %v1848_v12  ;;  %v9365_v40 = vpop.f32.mrb[129].mxu0  ;;  %v10892_v59 = vld [vmem:[#allocation50_spill] sm:$0xff] }
 0x3d0   : > { %v6213_v41 = vpop.eup %6212  ;;  %v9361_v14 = vmul.f32 0.5, %v2041_v44  ;;  %v2511_v10 = vmul.f32 0.70710677, %v1852_v39  ;;  %v1856_v31 = vadd.f32 %v10890_v0, %v10710_v33  ;;  %10891 = vst [vmem:[#allocation48_spill] sm:$0xff] %v9365_v40  ;;  %v9368_v46 = vmul.f32 %v3001_v53, %v9275_v7  ;;  %v9374_v12 = vpop.f32.mrb[130].mxu0 }
 0x3d1   : > { %v3007_v6 = vadd.f32 1.0, %v6209_v50  ;;  %v2513_v57 = vmul.f32 0.70710677, %v2045_v45  ;;  %v2049_v52 = vadd.f32 %v10892_v59, %v10711_v35  ;;  %10894 = vst [vmem:[#allocation61_spill] sm:$0xff] %v9374_v12  ;;  %v9377_v44 = vmul.f32 %v3000_v56, %v9277_v37  ;;  %v9381_v40 = vpop.f32.mrb[131].mxu0 }
 0x3d2   : > { %v9372_v1 = vpop.f32.mrb[128].mxu1  ;;  %v3009_v21 = vadd.f32 1.0, %v6211_v63  ;;  %6224 = verf.f32 %v2511_v10  ;;  %v2512_v20 = vmul.f32 0.70710677, %v1854_v62  ;;  %10896 = vst [vmem:[#allocation50_spill] sm:$0xff] %v9381_v40  ;;  %v6215_v7 = vpop.eup %6214  ;;  %v9384_v53 = vmul.f32 %v3002_v61, %v9279_v17 }
 0x3d3   : > { %10893 = vst [vmem:[#allocation57_spill] sm:$0xff] %v9372_v1  ;;  %v9379_v0 = vpop.f32.mrb[129].mxu1  ;;  %v3008_v50 = vadd.f32 1.0, %v6213_v41  ;;  %6226 = verf.f32 %v2513_v57  ;;  %v2514_v59 = vmul.f32 0.70710677, %v2047_v11  ;;  %v9388_v55 = vmul.f32 0.5, %v1852_v39 }
 0x3d4   : > { %10895 = vst [vmem:[#allocation58_spill] sm:$0xff] %v9379_v0  ;;  %v9386_v1 = vpop.f32.mrb[130].mxu1  ;;  %v6217_v12 = vpop.eup %6216  ;;  %v9390_v37 = vmul.f32 0.5, %v2045_v45  ;;  %6228 = verf.f32 %v2512_v20  ;;  %v2519_v56 = vmul.f32 0.70710677, %v1856_v31  ;;  %v9395_v40 = vmul.f32 %v3007_v6, %v9290_v58  ;;  %v10900_v45 = vld [vmem:[#allocation55_spill] sm:$0xff] }
 0x3d5   : > { %10897 = vst [vmem:[#allocation82_spill] sm:$0xff] %v9386_v1  ;;  %v9392_v63 = vpop.f32.mrb[131].mxu1  ;;  %v6219_v10 = vpop.eup %6218  ;;  %v9397_v17 = vmul.f32 0.5, %v1854_v62  ;;  %6230 = verf.f32 %v2514_v59  ;;  %v2521_v61 = vmul.f32 0.70710677, %v2049_v52  ;;  %v9400_v57 = vmul.f32 %v3009_v21, %v9302_v43  ;;  %v10901_v1 = vld [vmem:[#allocation62_spill] sm:$0xff] }
 0x3d6   : > { %10898 = vst [vmem:[#allocation83_spill] sm:$0xff] %v9392_v63  ;;  %v6221_v41 = vpop.eup %6220  ;;  %v9402_v39 = vmul.f32 0.5, %v2047_v11  ;;  %v1858_v20 = vadd.f32 %v10900_v45, %v10712_v54  ;;  %v2051_v63 = vadd.f32 %v10901_v1, %v10720_v4  ;;  %v9409_v0 = vmul.f32 %v3008_v50, %v9312_v13  ;;  %v9415_v59 = vpop.f32.mrb[132].mxu0 }
 0x3d7   : > { %10899 = vst [vmem:[#allocation84_spill] sm:$0xff] %v9400_v57  ;;  %v3010_v58 = vadd.f32 1.0, %v6215_v7  ;;  %v9411_v62 = vmul.f32 0.5, %v1856_v31  ;;  %v3463_v6 = vpack.c.bf16 %v9099_v30, %v9035_v16  ;;  %10902 = vst [vmem:[#allocation55_spill] sm:$0xff] %v9415_v59  ;;  %v3015_v43 = vadd.f32 1.0, %v6217_v12  ;;  %v9417_v28 = vpop.f32.mrb[133].mxu0 }
 0x3d8   : > { %v3017_v11 = vadd.f32 1.0, %v6219_v10  ;;  %6232 = verf.f32 %v2519_v56  ;;  %v2520_v21 = vmul.f32 0.70710677, %v1858_v20  ;;  %10903 = vst [vmem:[#allocation62_spill] sm:$0xff] %v9417_v28  ;;  %v3016_v57 = vadd.f32 1.0, %v6221_v41  ;;  %v9423_v7 = vpop.f32.mrb[134].mxu0 }
 0x3d9   : > { %v6223_v45 = vpop.eup %6222  ;;  %6234 = verf.f32 %v2521_v61  ;;  %v2522_v1 = vmul.f32 0.70710677, %v2051_v63  ;;  %4454 = vmatmul.mubr.bf16.gmra.mrb[204].mxu0 %v3463_v6  ;;  %v3465_v13 = vpack.c.bf16 %v9102_v22, %v9044_v42  ;;  %10905 = vst [vmem:[#allocation86_spill] sm:$0xff] %v9423_v7  ;;  %v9425_v16 = vmul.f32 0.5, %v2049_v52  ;;  %v9433_v56 = vpop.f32.mrb[135].mxu0  ;;  %v10908_v22 = vld [vmem:[#allocation59_spill] sm:$0xff] }
 0x3da   : > { %v9421_v31 = vpop.f32.mrb[132].mxu1  ;;  %6236 = verf.f32 %v2520_v21  ;;  %v3472_v30 = vpack.c.bf16 %v9193_v2, %v9152_v51  ;;  %v3474_v12 = vpack.c.bf16 %v9204_v19, %v9171_v9  ;;  %10907 = vst [vmem:[#allocation88_spill] sm:$0xff] %v9433_v56  ;;  %v1862_v42 = vadd.f32 %v8950_v38, %v10710_v33  ;;  %v10909_v10 = vld [vmem:[#allocation28_spill] sm:$0xff] }
 0x3db   : > { %10904 = vst [vmem:[#allocation85_spill] sm:$0xff] %v9421_v31  ;;  %v9431_v50 = vpop.f32.mrb[133].mxu1  ;;  %6238 = verf.f32 %v2522_v1  ;;  %4615 = vmatmul.mubr.bf16.gmra.mrb[204].mxu1 %v3465_v13  ;;  %v2055_v52 = vadd.f32 %v10908_v22, %v10711_v35  ;;  %v1864_v61 = vadd.f32 %v10909_v10, %v10712_v54  ;;  %v9444_v9 = vmul.f32 %v3010_v58, %v9326_v60  ;;  %v10911_v38 = vld [vmem:[#allocation16_spill] sm:$0xff] }
 0x3dc   : > { %10906 = vst [vmem:[#allocation87_spill] sm:$0xff] %v9431_v50  ;;  %v9441_v41 = vpop.f32.mrb[134].mxu1  ;;  %v6225_v51 = vpop.eup %6224  ;;  %v9447_v2 = vmul.f32 %v3015_v43, %v9336_v25  ;;  %v3018_v19 = vadd.f32 1.0, %v6223_v45  ;;  %4461 = vmatprep.mubr.bf16.mxu0 %v3472_v30  ;;  %4622 = vmatprep.mubr.bf16.mxu1 %v3474_v12  ;;  %v2057_v6 = vadd.f32 %v10911_v38, %v10720_v4  ;;  %v9459_v60 = vmul.f32 0.5, %v1858_v20  ;;  %v10913_v12 = vld [vmem:[#allocation42_spill] sm:$0xff]  ;;  %v10926_v50 = vld [vmem:[#allocation37_spill] sm:$0xff] }
 0x3dd   : > { %10910 = vst [vmem:[#allocation59_spill] sm:$0xff] %v9441_v41  ;;  %v9451_v21 = vpop.f32.mrb[135].mxu1  ;;  %v6227_v1 = vpop.eup %6226  ;;  %v9454_v13 = vmul.f32 %v3017_v11, %v9353_v34  ;;  %v9457_v22 = vmul.f32 %v3016_v57, %v9359_v26  ;;  %v2527_v58 = vmul.f32 0.70710677, %v1862_v42  ;;  %v3023_v43 = vadd.f32 1.0, %v6225_v51  ;;  %v10914_v34 = vld [vmem:[#allocation43_spill] sm:$0xff] }
 0x3de   : > { %10912 = vst [vmem:[#allocation28_spill] sm:$0xff] %v9451_v21  ;;  %v6229_v25 = vpop.eup %6228  ;;  %v2529_v45 = vmul.f32 0.70710677, %v2055_v52  ;;  %v2528_v30 = vmul.f32 0.70710677, %v1864_v61  ;;  %v1866_v10 = vadd.f32 %v10913_v12, %v10710_v33  ;;  %v3025_v41 = vadd.f32 1.0, %v6227_v1 }
 0x3df   : > { %v6231_v38 = vpop.eup %6230  ;;  %v9463_v21 = vmul.f32 0.5, %v2051_v63  ;;  %6240 = verf.f32 %v2527_v58  ;;  %v2059_v11 = vadd.f32 %v10914_v34, %v10711_v35  ;;  %v9467_v26 = vpop.f32.mrb[136].mxu0  ;;  %v9470_v57 = vmul.f32 %v3018_v19, %v9361_v14 }
 0x3e0   : > { %10915 = vst [vmem:[#allocation16_spill] sm:$0xff] %v9467_v26  ;;  %v3024_v20 = vadd.f32 1.0, %v6229_v25  ;;  %6242 = verf.f32 %v2529_v45  ;;  %v2530_v51 = vmul.f32 0.70710677, %v2057_v6  ;;  %v9472_v56 = vpop.f32.mrb[137].mxu0  ;;  %v9474_v7 = vmul.f32 0.5, %v1862_v42 }
 0x3e1   : > { %10916 = vst [vmem:[#allocation42_spill] sm:$0xff] %v9472_v56  ;;  %v9476_v12 = vmul.f32 0.5, %v2055_v52  ;;  %v9478_v63 = vmul.f32 0.5, %v1864_v61  ;;  %6244 = verf.f32 %v2528_v30  ;;  %v9482_v58 = vpop.f32.mrb[138].mxu0  ;;  %v9485_v14 = vmul.f32 %v3023_v43, %v9388_v55 }
 0x3e2   : > { %v9480_v1 = vpop.f32.mrb[136].mxu1  ;;  %10918 = vst [vmem:[#allocation89_spill] sm:$0xff] %v9482_v58  ;;  %v6233_v34 = vpop.eup %6232  ;;  %v3026_v19 = vadd.f32 1.0, %v6231_v38  ;;  %6246 = verf.f32 %v2530_v51  ;;  %v2535_v25 = vmul.f32 0.70710677, %v1866_v10  ;;  %v9492_v61 = vmul.f32 %v3025_v41, %v9390_v37  ;;  %v10921_v58 = vld [vmem:[#allocation63_spill] sm:$0xff] }
 0x3e3   : > { %10917 = vst [vmem:[#allocation43_spill] sm:$0xff] %v9480_v1  ;;  %v9487_v45 = vpop.f32.mrb[137].mxu1  ;;  %v9489_v42 = vpop.f32.mrb[139].mxu0  ;;  %v9494_v30 = vmul.f32 0.5, %v2057_v6  ;;  %v2537_v1 = vmul.f32 0.70710677, %v2059_v11  ;;  %v1868_v56 = vadd.f32 %v10921_v58, %v10712_v54  ;;  %v9501_v43 = vmul.f32 %v3024_v20, %v9397_v17 }
 0x3e4   : > { %10919 = vst [vmem:[#allocation90_spill] sm:$0xff] %v9487_v45  ;;  %10920 = vst [vmem:[#allocation91_spill] sm:$0xff] %v9489_v42  ;;  %v6235_v52 = vpop.eup %6234  ;;  %v9498_v26 = vpop.f32.mrb[138].mxu1  ;;  %6248 = verf.f32 %v2535_v25  ;;  %v10923_v38 = vld [vmem:[#allocation26_spill] sm:$0xff]  ;;  %v3471_v37 = vpack.c.bf16 %v9174_v36, %v9133_v47  ;;  %v3031_v42 = vadd.f32 1.0, %v6233_v34  ;;  %v9509_v45 = vmul.f32 0.5, %v1866_v10 }
 0x3e5   : > { %10922 = vst [vmem:[#allocation63_spill] sm:$0xff] %v9498_v26  ;;  %v6237_v55 = vpop.eup %6236  ;;  %v2061_v51 = vadd.f32 %v10923_v38, %v10720_v4  ;;  %v9507_v41 = vpop.f32.mrb[139].mxu1  ;;  %6250 = verf.f32 %v2537_v1  ;;  %v2536_v58 = vmul.f32 0.70710677, %v1868_v56  ;;  %v9512_v26 = vmul.f32 %v3026_v19, %v9402_v39  ;;  %v10925_v25 = vld [vmem:[#allocation72_spill] sm:$0xff]  ;;  %v10928_v39 = vld [vmem:[#allocation27_spill] sm:$0xff] }
 0x3e6   : > { %10924 = vst [vmem:[#allocation26_spill] sm:$0xff] %v9507_v41  ;;  %v6239_v6 = vpop.eup %6238  ;;  %v3033_v17 = vadd.f32 1.0, %v6235_v52  ;;  %4462 = vmatmul.mubr.bf16.gmra.mrb[208].mxu0 %v3471_v37  ;;  %v3473_v38 = vpack.c.bf16 %v10926_v50, %v10925_v25  ;;  %v3032_v31 = vadd.f32 1.0, %v6237_v55  ;;  %v3480_v47 = vpack.c.bf16 %v9285_v23, %v9241_v15  ;;  %v9520_v10 = vpop.f32.mrb[140].mxu0  ;;  %v10929_v19 = vld [vmem:[#allocation38_spill] sm:$0xff] }
 0x3e7   : > { %v2538_v20 = vmul.f32 0.70710677, %v2061_v51  ;;  %6252 = verf.f32 %v2536_v58  ;;  %v3482_v36 = vpack.c.bf16 %v9288_v5, %v9244_v24  ;;  %10927 = vst [vmem:[#allocation72_spill] sm:$0xff] %v9520_v10  ;;  %v3034_v1 = vadd.f32 1.0, %v6239_v6  ;;  %v9526_v50 = vpop.f32.mrb[141].mxu0  ;;  %v10931_v24 = vld [vmem:[#allocation39_spill] sm:$0xff] }
 0x3e8   : > { %4623 = vmatmul.mubr.bf16.gmra.mrb[208].mxu1 %v3473_v38  ;;  %v1872_v34 = vadd.f32 %v10928_v39, %v10710_v33  ;;  %v2065_v52 = vadd.f32 %v10929_v19, %v10711_v35  ;;  %10930 = vst [vmem:[#allocation37_spill] sm:$0xff] %v9526_v50  ;;  %v9529_v37 = vmul.f32 %v3031_v42, %v9411_v62  ;;  %v9531_v15 = vmul.f32 0.5, %v2059_v11  ;;  %v10932_v5 = vld [vmem:[#allocation49_spill] sm:$0xff]  ;;  %v10935_v42 = vld [vmem:[#allocation56_spill] sm:$0xff] }
 0x3e9   : > { %6254 = verf.f32 %v2538_v20  ;;  %v6241_v55 = vpop.eup %6240  ;;  %4469 = vmatprep.mubr.bf16.mxu0 %v3480_v47  ;;  %4630 = vmatprep.mubr.bf16.mxu1 %v3482_v36  ;;  %v1874_v23 = vadd.f32 %v10931_v24, %v10712_v54  ;;  %v2067_v6 = vadd.f32 %v10932_v5, %v10720_v4  ;;  %v9539_v20 = vpop.f32.mrb[142].mxu0  ;;  %v9542_v38 = vmul.f32 %v3033_v17, %v9425_v16 }
 0x3ea   : > { %v9537_v58 = vpop.f32.mrb[140].mxu1  ;;  %10934 = vst [vmem:[#allocation38_spill] sm:$0xff] %v9539_v20  ;;  %v6243_v25 = vpop.eup %6242  ;;  %v9544_v62 = vmul.f32 0.5, %v1868_v56  ;;  %v2543_v11 = vmul.f32 0.70710677, %v1872_v34  ;;  %v1876_v47 = vadd.f32 %v10935_v42, %v10710_v33  ;;  %v9551_v19 = vmul.f32 %v3032_v31, %v9459_v60 }
 0x3eb   : > { %10933 = vst [vmem:[#allocation27_spill] sm:$0xff] %v9537_v58  ;;  %v9548_v36 = vpop.f32.mrb[141].mxu1  ;;  %v6245_v39 = vpop.eup %6244  ;;  %v9553_v24 = vmul.f32 0.5, %v2061_v51  ;;  %v2545_v5 = vmul.f32 0.70710677, %v2065_v52  ;;  %v9556_v16 = vmul.f32 %v3034_v1, %v9463_v21  ;;  %v3039_v56 = vadd.f32 1.0, %v6241_v55 }
 0x3ec   : > { %10936 = vst [vmem:[#allocation39_spill] sm:$0xff] %v9548_v36  ;;  %v2544_v20 = vmul.f32 0.70710677, %v1874_v23  ;;  %v6247_v58 = vpop.eup %6246  ;;  %v9558_v17 = vmul.f32 0.5, %v1872_v34  ;;  %6256 = verf.f32 %v2543_v11  ;;  %v9560_v50 = vpop.f32.mrb[142].mxu1  ;;  %v3041_v36 = vadd.f32 1.0, %v6243_v25 }
 0x3ed   : > { %10937 = vst [vmem:[#allocation49_spill] sm:$0xff] %v9560_v50  ;;  %v9562_v42 = vpop.f32.mrb[143].mxu0  ;;  %v9564_v10 = vmul.f32 0.5, %v2065_v52  ;;  %6258 = verf.f32 %v2545_v5  ;;  %v2546_v31 = vmul.f32 0.70710677, %v2067_v6  ;;  %v9566_v60 = vpop.f32.mrb[143].mxu1  ;;  %v9575_v52 = vmul.f32 %v3039_v56, %v9474_v7 }
 0x3ee   : > { %10938 = vst [vmem:[#allocation56_spill] sm:$0xff] %v9562_v42  ;;  %10939 = vst [vmem:[#allocation92_spill] sm:$0xff] %v9566_v60  ;;  %v6249_v51 = vpop.eup %6248  ;;  %v3040_v41 = vadd.f32 1.0, %v6245_v39  ;;  %v9568_v28 = vmul.f32 0.5, %v1874_v23  ;;  %6260 = verf.f32 %v2544_v20  ;;  %v2551_v21 = vmul.f32 0.70710677, %v1876_v47 }
 0x3ef   : > { %v6251_v1 = vpop.eup %6250  ;;  %v3042_v34 = vadd.f32 1.0, %v6247_v58  ;;  %v3047_v55 = vadd.f32 1.0, %v6249_v51  ;;  %6262 = verf.f32 %v2546_v31  ;;  %v10940_v11 = vld [vmem:[#allocation51_spill] sm:$0xff]  ;;  %v9572_v25 = vpop.f32.mrb[144].mxu0  ;;  %v10942_v5 = vld [vmem:[#allocation18_spill] sm:$0xff]  ;;  %v9584_v31 = vmul.f32 %v3041_v36, %v9476_v12 }
 0x3f0   : > { %v2069_v50 = vadd.f32 %v10940_v11, %v10711_v35  ;;  %10941 = vst [vmem:[#allocation51_spill] sm:$0xff] %v9572_v25  ;;  %6264 = verf.f32 %v2551_v21  ;;  %v1878_v39 = vadd.f32 %v10942_v5, %v10712_v54  ;;  %v10943_v23 = vld [vmem:[#allocation19_spill] sm:$0xff]  ;;  %v9581_v60 = vpop.f32.mrb[145].mxu0  ;;  %v9586_v51 = vmul.f32 0.5, %v2067_v6 }
 0x3f1   : > { %v2071_v20 = vadd.f32 %v10943_v23, %v10720_v4  ;;  %10944 = vst [vmem:[#allocation18_spill] sm:$0xff] %v9581_v60  ;;  %v6253_v58 = vpop.eup %6252  ;;  %v3479_v7 = vpack.c.bf16 %v9269_v49, %v9229_v29  ;;  %v9592_v21 = vpop.f32.mrb[146].mxu0  ;;  %v9595_v25 = vmul.f32 %v3040_v41, %v9478_v63  ;;  %v3049_v23 = vadd.f32 1.0, %v6251_v1  ;;  %v10950_v41 = vld [vmem:[#allocation34_spill] sm:$0xff] }
 0x3f2   : > { %v2553_v11 = vmul.f32 0.70710677, %v2069_v50  ;;  %v9590_v56 = vpop.f32.mrb[144].mxu1  ;;  %10946 = vst [vmem:[#allocation93_spill] sm:$0xff] %v9592_v21  ;;  %v9597_v60 = vmul.f32 0.5, %v1876_v47  ;;  %v9601_v6 = vpop.f32.mrb[147].mxu0  ;;  %v9604_v36 = vmul.f32 %v3042_v34, %v9494_v30  ;;  %v9607_v29 = vmul.f32 %v3047_v55, %v9509_v45 }
 0x3f3   : > { %10945 = vst [vmem:[#allocation19_spill] sm:$0xff] %v9590_v56  ;;  %v6255_v5 = vpop.eup %6254  ;;  %v2552_v42 = vmul.f32 0.70710677, %v1878_v39  ;;  %v9599_v12 = vpop.f32.mrb[145].mxu1  ;;  %10948 = vst [vmem:[#allocation95_spill] sm:$0xff] %v9601_v6  ;;  %4470 = vmatmul.mubr.bf16.gmra.mrb[212].mxu0 %v3479_v7  ;;  %v3048_v63 = vadd.f32 1.0, %v6253_v58  ;;  %v3481_v47 = vpack.c.bf16 %v10950_v41, %v9232_v32  ;;  %v3488_v1 = vpack.c.bf16 %v9377_v44, %v9329_v27 }
 0x3f4   : > { %10947 = vst [vmem:[#allocation94_spill] sm:$0xff] %v9599_v12  ;;  %6266 = verf.f32 %v2553_v11  ;;  %v2554_v49 = vmul.f32 0.70710677, %v2071_v20  ;;  %v9609_v21 = vpop.f32.mrb[146].mxu1  ;;  %v3050_v30 = vadd.f32 1.0, %v6255_v5  ;;  %v3490_v45 = vpack.c.bf16 %v9384_v53, %v9334_v18  ;;  %v10952_v34 = vld [vmem:[#allocation20_spill] sm:$0xff] }
 0x3f5   : > { %10949 = vst [vmem:[#allocation96_spill] sm:$0xff] %v9609_v21  ;;  %6268 = verf.f32 %v2552_v42  ;;  %v9615_v6 = vpop.f32.mrb[147].mxu1  ;;  %v1882_v55 = vadd.f32 %v10952_v34, %v10710_v33  ;;  %v9622_v58 = vmul.f32 %v3049_v23, %v9531_v15  ;;  %v9624_v42 = vmul.f32 0.5, %v2069_v50  ;;  %4631 = vmatmul.mubr.bf16.gmra.mrb[212].mxu1 %v3481_v47  ;;  %4477 = vmatprep.mubr.bf16.mxu0 %v3488_v1  ;;  %v10953_v32 = vld [vmem:[#allocation46_spill] sm:$0xff]  ;;  %v10954_v44 = vld [vmem:[#allocation47_spill] sm:$0xff] }
 0x3f6   : > { %10951 = vst [vmem:[#allocation34_spill] sm:$0xff] %v9615_v6  ;;  %6270 = verf.f32 %v2554_v49  ;;  %v6257_v11 = vpop.eup %6256  ;;  %v2075_v27 = vadd.f32 %v10953_v32, %v10711_v35  ;;  %v1884_v7 = vadd.f32 %v10954_v44, %v10712_v54  ;;  %v9630_v49 = vmul.f32 0.5, %v1878_v39  ;;  %4638 = vmatprep.mubr.bf16.mxu1 %v3490_v45  ;;  %v10955_v15 = vld [vmem:[#allocation66_spill] sm:$0xff]  ;;  %v9636_v50 = vpop.f32.mrb[148].mxu0  ;;  %v10957_v32 = vld [vmem:[#allocation67_spill] sm:$0xff] }
 0x3f7   : > { %v6259_v5 = vpop.eup %6258  ;;  %v9632_v18 = vmul.f32 0.5, %v2071_v20  ;;  %v2559_v53 = vmul.f32 0.70710677, %v1882_v55  ;;  %v2077_v23 = vadd.f32 %v10955_v15, %v10720_v4  ;;  %10956 = vst [vmem:[#allocation20_spill] sm:$0xff] %v9636_v50  ;;  %v9639_v47 = vmul.f32 %v3048_v63, %v9544_v62  ;;  %v9643_v39 = vpop.f32.mrb[149].mxu0 }
 0x3f8   : > { %v6261_v41 = vpop.eup %6260  ;;  %v3055_v1 = vadd.f32 1.0, %v6257_v11  ;;  %v2561_v34 = vmul.f32 0.70710677, %v2075_v27  ;;  %v1886_v44 = vadd.f32 %v10957_v32, %v10710_v33  ;;  %10958 = vst [vmem:[#allocation46_spill] sm:$0xff] %v9643_v39  ;;  %v9646_v45 = vmul.f32 %v3050_v30, %v9553_v24  ;;  %v9650_v50 = vpop.f32.mrb[150].mxu0 }
 0x3f9   : > { %v6263_v20 = vpop.eup %6262  ;;  %v3057_v6 = vadd.f32 1.0, %v6259_v5  ;;  %6272 = verf.f32 %v2559_v53  ;;  %v2560_v15 = vmul.f32 0.70710677, %v1884_v7  ;;  %10960 = vst [vmem:[#allocation66_spill] sm:$0xff] %v9650_v50  ;;  %v3056_v63 = vadd.f32 1.0, %v6261_v41  ;;  %v9658_v39 = vpop.f32.mrb[151].mxu0 }
 0x3fa   : > { %v9648_v21 = vpop.f32.mrb[148].mxu1  ;;  %v6265_v62 = vpop.eup %6264  ;;  %v9652_v11 = vmul.f32 0.5, %v1882_v55  ;;  %v9654_v12 = vmul.f32 0.5, %v2075_v27  ;;  %6274 = verf.f32 %v2561_v34  ;;  %10962 = vst [vmem:[#allocation97_spill] sm:$0xff] %v9658_v39  ;;  %v3058_v24 = vadd.f32 1.0, %v6263_v20  ;;  %v10964_v27 = vld [vmem:[#allocation68_spill] sm:$0xff] }
 0x3fb   : > { %10959 = vst [vmem:[#allocation47_spill] sm:$0xff] %v9648_v21  ;;  %v9656_v32 = vpop.f32.mrb[149].mxu1  ;;  %v3063_v30 = vadd.f32 1.0, %v6265_v62  ;;  %6276 = verf.f32 %v2560_v15  ;;  %v2562_v5 = vmul.f32 0.70710677, %v2077_v23  ;;  %v9663_v21 = vmul.f32 %v3055_v1, %v9558_v17  ;;  %v10966_v20 = vld [vmem:[#allocation21_spill] sm:$0xff] }
 0x3fc   : > { %10961 = vst [vmem:[#allocation67_spill] sm:$0xff] %v9656_v32  ;;  %v9660_v53 = vpop.f32.mrb[150].mxu1  ;;  %v9665_v50 = vmul.f32 0.5, %v1884_v7  ;;  %v2567_v55 = vmul.f32 0.70710677, %v1886_v44  ;;  %v2079_v41 = vadd.f32 %v10964_v27, %v10711_v35  ;;  %v9672_v39 = vmul.f32 %v3057_v6, %v9564_v10  ;;  %v10967_v62 = vld [vmem:[#allocation69_spill] sm:$0xff] }
 0x3fd   : > { %10963 = vst [vmem:[#allocation98_spill] sm:$0xff] %v9660_v53  ;;  %v9669_v34 = vpop.f32.mrb[151].mxu1  ;;  %6278 = verf.f32 %v2562_v5  ;;  %v1888_v15 = vadd.f32 %v10966_v20, %v10712_v54  ;;  %v2081_v17 = vadd.f32 %v10967_v62, %v10720_v4  ;;  %v9679_v7 = vmul.f32 %v3056_v63, %v9568_v28 }
 0x3fe   : > { %10965 = vst [vmem:[#allocation68_spill] sm:$0xff] %v9669_v34  ;;  %v6267_v32 = vpop.eup %6266  ;;  %v9681_v53 = vmul.f32 0.5, %v2077_v23  ;;  %6280 = verf.f32 %v2567_v55  ;;  %v2569_v27 = vmul.f32 0.70710677, %v2079_v41  ;;  %v9684_v56 = vmul.f32 %v3058_v24, %v9586_v51  ;;  %v9691_v20 = vpop.f32.mrb[152].mxu0 }
 0x3ff   : > { %v6269_v1 = vpop.eup %6268  ;;  %v9687_v10 = vmul.f32 %v3063_v30, %v9597_v60  ;;  %v9689_v6 = vmul.f32 0.5, %v1886_v44  ;;  %v2568_v5 = vmul.f32 0.70710677, %v1888_v15  ;;  %10968 = vst [vmem:[#allocation21_spill] sm:$0xff] %v9691_v20  ;;  %v3065_v62 = vadd.f32 1.0, %v6267_v32  ;;  %v9695_v23 = vpop.f32.mrb[153].mxu0 }
 0x400   : > { %v6271_v34 = vpop.eup %6270  ;;  %v9693_v59 = vmul.f32 0.5, %v2079_v41  ;;  %6282 = verf.f32 %v2569_v27  ;;  %v2570_v28 = vmul.f32 0.70710677, %v2081_v17  ;;  %10969 = vst [vmem:[#allocation69_spill] sm:$0xff] %v9695_v23  ;;  %v3064_v63 = vadd.f32 1.0, %v6269_v1  ;;  %v9703_v24 = vpop.f32.mrb[154].mxu0 }
 0x401   : > { %6284 = verf.f32 %v2568_v5  ;;  %v3487_v51 = vpack.c.bf16 %v9341_v48, %v9321_v3  ;;  %v3489_v60 = vpack.c.bf16 %v9368_v46, %v9324_v8  ;;  %10971 = vst [vmem:[#allocation100_spill] sm:$0xff] %v9703_v24  ;;  %v3066_v30 = vadd.f32 1.0, %v6271_v34  ;;  %v9711_v1 = vpop.f32.mrb[155].mxu0  ;;  %v10974_v8 = vld [vmem:[#allocation17_spill] sm:$0xff]  ;;  %v10975_v34 = vld [vmem:[#allocation70_spill] sm:$0xff] }
 0x402   : > { %v9701_v44 = vpop.f32.mrb[152].mxu1  ;;  %6286 = verf.f32 %v2570_v28  ;;  %v3496_v32 = vpack.c.bf16 %v9457_v22, %v9409_v0  ;;  %v3498_v55 = vpack.c.bf16 %v9470_v57, %v9444_v9  ;;  %10973 = vst [vmem:[#allocation102_spill] sm:$0xff] %v9711_v1  ;;  %v9713_v48 = vmul.f32 0.5, %v1888_v15  ;;  %v10976_v0 = vld [vmem:[#allocation64_spill] sm:$0xff]  ;;  %v10980_v24 = vld [vmem:[#allocation65_spill] sm:$0xff] }
 0x403   : > { %10970 = vst [vmem:[#allocation99_spill] sm:$0xff] %v9701_v44  ;;  %v9709_v41 = vpop.f32.mrb[153].mxu1  ;;  %v6273_v3 = vpop.eup %6272  ;;  %4478 = vmatmul.mubr.bf16.gmra.mrb[216].mxu0 %v3487_v51  ;;  %4639 = vmatmul.mubr.bf16.gmra.mrb[216].mxu1 %v3489_v60  ;;  %v1892_v46 = vadd.f32 %v10974_v8, %v10710_v33  ;;  %v2085_v27 = vadd.f32 %v10975_v34, %v10711_v35  ;;  %v9726_v15 = vmul.f32 0.5, %v2081_v17  ;;  %v10978_v51 = vld [vmem:[#allocation71_spill] sm:$0xff] }
 0x404   : > { %10972 = vst [vmem:[#allocation101_spill] sm:$0xff] %v9709_v41  ;;  %v1894_v22 = vadd.f32 %v10976_v0, %v10712_v54  ;;  %v9721_v5 = vpop.f32.mrb[154].mxu1  ;;  %v6275_v9 = vpop.eup %6274  ;;  %v9724_v57 = vmul.f32 %v3065_v62, %v9624_v42  ;;  %v3071_v28 = vadd.f32 1.0, %v6273_v3  ;;  %4485 = vmatprep.mubr.bf16.mxu0 %v3496_v32  ;;  %4646 = vmatprep.mubr.bf16.mxu1 %v3498_v55  ;;  %v10981_v55 = vld [vmem:[#allocation60_spill] sm:$0xff] }
 0x405   : > { %10977 = vst [vmem:[#allocation17_spill] sm:$0xff] %v9721_v5  ;;  %v2087_v60 = vadd.f32 %v10978_v51, %v10720_v4  ;;  %v9730_v8 = vpop.f32.mrb[155].mxu1  ;;  %v6277_v34 = vpop.eup %6276  ;;  %v9733_v1 = vmul.f32 %v3064_v63, %v9630_v49  ;;  %v3073_v0 = vadd.f32 1.0, %v6275_v9  ;;  %v2575_v5 = vmul.f32 0.70710677, %v1892_v46 }
 0x406   : > { %10979 = vst [vmem:[#allocation70_spill] sm:$0xff] %v9730_v8  ;;  %v1896_v42 = vadd.f32 %v10980_v24, %v10710_v33  ;;  %v9738_v62 = vmul.f32 %v3066_v30, %v9632_v18  ;;  %v9740_v17 = vmul.f32 0.5, %v1892_v46  ;;  %v2577_v32 = vmul.f32 0.70710677, %v2085_v27 }
 0x407   : > { %v2089_v3 = vadd.f32 %v10981_v55, %v10711_v35  ;;  %v6279_v51 = vpop.eup %6278  ;;  %v3072_v8 = vadd.f32 1.0, %v6277_v34  ;;  %6288 = verf.f32 %v2575_v5  ;;  %v9744_v41 = vmul.f32 0.5, %v2085_v27  ;;  %v9746_v63 = vpop.f32.mrb[156].mxu0 }
 0x408   : > { %v2576_v49 = vmul.f32 0.70710677, %v1894_v22  ;;  %10982 = vst [vmem:[#allocation64_spill] sm:$0xff] %v9746_v63  ;;  %v6281_v9 = vpop.eup %6280  ;;  %v9749_v24 = vmul.f32 %v3071_v28, %v9652_v11  ;;  %6290 = verf.f32 %v2577_v32  ;;  %v9751_v18 = vmul.f32 0.5, %v1894_v22  ;;  %v9753_v46 = vpop.f32.mrb[157].mxu0 }
 0x409   : > { %v2578_v30 = vmul.f32 0.70710677, %v2087_v60  ;;  %10983 = vst [vmem:[#allocation71_spill] sm:$0xff] %v9753_v46  ;;  %v9756_v55 = vmul.f32 %v3073_v0, %v9654_v12  ;;  %v3074_v34 = vadd.f32 1.0, %v6279_v51  ;;  %v2583_v27 = vmul.f32 0.70710677, %v1896_v42 }
 0x40a   : > { %6292 = verf.f32 %v2576_v49  ;;  %v9758_v5 = vpop.f32.mrb[156].mxu1  ;;  %v9760_v44 = vpop.f32.mrb[158].mxu0  ;;  %v3079_v23 = vadd.f32 1.0, %v6281_v9  ;;  %v9762_v11 = vmul.f32 0.5, %v2087_v60  ;;  %v2585_v22 = vmul.f32 0.70710677, %v2089_v3 }
 0x40b   : > { %10984 = vst [vmem:[#allocation65_spill] sm:$0xff] %v9758_v5  ;;  %10985 = vst [vmem:[#allocation60_spill] sm:$0xff] %v9760_v44  ;;  %v6283_v63 = vpop.eup %6282  ;;  %6294 = verf.f32 %v2578_v30  ;;  %v9764_v28 = vpop.f32.mrb[157].mxu1  ;;  %v9769_v12 = vmul.f32 %v3072_v8, %v9665_v50  ;;  %v10988_v51 = vld [vmem:[#allocation73_spill] sm:$0xff]  ;;  %v9775_v60 = vmul.f32 0.5, %v1896_v42  ;;  %v10990_v30 = vld [vmem:[#allocation74_spill] sm:$0xff]  ;;  %v9784_v50 = vmul.f32 %v3074_v34, %v9681_v53 }
 0x40c   : > { %10986 = vst [vmem:[#allocation103_spill] sm:$0xff] %v9764_v28  ;;  %v9766_v32 = vpop.f32.mrb[159].mxu0  ;;  %v6285_v46 = vpop.eup %6284  ;;  %v3081_v0 = vadd.f32 1.0, %v6283_v63  ;;  %6296 = verf.f32 %v2583_v27  ;;  %v1898_v49 = vadd.f32 %v10988_v51, %v10712_v54  ;;  %v2091_v28 = vadd.f32 %v10990_v30, %v10720_v4 }
 0x40d   : > { %10987 = vst [vmem:[#allocation104_spill] sm:$0xff] %v9766_v32  ;;  %v9773_v44 = vpop.f32.mrb[158].mxu1  ;;  %v6287_v9 = vpop.eup %6286  ;;  %6298 = verf.f32 %v2585_v22  ;;  %v3495_v32 = vpack.c.bf16 %v9447_v2, %v9395_v40  ;;  %v3080_v8 = vadd.f32 1.0, %v6285_v46  ;;  %v9786_v63 = vmul.f32 0.5, %v2089_v3  ;;  %v10995_v46 = vld [vmem:[#allocation33_spill] sm:$0xff] }
 0x40e   : > { %10989 = vst [vmem:[#allocation73_spill] sm:$0xff] %v9773_v44  ;;  %v9781_v5 = vpop.f32.mrb[159].mxu1  ;;  %v2584_v27 = vmul.f32 0.70710677, %v1898_v49  ;;  %v9789_v51 = vmul.f32 %v3079_v23, %v9689_v6  ;;  %v3082_v42 = vadd.f32 1.0, %v6287_v9  ;;  %v10992_v44 = vld [vmem:[#allocation84_spill] sm:$0xff]  ;;  %v9794_v40 = vmul.f32 %v3081_v0, %v9693_v59 }
 0x40f   : > { %10991 = vst [vmem:[#allocation74_spill] sm:$0xff] %v9781_v5  ;;  %v2586_v22 = vmul.f32 0.70710677, %v2091_v28  ;;  %4486 = vmatmul.mubr.bf16.gmra.mrb[220].mxu0 %v3495_v32  ;;  %v3497_v30 = vpack.c.bf16 %v9454_v13, %v10992_v44  ;;  %v3504_v2 = vpack.c.bf16 %v9551_v19, %v9501_v43  ;;  %v3506_v53 = vpack.c.bf16 %v9556_v16, %v9512_v26  ;;  %v10994_v6 = vld [vmem:[#allocation29_spill] sm:$0xff]  ;;  %v10996_v59 = vld [vmem:[#allocation23_spill] sm:$0xff]  ;;  %v10998_v16 = vld [vmem:[#allocation22_spill] sm:$0xff] }
 0x410   : > { %6300 = verf.f32 %v2584_v27  ;;  %v9800_v3 = vpop.f32.mrb[160].mxu0  ;;  %v1902_v23 = vadd.f32 %v10994_v6, %v10710_v33  ;;  %v2095_v13 = vadd.f32 %v10995_v46, %v10711_v35  ;;  %v1904_v44 = vadd.f32 %v10996_v59, %v10712_v54 }
 0x411   : > { %10993 = vst [vmem:[#allocation84_spill] sm:$0xff] %v9800_v3  ;;  %6302 = verf.f32 %v2586_v22  ;;  %4647 = vmatmul.mubr.bf16.gmra.mrb[220].mxu1 %v3497_v30  ;;  %v9808_v34 = vpop.f32.mrb[161].mxu0  ;;  %v6289_v32 = vpop.eup %6288  ;;  %v9811_v43 = vmul.f32 %v3080_v8, %v9713_v48  ;;  %v9813_v26 = vmul.f32 0.5, %v1898_v49  ;;  %v9815_v19 = vmul.f32 0.5, %v2091_v28  ;;  %4493 = vmatprep.mubr.bf16.mxu0 %v3504_v2  ;;  %v11001_v49 = vld [vmem:[#allocation75_spill] sm:$0xff] }
 0x412   : > { %10997 = vst [vmem:[#allocation29_spill] sm:$0xff] %v9808_v34  ;;  %4654 = vmatprep.mubr.bf16.mxu1 %v3506_v53  ;;  %v2097_v0 = vadd.f32 %v10998_v16, %v10720_v4  ;;  %v9819_v9 = vpop.f32.mrb[160].mxu1  ;;  %v9821_v27 = vpop.f32.mrb[162].mxu0  ;;  %v9824_v30 = vmul.f32 %v3082_v42, %v9726_v15  ;;  %v3087_v6 = vadd.f32 1.0, %v6289_v32  ;;  %v2591_v48 = vmul.f32 0.70710677, %v1902_v23 }
 0x413   : > { %10999 = vst [vmem:[#allocation33_spill] sm:$0xff] %v9819_v9  ;;  %11000 = vst [vmem:[#allocation23_spill] sm:$0xff] %v9821_v27  ;;  %v6291_v22 = vpop.eup %6290  ;;  %v1906_v8 = vadd.f32 %v11001_v49, %v10710_v33  ;;  %v9828_v28 = vpop.f32.mrb[161].mxu1  ;;  %v2593_v46 = vmul.f32 0.70710677, %v2095_v13  ;;  %v11003_v16 = vld [vmem:[#allocation76_spill] sm:$0xff] }
 0x414   : > { %11002 = vst [vmem:[#allocation22_spill] sm:$0xff] %v9828_v28  ;;  %v6293_v2 = vpop.eup %6292  ;;  %v3089_v53 = vadd.f32 1.0, %v6291_v22  ;;  %v2592_v59 = vmul.f32 0.70710677, %v1904_v44  ;;  %v2099_v9 = vadd.f32 %v11003_v16, %v10711_v35  ;;  %v9832_v3 = vmul.f32 0.5, %v1902_v23  ;;  %v9836_v42 = vpop.f32.mrb[162].mxu1 }
 0x415   : > { %v6295_v34 = vpop.eup %6294  ;;  %v3088_v27 = vadd.f32 1.0, %v6293_v2  ;;  %6304 = verf.f32 %v2591_v48  ;;  %v9834_v15 = vmul.f32 0.5, %v2095_v13  ;;  %11004 = vst [vmem:[#allocation75_spill] sm:$0xff] %v9836_v42  ;;  %v9838_v32 = vpop.f32.mrb[163].mxu0  ;;  %v9840_v22 = vmul.f32 0.5, %v1904_v44 }
 0x416   : > { %11005 = vst [vmem:[#allocation76_spill] sm:$0xff] %v9838_v32  ;;  %v6297_v49 = vpop.eup %6296  ;;  %v3090_v28 = vadd.f32 1.0, %v6295_v34  ;;  %6306 = verf.f32 %v2593_v46  ;;  %v2594_v5 = vmul.f32 0.70710677, %v2097_v0  ;;  %v9842_v20 = vpop.f32.mrb[163].mxu1  ;;  %v9845_v2 = vmul.f32 %v3087_v6, %v9740_v17  ;;  %v11008_v17 = vld [vmem:[#allocation77_spill] sm:$0xff] }
 0x417   : > { %11006 = vst [vmem:[#allocation105_spill] sm:$0xff] %v9842_v20  ;;  %v6299_v16 = vpop.eup %6298  ;;  %v3095_v23 = vadd.f32 1.0, %v6297_v49  ;;  %6308 = verf.f32 %v2592_v59  ;;  %v9847_v13 = vmul.f32 0.5, %v2097_v0  ;;  %v9850_v48 = vmul.f32 %v3089_v53, %v9744_v41 }
 0x418   : > { %v9853_v42 = vmul.f32 %v3088_v27, %v9751_v18  ;;  %6310 = verf.f32 %v2594_v5  ;;  %v2599_v44 = vmul.f32 0.70710677, %v1906_v8  ;;  %v3097_v46 = vadd.f32 1.0, %v6299_v16  ;;  %v11010_v18 = vld [vmem:[#allocation78_spill] sm:$0xff] }
 0x419   : > { %v9855_v34 = vpop.f32.mrb[164].mxu0  ;;  %v9857_v20 = vmul.f32 0.5, %v1906_v8  ;;  %v2601_v32 = vmul.f32 0.70710677, %v2099_v9  ;;  %v1908_v6 = vadd.f32 %v11008_v17, %v10712_v54  ;;  %v9864_v41 = vmul.f32 %v3090_v28, %v9762_v11 }
 0x41a   : > { %11007 = vst [vmem:[#allocation106_spill] sm:$0xff] %v9855_v34  ;;  %v9861_v59 = vpop.f32.mrb[165].mxu0  ;;  %v6301_v0 = vpop.eup %6300  ;;  %6312 = verf.f32 %v2599_v44  ;;  %v2101_v5 = vadd.f32 %v11010_v18, %v10720_v4  ;;  %v3503_v27 = vpack.c.bf16 %v9529_v37, %v9485_v14  ;;  %v9875_v16 = vmul.f32 %v3095_v23, %v9775_v60 }
 0x41b   : > { %11009 = vst [vmem:[#allocation77_spill] sm:$0xff] %v9861_v59  ;;  %v9870_v53 = vpop.f32.mrb[164].mxu1  ;;  %v9872_v8 = vpop.f32.mrb[166].mxu0  ;;  %v3096_v17 = vadd.f32 1.0, %v6301_v0  ;;  %6314 = verf.f32 %v2601_v32  ;;  %v2600_v59 = vmul.f32 0.70710677, %v1908_v6  ;;  %v3505_v14 = vpack.c.bf16 %v9542_v38, %v9492_v61 }
 0x41c   : > { %11011 = vst [vmem:[#allocation78_spill] sm:$0xff] %v9872_v8  ;;  %v6303_v49 = vpop.eup %6302  ;;  %v9877_v11 = vpop.f32.mrb[165].mxu1  ;;  %v9881_v18 = vmul.f32 0.5, %v2099_v9  ;;  %v2602_v34 = vmul.f32 0.70710677, %v2101_v5  ;;  %4494 = vmatmul.mubr.bf16.gmra.mrb[224].mxu0 %v3503_v27  ;;  %v9888_v60 = vmul.f32 %v3097_v46, %v9786_v63  ;;  %v3512_v32 = vpack.c.bf16 %v9639_v47, %v9595_v25  ;;  %v11016_v61 = vld [vmem:[#allocation32_spill] sm:$0xff] }
 0x41d   : > { %11012 = vst [vmem:[#allocation107_spill] sm:$0xff] %v9877_v11  ;;  %v9879_v28 = vpop.f32.mrb[167].mxu0  ;;  %v3098_v44 = vadd.f32 1.0, %v6303_v49  ;;  %v9885_v37 = vpop.f32.mrb[166].mxu1  ;;  %6316 = verf.f32 %v2600_v59  ;;  %v3514_v23 = vpack.c.bf16 %v9646_v45, %v9604_v36  ;;  %v9896_v9 = vmul.f32 0.5, %v1908_v6  ;;  %4655 = vmatmul.mubr.bf16.gmra.mrb[224].mxu1 %v3505_v14  ;;  %v11017_v27 = vld [vmem:[#allocation36_spill] sm:$0xff] }
 0x41e   : > { %11013 = vst [vmem:[#allocation108_spill] sm:$0xff] %v9879_v28  ;;  %11014 = vst [vmem:[#allocation109_spill] sm:$0xff] %v9885_v37  ;;  %v9894_v0 = vpop.f32.mrb[167].mxu1  ;;  %6318 = verf.f32 %v2602_v34  ;;  %v1912_v38 = vadd.f32 %v11016_v61, %v10710_v33  ;;  %v2105_v63 = vadd.f32 %v11017_v27, %v10711_v35  ;;  %v9903_v59 = vmul.f32 %v3096_v17, %v9813_v26  ;;  %v11018_v36 = vld [vmem:[#allocation45_spill] sm:$0xff]  ;;  %v11019_v45 = vld [vmem:[#allocation40_spill] sm:$0xff] }
 0x41f   : > { %11015 = vst [vmem:[#allocation110_spill] sm:$0xff] %v9894_v0  ;;  %v6305_v46 = vpop.eup %6304  ;;  %v2346_v25 = vmul.f32 0.5, %v2101_v5  ;;  %4501 = vmatprep.mubr.bf16.mxu0 %v3512_v32  ;;  %4662 = vmatprep.mubr.bf16.mxu1 %v3514_v23  ;;  %v1914_v47 = vadd.f32 %v11018_v36, %v10712_v54  ;;  %v2107_v34 = vadd.f32 %v11019_v45, %v10720_v4  ;;  %v11020_v27 = vld [vmem:[#allocation54_spill] sm:$0xff] }
 0x420   : > { %v6307_v6 = vpop.eup %6306  ;;  %v9910_v49 = vmul.f32 %v3098_v44, %v9815_v19  ;;  %v3103_v14 = vadd.f32 1.0, %v6305_v46  ;;  %v2607_v61 = vmul.f32 0.70710677, %v1912_v38  ;;  %v1916_v0 = vadd.f32 %v11020_v27, %v10710_v33 }
 0x421   : > { %v6309_v26 = vpop.eup %6308  ;;  %v3105_v17 = vadd.f32 1.0, %v6307_v6  ;;  %v9914_v5 = vmul.f32 0.5, %v1912_v38  ;;  %v2609_v32 = vmul.f32 0.70710677, %v2105_v63  ;;  %v2608_v23 = vmul.f32 0.70710677, %v1914_v47 }
 0x422   : > { %v6311_v37 = vpop.eup %6310  ;;  %v3104_v36 = vadd.f32 1.0, %v6309_v26  ;;  %6320 = verf.f32 %v2607_v61  ;;  %v9916_v28 = vmul.f32 0.5, %v2105_v63  ;;  %v9918_v45 = vmul.f32 0.5, %v1914_v47  ;;  %v11022_v61 = vld [vmem:[#allocation30_spill] sm:$0xff] }
 0x423   : > { %v9921_v19 = vmul.f32 %v3103_v14, %v9832_v3  ;;  %v3106_v44 = vadd.f32 1.0, %v6311_v37  ;;  %6322 = verf.f32 %v2609_v32  ;;  %v2610_v46 = vmul.f32 0.70710677, %v2107_v34  ;;  %v11021_v3 = vld [vmem:[#allocation53_spill] sm:$0xff] }
 0x424   : > { %v6313_v27 = vpop.eup %6312  ;;  %v9924_v6 = vmul.f32 %v3105_v17, %v9834_v15  ;;  %6324 = verf.f32 %v2608_v23  ;;  %v9926_v38 = vmul.f32 0.5, %v2107_v34  ;;  %v2615_v8 = vmul.f32 0.70710677, %v1916_v0  ;;  %v11023_v15 = vld [vmem:[#allocation25_spill] sm:$0xff] }
 0x425   : > { %v6315_v26 = vpop.eup %6314  ;;  %v9929_v63 = vmul.f32 %v3104_v36, %v9840_v22  ;;  %v3111_v47 = vadd.f32 1.0, %v6313_v27  ;;  %6326 = verf.f32 %v2610_v46  ;;  %v2109_v14 = vadd.f32 %v11021_v3, %v10711_v35 }
 0x426   : > { %v3113_v37 = vadd.f32 1.0, %v6315_v26  ;;  %6328 = verf.f32 %v2615_v8  ;;  %v1918_v32 = vadd.f32 %v11022_v61, %v10712_v54  ;;  %v2111_v17 = vadd.f32 %v11023_v15, %v10720_v4 }
 0x427   : > { %v6317_v34 = vpop.eup %6316  ;;  %v9938_v23 = vmul.f32 %v3106_v44, %v9847_v13  ;;  %v9940_v11 = vmul.f32 0.5, %v1916_v0  ;;  %v2617_v22 = vmul.f32 0.70710677, %v2109_v14  ;;  %v3511_v36 = vpack.c.bf16 %v9607_v29, %v9575_v52  ;;  %v11024_v44 = vld [vmem:[#allocation24_spill] sm:$0xff] }
 0x428   : > { %v6319_v46 = vpop.eup %6318  ;;  %v9945_v27 = vmul.f32 %v3111_v47, %v9857_v20  ;;  %v3112_v8 = vadd.f32 1.0, %v6317_v34  ;;  %v9947_v26 = vmul.f32 0.5, %v2109_v14  ;;  %v2616_v3 = vmul.f32 0.70710677, %v1918_v32 }
 0x429   : > { %v9950_v61 = vmul.f32 %v3113_v37, %v9881_v18  ;;  %v3114_v15 = vadd.f32 1.0, %v6319_v46  ;;  %6330 = verf.f32 %v2617_v22  ;;  %v2618_v13 = vmul.f32 0.70710677, %v2111_v17  ;;  %4502 = vmatmul.mubr.bf16.gmra.mrb[228].mxu0 %v3511_v36 }
 0x42a   : > { %v9952_v0 = vmul.f32 0.5, %v1918_v32  ;;  %6332 = verf.f32 %v2616_v3  ;;  %v3513_v52 = vpack.c.bf16 %v9622_v58, %v9584_v31  ;;  %v3520_v29 = vpack.c.bf16 %v9733_v1, %v9679_v7  ;;  %v11025_v31 = vld [vmem:[#allocation79_spill] sm:$0xff]  ;;  %v11026_v7 = vld [vmem:[#allocation52_spill] sm:$0xff] }
 0x42b   : > { %v9959_v20 = vmul.f32 %v3112_v8, %v9896_v9  ;;  %6334 = verf.f32 %v2618_v13  ;;  %v3522_v18 = vpack.c.bf16 %v9738_v62, %v9684_v56  ;;  %v1922_v47 = vadd.f32 %v11024_v44, %v10710_v33  ;;  %v11027_v62 = vld [vmem:[#allocation80_spill] sm:$0xff] }
 0x42c   : > { %v6321_v14 = vpop.eup %6320  ;;  %v9965_v37 = vmul.f32 %v3114_v15, %v2346_v25  ;;  %v2362_v32 = vmul.f32 0.5, %v2111_v17  ;;  %4663 = vmatmul.mubr.bf16.gmra.mrb[228].mxu1 %v3513_v52  ;;  %4509 = vmatprep.mubr.bf16.mxu0 %v3520_v29  ;;  %v2115_v58 = vadd.f32 %v11025_v31, %v10711_v35  ;;  %v1924_v1 = vadd.f32 %v11026_v7, %v10712_v54  ;;  %v11028_v3 = vld [vmem:[#allocation44_spill] sm:$0xff] }
 0x42d   : > { %v6323_v9 = vpop.eup %6322  ;;  %v3119_v34 = vadd.f32 1.0, %v6321_v14  ;;  %4670 = vmatprep.mubr.bf16.mxu1 %v3522_v18  ;;  %v9971_v22 = vmul.f32 0.5, %v1922_v47  ;;  %v2623_v56 = vmul.f32 0.70710677, %v1922_v47  ;;  %v2117_v36 = vadd.f32 %v11027_v62, %v10720_v4 }
 0x42e   : > { %v6325_v25 = vpop.eup %6324  ;;  %v3121_v46 = vadd.f32 1.0, %v6323_v9  ;;  %v9975_v17 = vmul.f32 0.5, %v2115_v58  ;;  %v2625_v8 = vmul.f32 0.70710677, %v2115_v58  ;;  %v1926_v15 = vadd.f32 %v11028_v3, %v10710_v33 }
 0x42f   : > { %v6327_v13 = vpop.eup %6326  ;;  %v3120_v52 = vadd.f32 1.0, %v6325_v25  ;;  %6336 = verf.f32 %v2623_v56  ;;  %v9979_v29 = vmul.f32 0.5, %v1924_v1  ;;  %v2624_v18 = vmul.f32 0.70710677, %v1924_v1  ;;  %v11030_v25 = vld [vmem:[#allocation41_spill] sm:$0xff] }
 0x430   : > { %v6329_v44 = vpop.eup %6328  ;;  %v9982_v47 = vmul.f32 %v3119_v34, %v9914_v5  ;;  %v9985_v14 = vmul.f32 %v3121_v46, %v9916_v28  ;;  %v3122_v31 = vadd.f32 1.0, %v6327_v13  ;;  %6338 = verf.f32 %v2625_v8  ;;  %v11029_v5 = vld [vmem:[#allocation31_spill] sm:$0xff]  ;;  %v11031_v8 = vld [vmem:[#allocation81_spill] sm:$0xff] }
 0x431   : > { %v3127_v7 = vadd.f32 1.0, %v6329_v44  ;;  %6340 = verf.f32 %v2624_v18  ;;  %v9987_v58 = vmul.f32 0.5, %v2117_v36  ;;  %v2626_v33 = vmul.f32 0.70710677, %v2117_v36 }
 0x432   : > { %v9990_v9 = vmul.f32 %v3120_v52, %v9918_v45  ;;  %v9993_v56 = vmul.f32 %v3122_v31, %v9926_v38  ;;  %v2631_v1 = vmul.f32 0.70710677, %v1926_v15  ;;  %v2119_v34 = vadd.f32 %v11029_v5, %v10711_v35 }
 0x433   : > { %v6331_v62 = vpop.eup %6330  ;;  %6342 = verf.f32 %v2626_v33  ;;  %v9997_v28 = vmul.f32 0.5, %v1926_v15  ;;  %v1928_v46 = vadd.f32 %v11030_v25, %v10712_v54  ;;  %v2121_v36 = vadd.f32 %v11031_v8, %v10720_v4 }
 0x434   : > { %v6333_v3 = vpop.eup %6332  ;;  %v10004_v45 = vmul.f32 %v3127_v7, %v9940_v11  ;;  %v3129_v38 = vadd.f32 1.0, %v6331_v62  ;;  %6344 = verf.f32 %v2631_v1  ;;  %v2633_v13 = vmul.f32 0.70710677, %v2119_v34 }
 0x435   : > { %v6335_v52 = vpop.eup %6334  ;;  %v3128_v18 = vadd.f32 1.0, %v6333_v3  ;;  %v10006_v35 = vmul.f32 0.5, %v2119_v34  ;;  %v10008_v44 = vmul.f32 0.5, %v1928_v46  ;;  %v2632_v15 = vmul.f32 0.70710677, %v1928_v46  ;;  %v10013_v33 = vpop.f32.mrb[168].mxu0 }
 0x436   : > { %v10011_v31 = vmul.f32 %v3129_v38, %v9947_v26  ;;  %v3130_v54 = vadd.f32 1.0, %v6335_v52  ;;  %6346 = verf.f32 %v2633_v13  ;;  %v2634_v4 = vmul.f32 0.70710677, %v2121_v36  ;;  %v10022_v5 = vpop.f32.mrb[169].mxu0  ;;  %v11036_v3 = vld [vmem:[#allocation61_spill] sm:$0xff]  ;;  %v11037_v38 = vld [vmem:[#allocation50_spill] sm:$0xff] }
 0x437   : > { %v10016_v11 = vmul.f32 %v3128_v18, %v9952_v0  ;;  %6348 = verf.f32 %v2632_v15  ;;  %v3519_v7 = vpack.c.bf16 %v9687_v10, %v9663_v21  ;;  %v3521_v1 = vpack.c.bf16 %v9724_v57, %v9672_v39  ;;  %v10030_v0 = vpop.f32.mrb[170].mxu0  ;;  %v11032_v21 = vld [vmem:[#allocation35_spill] sm:$0xff]  ;;  %v11033_v39 = vld [vmem:[#allocation48_spill] sm:$0xff]  ;;  %v11034_v57 = vld [vmem:[#allocation57_spill] sm:$0xff] }
 0x438   : > { %v10024_v34 = vmul.f32 %v3130_v54, %v2362_v32  ;;  %6350 = verf.f32 %v2634_v4  ;;  %v3528_v26 = vpack.c.bf16 %v9811_v43, %v9769_v12  ;;  %v3530_v62 = vpack.c.bf16 %v9824_v30, %v9784_v50  ;;  %v11035_v32 = vld [vmem:[#allocation58_spill] sm:$0xff]  ;;  %v10040_v12 = vpop.f32.mrb[171].mxu0 }
 0x439   : > { %v6337_v25 = vpop.eup %6336  ;;  %v10032_v46 = vmul.f32 0.5, %v2121_v36  ;;  %4510 = vmatmul.mubr.bf16.gmra.mrb[232].mxu0 %v3519_v7  ;;  %4671 = vmatmul.mubr.bf16.gmra.mrb[232].mxu1 %v3521_v1  ;;  %v5190_v10 = vadd.f32 %v11033_v39, %v11032_v21  ;;  %v5302_v8 = vadd.f32 %v11035_v32, %v11034_v57  ;;  %v5193_v13 = vadd.f32 %v11037_v38, %v11036_v3  ;;  %v11038_v30 = vld [vmem:[#allocation82_spill] sm:$0xff]  ;;  %v11039_v36 = vld [vmem:[#allocation83_spill] sm:$0xff]  ;;  %v10048_v54 = vpop.f32.mrb[168].mxu1  ;;  %v11047_v38 = vld [vmem:[#allocation28_spill] sm:$0xff] }
 0x43a   : > { %v6339_v43 = vpop.eup %6338  ;;  %v3135_v50 = vadd.f32 1.0, %v6337_v25  ;;  %4517 = vmatprep.mubr.bf16.mxu0 %v3528_v26  ;;  %4678 = vmatprep.mubr.bf16.mxu1 %v3530_v62  ;;  %v5305_v52 = vadd.f32 %v11039_v36, %v11038_v30  ;;  %v3527_v18 = vpack.c.bf16 %v9789_v51, %v9749_v24  ;;  %v3529_v15 = vpack.c.bf16 %v9794_v40, %v9756_v55  ;;  %v10056_v62 = vpop.f32.mrb[169].mxu1  ;;  %v11040_v55 = vld [vmem:[#allocation55_spill] sm:$0xff]  ;;  %v11041_v40 = vld [vmem:[#allocation62_spill] sm:$0xff] }
 0x43b   : > { %v6341_v4 = vpop.eup %6340  ;;  %v3137_v7 = vadd.f32 1.0, %v6339_v43  ;;  %v10050_v1 = vadd.f32 %v5302_v8, %v5190_v10  ;;  %v3536_v25 = vpack.c.bf16 %v9903_v59, %v9853_v42  ;;  %v3538_v26 = vpack.c.bf16 %v9910_v49, %v9864_v41  ;;  %v10065_v57 = vpop.f32.mrb[170].mxu1  ;;  %v11042_v42 = vld [vmem:[#allocation85_spill] sm:$0xff]  ;;  %v11043_v59 = vld [vmem:[#allocation87_spill] sm:$0xff]  ;;  %v11044_v49 = vld [vmem:[#allocation86_spill] sm:$0xff] }
 0x43c   : > { %v10059_v21 = vmul.f32 %v3135_v50, %v9971_v22  ;;  %v3136_v24 = vadd.f32 1.0, %v6341_v4  ;;  %v10061_v51 = vadd.f32 %v5305_v52, %v5193_v13  ;;  %v5196_v39 = vadd.f32 %v11041_v40, %v11040_v55  ;;  %v11045_v8 = vld [vmem:[#allocation88_spill] sm:$0xff]  ;;  %v11046_v22 = vld [vmem:[#allocation59_spill] sm:$0xff]  ;;  %v10076_v13 = vpop.f32.mrb[171].mxu1 }
 0x43d   : > { %v6343_v10 = vpop.eup %6342  ;;  %v10068_v32 = vmul.f32 %v3137_v7, %v9975_v17  ;;  %v5308_v41 = vadd.f32 %v11043_v59, %v11042_v42  ;;  %v5199_v3 = vadd.f32 %v11045_v8, %v11044_v49  ;;  %v5311_v43 = vadd.f32 %v11047_v38, %v11046_v22  ;;  %v11056_v8 = vld [vmem:[#allocation63_spill] sm:$0xff] }
 0x43e   : > { %v6345_v50 = vpop.eup %6344  ;;  %v10079_v30 = vmul.f32 %v3136_v24, %v9979_v29  ;;  %v3138_v36 = vadd.f32 1.0, %v6343_v10  ;;  %v3535_v17 = vpack.c.bf16 %v9875_v16, %v9845_v2  ;;  %v3537_v52 = vpack.c.bf16 %v9888_v60, %v9850_v48  ;;  %v11050_v24 = vld [vmem:[#allocation16_spill] sm:$0xff]  ;;  %v11051_v2 = vld [vmem:[#allocation42_spill] sm:$0xff]  ;;  %v11052_v10 = vld [vmem:[#allocation43_spill] sm:$0xff] }
 0x43f   : > { %v3143_v4 = vadd.f32 1.0, %v6345_v50  ;;  %v10085_v7 = vadd.f32 %v5308_v41, %v5196_v39  ;;  %v10087_v55 = vadd.f32 %v5311_v43, %v5199_v3  ;;  %v3544_v40 = vpack.c.bf16 %v9959_v20, %v9929_v63  ;;  %v11053_v48 = vld [vmem:[#allocation90_spill] sm:$0xff]  ;;  %v11054_v63 = vld [vmem:[#allocation89_spill] sm:$0xff]  ;;  %v11055_v20 = vld [vmem:[#allocation91_spill] sm:$0xff] }
 0x440   : > { %v6347_v42 = vpop.eup %6346  ;;  %v10092_v59 = vmul.f32 %v3138_v36, %v9987_v58  ;;  %v3546_v29 = vpack.c.bf16 %v9965_v37, %v9938_v23  ;;  %v5202_v16 = vadd.f32 %v11051_v2, %v11050_v24  ;;  %v5314_v60 = vadd.f32 %v11053_v48, %v11052_v10  ;;  %v11057_v3 = vld [vmem:[#allocation26_spill] sm:$0xff]  ;;  %v11062_v2 = vld [vmem:[#allocation27_spill] sm:$0xff]  ;;  %v11088_v43 = vld [vmem:[#allocation21_spill] sm:$0xff] }
 0x441   : > { %11048 = vst [vmem:[#allocation32_spill] sm:$0xff] %v10085_v7  ;;  %11049 = vst [vmem:[#allocation36_spill] sm:$0xff] %v10087_v55  ;;  %v6349_v39 = vpop.eup %6348  ;;  %v10101_v41 = vmul.f32 %v3143_v4, %v9997_v28  ;;  %v3145_v49 = vadd.f32 1.0, %v6347_v42  ;;  %4518 = vmatmul.mubr.bf16.gmra.mrb[236].mxu0 %v3527_v18  ;;  %4679 = vmatmul.mubr.bf16.gmra.mrb[236].mxu1 %v3529_v15  ;;  %v5205_v58 = vadd.f32 %v11055_v20, %v11054_v63  ;;  %v11060_v4 = vld [vmem:[#allocation72_spill] sm:$0xff]  ;;  %v11061_v42 = vld [vmem:[#allocation37_spill] sm:$0xff] }
 0x442   : > { %v5317_v22 = vadd.f32 %v11057_v3, %v11056_v8  ;;  %v6351_v23 = vpop.eup %6350  ;;  %v3144_v37 = vadd.f32 1.0, %v6349_v39  ;;  %4525 = vmatprep.mubr.bf16.mxu0 %v3536_v25  ;;  %4686 = vmatprep.mubr.bf16.mxu1 %v3538_v26  ;;  %v10107_v38 = vadd.f32 %v5314_v60, %v5202_v16  ;;  %v5208_v24 = vadd.f32 %v11061_v42, %v11060_v4  ;;  %v11063_v16 = vld [vmem:[#allocation39_spill] sm:$0xff]  ;;  %v11064_v48 = vld [vmem:[#allocation38_spill] sm:$0xff]  ;;  %v11065_v60 = vld [vmem:[#allocation56_spill] sm:$0xff] }
 0x443   : > { %v10114_v18 = vmul.f32 %v3145_v49, %v10006_v35  ;;  %v3146_v15 = vadd.f32 1.0, %v6351_v23  ;;  %v5320_v10 = vadd.f32 %v11063_v16, %v11062_v2  ;;  %v5211_v39 = vadd.f32 %v11065_v60, %v11064_v48  ;;  %v11066_v49 = vld [vmem:[#allocation49_spill] sm:$0xff]  ;;  %v11067_v63 = vld [vmem:[#allocation92_spill] sm:$0xff]  ;;  %v11072_v4 = vld [vmem:[#allocation19_spill] sm:$0xff] }
 0x444   : > { %11058 = vst [vmem:[#allocation45_spill] sm:$0xff] %v10107_v38  ;;  %v10116_v50 = vadd.f32 %v5317_v22, %v5205_v58  ;;  %v10121_v25 = vmul.f32 %v3144_v37, %v10008_v44  ;;  %v5323_v20 = vadd.f32 %v11067_v63, %v11066_v49  ;;  %v11069_v22 = vld [vmem:[#allocation51_spill] sm:$0xff]  ;;  %v11073_v42 = vld [vmem:[#allocation94_spill] sm:$0xff]  ;;  %v11074_v16 = vld [vmem:[#allocation93_spill] sm:$0xff] }
 0x445   : > { %v10130_v35 = vmul.f32 %v3146_v15, %v10032_v46  ;;  %v10138_v58 = vadd.f32 %v5320_v10, %v5208_v24  ;;  %v11070_v46 = vld [vmem:[#allocation18_spill] sm:$0xff]  ;;  %v5326_v2 = vadd.f32 %v11073_v42, %v11072_v4  ;;  %v11075_v24 = vld [vmem:[#allocation95_spill] sm:$0xff]  ;;  %v11076_v49 = vld [vmem:[#allocation96_spill] sm:$0xff] }
 0x446   : > { %11059 = vst [vmem:[#allocation40_spill] sm:$0xff] %v10116_v50  ;;  %v5214_v23 = vadd.f32 %v11070_v46, %v11069_v22  ;;  %v10146_v37 = vadd.f32 %v5323_v20, %v5211_v39  ;;  %v5217_v10 = vadd.f32 %v11075_v24, %v11074_v16  ;;  %v5254_v48 = vpop.f32.mrb[172].mxu0  ;;  %v11077_v63 = vld [vmem:[#allocation34_spill] sm:$0xff]  ;;  %v11078_v20 = vld [vmem:[#allocation20_spill] sm:$0xff]  ;;  %v11081_v42 = vld [vmem:[#allocation47_spill] sm:$0xff] }
 0x447   : > { %11068 = vst [vmem:[#allocation54_spill] sm:$0xff] %v10138_v58  ;;  %v5366_v60 = vpop.f32.mrb[172].mxu1  ;;  %v5329_v8 = vadd.f32 %v11077_v63, %v11076_v49  ;;  %v11079_v22 = vld [vmem:[#allocation46_spill] sm:$0xff]  ;;  %v5255_v15 = vpop.f32.mrb[173].mxu0  ;;  %v11082_v16 = vld [vmem:[#allocation67_spill] sm:$0xff]  ;;  %v11084_v49 = vld [vmem:[#allocation97_spill] sm:$0xff] }
 0x448   : > { %11071 = vst [vmem:[#allocation53_spill] sm:$0xff] %v10146_v37  ;;  %v5220_v46 = vadd.f32 %v11079_v22, %v11078_v20  ;;  %v5367_v44 = vpop.f32.mrb[173].mxu1  ;;  %v10162_v4 = vadd.f32 %v5326_v2, %v5214_v23  ;;  %v5332_v24 = vadd.f32 %v11082_v16, %v11081_v42  ;;  %v11083_v26 = vld [vmem:[#allocation66_spill] sm:$0xff]  ;;  %v5257_v36 = vpop.f32.mrb[174].mxu0  ;;  %v11087_v20 = vld [vmem:[#allocation68_spill] sm:$0xff]  ;;  %v11091_v42 = vld [vmem:[#allocation99_spill] sm:$0xff] }
 0x449   : > { %4526 = vmatmul.mubr.bf16.gmra.mrb[240].mxu0 %v3535_v17  ;;  %4687 = vmatmul.mubr.bf16.gmra.mrb[240].mxu1 %v3537_v52  ;;  %v5223_v63 = vadd.f32 %v11084_v49, %v11083_v26  ;;  %v5369_v3 = vpop.f32.mrb[174].mxu1  ;;  %v10168_v39 = vadd.f32 %v5329_v8, %v5217_v10  ;;  %v11086_v28 = vld [vmem:[#allocation98_spill] sm:$0xff]  ;;  %v11089_v17 = vld [vmem:[#allocation69_spill] sm:$0xff]  ;;  %v5258_v23 = vpop.f32.mrb[175].mxu0  ;;  %v11093_v26 = vld [vmem:[#allocation100_spill] sm:$0xff] }
 0x44a   : > { %11080 = vst [vmem:[#allocation30_spill] sm:$0xff] %v10162_v4  ;;  %4533 = vmatprep.mubr.bf16.mxu0 %v3544_v40  ;;  %4694 = vmatprep.mubr.bf16.mxu1 %v3546_v29  ;;  %v5335_v22 = vadd.f32 %v11087_v20, %v11086_v28  ;;  %v5226_v52 = vadd.f32 %v11089_v17, %v11088_v43  ;;  %v5370_v2 = vpop.f32.mrb[175].mxu1  ;;  %v11092_v16 = vld [vmem:[#allocation101_spill] sm:$0xff]  ;;  %v11094_v49 = vld [vmem:[#allocation102_spill] sm:$0xff]  ;;  %v11099_v28 = vld [vmem:[#allocation71_spill] sm:$0xff] }
 0x44b   : > { %11085 = vst [vmem:[#allocation25_spill] sm:$0xff] %v10168_v39  ;;  %v10174_v4 = vadd.f32 %v5332_v24, %v5220_v46  ;;  %v5338_v37 = vadd.f32 %v11092_v16, %v11091_v42  ;;  %v5229_v58 = vadd.f32 %v11094_v49, %v11093_v26  ;;  %v11095_v40 = vld [vmem:[#allocation17_spill] sm:$0xff]  ;;  %v11096_v29 = vld [vmem:[#allocation70_spill] sm:$0xff]  ;;  %v11098_v39 = vld [vmem:[#allocation64_spill] sm:$0xff] }
 0x44c   : > { %v5341_v8 = vadd.f32 %v11096_v29, %v11095_v40  ;;  %v10182_v10 = vadd.f32 %v5335_v22, %v5223_v63  ;;  %v5232_v20 = vadd.f32 %v11099_v28, %v11098_v39  ;;  %v11100_v50 = vld [vmem:[#allocation65_spill] sm:$0xff]  ;;  %v11101_v43 = vld [vmem:[#allocation103_spill] sm:$0xff]  ;;  %v11102_v38 = vld [vmem:[#allocation60_spill] sm:$0xff] }
 0x44d   : > { %11090 = vst [vmem:[#allocation24_spill] sm:$0xff] %v10174_v4  ;;  %v5344_v17 = vadd.f32 %v11101_v43, %v11100_v50  ;;  %v11103_v46 = vld [vmem:[#allocation104_spill] sm:$0xff]  ;;  %v10190_v4 = vadd.f32 %v5338_v37, %v5226_v52  ;;  %v11104_v16 = vld [vmem:[#allocation73_spill] sm:$0xff]  ;;  %v11105_v26 = vld [vmem:[#allocation74_spill] sm:$0xff] }
 0x44e   : > { %11097 = vst [vmem:[#allocation79_spill] sm:$0xff] %v10182_v10  ;;  %v5235_v24 = vadd.f32 %v11103_v46, %v11102_v38  ;;  %v10192_v42 = vadd.f32 %v5341_v8, %v5229_v58  ;;  %v5347_v49 = vadd.f32 %v11105_v26, %v11104_v16  ;;  %v11106_v55 = vld [vmem:[#allocation84_spill] sm:$0xff]  ;;  %v11107_v40 = vld [vmem:[#allocation29_spill] sm:$0xff]  ;;  %v11109_v39 = vld [vmem:[#allocation22_spill] sm:$0xff] }
 0x44f   : > { %v5238_v63 = vadd.f32 %v11107_v40, %v11106_v55  ;;  %v10198_v22 = vadd.f32 %v5344_v17, %v5232_v20  ;;  %v11108_v29 = vld [vmem:[#allocation33_spill] sm:$0xff]  ;;  %v11110_v10 = vld [vmem:[#allocation23_spill] sm:$0xff]  ;;  %v11111_v50 = vld [vmem:[#allocation76_spill] sm:$0xff] }
 0x450   : > { %v5350_v28 = vadd.f32 %v11109_v39, %v11108_v29  ;;  %v5241_v43 = vadd.f32 %v11111_v50, %v11110_v10  ;;  %v11112_v7 = vld [vmem:[#allocation75_spill] sm:$0xff]  ;;  %v11113_v38 = vld [vmem:[#allocation105_spill] sm:$0xff]  ;;  %v10206_v52 = vadd.f32 %v5347_v49, %v5235_v24  ;;  %v11114_v58 = vld [vmem:[#allocation106_spill] sm:$0xff]  ;;  %v11121_v24 = vpack.c.bf16 %v9945_v27, %v9921_v19 }
 0x451   : > { %v5353_v37 = vadd.f32 %v11113_v38, %v11112_v7  ;;  %v11115_v8 = vld [vmem:[#allocation77_spill] sm:$0xff]  ;;  %v11116_v16 = vld [vmem:[#allocation107_spill] sm:$0xff]  ;;  %v11117_v55 = vld [vmem:[#allocation78_spill] sm:$0xff]  ;;  %v5250_v7 = vadd.f32 %v10022_v5, %v10013_v33  ;;  %v11124_v19 = vpack.c.bf16 %v10024_v34, %v9993_v56  ;;  %v5260_v33 = vpop.f32.mrb[176].mxu0 }
 0x452   : > { %v5244_v46 = vadd.f32 %v11115_v8, %v11114_v58  ;;  %v5356_v26 = vadd.f32 %v11116_v16, %v9870_v53  ;;  %v11118_v20 = vld [vmem:[#allocation108_spill] sm:$0xff]  ;;  %v10214_v40 = vadd.f32 %v5350_v28, %v5238_v63  ;;  %v11119_v39 = vld [vmem:[#allocation109_spill] sm:$0xff]  ;;  %v11120_v10 = vld [vmem:[#allocation110_spill] sm:$0xff]  ;;  %4534 = vmatmul.mubr.bf16.gmra.mrb[244].mxu0 %v11121_v24  ;;  %v11122_v53 = vpack.c.bf16 %v9950_v61, %v9924_v6 }
 0x453   : > { %v5247_v17 = vadd.f32 %v11118_v20, %v11117_v55  ;;  %v10216_v29 = vadd.f32 %v5353_v37, %v5241_v43  ;;  %v5359_v50 = vadd.f32 %v11120_v10, %v11119_v39  ;;  %v5362_v63 = vadd.f32 %v10056_v62, %v10048_v54  ;;  %v5372_v34 = vpop.f32.mrb[176].mxu1 }
 0x454   : > { %4695 = vmatmul.mubr.bf16.gmra.mrb[244].mxu1 %v11122_v53  ;;  %v10228_v49 = vadd.f32 %v5356_v26, %v5244_v46  ;;  %v5253_v28 = vadd.f32 %v10040_v12, %v10030_v0  ;;  %v11123_v43 = vpack.c.bf16 %v10016_v11, %v9990_v9  ;;  %v5365_v6 = vadd.f32 %v10076_v13, %v10065_v57  ;;  %v5261_v12 = vpop.f32.mrb[177].mxu0  ;;  %v5373_v8 = vpop.f32.mrb[177].mxu1 }
 0x455   : > { %4702 = vmatprep.mubr.bf16.mxu1 %v11124_v19  ;;  %v10240_v27 = vadd.f32 %v5359_v50, %v5247_v17  ;;  %v5256_v61 = vadd.f32 %v5255_v15, %v5254_v48  ;;  %v10244_v5 = vadd.f32 %v5362_v63, %v5250_v7  ;;  %v5368_v54 = vadd.f32 %v5367_v44, %v5366_v60  ;;  %v5263_v11 = vpop.f32.mrb[178].mxu0  ;;  %v5375_v15 = vpop.f32.mrb[178].mxu1 }
 0x456   : > { %4541 = vmatprep.mubr.bf16.mxu0 %v11123_v43  ;;  %v5259_v62 = vadd.f32 %v5258_v23, %v5257_v36  ;;  %v5371_v0 = vadd.f32 %v5370_v2, %v5369_v3  ;;  %v10246_v38 = vadd.f32 %v5365_v6, %v5253_v28  ;;  %v5262_v9 = vadd.f32 %v5261_v12, %v5260_v33  ;;  %v5264_v58 = vpop.f32.mrb[179].mxu0  ;;  %v5376_v48 = vpop.f32.mrb[179].mxu1 }
 0x457   : > { %v10248_v37 = vadd.f32 %v5368_v54, %v5256_v61  ;;  %v5265_v57 = vadd.f32 %v5264_v58, %v5263_v11  ;;  %v5374_v13 = vadd.f32 %v5373_v8, %v5372_v34  ;;  %v11125_v36 = vpack.c.bf16 %v10004_v45, %v9982_v47 }
 0x458   : > { %v10250_v56 = vadd.f32 %v5371_v0, %v5259_v62  ;;  %v11126_v44 = vpack.c.bf16 %v10011_v31, %v9985_v14  ;;  %v5377_v60 = vadd.f32 %v5376_v48, %v5375_v15  ;;  %v11127_v23 = vpack.c.bf16 %v10121_v25, %v10079_v30 }
 0x459   : > { %v10258_v3 = vadd.f32 %v5374_v13, %v5262_v9  ;;  %v11128_v2 = vpack.c.bf16 %v10130_v35, %v10092_v59  ;;  %v11129_v14 = vpack.c.bf16 %v10101_v41, %v10059_v21  ;;  %v11130_v31 = vpack.c.bf16 %v10114_v18, %v10068_v32 }
 0x45a   : > { %4542 = vmatmul.mubr.bf16.gmra.mrb[248].mxu0 %v11125_v36  ;;  %v10266_v46 = vadd.f32 %v5377_v60, %v5265_v57 }
 0x45b   : > { %4549 = vmatprep.mubr.bf16.mxu0 %v11127_v23 }
 0x45c   : > { %4703 = vmatmul.mubr.bf16.gmra.mrb[248].mxu1 %v11126_v44 }
 0x45d   : > { %4710 = vmatprep.mubr.bf16.mxu1 %v11128_v2 }
 0x45e   : > { %v5266_v16 = vpop.f32.mrb[180].mxu0  ;;  %v5378_v47 = vpop.f32.mrb[180].mxu1 }
 0x45f   : > { %v5267_v45 = vpop.f32.mrb[181].mxu0  ;;  %v5379_v26 = vpop.f32.mrb[181].mxu1 }
 0x460   : > { %v5268_v30 = vadd.f32 %v5267_v45, %v5266_v16  ;;  %v5380_v25 = vadd.f32 %v5379_v26, %v5378_v47  ;;  %v5269_v55 = vpop.f32.mrb[182].mxu0  ;;  %v5381_v20 = vpop.f32.mrb[182].mxu1 }
 0x461   : > { %v5270_v59 = vpop.f32.mrb[183].mxu0  ;;  %v5382_v35 = vpop.f32.mrb[183].mxu1 }
 0x462   : > { %4550 = vmatmul.mubr.bf16.gmra.mrb[252].mxu0 %v11129_v14  ;;  %v10274_v17 = vadd.f32 %v5380_v25, %v5268_v30  ;;  %v5271_v39 = vadd.f32 %v5270_v59, %v5269_v55  ;;  %v5383_v10 = vadd.f32 %v5382_v35, %v5381_v20  ;;  %v10290_v55 = vld [vmem:[%s10453_s6] ss:$0 sm:$0xff] }
 0x464   : > { %4711 = vmatmul.mubr.bf16.gmra.mrb[252].mxu1 %v11130_v31  ;;  %v10276_v50 = vadd.f32 %v5383_v10, %v5271_v39 }
 0x469   : > { %v5272_v7 = vpop.f32.mrb[184].mxu0  ;;  %v5384_v24 = vpop.f32.mrb[184].mxu1 }
 0x46a   : > { %v5273_v21 = vpop.f32.mrb[185].mxu0  ;;  %v5385_v41 = vpop.f32.mrb[185].mxu1 }
 0x46b   : > { %v5274_v53 = vadd.f32 %v5273_v21, %v5272_v7  ;;  %v5386_v63 = vadd.f32 %v5385_v41, %v5384_v24  ;;  %v5275_v32 = vpop.f32.mrb[186].mxu0  ;;  %v5387_v18 = vpop.f32.mrb[186].mxu1 }
 0x46c   : > { %v5276_v28 = vpop.f32.mrb[187].mxu0  ;;  %v5388_v43 = vpop.f32.mrb[187].mxu1 }
 0x46d   : > { %v10278_v19 = vadd.f32 %v5386_v63, %v5274_v53  ;;  %v5277_v6 = vadd.f32 %v5276_v28, %v5275_v32  ;;  %v5389_v61 = vadd.f32 %v5388_v43, %v5387_v18  ;;  %v11131_v43 = vld [vmem:[#allocation32_spill] sm:$0xff] }
 0x46f   : > { %v10280_v33 = vadd.f32 %v5389_v61, %v5277_v6 }
 0x478   : > { %v5278_v54 = vpop.f32.mrb[188].mxu0 }
 0x479   : > { %v5390_v62 = vpop.f32.mrb[188].mxu1  ;;  %v5279_v0 = vpop.f32.mrb[189].mxu0 }
 0x47a   : > { %v5280_v12 = vadd.f32 %v5279_v0, %v5278_v54  ;;  %v5391_v9 = vpop.f32.mrb[189].mxu1  ;;  %v5281_v11 = vpop.f32.mrb[190].mxu0  ;;  %v11132_v0 = vld [vmem:[#allocation36_spill] sm:$0xff] }
 0x47b   : > { %v5392_v34 = vadd.f32 %v5391_v9, %v5390_v62  ;;  %v5393_v58 = vpop.f32.mrb[190].mxu1  ;;  %v5282_v8 = vpop.f32.mrb[191].mxu0 }
 0x47c   : > { %v5283_v57 = vadd.f32 %v5282_v8, %v5281_v11  ;;  %v5394_v13 = vpop.f32.mrb[191].mxu1 }
 0x47d   : > { %v10282_v15 = vadd.f32 %v5392_v34, %v5280_v12  ;;  %v5395_v48 = vadd.f32 %v5394_v13, %v5393_v58 }
 0x47f   : > { %v10284_v36 = vadd.f32 %v5395_v48, %v5283_v57 }
 0x483   : > { %v5412_v44 = vpop.f32.mrb[192].mxu0 }
 0x484   : > { %v5524_v60 = vpop.f32.mrb[192].mxu1  ;;  %v5413_v23 = vpop.f32.mrb[193].mxu0 }
 0x485   : > { %v5414_v2 = vadd.f32 %v5413_v23, %v5412_v44  ;;  %v5525_v16 = vpop.f32.mrb[193].mxu1  ;;  %v5415_v47 = vpop.f32.mrb[194].mxu0 }
 0x486   : > { %v5526_v45 = vadd.f32 %v5525_v16, %v5524_v60  ;;  %v5527_v26 = vpop.f32.mrb[194].mxu1  ;;  %v5416_v14 = vpop.f32.mrb[195].mxu0  ;;  %v11133_v16 = vld [vmem:[#allocation45_spill] sm:$0xff] }
 0x487   : > { %v4432_v31 = vadd.f32 %v5414_v2, %v10050_v1  ;;  %v5417_v30 = vadd.f32 %v5416_v14, %v5415_v47  ;;  %v5528_v25 = vpop.f32.mrb[195].mxu1 }
 0x488   : > { %v5529_v20 = vadd.f32 %v5528_v25, %v5527_v26 }
 0x489   : > { %v4593_v59 = vadd.f32 %v5526_v45, %v4432_v31  ;;  %v4435_v35 = vadd.f32 %v5417_v30, %v10061_v51  ;;  %v11134_v30 = vld [vmem:[#allocation40_spill] sm:$0xff] }
 0x48b   : > { %v4825_v39 = vadd.f32 %v10290_v55, %v4593_v59  ;;  %v4596_v10 = vadd.f32 %v5529_v20, %v4435_v35 }
 0x48d   : > { %4857 = vst [vmem:[%s10296_s30] sm:$0xff] %v4825_v39  ;;  %v4826_v1 = vadd.f32 %v10290_v55, %v4596_v10 }
 0x48f   : > { %4858 = vst [vmem:[%s10296_s30 + $0x8] sm:$0xff] %v4826_v1 }
 0x491   : > { %v5418_v7 = vpop.f32.mrb[196].mxu0  ;;  %v5530_v24 = vpop.f32.mrb[196].mxu1 }
 0x492   : > { %v5419_v21 = vpop.f32.mrb[197].mxu0  ;;  %v5531_v41 = vpop.f32.mrb[197].mxu1 }
 0x493   : > { %v5420_v53 = vadd.f32 %v5419_v21, %v5418_v7  ;;  %v5532_v51 = vadd.f32 %v5531_v41, %v5530_v24  ;;  %v5421_v63 = vpop.f32.mrb[198].mxu0  ;;  %v5533_v32 = vpop.f32.mrb[198].mxu1 }
 0x494   : > { %v5422_v18 = vpop.f32.mrb[199].mxu0  ;;  %v5534_v28 = vpop.f32.mrb[199].mxu1 }
 0x495   : > { %v4440_v6 = vadd.f32 %v5420_v53, %v11131_v43  ;;  %v5423_v61 = vadd.f32 %v5422_v18, %v5421_v63  ;;  %v5535_v54 = vadd.f32 %v5534_v28, %v5533_v32  ;;  %v11135_v53 = vld [vmem:[#allocation54_spill] sm:$0xff] }
 0x497   : > { %v4601_v62 = vadd.f32 %v5532_v51, %v4440_v6  ;;  %v4443_v12 = vadd.f32 %v5423_v61, %v11132_v0  ;;  %v11136_v6 = vld [vmem:[#allocation53_spill] sm:$0xff] }
 0x499   : > { %v4827_v9 = vadd.f32 %v10290_v55, %v4601_v62  ;;  %v4604_v11 = vadd.f32 %v5535_v54, %v4443_v12 }
 0x49b   : > { %4859 = vst [vmem:[%s10296_s30 + $0x10] sm:$0xff] %v4827_v9  ;;  %v4828_v34 = vadd.f32 %v10290_v55, %v4604_v11 }
 0x49d   : > { %4860 = vst [vmem:[%s10296_s30 + $0x18] sm:$0xff] %v4828_v34 }
 0x4a0   : > { %v5424_v58 = vpop.f32.mrb[200].mxu0 }
 0x4a1   : > { %v5536_v8 = vpop.f32.mrb[200].mxu1  ;;  %v5425_v57 = vpop.f32.mrb[201].mxu0 }
 0x4a2   : > { %v5426_v13 = vadd.f32 %v5425_v57, %v5424_v58  ;;  %v5537_v48 = vpop.f32.mrb[201].mxu1  ;;  %v5427_v44 = vpop.f32.mrb[202].mxu0 }
 0x4a3   : > { %v5538_v60 = vadd.f32 %v5537_v48, %v5536_v8  ;;  %v5539_v23 = vpop.f32.mrb[202].mxu1  ;;  %v5428_v2 = vpop.f32.mrb[203].mxu0  ;;  %v11137_v48 = vld [vmem:[#allocation30_spill] sm:$0xff] }
 0x4a4   : > { %v4448_v47 = vadd.f32 %v5426_v13, %v11133_v16  ;;  %v5429_v45 = vadd.f32 %v5428_v2, %v5427_v44  ;;  %v5540_v26 = vpop.f32.mrb[203].mxu1 }
 0x4a5   : > { %v5541_v14 = vadd.f32 %v5540_v26, %v5539_v23 }
 0x4a6   : > { %v4609_v31 = vadd.f32 %v5538_v60, %v4448_v47  ;;  %v4451_v25 = vadd.f32 %v5429_v45, %v11134_v30  ;;  %v11138_v45 = vld [vmem:[#allocation25_spill] sm:$0xff] }
 0x4a8   : > { %v4829_v20 = vadd.f32 %v10290_v55, %v4609_v31  ;;  %v4612_v59 = vadd.f32 %v5541_v14, %v4451_v25 }
 0x4aa   : > { %4861 = vst [vmem:[%s10296_s30 + $0x20] sm:$0xff] %v4829_v20  ;;  %v4830_v35 = vadd.f32 %v10290_v55, %v4612_v59 }
 0x4ac   : > { %4862 = vst [vmem:[%s10296_s30 + $0x28] sm:$0xff] %v4830_v35  ;;  %v5430_v39 = vpop.f32.mrb[204].mxu0 }
 0x4ad   : > { %v5431_v10 = vpop.f32.mrb[205].mxu0 }
 0x4ae   : > { %v5542_v1 = vpop.f32.mrb[204].mxu1  ;;  %v5432_v7 = vadd.f32 %v5431_v10, %v5430_v39  ;;  %v5433_v24 = vpop.f32.mrb[206].mxu0 }
 0x4af   : > { %v5543_v21 = vpop.f32.mrb[205].mxu1  ;;  %v5434_v41 = vpop.f32.mrb[207].mxu0 }
 0x4b0   : > { %v4456_v51 = vadd.f32 %v5432_v7, %v11135_v53  ;;  %v5544_v63 = vadd.f32 %v5543_v21, %v5542_v1  ;;  %v5545_v32 = vpop.f32.mrb[206].mxu1  ;;  %v5435_v18 = vadd.f32 %v5434_v41, %v5433_v24  ;;  %v11139_v7 = vld [vmem:[#allocation24_spill] sm:$0xff] }
 0x4b1   : > { %v5546_v28 = vpop.f32.mrb[207].mxu1 }
 0x4b2   : > { %v4617_v43 = vadd.f32 %v5544_v63, %v4456_v51  ;;  %v4459_v61 = vadd.f32 %v5435_v18, %v11136_v6  ;;  %v5547_v54 = vadd.f32 %v5546_v28, %v5545_v32  ;;  %v11140_v63 = vld [vmem:[#allocation79_spill] sm:$0xff] }
 0x4b4   : > { %v4831_v62 = vadd.f32 %v10290_v55, %v4617_v43  ;;  %v4620_v0 = vadd.f32 %v5547_v54, %v4459_v61 }
 0x4b6   : > { %4863 = vst [vmem:[%s10296_s30 + $0x30] sm:$0xff] %v4831_v62  ;;  %v4832_v12 = vadd.f32 %v10290_v55, %v4620_v0 }
 0x4b8   : > { %4864 = vst [vmem:[%s10296_s30 + $0x38] sm:$0xff] %v4832_v12 }
 0x4b9   : > { %v5436_v9 = vpop.f32.mrb[208].mxu0 }
 0x4ba   : > { %v5437_v11 = vpop.f32.mrb[209].mxu0 }
 0x4bb   : > { %v5548_v34 = vpop.f32.mrb[208].mxu1  ;;  %v5438_v58 = vadd.f32 %v5437_v11, %v5436_v9  ;;  %v5439_v8 = vpop.f32.mrb[210].mxu0 }
 0x4bc   : > { %v5549_v57 = vpop.f32.mrb[209].mxu1  ;;  %v5440_v13 = vpop.f32.mrb[211].mxu0 }
 0x4bd   : > { %v4464_v44 = vadd.f32 %v5438_v58, %v11137_v48  ;;  %v5550_v60 = vadd.f32 %v5549_v57, %v5548_v34  ;;  %v5551_v23 = vpop.f32.mrb[210].mxu1  ;;  %v5441_v2 = vadd.f32 %v5440_v13, %v5439_v8 }
 0x4be   : > { %v5552_v16 = vpop.f32.mrb[211].mxu1 }
 0x4bf   : > { %v4625_v47 = vadd.f32 %v5550_v60, %v4464_v44  ;;  %v4467_v26 = vadd.f32 %v5441_v2, %v11138_v45  ;;  %v5553_v14 = vadd.f32 %v5552_v16, %v5551_v23 }
 0x4c1   : > { %v4833_v31 = vadd.f32 %v10290_v55, %v4625_v47  ;;  %v4628_v30 = vadd.f32 %v5553_v14, %v4467_v26 }
 0x4c3   : > { %4865 = vst [vmem:[%s10296_s30 + $0x40] sm:$0xff] %v4833_v31  ;;  %v4834_v25 = vadd.f32 %v10290_v55, %v4628_v30 }
 0x4c5   : > { %4866 = vst [vmem:[%s10296_s30 + $0x48] sm:$0xff] %v4834_v25 }
 0x4c6   : > { %v5442_v20 = vpop.f32.mrb[212].mxu0 }
 0x4c7   : > { %v5443_v59 = vpop.f32.mrb[213].mxu0 }
 0x4c8   : > { %v5444_v35 = vadd.f32 %v5443_v59, %v5442_v20  ;;  %v5445_v39 = vpop.f32.mrb[214].mxu0  ;;  %v5554_v10 = vpop.f32.mrb[212].mxu1 }
 0x4c9   : > { %v5446_v1 = vpop.f32.mrb[215].mxu0  ;;  %v5555_v21 = vpop.f32.mrb[213].mxu1 }
 0x4ca   : > { %v4472_v24 = vadd.f32 %v5444_v35, %v11139_v7  ;;  %v5447_v41 = vadd.f32 %v5446_v1, %v5445_v39  ;;  %v5556_v53 = vadd.f32 %v5555_v21, %v5554_v10  ;;  %v5557_v51 = vpop.f32.mrb[214].mxu1 }
 0x4cb   : > { %v5558_v18 = vpop.f32.mrb[215].mxu1 }
 0x4cc   : > { %v4475_v32 = vadd.f32 %v5447_v41, %v11140_v63  ;;  %v4633_v28 = vadd.f32 %v5556_v53, %v4472_v24  ;;  %v5559_v43 = vadd.f32 %v5558_v18, %v5557_v51 }
 0x4ce   : > { %v4835_v6 = vadd.f32 %v10290_v55, %v4633_v28  ;;  %v4636_v61 = vadd.f32 %v5559_v43, %v4475_v32 }
 0x4d0   : > { %4867 = vst [vmem:[%s10296_s30 + $0x50] sm:$0xff] %v4835_v6  ;;  %v4836_v54 = vadd.f32 %v10290_v55, %v4636_v61 }
 0x4d2   : > { %4868 = vst [vmem:[%s10296_s30 + $0x58] sm:$0xff] %v4836_v54 }
 0x4d6   : > { %v5448_v62 = vpop.f32.mrb[216].mxu0  ;;  %v5560_v0 = vpop.f32.mrb[216].mxu1 }
 0x4d7   : > { %v5449_v12 = vpop.f32.mrb[217].mxu0  ;;  %v5561_v9 = vpop.f32.mrb[217].mxu1 }
 0x4d8   : > { %v5450_v11 = vadd.f32 %v5449_v12, %v5448_v62  ;;  %v5562_v34 = vadd.f32 %v5561_v9, %v5560_v0  ;;  %v5451_v58 = vpop.f32.mrb[218].mxu0  ;;  %v5563_v8 = vpop.f32.mrb[218].mxu1 }
 0x4d9   : > { %v5452_v57 = vpop.f32.mrb[219].mxu0  ;;  %v5564_v13 = vpop.f32.mrb[219].mxu1 }
 0x4da   : > { %v4480_v48 = vadd.f32 %v5450_v11, %v10190_v4  ;;  %v5453_v44 = vadd.f32 %v5452_v57, %v5451_v58  ;;  %v5565_v60 = vadd.f32 %v5564_v13, %v5563_v8 }
 0x4dc   : > { %v4641_v23 = vadd.f32 %v5562_v34, %v4480_v48  ;;  %v4483_v2 = vadd.f32 %v5453_v44, %v10192_v42 }
 0x4de   : > { %v4837_v16 = vadd.f32 %v10290_v55, %v4641_v23  ;;  %v4644_v47 = vadd.f32 %v5565_v60, %v4483_v2 }
 0x4e0   : > { %4869 = vst [vmem:[%s10296_s30 + $0x60] sm:$0xff] %v4837_v16  ;;  %v4838_v45 = vadd.f32 %v10290_v55, %v4644_v47 }
 0x4e2   : > { %v5454_v26 = vpop.f32.mrb[220].mxu0  ;;  %4870 = vst [vmem:[%s10296_s30 + $0x68] sm:$0xff] %v4838_v45 }
 0x4e3   : > { %v5455_v14 = vpop.f32.mrb[221].mxu0 }
 0x4e4   : > { %v5566_v31 = vpop.f32.mrb[220].mxu1  ;;  %v5456_v30 = vadd.f32 %v5455_v14, %v5454_v26  ;;  %v5457_v25 = vpop.f32.mrb[222].mxu0 }
 0x4e5   : > { %v5567_v4 = vpop.f32.mrb[221].mxu1  ;;  %v5458_v20 = vpop.f32.mrb[223].mxu0 }
 0x4e6   : > { %v4488_v59 = vadd.f32 %v5456_v30, %v10198_v22  ;;  %v5568_v35 = vadd.f32 %v5567_v4, %v5566_v31  ;;  %v5569_v42 = vpop.f32.mrb[222].mxu1  ;;  %v5459_v39 = vadd.f32 %v5458_v20, %v5457_v25 }
 0x4e7   : > { %v5570_v10 = vpop.f32.mrb[223].mxu1 }
 0x4e8   : > { %v4649_v1 = vadd.f32 %v5568_v35, %v4488_v59  ;;  %v4491_v7 = vadd.f32 %v5459_v39, %v10206_v52  ;;  %v5571_v24 = vadd.f32 %v5570_v10, %v5569_v42 }
 0x4ea   : > { %v4839_v21 = vadd.f32 %v10290_v55, %v4649_v1  ;;  %v4652_v41 = vadd.f32 %v5571_v24, %v4491_v7 }
 0x4ec   : > { %4871 = vst [vmem:[%s10296_s30 + $0x70] sm:$0xff] %v4839_v21  ;;  %v4840_v53 = vadd.f32 %v10290_v55, %v4652_v41 }
 0x4ee   : > { %4872 = vst [vmem:[%s10296_s30 + $0x78] sm:$0xff] %v4840_v53 }
 0x4ef   : > { %v5460_v51 = vpop.f32.mrb[224].mxu0 }
 0x4f0   : > { %v5461_v63 = vpop.f32.mrb[225].mxu0  ;;  %v5572_v32 = vpop.f32.mrb[224].mxu1 }
 0x4f1   : > { %v5462_v22 = vadd.f32 %v5461_v63, %v5460_v51  ;;  %v5463_v18 = vpop.f32.mrb[226].mxu0  ;;  %v5573_v28 = vpop.f32.mrb[225].mxu1 }
 0x4f2   : > { %v5464_v43 = vpop.f32.mrb[227].mxu0  ;;  %v5574_v52 = vadd.f32 %v5573_v28, %v5572_v32  ;;  %v5575_v61 = vpop.f32.mrb[226].mxu1 }
 0x4f3   : > { %v4496_v6 = vadd.f32 %v5462_v22, %v10214_v40  ;;  %v5465_v54 = vadd.f32 %v5464_v43, %v5463_v18  ;;  %v5576_v62 = vpop.f32.mrb[227].mxu1 }
 0x4f4   : > { %v5577_v9 = vadd.f32 %v5576_v62, %v5575_v61 }
 0x4f5   : > { %v4657_v0 = vadd.f32 %v5574_v52, %v4496_v6  ;;  %v4499_v12 = vadd.f32 %v5465_v54, %v10216_v29 }
 0x4f7   : > { %v4841_v11 = vadd.f32 %v10290_v55, %v4657_v0  ;;  %v4660_v34 = vadd.f32 %v5577_v9, %v4499_v12 }
 0x4f9   : > { %4873 = vst [vmem:[%s10296_s30 + $0x80] sm:$0xff] %v4841_v11  ;;  %v4842_v58 = vadd.f32 %v10290_v55, %v4660_v34 }
 0x4fb   : > { %4874 = vst [vmem:[%s10296_s30 + $0x88] sm:$0xff] %v4842_v58 }
 0x4fc   : > { %v5466_v8 = vpop.f32.mrb[228].mxu0 }
 0x4fd   : > { %v5467_v57 = vpop.f32.mrb[229].mxu0 }
 0x4fe   : > { %v5468_v13 = vadd.f32 %v5467_v57, %v5466_v8  ;;  %v5469_v40 = vpop.f32.mrb[230].mxu0 }
 0x4ff   : > { %v5578_v48 = vpop.f32.mrb[228].mxu1  ;;  %v5470_v44 = vpop.f32.mrb[231].mxu0 }
 0x500   : > { %v4504_v60 = vadd.f32 %v5468_v13, %v10228_v49  ;;  %v5579_v23 = vpop.f32.mrb[229].mxu1  ;;  %v5471_v29 = vadd.f32 %v5470_v44, %v5469_v40 }
 0x501   : > { %v5580_v2 = vadd.f32 %v5579_v23, %v5578_v48  ;;  %v5581_v16 = vpop.f32.mrb[230].mxu1 }
 0x502   : > { %v4507_v47 = vadd.f32 %v5471_v29, %v10240_v27  ;;  %v5582_v45 = vpop.f32.mrb[231].mxu1 }
 0x503   : > { %v4665_v26 = vadd.f32 %v5580_v2, %v4504_v60  ;;  %v5583_v14 = vadd.f32 %v5582_v45, %v5581_v16 }
 0x505   : > { %v4843_v31 = vadd.f32 %v10290_v55, %v4665_v26  ;;  %v4668_v30 = vadd.f32 %v5583_v14, %v4507_v47 }
 0x507   : > { %4875 = vst [vmem:[%s10296_s30 + $0x90] sm:$0xff] %v4843_v31  ;;  %v4844_v25 = vadd.f32 %v10290_v55, %v4668_v30 }
 0x509   : > { %4876 = vst [vmem:[%s10296_s30 + $0x98] sm:$0xff] %v4844_v25 }
 0x50c   : > { %v5472_v4 = vpop.f32.mrb[232].mxu0  ;;  %v5584_v20 = vpop.f32.mrb[232].mxu1 }
 0x50d   : > { %v5473_v59 = vpop.f32.mrb[233].mxu0  ;;  %v5585_v49 = vpop.f32.mrb[233].mxu1 }
 0x50e   : > { %v5474_v35 = vadd.f32 %v5473_v59, %v5472_v4  ;;  %v5586_v42 = vadd.f32 %v5585_v49, %v5584_v20  ;;  %v5475_v39 = vpop.f32.mrb[234].mxu0  ;;  %v5587_v10 = vpop.f32.mrb[234].mxu1 }
 0x50f   : > { %v5476_v27 = vpop.f32.mrb[235].mxu0  ;;  %v5588_v1 = vpop.f32.mrb[235].mxu1 }
 0x510   : > { %v4512_v7 = vadd.f32 %v5474_v35, %v10244_v5  ;;  %v5477_v24 = vadd.f32 %v5476_v27, %v5475_v39  ;;  %v5589_v21 = vadd.f32 %v5588_v1, %v5587_v10 }
 0x512   : > { %v4673_v41 = vadd.f32 %v5586_v42, %v4512_v7  ;;  %v4515_v53 = vadd.f32 %v5477_v24, %v10246_v38 }
 0x514   : > { %v4845_v51 = vadd.f32 %v10290_v55, %v4673_v41  ;;  %v4676_v63 = vadd.f32 %v5589_v21, %v4515_v53  ;;  %v5478_v32 = vpop.f32.mrb[236].mxu0  ;;  %v5590_v22 = vpop.f32.mrb[236].mxu1 }
 0x515   : > { %v5479_v18 = vpop.f32.mrb[237].mxu0  ;;  %v5591_v28 = vpop.f32.mrb[237].mxu1 }
 0x516   : > { %4877 = vst [vmem:[%s10296_s30 + $0xa0] sm:$0xff] %v4845_v51  ;;  %v4846_v43 = vadd.f32 %v10290_v55, %v4676_v63  ;;  %v5480_v6 = vadd.f32 %v5479_v18, %v5478_v32  ;;  %v5592_v52 = vadd.f32 %v5591_v28, %v5590_v22  ;;  %v5481_v61 = vpop.f32.mrb[238].mxu0  ;;  %v5593_v5 = vpop.f32.mrb[238].mxu1 }
 0x517   : > { %v5482_v54 = vpop.f32.mrb[239].mxu0  ;;  %v5594_v62 = vpop.f32.mrb[239].mxu1 }
 0x518   : > { %4878 = vst [vmem:[%s10296_s30 + $0xa8] sm:$0xff] %v4846_v43  ;;  %v4520_v38 = vadd.f32 %v5480_v6, %v10248_v37  ;;  %v5483_v0 = vadd.f32 %v5482_v54, %v5481_v61  ;;  %v5595_v12 = vadd.f32 %v5594_v62, %v5593_v5 }
 0x51a   : > { %v4681_v9 = vadd.f32 %v5592_v52, %v4520_v38  ;;  %v4523_v11 = vadd.f32 %v5483_v0, %v10250_v56 }
 0x51c   : > { %v4847_v34 = vadd.f32 %v10290_v55, %v4681_v9  ;;  %v4684_v58 = vadd.f32 %v5595_v12, %v4523_v11  ;;  %v5484_v8 = vpop.f32.mrb[240].mxu0  ;;  %v5596_v57 = vpop.f32.mrb[240].mxu1 }
 0x51d   : > { %v5485_v13 = vpop.f32.mrb[241].mxu0  ;;  %v5597_v40 = vpop.f32.mrb[241].mxu1 }
 0x51e   : > { %4879 = vst [vmem:[%s10296_s30 + $0xb0] sm:$0xff] %v4847_v34  ;;  %v4848_v48 = vadd.f32 %v10290_v55, %v4684_v58  ;;  %v5486_v44 = vadd.f32 %v5485_v13, %v5484_v8  ;;  %v5598_v60 = vadd.f32 %v5597_v40, %v5596_v57  ;;  %v5487_v23 = vpop.f32.mrb[242].mxu0  ;;  %v5599_v37 = vpop.f32.mrb[242].mxu1 }
 0x51f   : > { %v5488_v29 = vpop.f32.mrb[243].mxu0  ;;  %v5600_v2 = vpop.f32.mrb[243].mxu1 }
 0x520   : > { %4880 = vst [vmem:[%s10296_s30 + $0xb8] sm:$0xff] %v4848_v48  ;;  %v4528_v56 = vadd.f32 %v5486_v44, %v10258_v3  ;;  %v5489_v16 = vadd.f32 %v5488_v29, %v5487_v23  ;;  %v5601_v47 = vadd.f32 %v5600_v2, %v5599_v37 }
 0x522   : > { %v4689_v45 = vadd.f32 %v5598_v60, %v4528_v56  ;;  %v4531_v26 = vadd.f32 %v5489_v16, %v10266_v46 }
 0x524   : > { %v4849_v14 = vadd.f32 %v10290_v55, %v4689_v45  ;;  %v4692_v31 = vadd.f32 %v5601_v47, %v4531_v26 }
 0x525   : > { %v5490_v30 = vpop.f32.mrb[244].mxu0 }
 0x526   : > { %v5491_v4 = vpop.f32.mrb[245].mxu0  ;;  %4881 = vst [vmem:[%s10296_s30 + $0xc0] sm:$0xff] %v4849_v14  ;;  %v4850_v59 = vadd.f32 %v10290_v55, %v4692_v31 }
 0x527   : > { %v5602_v25 = vpop.f32.mrb[244].mxu1  ;;  %v5492_v49 = vadd.f32 %v5491_v4, %v5490_v30  ;;  %v5493_v42 = vpop.f32.mrb[246].mxu0 }
 0x528   : > { %v5603_v20 = vpop.f32.mrb[245].mxu1  ;;  %v5494_v39 = vpop.f32.mrb[247].mxu0  ;;  %4882 = vst [vmem:[%s10296_s30 + $0xc8] sm:$0xff] %v4850_v59 }
 0x529   : > { %v5604_v35 = vadd.f32 %v5603_v20, %v5602_v25  ;;  %v5605_v3 = vpop.f32.mrb[246].mxu1  ;;  %v4536_v46 = vadd.f32 %v5492_v49, %v10274_v17  ;;  %v5495_v27 = vadd.f32 %v5494_v39, %v5493_v42 }
 0x52a   : > { %v5606_v10 = vpop.f32.mrb[247].mxu1 }
 0x52b   : > { %v5607_v1 = vadd.f32 %v5606_v10, %v5605_v3  ;;  %v4697_v7 = vadd.f32 %v5604_v35, %v4536_v46  ;;  %v4539_v24 = vadd.f32 %v5495_v27, %v10276_v50 }
 0x52d   : > { %v4851_v21 = vadd.f32 %v10290_v55, %v4697_v7  ;;  %v4700_v41 = vadd.f32 %v5607_v1, %v4539_v24  ;;  %v5496_v53 = vpop.f32.mrb[248].mxu0 }
 0x52e   : > { %v5497_v63 = vpop.f32.mrb[249].mxu0 }
 0x52f   : > { %v5608_v51 = vpop.f32.mrb[248].mxu1  ;;  %4883 = vst [vmem:[%s10296_s30 + $0xd0] sm:$0xff] %v4851_v21  ;;  %v4852_v22 = vadd.f32 %v10290_v55, %v4700_v41  ;;  %v5498_v18 = vadd.f32 %v5497_v63, %v5496_v53  ;;  %v5499_v43 = vpop.f32.mrb[250].mxu0 }
 0x530   : > { %v5609_v32 = vpop.f32.mrb[249].mxu1  ;;  %v5500_v6 = vpop.f32.mrb[251].mxu0 }
 0x531   : > { %v5610_v28 = vadd.f32 %v5609_v32, %v5608_v51  ;;  %v5611_v17 = vpop.f32.mrb[250].mxu1  ;;  %4884 = vst [vmem:[%s10296_s30 + $0xd8] sm:$0xff] %v4852_v22  ;;  %v4544_v50 = vadd.f32 %v5498_v18, %v10278_v19  ;;  %v5501_v61 = vadd.f32 %v5500_v6, %v5499_v43 }
 0x532   : > { %v5612_v52 = vpop.f32.mrb[251].mxu1 }
 0x533   : > { %v5613_v5 = vadd.f32 %v5612_v52, %v5611_v17  ;;  %v4705_v54 = vadd.f32 %v5610_v28, %v4544_v50  ;;  %v4547_v62 = vadd.f32 %v5501_v61, %v10280_v33 }
 0x535   : > { %v4853_v38 = vadd.f32 %v10290_v55, %v4705_v54  ;;  %v4708_v0 = vadd.f32 %v5613_v5, %v4547_v62  ;;  %v5502_v12 = vpop.f32.mrb[252].mxu0 }
 0x536   : > { %v5503_v11 = vpop.f32.mrb[253].mxu0 }
 0x537   : > { %v5614_v9 = vpop.f32.mrb[252].mxu1  ;;  %4885 = vst [vmem:[%s10296_s30 + $0xe0] sm:$0xff] %v4853_v38  ;;  %v4854_v58 = vadd.f32 %v10290_v55, %v4708_v0  ;;  %v5504_v8 = vadd.f32 %v5503_v11, %v5502_v12  ;;  %v5505_v57 = vpop.f32.mrb[254].mxu0 }
 0x538   : > { %v5615_v34 = vpop.f32.mrb[253].mxu1  ;;  %v5506_v40 = vpop.f32.mrb[255].mxu0 }
 0x539   : > { %v5616_v19 = vadd.f32 %v5615_v34, %v5614_v9  ;;  %v5617_v13 = vpop.f32.mrb[254].mxu1  ;;  %4886 = vst [vmem:[%s10296_s30 + $0xe8] sm:$0xff] %v4854_v58  ;;  %v4552_v48 = vadd.f32 %v5504_v8, %v10282_v15  ;;  %v5507_v44 = vadd.f32 %v5506_v40, %v5505_v57 }
 0x53a   : > { %v5618_v33 = vpop.f32.mrb[255].mxu1 }
 0x53b   : > { %v5619_v60 = vadd.f32 %v5618_v33, %v5617_v13  ;;  %v4713_v23 = vadd.f32 %v5616_v19, %v4552_v48  ;;  %v4555_v37 = vadd.f32 %v5507_v44, %v10284_v36 }
 0x53d   : > { %v4855_v29 = vadd.f32 %v10290_v55, %v4713_v23  ;;  %v4716_v2 = vadd.f32 %v5619_v60, %v4555_v37 }
 0x53f   : > { %4887 = vst [vmem:[%s10296_s30 + $0xf0] sm:$0xff] %v4855_v29  ;;  %v4856_v15 = vadd.f32 %v10290_v55, %v4716_v2 }
 0x541   : > { %4888 = vst [vmem:[%s10296_s30 + $0xf8] sm:$0xff] %v4856_v15 }
 0x542   : > { %6452 = shalt.err (!%p6449_p11)
}
 0x543   : > { %s6453_s19 = scalar_lea.hbm %s10393_s11, 4096  ;;  %s6457_s21 = scalar_lea.hbm %s10454_s7, 8192 }
 0x544   : > { %p6454_p0 = scmp.ne.s32.totalorder %s10393_s11, %s6453_s19  ;;  %p6458_p6 = scmp.lt.u32.totalorder %s10393_s11, %s10454_s7 }
 0x545   : > { %p6459_p7 = scmp.lt.u32.totalorder %s6457_s21, %s6453_s19  ;;  %p6461_p8 = scmp.lt.u32.totalorder %s6453_s19, %s10393_s11 }
 0x546   : > { %p6455_p4 = pnand %p6454_p0, %p11141_p12 }
 0x547   : > { %p6460_p2 = por %p6459_p7, %p6458_p6 }
 0x548   : > { %p6456_p13 = pneg %p6455_p4 }
 0x549   : > { %p6462_p1 = por %p6461_p8, %p6460_p2 }
 0x54b   : > { %p6463_p10 = pnand %p6462_p1, %p6456_p13 }
 0x54d   : > { %6466 = shalt.err (!%p6463_p10)
}
 0x54e   : > { %s6538_s10 = smov 128   ;;  %s6539_s9 = smov 8  }
 0x54f   : > { %5630 = dma.vmem_to_hbm [thread:$0]  (%p11141_p12), %s10395_s23, 4096, %s10393_s11, %s4890_s13, %s6538_s10, %s6538_s10, %s6539_s9  }
 0x550 PF: > { %s11142_s27 = sld [smem:[#allocation14_spill]]  ;;  %s11143_s24 = sld [smem:[#allocation15_spill]] }
 0x551   : > { %p11145_p5 = scmp.ge.s32.totalorder %s6525_s29, 2 }
 0x556   : > { %s4918_s12 = sand.u32 1, %s11142_s27   ;;  %p11144_p3 = scmp.ne.s32.totalorder %s11143_s24, 0 }
 0x557   : > { %s4919_s17 = scalar_lea.sflag [#allocation6], %s4918_s12 }
 0x558   : > { %p5644_p9 = pnand %p11145_p5, %p11144_p3 }
 0x55a   : > { %6500 = dma.done.wait (!%p5644_p9), %s4919_s17, 4096  }
 0x55b   : > { %6502 = vsyncadd (!%p5644_p9), %s4919_s17, 4294963200  ;;  %s24_s29 = sadd.s32 1, %s6525_s29   ;;  %s11146_s24 = smov %s6509_s25 }
 0x55c   : > { %p21_p11 = scmp.ge.s32.totalorder %s24_s29, 4   ;;  %s11147_s25 = smov %s6513_s26 }
 0x55d   : > { %s11148_s26 = smov %s6722_s8  ;;  %s11149_s27 = smov %s6521_s28 }
 0x55e   : > { %s11150_s28 = smov %s11152_s20  ;;  %23 = sbr.rel (!%p21_p11) target bundleno = 7 (0x7), region = 114 }
 0x565   :  { %4924 = vsyncpa [#allocation5], 1 }
 0x566   :  { %4926 = vsyncpa [#allocation5 + $0x1], 1 }
 0x567   :  { %4927 = vsyncpa [#allocation8], 1 }
 0x568   :  { %4928 = vsyncpa [#allocation6], 1 }
 0x569   :  { %4930 = vsyncpa [#allocation6 + $0x1], 1 }

</bundles_post_ra>
